<compile_context>
chip_gen: v6e
topology: v6e:2x2x1
jax: 0.10.0
libtpu: 0.0.40
codegen_flags: <defaults>
</compile_context>

<pallas_src>
import jax
import jax.numpy as jnp
from jax import lax
from jax.experimental import pallas as pl
from jax.experimental.pallas import tpu as pltpu


# ------------------------- model parameters (synthetic) ---------------------

def init_dictionary_params(key, kernel_size, widths, n_classes):
    """Builds the weights of `dictionary_model` (which the adjoint model shares)."""
    k = kernel_size

    def norm(kk, shape, fan_in):
        return jax.random.normal(kk, shape, jnp.float32) / jnp.sqrt(float(fan_in))

    keys = jax.random.split(key, 2 + 2 * (len(widths) - 1))
    w0 = widths[0]
    params = {
        # bottleneck_conv: Conv2d(w0, w0, k) weight, OIHW
        'bneck_w': norm(keys[0], (w0, w0, k, k), w0 * k * k),
        'ups': [],
        # syn_outc: Conv2d(widths[-1], n_classes, 1) weight, OIHW
        'outc_w': norm(keys[-1], (n_classes, widths[-1], 1, 1), widths[-1]),
    }
    for i in range(len(widths) - 1):
        wi, wo = widths[i], widths[i + 1]
        params['ups'].append({
            # up: ConvTranspose2d(wi, wi-32, 2, 2) weight, (in, out, kh, kw)
            'up_w': norm(keys[1 + 2 * i], (wi, wi - 32, 2, 2), wi * 4),
            # conv: Conv2d((wi-32)*2, wo, k) weight, OIHW
            'conv_w': norm(keys[2 + 2 * i], (wo, (wi - 32) * 2, k, k), (wi - 32) * 2 * k * k),
        })
    return params


# ----------------- weight preparation (hoisted, done exactly once) ----------

def _convT_same_taps(wt, k):
    """ConvTranspose2d weight (Cin, Cout, k, k), stride 1, padding k//2 ->
    taps[dy, dx] of shape (Cin, Cout) so that
    out[h, w] = sum_{dy, dx} x_pad[h + dy, w + dx] @ taps[dy, dx]."""
    return jnp.transpose(jnp.flip(wt, axis=(2, 3)), (2, 3, 0, 1))  # (k, k, Cin, Cout)


def prepare_adjoint_weights(params, kernel_size, n_classes):
    """Precompute all kernel-side weight matrices (flip / transpose / stack /
    fold-1x1 / cast to bf16) once, so the Pallas kernel only does matmuls."""
    k = kernel_size
    assert k % 2 == 1, "adjoint 'same' equivalence requires odd kernel_size"
    n = len(params['ups'])
    weights = []
    w1x1 = params['outc_w'][:, :, 0, 0]                      # (n_classes, C_last)
    for j in range(n):                                       # processing: finest -> coarsest
        li = n - 1 - j
        up = params['ups'][li]
        taps = _convT_same_taps(up['conv_w'], k)             # (k, k, Cin_T, 2*half)
        if j == 0:
            # fold the 1x1 adjoint (outc) into the first kxk same-conv
            taps = jnp.einsum('ac,yxco->yxao', w1x1, taps)   # (k, k, n_classes, 2*half)
        cin, c2 = taps.shape[2], taps.shape[3]
        weights.append(taps.reshape(k * k * cin, c2).astype(jnp.bfloat16))
        # adjoint_up: Conv2d(stride=2, kernel=2) with OIHW weight up_w (Co, Ci, 2, 2)
        up_w = up['up_w']
        w_s2d = jnp.transpose(up_w, (2, 3, 1, 0)).reshape(4, up_w.shape[1], up_w.shape[0])
        weights.append(w_s2d.astype(jnp.bfloat16))           # [dy*2+dx, ci, co]
    tb = _convT_same_taps(params['bneck_w'], k)
    weights.append(tb.reshape(k * k * tb.shape[2], tb.shape[3]).astype(jnp.bfloat16))
    return tuple(weights)


# ------------------------------ fused Pallas kernel --------------------------

def _build_fused_kernel(k, n, n_classes, widths, H, W):
    p = k // 2
    # static per-level dims, processing order finest -> coarsest
    lev = []
    for j in range(n):
        li = n - 1 - j
        Hl, Wl = H >> j, W >> j
        cin = n_classes if j == 0 else widths[li + 1]
        half = widths[li] - 32
        co_up = widths[li]
        lev.append((Hl, Wl, cin, half, co_up))
    HB, WB, CB = H >> n, W >> n, widths[0]

    def kernel(*refs):
        y_ref = refs[0]
        w_refs = refs[1: 2 * n + 2]                 # w_same_0, w_s2d_0, ..., w_bneck
        out_refs = refs[2 * n + 2: 3 * n + 3]       # x2_0..x2_{n-1}, bneck
        scratch = refs[3 * n + 3:]
        pad_refs = scratch[: n + 1]
        patch_refs = scratch[n + 1:]

        def same_conv(act, Hl, Wl, cin, padr, patr, w_ref):
            # zero-pad in VMEM, build im2col patch in VMEM, single big-K matmul
            M = Hl * Wl
            padr[...] = jnp.zeros_like(padr)
            padr[p:p + Hl, p:p + Wl, :] = act.reshape(Hl, Wl, cin)
            for dy in range(k):
                for dx in range(k):
                    t = dy * k + dx
                    patr[:, t * cin:(t + 1) * cin] = (
                        padr[dy:dy + Hl, dx:dx + Wl, :]
                        .reshape(M, cin).astype(jnp.bfloat16))
            return jnp.dot(patr[...], w_ref[...], preferred_element_type=jnp.float32)

        act = y_ref[0]                                        # (H, W, n_classes)
        for j in range(n):
            Hl, Wl, cin, half, co_up = lev[j]
            yfull = same_conv(act, Hl, Wl, cin, pad_refs[j], patch_refs[j],
                              w_refs[2 * j])                   # (Hl*Wl, 2*half)

            # channel split (in-kernel); x2 goes straight to its output block
            out_refs[j][0] = yfull[:, :half].reshape(Hl, Wl, half)

            # adjoint_up: Conv2d(kernel=2, stride=2) as 4 space-to-depth tap matmuls
            x1 = yfull[:, half:]                               # (Hl*Wl, half)
            Hh, Wh = Hl // 2, Wl // 2
            ws = w_refs[2 * j + 1]                             # (4, half, co_up)
            x1h = x1.reshape(Hh, 2, Wl, half)                  # split rows by H parity
            acc = jnp.zeros((Hh * Wh, co_up), jnp.float32)
            for dy in range(2):
                a_dy = x1h[:, dy].reshape(Hh, Wh, 2, half)     # split cols by W parity
                for dx in range(2):
                    tap = a_dy[:, :, dx, :].reshape(Hh * Wh, half)
                    acc = acc + jnp.dot(tap.astype(jnp.bfloat16), ws[dy * 2 + dx],
                                        preferred_element_type=jnp.float32)
            act = acc                                          # (Hh*Wh, co_up)

        # adjoint bottleneck same-conv
        yb = same_conv(act, HB, WB, CB, pad_refs[n], patch_refs[n], w_refs[2 * n])
        out_refs[n][0] = yb.reshape(HB, WB, CB)

    return kernel, lev, (HB, WB, CB)


def make_adjoint_forward(kernel_size, widths, n_classes, B, H, W):
    k = kernel_size
    assert k % 2 == 1, "adjoint 'same' equivalence requires odd kernel_size"
    n = len(widths) - 1
    assert H % (1 << n) == 0 and W % (1 << n) == 0
    assert min(widths[:n]) > 32
    p = k // 2

    kernel, lev, (HB, WB, CB) = _build_fused_kernel(k, n, n_classes, widths, H, W)

    # ---- specs (weights are full blocks, re-used by every grid step) ----
    in_specs = [pl.BlockSpec((1, H, W, n_classes), lambda b: (b, 0, 0, 0))]
    w_shapes = []
    for (Hl, Wl, cin, half, co_up) in lev:
        w_shapes.append((k * k * cin, 2 * half))
        w_shapes.append((4, half, co_up))
    w_shapes.append((k * k * widths[0], widths[0]))
    for s in w_shapes:
        in_specs.append(pl.BlockSpec(s, (lambda b, _nd=len(s): (0,) * _nd)))

    out_shapes, out_specs = [], []
    for (Hl, Wl, cin, half, co_up) in lev:
        out_shapes.append(jax.ShapeDtypeStruct((B, Hl, Wl, half), jnp.float32))
        out_specs.append(pl.BlockSpec((1, Hl, Wl, half), lambda b: (b, 0, 0, 0)))
    out_shapes.append(jax.ShapeDtypeStruct((B, HB, WB, CB), jnp.float32))
    out_specs.append(pl.BlockSpec((1, HB, WB, CB), lambda b: (b, 0, 0, 0)))

    scratch_shapes = [pltpu.VMEM((Hl + 2 * p, Wl + 2 * p, cin), jnp.float32)
                      for (Hl, Wl, cin, half, co_up) in lev]
    scratch_shapes.append(pltpu.VMEM((HB + 2 * p, WB + 2 * p, widths[0]), jnp.float32))
    scratch_shapes += [pltpu.VMEM((Hl * Wl, k * k * cin), jnp.bfloat16)
                       for (Hl, Wl, cin, half, co_up) in lev]
    scratch_shapes.append(pltpu.VMEM((HB * WB, k * k * widths[0]), jnp.bfloat16))

    call = pl.pallas_call(
        kernel,
        out_shape=tuple(out_shapes),
        grid=(B,),
        in_specs=in_specs,
        out_specs=tuple(out_specs),
        scratch_shapes=scratch_shapes,
        compiler_params=pltpu.CompilerParams(dimension_semantics=("parallel",)),
    )

    def forward(y_nchw, weights):
        y = jnp.transpose(y_nchw, (0, 2, 3, 1)).astype(jnp.float32)   # NCHW -> NHWC
        outs = call(y, *weights)
        x2_outs = list(outs[:n])                # processing order: finest -> coarsest
        bneck = outs[n]
        x_list = [bneck] + x2_outs[::-1]        # [bneck, x2@li=0, ..., x2@li=n-1]
        return [jnp.transpose(x, (0, 3, 1, 2)) for x in x_list]       # back to NCHW

    return jax.jit(forward)


# ------------------------- pure-JAX reference (check) ------------------------

def ref_adjoint_forward(y_nchw, params, kernel_size):
    k = kernel_size
    p = k // 2

    def convt_same(x, wt):  # ConvTranspose2d(stride=1, padding=k//2), NHWC
        we = jnp.transpose(jnp.flip(wt, axis=(2, 3)), (2, 3, 0, 1))   # HWIO
        return lax.conv_general_dilated(x, we, (1, 1), [(p, p), (p, p)],
                                        dimension_numbers=('NHWC', 'HWIO', 'NHWC'))

    y = jnp.transpose(y_nchw, (0, 2, 3, 1)).astype(jnp.float32)
    y = jnp.einsum('bhwa,aj->bhwj', y, params['outc_w'][:, :, 0, 0])
    xs = []
    for li in range(len(params['ups']) - 1, -1, -1):
        up = params['ups'][li]
        y = convt_same(y, up['conv_w'])
        half = y.shape[-1] // 2
        x2, x1 = y[..., :half], y[..., half:]
        we = jnp.transpose(up['up_w'], (2, 3, 1, 0))  # HWIO
        y = lax.conv_general_dilated(x1, we, (2, 2), [(0, 0), (0, 0)],
                                     dimension_numbers=('NHWC', 'HWIO', 'NHWC'))
        xs.append(x2)
    y = convt_same(y, params['bneck_w'])
    xs.append(y)
    xs.reverse()
    return [jnp.transpose(x, (0, 3, 1, 2)) for x in xs]


# ----------------------------------- main -----------------------------------

if __name__ == "__main__":
    key = jax.random.PRNGKey(0)
    kernel_size = 3
    hidden_layer_width_list = [64, 48, 64]   # two up-blocks
    n_classes = 4
    B, H, W = 2, 16, 16

    kp, ky = jax.random.split(key)
    params = init_dictionary_params(kp, kernel_size, hidden_layer_width_list, n_classes)
    y = jax.random.normal(ky, (B, n_classes, H, W), jnp.float32)

    weights = prepare_adjoint_weights(params, kernel_size, n_classes)
    fwd = make_adjoint_forward(kernel_size, hidden_layer_width_list, n_classes, B, H, W)

    outs = fwd(y, weights)
    outs = [jax.block_until_ready(o) for o in outs]

    refs = ref_adjoint_forward(y, params, kernel_size)
    assert len(outs) == len(refs)
    for o, r in zip(outs, refs):
        assert o.shape == r.shape, (o.shape, r.shape)
        if not jnp.allclose(o, r, rtol=2e-2, atol=2e-2):
            raise AssertionError(
                f"mismatch for shape {o.shape}: max abs err {float(jnp.max(jnp.abs(o - r)))}")

    print("KERNEL_OK")
</pallas_src>

<mosaic_0001>
module attributes {stable_mosaic.version = 11 : i64} {
  func.func @kernel(%arg0: i32, %arg1: memref<1x16x16x4xf32, #tpu.memory_space<vmem>>, %arg2: memref<36x32xbf16, #tpu.memory_space<vmem>>, %arg3: memref<4x16x48xbf16, #tpu.memory_space<vmem>>, %arg4: memref<432x64xbf16, #tpu.memory_space<vmem>>, %arg5: memref<4x32x64xbf16, #tpu.memory_space<vmem>>, %arg6: memref<576x64xbf16, #tpu.memory_space<vmem>>, %arg7: memref<1x16x16x16xf32, #tpu.memory_space<vmem>>, %arg8: memref<1x8x8x32xf32, #tpu.memory_space<vmem>>, %arg9: memref<1x4x4x64xf32, #tpu.memory_space<vmem>>, %arg10: memref<18x18x4xf32, #tpu.memory_space<vmem>>, %arg11: memref<10x10x48xf32, #tpu.memory_space<vmem>>, %arg12: memref<6x6x64xf32, #tpu.memory_space<vmem>>, %arg13: memref<256x36xbf16, #tpu.memory_space<vmem>>, %arg14: memref<64x432xbf16, #tpu.memory_space<vmem>>, %arg15: memref<16x576xbf16, #tpu.memory_space<vmem>>) attributes {dimension_semantics = [#tpu.dimension_semantics<parallel>], iteration_bounds = array<i64: 2>, scalar_prefetch = 0 : i64, scratch_operands = 6 : i64, tpu.core_type = #tpu.core_type<tc>, window_params = [{transform_indices = @transform_0, window_bounds = array<i64: 1, 16, 16, 4>}, {pipeline_mode = #tpu.pipeline_mode<synchronous>, transform_indices = @transform_1, window_bounds = array<i64: 36, 32>}, {pipeline_mode = #tpu.pipeline_mode<synchronous>, transform_indices = @transform_2, window_bounds = array<i64: 4, 16, 48>}, {pipeline_mode = #tpu.pipeline_mode<synchronous>, transform_indices = @transform_3, window_bounds = array<i64: 432, 64>}, {pipeline_mode = #tpu.pipeline_mode<synchronous>, transform_indices = @transform_4, window_bounds = array<i64: 4, 32, 64>}, {pipeline_mode = #tpu.pipeline_mode<synchronous>, transform_indices = @transform_5, window_bounds = array<i64: 576, 64>}, {transform_indices = @transform_6, window_bounds = array<i64: 1, 16, 16, 16>}, {transform_indices = @transform_7, window_bounds = array<i64: 1, 8, 8, 32>}, {transform_indices = @transform_8, window_bounds = array<i64: 1, 4, 4, 64>}]} {
    %c0 = arith.constant 0 : index
    %c0_0 = arith.constant 0 : index
    %c0_1 = arith.constant 0 : index
    %c0_2 = arith.constant 0 : index
    %0 = vector.load %arg1[%c0, %c0_0, %c0_1, %c0_2] : memref<1x16x16x4xf32, #tpu.memory_space<vmem>>, vector<1x16x16x4xf32>
    %1 = vector.shape_cast %0 : vector<1x16x16x4xf32> to vector<16x16x4xf32>
    %cst = arith.constant 0.000000e+00 : f32
    %2 = vector.broadcast %cst : f32 to vector<18x18x4xf32>
    %c0_3 = arith.constant 0 : index
    %c0_4 = arith.constant 0 : index
    %c0_5 = arith.constant 0 : index
    %3 = vector.load %arg10[%c0_3, %c0_4, %c0_5] : memref<18x18x4xf32, #tpu.memory_space<vmem>>, vector<18x18x4xf32>
    tpu.vector_store %arg10[%c0_3, %c0_4, %c0_5], %2 {strides = array<i32>} : memref<18x18x4xf32, #tpu.memory_space<vmem>>, vector<18x18x4xf32>,
    %c1 = arith.constant 1 : index
    %c1_6 = arith.constant 1 : index
    %c0_7 = arith.constant 0 : index
    %4 = vector.load %arg10[%c1, %c1_6, %c0_7] : memref<18x18x4xf32, #tpu.memory_space<vmem>>, vector<16x16x4xf32>
    tpu.vector_store %arg10[%c1, %c1_6, %c0_7], %1 {strides = array<i32>} : memref<18x18x4xf32, #tpu.memory_space<vmem>>, vector<16x16x4xf32>,
    %c0_8 = arith.constant 0 : index
    %c0_9 = arith.constant 0 : index
    %c0_10 = arith.constant 0 : index
    %5 = vector.load %arg10[%c0_8, %c0_9, %c0_10] : memref<18x18x4xf32, #tpu.memory_space<vmem>>, vector<16x16x4xf32>
    %6 = vector.shape_cast %5 : vector<16x16x4xf32> to vector<256x4xf32>
    %7 = arith.truncf %6 : vector<256x4xf32> to vector<256x4xbf16>
    %c0_11 = arith.constant 0 : index
    %c0_12 = arith.constant 0 : index
    %8 = vector.load %arg13[%c0_11, %c0_12] : memref<256x36xbf16, #tpu.memory_space<vmem>>, vector<256x4xbf16>
    tpu.vector_store %arg13[%c0_11, %c0_12], %7 {strides = array<i32>} : memref<256x36xbf16, #tpu.memory_space<vmem>>, vector<256x4xbf16>,
    %c0_13 = arith.constant 0 : index
    %c1_14 = arith.constant 1 : index
    %c0_15 = arith.constant 0 : index
    %9 = vector.load %arg10[%c0_13, %c1_14, %c0_15] : memref<18x18x4xf32, #tpu.memory_space<vmem>>, vector<16x16x4xf32>
    %10 = vector.shape_cast %9 : vector<16x16x4xf32> to vector<256x4xf32>
    %11 = arith.truncf %10 : vector<256x4xf32> to vector<256x4xbf16>
    %c0_16 = arith.constant 0 : index
    %c4 = arith.constant 4 : index
    %12 = vector.load %arg13[%c0_16, %c4] : memref<256x36xbf16, #tpu.memory_space<vmem>>, vector<256x4xbf16>
    tpu.vector_store %arg13[%c0_16, %c4], %11 {strides = array<i32>} : memref<256x36xbf16, #tpu.memory_space<vmem>>, vector<256x4xbf16>,
    %c0_17 = arith.constant 0 : index
    %c2 = arith.constant 2 : index
    %c0_18 = arith.constant 0 : index
    %13 = vector.load %arg10[%c0_17, %c2, %c0_18] : memref<18x18x4xf32, #tpu.memory_space<vmem>>, vector<16x16x4xf32>
    %14 = vector.shape_cast %13 : vector<16x16x4xf32> to vector<256x4xf32>
    %15 = arith.truncf %14 : vector<256x4xf32> to vector<256x4xbf16>
    %c0_19 = arith.constant 0 : index
    %c8 = arith.constant 8 : index
    %16 = vector.load %arg13[%c0_19, %c8] : memref<256x36xbf16, #tpu.memory_space<vmem>>, vector<256x4xbf16>
    tpu.vector_store %arg13[%c0_19, %c8], %15 {strides = array<i32>} : memref<256x36xbf16, #tpu.memory_space<vmem>>, vector<256x4xbf16>,
    %c1_20 = arith.constant 1 : index
    %c0_21 = arith.constant 0 : index
    %c0_22 = arith.constant 0 : index
    %17 = vector.load %arg10[%c1_20, %c0_21, %c0_22] : memref<18x18x4xf32, #tpu.memory_space<vmem>>, vector<16x16x4xf32>
    %18 = vector.shape_cast %17 : vector<16x16x4xf32> to vector<256x4xf32>
    %19 = arith.truncf %18 : vector<256x4xf32> to vector<256x4xbf16>
    %c0_23 = arith.constant 0 : index
    %c12 = arith.constant 12 : index
    %20 = vector.load %arg13[%c0_23, %c12] : memref<256x36xbf16, #tpu.memory_space<vmem>>, vector<256x4xbf16>
    tpu.vector_store %arg13[%c0_23, %c12], %19 {strides = array<i32>} : memref<256x36xbf16, #tpu.memory_space<vmem>>, vector<256x4xbf16>,
    %c1_24 = arith.constant 1 : index
    %c1_25 = arith.constant 1 : index
    %c0_26 = arith.constant 0 : index
    %21 = vector.load %arg10[%c1_24, %c1_25, %c0_26] : memref<18x18x4xf32, #tpu.memory_space<vmem>>, vector<16x16x4xf32>
    %22 = vector.shape_cast %21 : vector<16x16x4xf32> to vector<256x4xf32>
    %23 = arith.truncf %22 : vector<256x4xf32> to vector<256x4xbf16>
    %c0_27 = arith.constant 0 : index
    %c16 = arith.constant 16 : index
    %24 = vector.load %arg13[%c0_27, %c16] : memref<256x36xbf16, #tpu.memory_space<vmem>>, vector<256x4xbf16>
    tpu.vector_store %arg13[%c0_27, %c16], %23 {strides = array<i32>} : memref<256x36xbf16, #tpu.memory_space<vmem>>, vector<256x4xbf16>,
    %c1_28 = arith.constant 1 : index
    %c2_29 = arith.constant 2 : index
    %c0_30 = arith.constant 0 : index
    %25 = vector.load %arg10[%c1_28, %c2_29, %c0_30] : memref<18x18x4xf32, #tpu.memory_space<vmem>>, vector<16x16x4xf32>
    %26 = vector.shape_cast %25 : vector<16x16x4xf32> to vector<256x4xf32>
    %27 = arith.truncf %26 : vector<256x4xf32> to vector<256x4xbf16>
    %c0_31 = arith.constant 0 : index
    %c20 = arith.constant 20 : index
    %28 = vector.load %arg13[%c0_31, %c20] : memref<256x36xbf16, #tpu.memory_space<vmem>>, vector<256x4xbf16>
    tpu.vector_store %arg13[%c0_31, %c20], %27 {strides = array<i32>} : memref<256x36xbf16, #tpu.memory_space<vmem>>, vector<256x4xbf16>,
    %c2_32 = arith.constant 2 : index
    %c0_33 = arith.constant 0 : index
    %c0_34 = arith.constant 0 : index
    %29 = vector.load %arg10[%c2_32, %c0_33, %c0_34] : memref<18x18x4xf32, #tpu.memory_space<vmem>>, vector<16x16x4xf32>
    %30 = vector.shape_cast %29 : vector<16x16x4xf32> to vector<256x4xf32>
    %31 = arith.truncf %30 : vector<256x4xf32> to vector<256x4xbf16>
    %c0_35 = arith.constant 0 : index
    %c24 = arith.constant 24 : index
    %32 = vector.load %arg13[%c0_35, %c24] : memref<256x36xbf16, #tpu.memory_space<vmem>>, vector<256x4xbf16>
    tpu.vector_store %arg13[%c0_35, %c24], %31 {strides = array<i32>} : memref<256x36xbf16, #tpu.memory_space<vmem>>, vector<256x4xbf16>,
    %c2_36 = arith.constant 2 : index
    %c1_37 = arith.constant 1 : index
    %c0_38 = arith.constant 0 : index
    %33 = vector.load %arg10[%c2_36, %c1_37, %c0_38] : memref<18x18x4xf32, #tpu.memory_space<vmem>>, vector<16x16x4xf32>
    %34 = vector.shape_cast %33 : vector<16x16x4xf32> to vector<256x4xf32>
    %35 = arith.truncf %34 : vector<256x4xf32> to vector<256x4xbf16>
    %c0_39 = arith.constant 0 : index
    %c28 = arith.constant 28 : index
    %36 = vector.load %arg13[%c0_39, %c28] : memref<256x36xbf16, #tpu.memory_space<vmem>>, vector<256x4xbf16>
    tpu.vector_store %arg13[%c0_39, %c28], %35 {strides = array<i32>} : memref<256x36xbf16, #tpu.memory_space<vmem>>, vector<256x4xbf16>,
    %c2_40 = arith.constant 2 : index
    %c2_41 = arith.constant 2 : index
    %c0_42 = arith.constant 0 : index
    %37 = vector.load %arg10[%c2_40, %c2_41, %c0_42] : memref<18x18x4xf32, #tpu.memory_space<vmem>>, vector<16x16x4xf32>
    %38 = vector.shape_cast %37 : vector<16x16x4xf32> to vector<256x4xf32>
    %39 = arith.truncf %38 : vector<256x4xf32> to vector<256x4xbf16>
    %c0_43 = arith.constant 0 : index
    %c32 = arith.constant 32 : index
    %40 = vector.load %arg13[%c0_43, %c32] : memref<256x36xbf16, #tpu.memory_space<vmem>>, vector<256x4xbf16>
    tpu.vector_store %arg13[%c0_43, %c32], %39 {strides = array<i32>} : memref<256x36xbf16, #tpu.memory_space<vmem>>, vector<256x4xbf16>,
    %c0_44 = arith.constant 0 : index
    %c0_45 = arith.constant 0 : index
    %41 = vector.load %arg13[%c0_44, %c0_45] : memref<256x36xbf16, #tpu.memory_space<vmem>>, vector<256x36xbf16>
    %c0_46 = arith.constant 0 : index
    %c0_47 = arith.constant 0 : index
    %42 = vector.load %arg2[%c0_46, %c0_47] : memref<36x32xbf16, #tpu.memory_space<vmem>>, vector<36x32xbf16>
    %cst_48 = arith.constant dense<0.000000e+00> : vector<256x32xf32>
    %43 = tpu.matmul %41, %42, %cst_48 {dimension_numbers = #tpu.dot_dimension_numbers<[1], [0], [0], [1], [0, 0, 1, 1], [], []>} : vector<256x36xbf16>, vector<36x32xbf16>, vector<256x32xf32> -> vector<256x32xf32>
    %44 = vector.extract_strided_slice %43 {offsets = [0, 0], sizes = [256, 16], strides = [1, 1]} : vector<256x32xf32> to vector<256x16xf32>
    %45 = vector.shape_cast %44 : vector<256x16xf32> to vector<16x16x16xf32>
    %c0_49 = arith.constant 0 : index
    %c0_50 = arith.constant 0 : index
    %c0_51 = arith.constant 0 : index
    %c0_52 = arith.constant 0 : index
    %46 = vector.load %arg7[%c0_49, %c0_50, %c0_51, %c0_52] : memref<1x16x16x16xf32, #tpu.memory_space<vmem>>, vector<1x16x16x16xf32>
    %47 = vector.shape_cast %46 : vector<1x16x16x16xf32> to vector<16x16x16xf32>
    %48 = vector.shape_cast %45 : vector<16x16x16xf32> to vector<1x16x16x16xf32>
    tpu.vector_store %arg7[%c0_49, %c0_50, %c0_51, %c0_52], %48 {strides = array<i32>} : memref<1x16x16x16xf32, #tpu.memory_space<vmem>>, vector<1x16x16x16xf32>,
    %49 = vector.extract_strided_slice %43 {offsets = [0, 16], sizes = [256, 16], strides = [1, 1]} : vector<256x32xf32> to vector<256x16xf32>
    %50 = vector.shape_cast %49 : vector<256x16xf32> to vector<8x2x16x16xf32>
    %cst_53 = arith.constant 0.000000e+00 : f32
    %51 = vector.broadcast %cst_53 : f32 to vector<64x48xf32>
    %52 = vector.extract_strided_slice %50 {offsets = [0, 0, 0, 0], sizes = [8, 1, 16, 16], strides = [1, 1, 1, 1]} : vector<8x2x16x16xf32> to vector<8x1x16x16xf32>
    %53 = vector.shape_cast %52 : vector<8x1x16x16xf32> to vector<8x16x16xf32>
    %54 = vector.shape_cast %53 : vector<8x16x16xf32> to vector<8x8x2x16xf32>
    %55 = vector.extract_strided_slice %54 {offsets = [0, 0, 0, 0], sizes = [8, 8, 1, 16], strides = [1, 1, 1, 1]} : vector<8x8x2x16xf32> to vector<8x8x1x16xf32>
    %56 = vector.shape_cast %55 : vector<8x8x1x16xf32> to vector<8x8x16xf32>
    %57 = vector.shape_cast %56 : vector<8x8x16xf32> to vector<64x16xf32>
    %58 = arith.truncf %57 : vector<64x16xf32> to vector<64x16xbf16>
    %c0_54 = arith.constant 0 : index
    %c0_55 = arith.constant 0 : index
    %c0_56 = arith.constant 0 : index
    %59 = vector.load %arg3[%c0_54, %c0_55, %c0_56] : memref<4x16x48xbf16, #tpu.memory_space<vmem>>, vector<1x16x48xbf16>
    %60 = vector.shape_cast %59 : vector<1x16x48xbf16> to vector<16x48xbf16>
    %cst_57 = arith.constant dense<0.000000e+00> : vector<64x48xf32>
    %61 = tpu.matmul %58, %60, %cst_57 {dimension_numbers = #tpu.dot_dimension_numbers<[1], [0], [0], [1], [0, 0, 1, 1], [], []>} : vector<64x16xbf16>, vector<16x48xbf16>, vector<64x48xf32> -> vector<64x48xf32>
    %62 = arith.addf %51, %61 : vector<64x48xf32>
    %63 = vector.extract_strided_slice %54 {offsets = [0, 0, 1, 0], sizes = [8, 8, 1, 16], strides = [1, 1, 1, 1]} : vector<8x8x2x16xf32> to vector<8x8x1x16xf32>
    %64 = vector.shape_cast %63 : vector<8x8x1x16xf32> to vector<8x8x16xf32>
    %65 = vector.shape_cast %64 : vector<8x8x16xf32> to vector<64x16xf32>
    %66 = arith.truncf %65 : vector<64x16xf32> to vector<64x16xbf16>
    %c1_58 = arith.constant 1 : index
    %c0_59 = arith.constant 0 : index
    %c0_60 = arith.constant 0 : index
    %67 = vector.load %arg3[%c1_58, %c0_59, %c0_60] : memref<4x16x48xbf16, #tpu.memory_space<vmem>>, vector<1x16x48xbf16>
    %68 = vector.shape_cast %67 : vector<1x16x48xbf16> to vector<16x48xbf16>
    %cst_61 = arith.constant dense<0.000000e+00> : vector<64x48xf32>
    %69 = tpu.matmul %66, %68, %cst_61 {dimension_numbers = #tpu.dot_dimension_numbers<[1], [0], [0], [1], [0, 0, 1, 1], [], []>} : vector<64x16xbf16>, vector<16x48xbf16>, vector<64x48xf32> -> vector<64x48xf32>
    %70 = arith.addf %62, %69 : vector<64x48xf32>
    %71 = vector.extract_strided_slice %50 {offsets = [0, 1, 0, 0], sizes = [8, 1, 16, 16], strides = [1, 1, 1, 1]} : vector<8x2x16x16xf32> to vector<8x1x16x16xf32>
    %72 = vector.shape_cast %71 : vector<8x1x16x16xf32> to vector<8x16x16xf32>
    %73 = vector.shape_cast %72 : vector<8x16x16xf32> to vector<8x8x2x16xf32>
    %74 = vector.extract_strided_slice %73 {offsets = [0, 0, 0, 0], sizes = [8, 8, 1, 16], strides = [1, 1, 1, 1]} : vector<8x8x2x16xf32> to vector<8x8x1x16xf32>
    %75 = vector.shape_cast %74 : vector<8x8x1x16xf32> to vector<8x8x16xf32>
    %76 = vector.shape_cast %75 : vector<8x8x16xf32> to vector<64x16xf32>
    %77 = arith.truncf %76 : vector<64x16xf32> to vector<64x16xbf16>
    %c2_62 = arith.constant 2 : index
    %c0_63 = arith.constant 0 : index
    %c0_64 = arith.constant 0 : index
    %78 = vector.load %arg3[%c2_62, %c0_63, %c0_64] : memref<4x16x48xbf16, #tpu.memory_space<vmem>>, vector<1x16x48xbf16>
    %79 = vector.shape_cast %78 : vector<1x16x48xbf16> to vector<16x48xbf16>
    %cst_65 = arith.constant dense<0.000000e+00> : vector<64x48xf32>
    %80 = tpu.matmul %77, %79, %cst_65 {dimension_numbers = #tpu.dot_dimension_numbers<[1], [0], [0], [1], [0, 0, 1, 1], [], []>} : vector<64x16xbf16>, vector<16x48xbf16>, vector<64x48xf32> -> vector<64x48xf32>
    %81 = arith.addf %70, %80 : vector<64x48xf32>
    %82 = vector.extract_strided_slice %73 {offsets = [0, 0, 1, 0], sizes = [8, 8, 1, 16], strides = [1, 1, 1, 1]} : vector<8x8x2x16xf32> to vector<8x8x1x16xf32>
    %83 = vector.shape_cast %82 : vector<8x8x1x16xf32> to vector<8x8x16xf32>
    %84 = vector.shape_cast %83 : vector<8x8x16xf32> to vector<64x16xf32>
    %85 = arith.truncf %84 : vector<64x16xf32> to vector<64x16xbf16>
    %c3 = arith.constant 3 : index
    %c0_66 = arith.constant 0 : index
    %c0_67 = arith.constant 0 : index
    %86 = vector.load %arg3[%c3, %c0_66, %c0_67] : memref<4x16x48xbf16, #tpu.memory_space<vmem>>, vector<1x16x48xbf16>
    %87 = vector.shape_cast %86 : vector<1x16x48xbf16> to vector<16x48xbf16>
    %cst_68 = arith.constant dense<0.000000e+00> : vector<64x48xf32>
    %88 = tpu.matmul %85, %87, %cst_68 {dimension_numbers = #tpu.dot_dimension_numbers<[1], [0], [0], [1], [0, 0, 1, 1], [], []>} : vector<64x16xbf16>, vector<16x48xbf16>, vector<64x48xf32> -> vector<64x48xf32>
    %89 = arith.addf %81, %88 : vector<64x48xf32>
    %cst_69 = arith.constant 0.000000e+00 : f32
    %90 = vector.broadcast %cst_69 : f32 to vector<10x10x48xf32>
    %c0_70 = arith.constant 0 : index
    %c0_71 = arith.constant 0 : index
    %c0_72 = arith.constant 0 : index
    %91 = vector.load %arg11[%c0_70, %c0_71, %c0_72] : memref<10x10x48xf32, #tpu.memory_space<vmem>>, vector<10x10x48xf32>
    tpu.vector_store %arg11[%c0_70, %c0_71, %c0_72], %90 {strides = array<i32>} : memref<10x10x48xf32, #tpu.memory_space<vmem>>, vector<10x10x48xf32>,
    %92 = vector.shape_cast %89 : vector<64x48xf32> to vector<8x8x48xf32>
    %c1_73 = arith.constant 1 : index
    %c1_74 = arith.constant 1 : index
    %c0_75 = arith.constant 0 : index
    %93 = vector.load %arg11[%c1_73, %c1_74, %c0_75] : memref<10x10x48xf32, #tpu.memory_space<vmem>>, vector<8x8x48xf32>
    tpu.vector_store %arg11[%c1_73, %c1_74, %c0_75], %92 {strides = array<i32>} : memref<10x10x48xf32, #tpu.memory_space<vmem>>, vector<8x8x48xf32>,
    %c0_76 = arith.constant 0 : index
    %c0_77 = arith.constant 0 : index
    %c0_78 = arith.constant 0 : index
    %94 = vector.load %arg11[%c0_76, %c0_77, %c0_78] : memref<10x10x48xf32, #tpu.memory_space<vmem>>, vector<8x8x48xf32>
    %95 = vector.shape_cast %94 : vector<8x8x48xf32> to vector<64x48xf32>
    %96 = arith.truncf %95 : vector<64x48xf32> to vector<64x48xbf16>
    %c0_79 = arith.constant 0 : index
    %c0_80 = arith.constant 0 : index
    %97 = vector.load %arg14[%c0_79, %c0_80] : memref<64x432xbf16, #tpu.memory_space<vmem>>, vector<64x48xbf16>
    tpu.vector_store %arg14[%c0_79, %c0_80], %96 {strides = array<i32>} : memref<64x432xbf16, #tpu.memory_space<vmem>>, vector<64x48xbf16>,
    %c0_81 = arith.constant 0 : index
    %c1_82 = arith.constant 1 : index
    %c0_83 = arith.constant 0 : index
    %98 = vector.load %arg11[%c0_81, %c1_82, %c0_83] : memref<10x10x48xf32, #tpu.memory_space<vmem>>, vector<8x8x48xf32>
    %99 = vector.shape_cast %98 : vector<8x8x48xf32> to vector<64x48xf32>
    %100 = arith.truncf %99 : vector<64x48xf32> to vector<64x48xbf16>
    %c0_84 = arith.constant 0 : index
    %c48 = arith.constant 48 : index
    %101 = vector.load %arg14[%c0_84, %c48] : memref<64x432xbf16, #tpu.memory_space<vmem>>, vector<64x48xbf16>
    tpu.vector_store %arg14[%c0_84, %c48], %100 {strides = array<i32>} : memref<64x432xbf16, #tpu.memory_space<vmem>>, vector<64x48xbf16>,
    %c0_85 = arith.constant 0 : index
    %c2_86 = arith.constant 2 : index
    %c0_87 = arith.constant 0 : index
    %102 = vector.load %arg11[%c0_85, %c2_86, %c0_87] : memref<10x10x48xf32, #tpu.memory_space<vmem>>, vector<8x8x48xf32>
    %103 = vector.shape_cast %102 : vector<8x8x48xf32> to vector<64x48xf32>
    %104 = arith.truncf %103 : vector<64x48xf32> to vector<64x48xbf16>
    %c0_88 = arith.constant 0 : index
    %c96 = arith.constant 96 : index
    %105 = vector.load %arg14[%c0_88, %c96] : memref<64x432xbf16, #tpu.memory_space<vmem>>, vector<64x48xbf16>
    tpu.vector_store %arg14[%c0_88, %c96], %104 {strides = array<i32>} : memref<64x432xbf16, #tpu.memory_space<vmem>>, vector<64x48xbf16>,
    %c1_89 = arith.constant 1 : index
    %c0_90 = arith.constant 0 : index
    %c0_91 = arith.constant 0 : index
    %106 = vector.load %arg11[%c1_89, %c0_90, %c0_91] : memref<10x10x48xf32, #tpu.memory_space<vmem>>, vector<8x8x48xf32>
    %107 = vector.shape_cast %106 : vector<8x8x48xf32> to vector<64x48xf32>
    %108 = arith.truncf %107 : vector<64x48xf32> to vector<64x48xbf16>
    %c0_92 = arith.constant 0 : index
    %c144 = arith.constant 144 : index
    %109 = vector.load %arg14[%c0_92, %c144] : memref<64x432xbf16, #tpu.memory_space<vmem>>, vector<64x48xbf16>
    tpu.vector_store %arg14[%c0_92, %c144], %108 {strides = array<i32>} : memref<64x432xbf16, #tpu.memory_space<vmem>>, vector<64x48xbf16>,
    %c1_93 = arith.constant 1 : index
    %c1_94 = arith.constant 1 : index
    %c0_95 = arith.constant 0 : index
    %110 = vector.load %arg11[%c1_93, %c1_94, %c0_95] : memref<10x10x48xf32, #tpu.memory_space<vmem>>, vector<8x8x48xf32>
    %111 = vector.shape_cast %110 : vector<8x8x48xf32> to vector<64x48xf32>
    %112 = arith.truncf %111 : vector<64x48xf32> to vector<64x48xbf16>
    %c0_96 = arith.constant 0 : index
    %c192 = arith.constant 192 : index
    %113 = vector.load %arg14[%c0_96, %c192] : memref<64x432xbf16, #tpu.memory_space<vmem>>, vector<64x48xbf16>
    tpu.vector_store %arg14[%c0_96, %c192], %112 {strides = array<i32>} : memref<64x432xbf16, #tpu.memory_space<vmem>>, vector<64x48xbf16>,
    %c1_97 = arith.constant 1 : index
    %c2_98 = arith.constant 2 : index
    %c0_99 = arith.constant 0 : index
    %114 = vector.load %arg11[%c1_97, %c2_98, %c0_99] : memref<10x10x48xf32, #tpu.memory_space<vmem>>, vector<8x8x48xf32>
    %115 = vector.shape_cast %114 : vector<8x8x48xf32> to vector<64x48xf32>
    %116 = arith.truncf %115 : vector<64x48xf32> to vector<64x48xbf16>
    %c0_100 = arith.constant 0 : index
    %c240 = arith.constant 240 : index
    %117 = vector.load %arg14[%c0_100, %c240] : memref<64x432xbf16, #tpu.memory_space<vmem>>, vector<64x48xbf16>
    tpu.vector_store %arg14[%c0_100, %c240], %116 {strides = array<i32>} : memref<64x432xbf16, #tpu.memory_space<vmem>>, vector<64x48xbf16>,
    %c2_101 = arith.constant 2 : index
    %c0_102 = arith.constant 0 : index
    %c0_103 = arith.constant 0 : index
    %118 = vector.load %arg11[%c2_101, %c0_102, %c0_103] : memref<10x10x48xf32, #tpu.memory_space<vmem>>, vector<8x8x48xf32>
    %119 = vector.shape_cast %118 : vector<8x8x48xf32> to vector<64x48xf32>
    %120 = arith.truncf %119 : vector<64x48xf32> to vector<64x48xbf16>
    %c0_104 = arith.constant 0 : index
    %c288 = arith.constant 288 : index
    %121 = vector.load %arg14[%c0_104, %c288] : memref<64x432xbf16, #tpu.memory_space<vmem>>, vector<64x48xbf16>
    tpu.vector_store %arg14[%c0_104, %c288], %120 {strides = array<i32>} : memref<64x432xbf16, #tpu.memory_space<vmem>>, vector<64x48xbf16>,
    %c2_105 = arith.constant 2 : index
    %c1_106 = arith.constant 1 : index
    %c0_107 = arith.constant 0 : index
    %122 = vector.load %arg11[%c2_105, %c1_106, %c0_107] : memref<10x10x48xf32, #tpu.memory_space<vmem>>, vector<8x8x48xf32>
    %123 = vector.shape_cast %122 : vector<8x8x48xf32> to vector<64x48xf32>
    %124 = arith.truncf %123 : vector<64x48xf32> to vector<64x48xbf16>
    %c0_108 = arith.constant 0 : index
    %c336 = arith.constant 336 : index
    %125 = vector.load %arg14[%c0_108, %c336] : memref<64x432xbf16, #tpu.memory_space<vmem>>, vector<64x48xbf16>
    tpu.vector_store %arg14[%c0_108, %c336], %124 {strides = array<i32>} : memref<64x432xbf16, #tpu.memory_space<vmem>>, vector<64x48xbf16>,
    %c2_109 = arith.constant 2 : index
    %c2_110 = arith.constant 2 : index
    %c0_111 = arith.constant 0 : index
    %126 = vector.load %arg11[%c2_109, %c2_110, %c0_111] : memref<10x10x48xf32, #tpu.memory_space<vmem>>, vector<8x8x48xf32>
    %127 = vector.shape_cast %126 : vector<8x8x48xf32> to vector<64x48xf32>
    %128 = arith.truncf %127 : vector<64x48xf32> to vector<64x48xbf16>
    %c0_112 = arith.constant 0 : index
    %c384 = arith.constant 384 : index
    %129 = vector.load %arg14[%c0_112, %c384] : memref<64x432xbf16, #tpu.memory_space<vmem>>, vector<64x48xbf16>
    tpu.vector_store %arg14[%c0_112, %c384], %128 {strides = array<i32>} : memref<64x432xbf16, #tpu.memory_space<vmem>>, vector<64x48xbf16>,
    %c0_113 = arith.constant 0 : index
    %c0_114 = arith.constant 0 : index
    %130 = vector.load %arg14[%c0_113, %c0_114] : memref<64x432xbf16, #tpu.memory_space<vmem>>, vector<64x432xbf16>
    %c0_115 = arith.constant 0 : index
    %c0_116 = arith.constant 0 : index
    %131 = vector.load %arg4[%c0_115, %c0_116] : memref<432x64xbf16, #tpu.memory_space<vmem>>, vector<432x64xbf16>
    %cst_117 = arith.constant dense<0.000000e+00> : vector<64x64xf32>
    %132 = tpu.matmul %130, %131, %cst_117 {dimension_numbers = #tpu.dot_dimension_numbers<[1], [0], [0], [1], [0, 0, 1, 1], [], []>} : vector<64x432xbf16>, vector<432x64xbf16>, vector<64x64xf32> -> vector<64x64xf32>
    %133 = vector.extract_strided_slice %132 {offsets = [0, 0], sizes = [64, 32], strides = [1, 1]} : vector<64x64xf32> to vector<64x32xf32>
    %134 = vector.shape_cast %133 : vector<64x32xf32> to vector<8x8x32xf32>
    %c0_118 = arith.constant 0 : index
    %c0_119 = arith.constant 0 : index
    %c0_120 = arith.constant 0 : index
    %c0_121 = arith.constant 0 : index
    %135 = vector.load %arg8[%c0_118, %c0_119, %c0_120, %c0_121] : memref<1x8x8x32xf32, #tpu.memory_space<vmem>>, vector<1x8x8x32xf32>
    %136 = vector.shape_cast %135 : vector<1x8x8x32xf32> to vector<8x8x32xf32>
    %137 = vector.shape_cast %134 : vector<8x8x32xf32> to vector<1x8x8x32xf32>
    tpu.vector_store %arg8[%c0_118, %c0_119, %c0_120, %c0_121], %137 {strides = array<i32>} : memref<1x8x8x32xf32, #tpu.memory_space<vmem>>, vector<1x8x8x32xf32>,
    %138 = vector.extract_strided_slice %132 {offsets = [0, 32], sizes = [64, 32], strides = [1, 1]} : vector<64x64xf32> to vector<64x32xf32>
    %139 = vector.shape_cast %138 : vector<64x32xf32> to vector<4x2x8x32xf32>
    %cst_122 = arith.constant 0.000000e+00 : f32
    %140 = vector.broadcast %cst_122 : f32 to vector<16x64xf32>
    %141 = vector.extract_strided_slice %139 {offsets = [0, 0, 0, 0], sizes = [4, 1, 8, 32], strides = [1, 1, 1, 1]} : vector<4x2x8x32xf32> to vector<4x1x8x32xf32>
    %142 = vector.shape_cast %141 : vector<4x1x8x32xf32> to vector<4x8x32xf32>
    %143 = vector.shape_cast %142 : vector<4x8x32xf32> to vector<4x4x2x32xf32>
    %144 = vector.extract_strided_slice %143 {offsets = [0, 0, 0, 0], sizes = [4, 4, 1, 32], strides = [1, 1, 1, 1]} : vector<4x4x2x32xf32> to vector<4x4x1x32xf32>
    %145 = vector.shape_cast %144 : vector<4x4x1x32xf32> to vector<4x4x32xf32>
    %146 = vector.shape_cast %145 : vector<4x4x32xf32> to vector<16x32xf32>
    %147 = arith.truncf %146 : vector<16x32xf32> to vector<16x32xbf16>
    %c0_123 = arith.constant 0 : index
    %c0_124 = arith.constant 0 : index
    %c0_125 = arith.constant 0 : index
    %148 = vector.load %arg5[%c0_123, %c0_124, %c0_125] : memref<4x32x64xbf16, #tpu.memory_space<vmem>>, vector<1x32x64xbf16>
    %149 = vector.shape_cast %148 : vector<1x32x64xbf16> to vector<32x64xbf16>
    %cst_126 = arith.constant dense<0.000000e+00> : vector<16x64xf32>
    %150 = tpu.matmul %147, %149, %cst_126 {dimension_numbers = #tpu.dot_dimension_numbers<[1], [0], [0], [1], [0, 0, 1, 1], [], []>} : vector<16x32xbf16>, vector<32x64xbf16>, vector<16x64xf32> -> vector<16x64xf32>
    %151 = arith.addf %140, %150 : vector<16x64xf32>
    %152 = vector.extract_strided_slice %143 {offsets = [0, 0, 1, 0], sizes = [4, 4, 1, 32], strides = [1, 1, 1, 1]} : vector<4x4x2x32xf32> to vector<4x4x1x32xf32>
    %153 = vector.shape_cast %152 : vector<4x4x1x32xf32> to vector<4x4x32xf32>
    %154 = vector.shape_cast %153 : vector<4x4x32xf32> to vector<16x32xf32>
    %155 = arith.truncf %154 : vector<16x32xf32> to vector<16x32xbf16>
    %c1_127 = arith.constant 1 : index
    %c0_128 = arith.constant 0 : index
    %c0_129 = arith.constant 0 : index
    %156 = vector.load %arg5[%c1_127, %c0_128, %c0_129] : memref<4x32x64xbf16, #tpu.memory_space<vmem>>, vector<1x32x64xbf16>
    %157 = vector.shape_cast %156 : vector<1x32x64xbf16> to vector<32x64xbf16>
    %cst_130 = arith.constant dense<0.000000e+00> : vector<16x64xf32>
    %158 = tpu.matmul %155, %157, %cst_130 {dimension_numbers = #tpu.dot_dimension_numbers<[1], [0], [0], [1], [0, 0, 1, 1], [], []>} : vector<16x32xbf16>, vector<32x64xbf16>, vector<16x64xf32> -> vector<16x64xf32>
    %159 = arith.addf %151, %158 : vector<16x64xf32>
    %160 = vector.extract_strided_slice %139 {offsets = [0, 1, 0, 0], sizes = [4, 1, 8, 32], strides = [1, 1, 1, 1]} : vector<4x2x8x32xf32> to vector<4x1x8x32xf32>
    %161 = vector.shape_cast %160 : vector<4x1x8x32xf32> to vector<4x8x32xf32>
    %162 = vector.shape_cast %161 : vector<4x8x32xf32> to vector<4x4x2x32xf32>
    %163 = vector.extract_strided_slice %162 {offsets = [0, 0, 0, 0], sizes = [4, 4, 1, 32], strides = [1, 1, 1, 1]} : vector<4x4x2x32xf32> to vector<4x4x1x32xf32>
    %164 = vector.shape_cast %163 : vector<4x4x1x32xf32> to vector<4x4x32xf32>
    %165 = vector.shape_cast %164 : vector<4x4x32xf32> to vector<16x32xf32>
    %166 = arith.truncf %165 : vector<16x32xf32> to vector<16x32xbf16>
    %c2_131 = arith.constant 2 : index
    %c0_132 = arith.constant 0 : index
    %c0_133 = arith.constant 0 : index
    %167 = vector.load %arg5[%c2_131, %c0_132, %c0_133] : memref<4x32x64xbf16, #tpu.memory_space<vmem>>, vector<1x32x64xbf16>
    %168 = vector.shape_cast %167 : vector<1x32x64xbf16> to vector<32x64xbf16>
    %cst_134 = arith.constant dense<0.000000e+00> : vector<16x64xf32>
    %169 = tpu.matmul %166, %168, %cst_134 {dimension_numbers = #tpu.dot_dimension_numbers<[1], [0], [0], [1], [0, 0, 1, 1], [], []>} : vector<16x32xbf16>, vector<32x64xbf16>, vector<16x64xf32> -> vector<16x64xf32>
    %170 = arith.addf %159, %169 : vector<16x64xf32>
    %171 = vector.extract_strided_slice %162 {offsets = [0, 0, 1, 0], sizes = [4, 4, 1, 32], strides = [1, 1, 1, 1]} : vector<4x4x2x32xf32> to vector<4x4x1x32xf32>
    %172 = vector.shape_cast %171 : vector<4x4x1x32xf32> to vector<4x4x32xf32>
    %173 = vector.shape_cast %172 : vector<4x4x32xf32> to vector<16x32xf32>
    %174 = arith.truncf %173 : vector<16x32xf32> to vector<16x32xbf16>
    %c3_135 = arith.constant 3 : index
    %c0_136 = arith.constant 0 : index
    %c0_137 = arith.constant 0 : index
    %175 = vector.load %arg5[%c3_135, %c0_136, %c0_137] : memref<4x32x64xbf16, #tpu.memory_space<vmem>>, vector<1x32x64xbf16>
    %176 = vector.shape_cast %175 : vector<1x32x64xbf16> to vector<32x64xbf16>
    %cst_138 = arith.constant dense<0.000000e+00> : vector<16x64xf32>
    %177 = tpu.matmul %174, %176, %cst_138 {dimension_numbers = #tpu.dot_dimension_numbers<[1], [0], [0], [1], [0, 0, 1, 1], [], []>} : vector<16x32xbf16>, vector<32x64xbf16>, vector<16x64xf32> -> vector<16x64xf32>
    %178 = arith.addf %170, %177 : vector<16x64xf32>
    %cst_139 = arith.constant 0.000000e+00 : f32
    %179 = vector.broadcast %cst_139 : f32 to vector<6x6x64xf32>
    %c0_140 = arith.constant 0 : index
    %c0_141 = arith.constant 0 : index
    %c0_142 = arith.constant 0 : index
    %180 = vector.load %arg12[%c0_140, %c0_141, %c0_142] : memref<6x6x64xf32, #tpu.memory_space<vmem>>, vector<6x6x64xf32>
    tpu.vector_store %arg12[%c0_140, %c0_141, %c0_142], %179 {strides = array<i32>} : memref<6x6x64xf32, #tpu.memory_space<vmem>>, vector<6x6x64xf32>,
    %181 = vector.shape_cast %178 : vector<16x64xf32> to vector<4x4x64xf32>
    %c1_143 = arith.constant 1 : index
    %c1_144 = arith.constant 1 : index
    %c0_145 = arith.constant 0 : index
    %182 = vector.load %arg12[%c1_143, %c1_144, %c0_145] : memref<6x6x64xf32, #tpu.memory_space<vmem>>, vector<4x4x64xf32>
    tpu.vector_store %arg12[%c1_143, %c1_144, %c0_145], %181 {strides = array<i32>} : memref<6x6x64xf32, #tpu.memory_space<vmem>>, vector<4x4x64xf32>,
    %c0_146 = arith.constant 0 : index
    %c0_147 = arith.constant 0 : index
    %c0_148 = arith.constant 0 : index
    %183 = vector.load %arg12[%c0_146, %c0_147, %c0_148] : memref<6x6x64xf32, #tpu.memory_space<vmem>>, vector<4x4x64xf32>
    %184 = vector.shape_cast %183 : vector<4x4x64xf32> to vector<16x64xf32>
    %185 = arith.truncf %184 : vector<16x64xf32> to vector<16x64xbf16>
    %c0_149 = arith.constant 0 : index
    %c0_150 = arith.constant 0 : index
    %186 = vector.load %arg15[%c0_149, %c0_150] : memref<16x576xbf16, #tpu.memory_space<vmem>>, vector<16x64xbf16>
    tpu.vector_store %arg15[%c0_149, %c0_150], %185 {strides = array<i32>} : memref<16x576xbf16, #tpu.memory_space<vmem>>, vector<16x64xbf16>,
    %c0_151 = arith.constant 0 : index
    %c1_152 = arith.constant 1 : index
    %c0_153 = arith.constant 0 : index
    %187 = vector.load %arg12[%c0_151, %c1_152, %c0_153] : memref<6x6x64xf32, #tpu.memory_space<vmem>>, vector<4x4x64xf32>
    %188 = vector.shape_cast %187 : vector<4x4x64xf32> to vector<16x64xf32>
    %189 = arith.truncf %188 : vector<16x64xf32> to vector<16x64xbf16>
    %c0_154 = arith.constant 0 : index
    %c64 = arith.constant 64 : index
    %190 = vector.load %arg15[%c0_154, %c64] : memref<16x576xbf16, #tpu.memory_space<vmem>>, vector<16x64xbf16>
    tpu.vector_store %arg15[%c0_154, %c64], %189 {strides = array<i32>} : memref<16x576xbf16, #tpu.memory_space<vmem>>, vector<16x64xbf16>,
    %c0_155 = arith.constant 0 : index
    %c2_156 = arith.constant 2 : index
    %c0_157 = arith.constant 0 : index
    %191 = vector.load %arg12[%c0_155, %c2_156, %c0_157] : memref<6x6x64xf32, #tpu.memory_space<vmem>>, vector<4x4x64xf32>
    %192 = vector.shape_cast %191 : vector<4x4x64xf32> to vector<16x64xf32>
    %193 = arith.truncf %192 : vector<16x64xf32> to vector<16x64xbf16>
    %c0_158 = arith.constant 0 : index
    %c128 = arith.constant 128 : index
    %194 = vector.load %arg15[%c0_158, %c128] : memref<16x576xbf16, #tpu.memory_space<vmem>>, vector<16x64xbf16>
    tpu.vector_store %arg15[%c0_158, %c128], %193 {strides = array<i32>} : memref<16x576xbf16, #tpu.memory_space<vmem>>, vector<16x64xbf16>,
    %c1_159 = arith.constant 1 : index
    %c0_160 = arith.constant 0 : index
    %c0_161 = arith.constant 0 : index
    %195 = vector.load %arg12[%c1_159, %c0_160, %c0_161] : memref<6x6x64xf32, #tpu.memory_space<vmem>>, vector<4x4x64xf32>
    %196 = vector.shape_cast %195 : vector<4x4x64xf32> to vector<16x64xf32>
    %197 = arith.truncf %196 : vector<16x64xf32> to vector<16x64xbf16>
    %c0_162 = arith.constant 0 : index
    %c192_163 = arith.constant 192 : index
    %198 = vector.load %arg15[%c0_162, %c192_163] : memref<16x576xbf16, #tpu.memory_space<vmem>>, vector<16x64xbf16>
    tpu.vector_store %arg15[%c0_162, %c192_163], %197 {strides = array<i32>} : memref<16x576xbf16, #tpu.memory_space<vmem>>, vector<16x64xbf16>,
    %c1_164 = arith.constant 1 : index
    %c1_165 = arith.constant 1 : index
    %c0_166 = arith.constant 0 : index
    %199 = vector.load %arg12[%c1_164, %c1_165, %c0_166] : memref<6x6x64xf32, #tpu.memory_space<vmem>>, vector<4x4x64xf32>
    %200 = vector.shape_cast %199 : vector<4x4x64xf32> to vector<16x64xf32>
    %201 = arith.truncf %200 : vector<16x64xf32> to vector<16x64xbf16>
    %c0_167 = arith.constant 0 : index
    %c256 = arith.constant 256 : index
    %202 = vector.load %arg15[%c0_167, %c256] : memref<16x576xbf16, #tpu.memory_space<vmem>>, vector<16x64xbf16>
    tpu.vector_store %arg15[%c0_167, %c256], %201 {strides = array<i32>} : memref<16x576xbf16, #tpu.memory_space<vmem>>, vector<16x64xbf16>,
    %c1_168 = arith.constant 1 : index
    %c2_169 = arith.constant 2 : index
    %c0_170 = arith.constant 0 : index
    %203 = vector.load %arg12[%c1_168, %c2_169, %c0_170] : memref<6x6x64xf32, #tpu.memory_space<vmem>>, vector<4x4x64xf32>
    %204 = vector.shape_cast %203 : vector<4x4x64xf32> to vector<16x64xf32>
    %205 = arith.truncf %204 : vector<16x64xf32> to vector<16x64xbf16>
    %c0_171 = arith.constant 0 : index
    %c320 = arith.constant 320 : index
    %206 = vector.load %arg15[%c0_171, %c320] : memref<16x576xbf16, #tpu.memory_space<vmem>>, vector<16x64xbf16>
    tpu.vector_store %arg15[%c0_171, %c320], %205 {strides = array<i32>} : memref<16x576xbf16, #tpu.memory_space<vmem>>, vector<16x64xbf16>,
    %c2_172 = arith.constant 2 : index
    %c0_173 = arith.constant 0 : index
    %c0_174 = arith.constant 0 : index
    %207 = vector.load %arg12[%c2_172, %c0_173, %c0_174] : memref<6x6x64xf32, #tpu.memory_space<vmem>>, vector<4x4x64xf32>
    %208 = vector.shape_cast %207 : vector<4x4x64xf32> to vector<16x64xf32>
    %209 = arith.truncf %208 : vector<16x64xf32> to vector<16x64xbf16>
    %c0_175 = arith.constant 0 : index
    %c384_176 = arith.constant 384 : index
    %210 = vector.load %arg15[%c0_175, %c384_176] : memref<16x576xbf16, #tpu.memory_space<vmem>>, vector<16x64xbf16>
    tpu.vector_store %arg15[%c0_175, %c384_176], %209 {strides = array<i32>} : memref<16x576xbf16, #tpu.memory_space<vmem>>, vector<16x64xbf16>,
    %c2_177 = arith.constant 2 : index
    %c1_178 = arith.constant 1 : index
    %c0_179 = arith.constant 0 : index
    %211 = vector.load %arg12[%c2_177, %c1_178, %c0_179] : memref<6x6x64xf32, #tpu.memory_space<vmem>>, vector<4x4x64xf32>
    %212 = vector.shape_cast %211 : vector<4x4x64xf32> to vector<16x64xf32>
    %213 = arith.truncf %212 : vector<16x64xf32> to vector<16x64xbf16>
    %c0_180 = arith.constant 0 : index
    %c448 = arith.constant 448 : index
    %214 = vector.load %arg15[%c0_180, %c448] : memref<16x576xbf16, #tpu.memory_space<vmem>>, vector<16x64xbf16>
    tpu.vector_store %arg15[%c0_180, %c448], %213 {strides = array<i32>} : memref<16x576xbf16, #tpu.memory_space<vmem>>, vector<16x64xbf16>,
    %c2_181 = arith.constant 2 : index
    %c2_182 = arith.constant 2 : index
    %c0_183 = arith.constant 0 : index
    %215 = vector.load %arg12[%c2_181, %c2_182, %c0_183] : memref<6x6x64xf32, #tpu.memory_space<vmem>>, vector<4x4x64xf32>
    %216 = vector.shape_cast %215 : vector<4x4x64xf32> to vector<16x64xf32>
    %217 = arith.truncf %216 : vector<16x64xf32> to vector<16x64xbf16>
    %c0_184 = arith.constant 0 : index
    %c512 = arith.constant 512 : index
    %218 = vector.load %arg15[%c0_184, %c512] : memref<16x576xbf16, #tpu.memory_space<vmem>>, vector<16x64xbf16>
    tpu.vector_store %arg15[%c0_184, %c512], %217 {strides = array<i32>} : memref<16x576xbf16, #tpu.memory_space<vmem>>, vector<16x64xbf16>,
    %c0_185 = arith.constant 0 : index
    %c0_186 = arith.constant 0 : index
    %219 = vector.load %arg15[%c0_185, %c0_186] : memref<16x576xbf16, #tpu.memory_space<vmem>>, vector<16x576xbf16>
    %c0_187 = arith.constant 0 : index
    %c0_188 = arith.constant 0 : index
    %220 = vector.load %arg6[%c0_187, %c0_188] : memref<576x64xbf16, #tpu.memory_space<vmem>>, vector<576x64xbf16>
    %cst_189 = arith.constant dense<0.000000e+00> : vector<16x64xf32>
    %221 = tpu.matmul %219, %220, %cst_189 {dimension_numbers = #tpu.dot_dimension_numbers<[1], [0], [0], [1], [0, 0, 1, 1], [], []>} : vector<16x576xbf16>, vector<576x64xbf16>, vector<16x64xf32> -> vector<16x64xf32>
    %222 = vector.shape_cast %221 : vector<16x64xf32> to vector<4x4x64xf32>
    %c0_190 = arith.constant 0 : index
    %c0_191 = arith.constant 0 : index
    %c0_192 = arith.constant 0 : index
    %c0_193 = arith.constant 0 : index
    %223 = vector.load %arg9[%c0_190, %c0_191, %c0_192, %c0_193] : memref<1x4x4x64xf32, #tpu.memory_space<vmem>>, vector<1x4x4x64xf32>
    %224 = vector.shape_cast %223 : vector<1x4x4x64xf32> to vector<4x4x64xf32>
    %225 = vector.shape_cast %222 : vector<4x4x64xf32> to vector<1x4x4x64xf32>
    tpu.vector_store %arg9[%c0_190, %c0_191, %c0_192, %c0_193], %225 {strides = array<i32>} : memref<1x4x4x64xf32, #tpu.memory_space<vmem>>, vector<1x4x4x64xf32>,
    return
  }
  func.func @transform_0(%arg0: i32) -> (i32, i32, i32, i32) {
    %c0_i32 = arith.constant 0 : i32
    %c0_i32_0 = arith.constant 0 : i32
    %c0_i32_1 = arith.constant 0 : i32
    %c0_i32_2 = arith.constant 0 : i32
    return %arg0, %c0_i32, %c0_i32_0, %c0_i32_1 : i32, i32, i32, i32
  }
  func.func @transform_1(%arg0: i32) -> (i32, i32) {
    %c0_i32 = arith.constant 0 : i32
    %c0_i32_0 = arith.constant 0 : i32
    %c0_i32_1 = arith.constant 0 : i32
    return %c0_i32, %c0_i32_0 : i32, i32
  }
  func.func @transform_2(%arg0: i32) -> (i32, i32, i32) {
    %c0_i32 = arith.constant 0 : i32
    %c0_i32_0 = arith.constant 0 : i32
    %c0_i32_1 = arith.constant 0 : i32
    %c0_i32_2 = arith.constant 0 : i32
    return %c0_i32, %c0_i32_0, %c0_i32_1 : i32, i32, i32
  }
  func.func @transform_3(%arg0: i32) -> (i32, i32) {
    %c0_i32 = arith.constant 0 : i32
    %c0_i32_0 = arith.constant 0 : i32
    %c0_i32_1 = arith.constant 0 : i32
    return %c0_i32, %c0_i32_0 : i32, i32
  }
  func.func @transform_4(%arg0: i32) -> (i32, i32, i32) {
    %c0_i32 = arith.constant 0 : i32
    %c0_i32_0 = arith.constant 0 : i32
    %c0_i32_1 = arith.constant 0 : i32
    %c0_i32_2 = arith.constant 0 : i32
    return %c0_i32, %c0_i32_0, %c0_i32_1 : i32, i32, i32
  }
  func.func @transform_5(%arg0: i32) -> (i32, i32) {
    %c0_i32 = arith.constant 0 : i32
    %c0_i32_0 = arith.constant 0 : i32
    %c0_i32_1 = arith.constant 0 : i32
    return %c0_i32, %c0_i32_0 : i32, i32
  }
  func.func @transform_6(%arg0: i32) -> (i32, i32, i32, i32) {
    %c0_i32 = arith.constant 0 : i32
    %c0_i32_0 = arith.constant 0 : i32
    %c0_i32_1 = arith.constant 0 : i32
    %c0_i32_2 = arith.constant 0 : i32
    return %arg0, %c0_i32, %c0_i32_0, %c0_i32_1 : i32, i32, i32, i32
  }
  func.func @transform_7(%arg0: i32) -> (i32, i32, i32, i32) {
    %c0_i32 = arith.constant 0 : i32
    %c0_i32_0 = arith.constant 0 : i32
    %c0_i32_1 = arith.constant 0 : i32
    %c0_i32_2 = arith.constant 0 : i32
    return %arg0, %c0_i32, %c0_i32_0, %c0_i32_1 : i32, i32, i32, i32
  }
  func.func @transform_8(%arg0: i32) -> (i32, i32, i32, i32) {
    %c0_i32 = arith.constant 0 : i32
    %c0_i32_0 = arith.constant 0 : i32
    %c0_i32_1 = arith.constant 0 : i32
    %c0_i32_2 = arith.constant 0 : i32
    return %arg0, %c0_i32, %c0_i32_0, %c0_i32_1 : i32, i32, i32, i32
  }
}

</mosaic_0001>

<bundles_post_ra>
// kernel: forward.1
= control target key start
LH: loop header
LB: loop body
LE: loop exit
PB: predicated region body
PF: predicated region fallthrough
CT: control target
= control target key end

     0   :  { %14 = vsyncpa [#allocation9], 0  ;;  %s11704_s0 = inlined_call_operand.vmem [shape: f32[2,16,16,4], index: 0, kind: input, shape index: {}]   ;;  %s11705_s1 = inlined_call_operand.vmem [shape: bf16[36,32], index: 1, kind: input, shape index: {}]   ;;  %s11706_s2 = inlined_call_operand.vmem [shape: bf16[4,16,48], index: 2, kind: input, shape index: {}]   ;;  %s11707_s3 = inlined_call_operand.vmem [shape: bf16[432,64], index: 3, kind: input, shape index: {}]   ;;  %s11708_s4 = inlined_call_operand.vmem [shape: bf16[4,32,64], index: 4, kind: input, shape index: {}]   ;;  %s11709_s5 = inlined_call_operand.vmem [shape: bf16[576,64], index: 5, kind: input, shape index: {}]   ;;  %s11710_s6 = inlined_call_operand.vmem [shape: f32[2,16,16,16], index: 6, kind: output, shape index: {0}]   ;;  %s11711_s7 = inlined_call_operand.hbm [shape: f32[2,8,8,32], index: 7, kind: output, shape index: {1}]   ;;  %s11712_s8 = inlined_call_operand.hbm [shape: f32[2,4,4,64], index: 8, kind: output, shape index: {2}]  }
   0x1   :  { %16 = vsyncpa [#allocation9 + $0x1], 0 }
   0x2   :  { %17 = vsyncpa [#allocation11], 0 }
   0x3   :  { %19 = vsyncpa [#allocation11 + $0x1], 0  ;;  %s9180_s27 = smov 0   ;;  %s9182_s28 = smov 0  }
   0x4   :  { %s9184_s29 = smov 0   ;;  %s9186_s30 = smov 0  }
   0x5 LB: > { %s9201_s9 = sadd.s32 4294967295, %s9113_s30   ;;  %s7605_s10 = sadd.s32 4294967294, %s9113_s30   ;;  %s9113_s30 = sphi %s9186_s30, %s11825_s30   ;;  %s9109_s29 = sphi %s9184_s29, %s11824_s29   ;;  %s9105_s28 = sphi %s9182_s28, %s11823_s28   ;;  %s9101_s27 = sphi %s9180_s27, %s11822_s27  }
   0x6   : > { %s9205_s11 = sadd.s32 1, %s9113_s30   ;;  %s189_s12 = sadd.s32 1, %s9109_s29 }
   0x7   : > { %s186_s13 = ssub.s32 %s9113_s30, %s9205_s11  ;;  %p199_p0 = scmp.ne.s32.totalorder %s9109_s29, %s9105_s28 }
   0x8   : > { %p187_p1 = scmp.eq.s32.totalorder %s186_s13, 0  ;;  %p200_p2 = scmp.eq.s32.totalorder %s9201_s9, 1 }
   0x9   : > { %p205_p3 = scmp.ne.s32.totalorder %s9105_s28, %s9101_s27  ;;  %p206_p4 = scmp.eq.s32.totalorder %s7605_s10, 1 }
   0xa   : > { %s9216_s14 = scalar_select %p187_p1, %s9109_s29, %s189_s12  }
   0xb   : > { %p9218_p5 = por %p200_p2, %p199_p0  ;;  %p9222_p6 = por %p206_p4, %p205_p3 }
   0xc   : > { %p7608_p7 = scmp.ge.s32.totalorder %s9113_s30, 1  ;;  %p273_p8 = scmp.lt.s32.totalorder %s9113_s30, 3 }
   0xe   : > { %p274_p9 = pnand %p7608_p7, %p273_p8 }
   0xf   : > { %p317_p10 = scmp.lt.s32.totalorder (!%p274_p9), %s9201_s9, 1  ;;  %s11722_s22 = smov (!%p274_p9), 4  }
  0x10   : > { %277 = sbr.rel (%p274_p9) target bundleno = 2406 (0x966), region = 44  ;;  %s11723_s23 = smov (!%p274_p9), 8  }
  0x11   : > { %s9118_s24 = smov (!%p274_p9), 12   ;;  %s9119_s25 = smov (!%p274_p9), 16  }
  0x12   : > { %s9120_s26 = smov (!%p274_p9), 20   ;;  %s11714_s10 = smov (!%p274_p9), 24  }
  0x13   : > { %s9122_s12 = smov (!%p274_p9), 28   ;;  %s9132_s13 = smov (!%p274_p9), [#allocation8]  }
  0x15   : > { %vm360_vm0 = vcmask 31744   ;;  %vm363_vm1 = vcmask 25600   ;;  %v9115_v0 = vmov 0.0   ;;  %s9338_s17 = scalar_select %p317_p10, %s9201_s9, 1  ;;  %vm609_vm2 = vcmask 27648  }
  0x16   : > { %361 = vst.msk [vmem:[#allocation2] sm:$0xff] %vm360_vm0, %v9115_v0  ;;  %362 = vst.msk [vmem:[#allocation2 + $0x8] sm:$0xff] %vm360_vm0, %v9115_v0  ;;  %vm2880_vm3 = vcmask 1041408   ;;  %vm11719_vm4 = vcmask 60448   ;;  %vm1123_vm5 = vcmask 93248   ;;  %vm11716_vm6 = vcmask 126048  }
  0x17   : > { %365 = vst.msk [vmem:[#allocation2 + $0x18] sm:$0xff] %vm360_vm0, %v9115_v0  ;;  %366 = vst.msk [vmem:[#allocation2 + $0x20] sm:$0xff] %vm360_vm0, %v9115_v0  ;;  %s11713_s18 = sshll.u32 %s9338_s17, 8  ;;  %vm1637_vm7 = vcmask 158848   ;;  %vm1894_vm8 = vcmask 191648   ;;  %vm11721_vm9 = vcmask 224448  }
  0x18   : > { %368 = vst.msk [vmem:[#allocation2 + $0x30] sm:$0xff] %vm360_vm0, %v9115_v0  ;;  %369 = vst.msk [vmem:[#allocation2 + $0x38] sm:$0xff] %vm360_vm0, %v9115_v0  ;;  %s9346_s21 = scalar_lea.vmem %s11704_s0, %s11713_s18  ;;  %s11730_s18 = smov 24   ;;  %vm11720_vm10 = vcmask 257248   ;;  %vm2666_vm11 = vcmask 290048   ;;  %vm11718_vm12 = vcmask 293888  }
  0x19   : > { %371 = vst.msk [vmem:[#allocation2 + $0x48] sm:$0xff] %vm360_vm0, %v9115_v0  ;;  %372 = vst.msk [vmem:[#allocation2 + $0x50] sm:$0xff] %vm360_vm0, %v9115_v0  ;;  %v328_v1 = vld [vmem:[%s9346_s21] sm:$0xff]  ;;  %v329_v2 = vld [vmem:[%s9346_s21 + $0x8] sm:$0xff]  ;;  %vm11717_vm13 = vcmask 130048   ;;  %vm3628_vm14 = vcmask 1041409  }
  0x1a   : > { %374 = vst.msk [vmem:[#allocation2 + $0x60] sm:$0xff] %vm360_vm0, %v9115_v0  ;;  %375 = vst.msk [vmem:[#allocation2 + $0x68] sm:$0xff] %vm360_vm0, %v9115_v0  ;;  %v330_v3 = vld [vmem:[%s9346_s21 + $0x10] sm:$0xff]  ;;  %v331_v9 = vld [vmem:[%s9346_s21 + $0x18] sm:$0xff]  ;;  %vm3631_vm15 = vcmask 1042434  }
  0x1b   : > { %377 = vst.msk [vmem:[#allocation2 + $0x78] sm:$0xff] %vm360_vm0, %v9115_v0  ;;  %378 = vst.msk [vmem:[#allocation2 + $0x80] sm:$0xff] %vm360_vm0, %v9115_v0  ;;  %v332_v10 = vld [vmem:[%s9346_s21 + $0x20] sm:$0xff]  ;;  %v333_v12 = vld [vmem:[%s9346_s21 + $0x28] sm:$0xff] }
  0x1c   : > { %380 = vst.msk [vmem:[#allocation2 + $0x90] sm:$0xff] %vm360_vm0, %v9115_v0  ;;  %381 = vst.msk [vmem:[#allocation2 + $0x98] sm:$0xff] %vm360_vm0, %v9115_v0  ;;  %v334_v13 = vld [vmem:[%s9346_s21 + $0x30] sm:$0xff]  ;;  %v335_v14 = vld [vmem:[%s9346_s21 + $0x38] sm:$0xff] }
  0x1d   : > { %383 = vst.msk [vmem:[#allocation2 + $0xa8] sm:$0xff] %vm360_vm0, %v9115_v0  ;;  %384 = vst.msk [vmem:[#allocation2 + $0xb0] sm:$0xff] %vm360_vm0, %v9115_v0  ;;  %v642_v4 = vld [vmem:[#allocation2 + $0x1] sm:$0xff]  ;;  %v338_v51 = vld [vmem:[%s9346_s21 + $0x50] sm:$0xff] }
  0x1e   : > { %386 = vst.msk [vmem:[#allocation2 + $0xc0] sm:$0xff] %vm360_vm0, %v9115_v0  ;;  %387 = vst.msk [vmem:[#allocation2 + $0xc8] sm:$0xff] %vm360_vm0, %v9115_v0  ;;  %v8209_v7 = vpack.c.bf16 %v642_v4, %v642_v4  ;;  %v899_v11 = vld [vmem:[#allocation2 + $0x2] sm:$0xff]  ;;  %v339_v52 = vld [vmem:[%s9346_s21 + $0x58] sm:$0xff] }
  0x1f   : > { %389 = vst.msk [vmem:[#allocation2 + $0xd8] sm:$0xff] %vm360_vm0, %v9115_v0  ;;  %390 = vst.msk [vmem:[#allocation2 + $0xe0] sm:$0xff] %vm360_vm0, %v9115_v0  ;;  %v336_v16 = vld [vmem:[%s9346_s21 + $0x40] sm:$0xff]  ;;  %v337_v17 = vld [vmem:[%s9346_s21 + $0x48] sm:$0xff]  ;;  %v8241_v23 = vpack.c.bf16 %v899_v11, %v899_v11 }
  0x20   : > { %392 = vst.msk [vmem:[#allocation2 + $0xf0] sm:$0xff] %vm360_vm0, %v9115_v0  ;;  %393 = vst.msk [vmem:[#allocation2 + $0xf8] sm:$0xff] %vm360_vm0, %v9115_v0  ;;  %770 = vrot.lane.b32.xlu0 %v8209_v7, %s11722_s22  ;;  %v449_v18 = vld [vmem:[#allocation2] sm:$0xff]  ;;  %v450_v20 = vld [vmem:[#allocation2 + $0x8] sm:$0xff] }
  0x21   : > { %395 = vst.msk [vmem:[#allocation2 + $0x108] sm:$0xff] %vm360_vm0, %v9115_v0  ;;  %396 = vst.msk [vmem:[#allocation2 + $0x110] sm:$0xff] %vm360_vm0, %v9115_v0  ;;  %v8177_v19 = vpack.c.bf16 %v449_v18, %v449_v18  ;;  %v8178_v21 = vpack.c.bf16 %v450_v20, %v450_v20  ;;  %v8882_v11 = vld [vmem:[%s11705_s1 + $0x10] ss:$0 sps:$4 sm:$0x33]  }
  0x22   : > { %398 = vst.msk [vmem:[#allocation2 + $0x120] sm:$0xff] %vm360_vm0, %v9115_v0  ;;  %399 = vst.msk [vmem:[#allocation2 + $0x128] sm:$0xff] %vm360_vm0, %v9115_v0  ;;  %8819 = vmatprep.subr.msk.bf16.mxu0 %vm2880_vm3, %v8882_v11  ;;  %v342_v20 = vld [vmem:[%s9346_s21 + $0x70] sm:$0xff] }
  0x23   : > { %401 = vst.msk [vmem:[#allocation2 + $0x138] sm:$0xff] %vm360_vm0, %v9115_v0  ;;  %402 = vst.msk [vmem:[#allocation2 + $0x140] sm:$0xff] %vm360_vm0, %v9115_v0 }
  0x24   : > { %404 = vst.msk [vmem:[#allocation2 + $0x150] sm:$0xff] %vm360_vm0, %v9115_v0  ;;  %405 = vst.msk [vmem:[#allocation2 + $0x158] sm:$0xff] %vm360_vm0, %v9115_v0 }
  0x25   : > { %407 = vst.msk [vmem:[#allocation2 + $0x168] sm:$0xff] %vm360_vm0, %v9115_v0  ;;  %408 = vst.msk [vmem:[#allocation2 + $0x170] sm:$0xff] %vm360_vm0, %v9115_v0 }
  0x26   : > { %410 = vst.msk [vmem:[#allocation2 + $0x180] sm:$0xff] %vm360_vm0, %v9115_v0  ;;  %411 = vst.msk [vmem:[#allocation2 + $0x188] sm:$0xff] %vm360_vm0, %v9115_v0 }
  0x27   : > { %413 = vst.msk [vmem:[#allocation2 + $0x198] sm:$0xff] %vm360_vm0, %v9115_v0  ;;  %414 = vst.msk [vmem:[#allocation2 + $0x1a0] sm:$0xff] %vm360_vm0, %v9115_v0 }
  0x28   : > { %364 = vst.msk [vmem:[#allocation2 + $0x10] sm:$0x3] %vm363_vm1, %v9115_v0  ;;  %367 = vst.msk [vmem:[#allocation2 + $0x28] sm:$0x3] %vm363_vm1, %v9115_v0 }
  0x29   : > { %370 = vst.msk [vmem:[#allocation2 + $0x40] sm:$0x3] %vm363_vm1, %v9115_v0  ;;  %373 = vst.msk [vmem:[#allocation2 + $0x58] sm:$0x3] %vm363_vm1, %v9115_v0 }
  0x2a   : > { %376 = vst.msk [vmem:[#allocation2 + $0x70] sm:$0x3] %vm363_vm1, %v9115_v0  ;;  %379 = vst.msk [vmem:[#allocation2 + $0x88] sm:$0x3] %vm363_vm1, %v9115_v0 }
  0x2b   : > { %382 = vst.msk [vmem:[#allocation2 + $0xa0] sm:$0x3] %vm363_vm1, %v9115_v0  ;;  %385 = vst.msk [vmem:[#allocation2 + $0xb8] sm:$0x3] %vm363_vm1, %v9115_v0 }
  0x2c   : > { %388 = vst.msk [vmem:[#allocation2 + $0xd0] sm:$0x3] %vm363_vm1, %v9115_v0  ;;  %391 = vst.msk [vmem:[#allocation2 + $0xe8] sm:$0x3] %vm363_vm1, %v9115_v0 }
  0x2d   : > { %394 = vst.msk [vmem:[#allocation2 + $0x100] sm:$0x3] %vm363_vm1, %v9115_v0  ;;  %397 = vst.msk [vmem:[#allocation2 + $0x118] sm:$0x3] %vm363_vm1, %v9115_v0 }
  0x2e   : > { %400 = vst.msk [vmem:[#allocation2 + $0x130] sm:$0x3] %vm363_vm1, %v9115_v0  ;;  %403 = vst.msk [vmem:[#allocation2 + $0x148] sm:$0x3] %vm363_vm1, %v9115_v0 }
  0x2f   : > { %406 = vst.msk [vmem:[#allocation2 + $0x160] sm:$0x3] %vm363_vm1, %v9115_v0  ;;  %409 = vst.msk [vmem:[#allocation2 + $0x178] sm:$0x3] %vm363_vm1, %v9115_v0  ;;  %v900_v5 = vld [vmem:[#allocation2 + $0xa] sm:$0xff] }
  0x30   : > { %412 = vst.msk [vmem:[#allocation2 + $0x190] sm:$0x3] %vm363_vm1, %v9115_v0  ;;  %415 = vst.msk [vmem:[#allocation2 + $0x1a8] sm:$0x3] %vm363_vm1, %v9115_v0  ;;  %v643_v6 = vld [vmem:[#allocation2 + $0x9] sm:$0xff]  ;;  %v8242_v8 = vpack.c.bf16 %v900_v5, %v900_v5  ;;  %vm3637_vm1 = vcmask 1044484  }
  0x31   : > { %417 = vst.msk [vmem:[#allocation2 + $0x19] sm:$0xff] %vm360_vm0, %v328_v1  ;;  %418 = vst.msk [vmem:[#allocation2 + $0x21] sm:$0xff] %vm360_vm0, %v329_v2  ;;  %v8210_v15 = vpack.c.bf16 %v643_v6, %v643_v6  ;;  %v340_v1 = vld [vmem:[%s9346_s21 + $0x60] sm:$0xff] }
  0x32   : > { %419 = vst.msk [vmem:[#allocation2 + $0x31] sm:$0xff] %vm360_vm0, %v330_v3  ;;  %420 = vst.msk [vmem:[#allocation2 + $0x39] sm:$0xff] %vm360_vm0, %v331_v9  ;;  %1029 = vrot.lane.b32.xlu1 %v8242_v8, %s11723_s23  ;;  %v341_v3 = vld [vmem:[%s9346_s21 + $0x68] sm:$0xff] }
  0x33   : > { %421 = vst.msk [vmem:[#allocation2 + $0x49] sm:$0xff] %vm360_vm0, %v332_v10  ;;  %422 = vst.msk [vmem:[#allocation2 + $0x51] sm:$0xff] %vm360_vm0, %v333_v12  ;;  %772 = vrot.lane.b32.xlu0 %v8210_v15, %s11722_s22 }
  0x34   : > { %423 = vst.msk [vmem:[#allocation2 + $0x61] sm:$0xff] %vm360_vm0, %v334_v13  ;;  %424 = vst.msk [vmem:[#allocation2 + $0x69] sm:$0xff] %vm360_vm0, %v335_v14  ;;  %v2882_v13 = vsel %vm2880_vm3, %v8882_v11, 0  ;;  %v8883_v14 = vld [vmem:[%s11705_s1 + $0x8] sm:$0xff]   ;;  %vm3640_vm3 = vcmask 1045509  }
  0x35   : > { %425 = vst.msk [vmem:[#allocation2 + $0x79] sm:$0xff] %vm360_vm0, %v336_v16  ;;  %426 = vst.msk [vmem:[#allocation2 + $0x81] sm:$0xff] %vm360_vm0, %v337_v17  ;;  %8698 = vmatpush3.bf16.msra.mxu0 %v2882_v13  ;;  %v8885_v16 = vld [vmem:[%s11705_s1] sm:$0xff]  }
  0x36   : > { %610 = vst.msk [vmem:[#allocation5] sm:$0xf] %vm609_vm2, %v8177_v19  ;;  %611 = vst.msk [vmem:[#allocation5 + $0x4] sm:$0xf] %vm609_vm2, %v8178_v21  ;;  %8699 = vmatprep.subr.bf16.mxu0 %v8883_v14  ;;  %v343_v21 = vld [vmem:[%s9346_s21 + $0x78] sm:$0xff] }
  0x37   : > { %1027 = vrot.lane.b32.xlu0 %v8241_v23, %s11723_s23  ;;  %427 = vst.msk [vmem:[#allocation2 + $0x91] sm:$0xff] %vm360_vm0, %v338_v51  ;;  %428 = vst.msk [vmem:[#allocation2 + $0x99] sm:$0xff] %vm360_vm0, %v339_v52 }
  0x38   : > { %v644_v22 = vld [vmem:[#allocation2 + $0x19] sm:$0xff]  ;;  %v645_v24 = vld [vmem:[#allocation2 + $0x21] sm:$0xff]  ;;  %429 = vst.msk [vmem:[#allocation2 + $0xa9] sm:$0xff] %vm360_vm0, %v340_v1  ;;  %430 = vst.msk [vmem:[#allocation2 + $0xb1] sm:$0xff] %vm360_vm0, %v341_v3 }
  0x39   : > { %v8211_v25 = vpack.c.bf16 %v644_v22, %v644_v22  ;;  %v901_v26 = vld [vmem:[#allocation2 + $0x1a] sm:$0xff]  ;;  %v1158_v31 = vld [vmem:[#allocation2 + $0x30] sm:$0xff]  ;;  %v8212_v33 = vpack.c.bf16 %v645_v24, %v645_v24  ;;  %v902_v37 = vld [vmem:[#allocation2 + $0x22] sm:$0xff]  ;;  %8700 = vmatpush3.bf16.msra.mxu0 %v8883_v14  ;;  %431 = vst.msk [vmem:[#allocation2 + $0xc1] sm:$0xff] %vm360_vm0, %v342_v20 }
  0x3a   : > { %v1156_v27 = vld [vmem:[#allocation2 + $0x18] sm:$0xff]  ;;  %v1157_v28 = vld [vmem:[#allocation2 + $0x20] sm:$0xff]  ;;  %v9374_v34 = vpack.c.bf16 %v1158_v31, %v1158_v31  ;;  %v8243_v36 = vpack.c.bf16 %v901_v26, %v901_v26  ;;  %v1930_v38 = vld [vmem:[#allocation2 + $0x48] sm:$0xff]  ;;  %v8244_v44 = vpack.c.bf16 %v902_v37, %v902_v37  ;;  %8701 = vmatprep.subr.bf16.mxu0 %v8885_v16  ;;  %432 = vst.msk [vmem:[#allocation2 + $0xc9] sm:$0xff] %vm360_vm0, %v343_v21 }
  0x3b   : > { %v8273_v29 = vpack.c.bf16 %v1156_v27, %v1156_v27  ;;  %v8274_v30 = vpack.c.bf16 %v1157_v28, %v1157_v28  ;;  %v1159_v32 = vld [vmem:[#allocation2 + $0x38] sm:$0xff]  ;;  %774 = vrot.lane.b32.xlu1 %v8211_v25, %s11722_s22  ;;  %v1931_v39 = vld [vmem:[#allocation2 + $0x50] sm:$0xff]  ;;  %v9381_v40 = vpack.c.bf16 %v1930_v38, %v1930_v38  ;;  %v1162_v42 = vld [vmem:[#allocation2 + $0x60] sm:$0xff] }
  0x3c   : > { %v9376_v35 = vpack.c.bf16 %v1159_v32, %v1159_v32  ;;  %v9383_v41 = vpack.c.bf16 %v1931_v39, %v1931_v39  ;;  %614 = vst.msk [vmem:[#allocation5 + $0x10] sm:$0xf] %vm609_vm2, %v9374_v34  ;;  %v1163_v43 = vld [vmem:[#allocation2 + $0x68] sm:$0xff]  ;;  %v9390_v45 = vpack.c.bf16 %v1162_v42, %v1162_v42  ;;  %1031 = vrot.lane.b32.xlu0 %v8243_v36, %s11723_s23  ;;  %v1934_v47 = vld [vmem:[#allocation2 + $0x78] sm:$0xff]  ;;  %v1935_v48 = vld [vmem:[#allocation2 + $0x80] sm:$0xff] }
  0x3d   : > { %612 = vst.msk [vmem:[#allocation5 + $0x8] sm:$0xf] %vm609_vm2, %v8273_v29  ;;  %613 = vst.msk [vmem:[#allocation5 + $0xc] sm:$0xf] %vm609_vm2, %v8274_v30  ;;  %v9392_v46 = vpack.c.bf16 %v1163_v43, %v1163_v43  ;;  %v9399_v49 = vpack.c.bf16 %v1934_v47, %v1934_v47  ;;  %v9401_v50 = vpack.c.bf16 %v1935_v48, %v1935_v48  ;;  %v1415_v53 = vld [vmem:[#allocation2 + $0x31] sm:$0xff]  ;;  %v1416_v54 = vld [vmem:[#allocation2 + $0x39] sm:$0xff]  ;;  %8702 = vmatpush3.bf16.msra.mxu0 %v8885_v16 }
  0x3e   : > { %615 = vst.msk [vmem:[#allocation5 + $0x14] sm:$0xf] %vm609_vm2, %v9376_v35  ;;  %616 = vst.msk [vmem:[#allocation5 + $0x18] sm:$0xf] %vm609_vm2, %v9381_v40  ;;  %v1166_v55 = vld [vmem:[#allocation2 + $0x90] sm:$0xff]  ;;  %v1167_v56 = vld [vmem:[#allocation2 + $0x98] sm:$0xff]  ;;  %v8307_v59 = vpack.c.bf16 %v1415_v53, %v1415_v53  ;;  %v8308_v60 = vpack.c.bf16 %v1416_v54, %v1416_v54 }
  0x3f   : > { %776 = vrot.lane.b32.xlu1 %v8212_v33, %s11722_s22  ;;  %617 = vst.msk [vmem:[#allocation5 + $0x1c] sm:$0xf] %vm609_vm2, %v9383_v41  ;;  %618 = vst.msk [vmem:[#allocation5 + $0x20] sm:$0xf] %vm609_vm2, %v9390_v45  ;;  %v9422_v57 = vpack.c.bf16 %v1166_v55, %v1166_v55  ;;  %v9424_v58 = vpack.c.bf16 %v1167_v56, %v1167_v56  ;;  %v1672_v61 = vld [vmem:[#allocation2 + $0x32] sm:$0xff]  ;;  %v1673_v62 = vld [vmem:[#allocation2 + $0x3a] sm:$0xff] }
  0x40   : > { %619 = vst.msk [vmem:[#allocation5 + $0x24] sm:$0xf] %vm609_vm2, %v9392_v46  ;;  %620 = vst.msk [vmem:[#allocation5 + $0x28] sm:$0xf] %vm609_vm2, %v9399_v49  ;;  %1284 = vrot.lane.b32.xlu0 %v8273_v29, %s9118_s24  ;;  %v8339_v63 = vpack.c.bf16 %v1672_v61, %v1672_v61  ;;  %v8340_v2 = vpack.c.bf16 %v1673_v62, %v1673_v62  ;;  %v1938_v4 = vld [vmem:[#allocation2 + $0xa8] sm:$0xff]  ;;  %v1939_v7 = vld [vmem:[#allocation2 + $0xb0] sm:$0xff] }
  0x41   : > { %621 = vst.msk [vmem:[#allocation5 + $0x2c] sm:$0xf] %vm609_vm2, %v9401_v50  ;;  %622 = vst.msk [vmem:[#allocation5 + $0x30] sm:$0xf] %vm609_vm2, %v9422_v57  ;;  %v2187_v5 = vld [vmem:[#allocation2 + $0x49] sm:$0xff]  ;;  %v9446_v6 = vpack.c.bf16 %v1938_v4, %v1938_v4  ;;  %v9450_v8 = vpack.c.bf16 %v1939_v7, %v1939_v7  ;;  %v2188_v9 = vld [vmem:[#allocation2 + $0x51] sm:$0xff] }
  0x42   : > { %623 = vst.msk [vmem:[#allocation5 + $0x34] sm:$0xf] %vm609_vm2, %v9424_v58  ;;  %v8403_v10 = vpack.c.bf16 %v2187_v5, %v2187_v5  ;;  %v8404_v12 = vpack.c.bf16 %v2188_v9, %v2188_v9  ;;  %v2444_v15 = vld [vmem:[#allocation2 + $0x4a] sm:$0xff]  ;;  %v2445_v17 = vld [vmem:[#allocation2 + $0x52] sm:$0xff]  ;;  %v1170_v22 = vld [vmem:[#allocation2 + $0xc0] sm:$0xff] }
  0x43   : > { %1033 = vrot.lane.b32.xlu1 %v8244_v44, %s11723_s23  ;;  %624 = vst.msk [vmem:[#allocation5 + $0x38] sm:$0xf] %vm609_vm2, %v9446_v6  ;;  %625 = vst.msk [vmem:[#allocation5 + $0x3c] sm:$0xf] %vm609_vm2, %v9450_v8  ;;  %v8435_v18 = vpack.c.bf16 %v2444_v15, %v2444_v15  ;;  %v8436_v19 = vpack.c.bf16 %v2445_v17, %v2445_v17  ;;  %v9491_v23 = vpack.c.bf16 %v1170_v22, %v1170_v22  ;;  %v1171_v24 = vld [vmem:[#allocation2 + $0xc8] sm:$0xff]  ;;  %v2191_v39 = vld [vmem:[#allocation2 + $0x79] sm:$0xff] }
  0x44   : > { %1288 = vrot.lane.b32.xlu0 %v9374_v34, %s9118_s24  ;;  %v9495_v26 = vpack.c.bf16 %v1171_v24, %v1171_v24  ;;  %v1420_v28 = vld [vmem:[#allocation2 + $0x69] sm:$0xff]  ;;  %v2192_v42 = vld [vmem:[#allocation2 + $0x81] sm:$0xff]  ;;  %v347_v3 = vld [vmem:[%s9346_s21 + $0x98] sm:$0xff] }
  0x45   : > { %626 = vst.msk [vmem:[#allocation5 + $0x40] sm:$0xf] %vm609_vm2, %v9491_v23  ;;  %v8312_v29 = vpack.c.bf16 %v1420_v28, %v1420_v28  ;;  %v1677_v32 = vld [vmem:[#allocation2 + $0x6a] sm:$0xff]  ;;  %v2448_v48 = vld [vmem:[#allocation2 + $0x7a] sm:$0xff]  ;;  %v2449_v53 = vld [vmem:[#allocation2 + $0x82] sm:$0xff] }
  0x46   : > { %627 = vst.msk [vmem:[#allocation5 + $0x44] sm:$0xf] %vm609_vm2, %v9495_v26  ;;  %v9557_v52 = vpack.c.bf16 %v2448_v48, %v2448_v48  ;;  %v9562_v56 = vpack.c.bf16 %v2449_v53, %v2449_v53  ;;  %v1423_v11 = vld [vmem:[#allocation2 + $0x91] sm:$0xff]  ;;  %v1681_v20 = vld [vmem:[#allocation2 + $0x9a] sm:$0xff] }
  0x47   : > { %1286 = vrot.lane.b32.xlu1 %v8274_v30, %s9118_s24  ;;  %v1676_v30 = vld [vmem:[#allocation2 + $0x62] sm:$0xff]  ;;  %436 = vst.msk [vmem:[#allocation2 + $0xf9] sm:$0xff] %vm360_vm0, %v347_v3  ;;  %v1680_v17 = vld [vmem:[#allocation2 + $0x92] sm:$0xff] }
  0x48   : > { %1541 = vrot.lane.b32.xlu0 %v8211_v25, %s9119_s25  ;;  %v1419_v25 = vld [vmem:[#allocation2 + $0x61] sm:$0xff]  ;;  %v9508_v31 = vpack.c.bf16 %v1676_v30, %v1676_v30 }
  0x49   : > { %v8311_v27 = vpack.c.bf16 %v1419_v25, %v1419_v25  ;;  %v348_v24 = vld [vmem:[%s9346_s21 + $0xa0] sm:$0xff]  ;;  %v9629_v25 = vpack.c.bf16 %v1681_v20, %v1681_v20  ;;  %v353_v20 = vld [vmem:[%s9346_s21 + $0xc8] sm:$0xff] }
  0x4a   : > { %437 = vst.msk [vmem:[#allocation2 + $0x109] sm:$0xff] %vm360_vm0, %v348_v24  ;;  %442 = vst.msk [vmem:[#allocation2 + $0x141] sm:$0xff] %vm360_vm0, %v353_v20 }
  0x4b   : > { %1290 = vrot.lane.b32.xlu1 %v9376_v35, %s9118_s24 }
  0x4c   : > { %1545 = vrot.lane.b32.xlu0 %v8307_v59, %s9119_s25 }
  0x4f   : > { %1543 = vrot.lane.b32.xlu1 %v8212_v33, %s9119_s25  ;;  %v344_v33 = vld [vmem:[%s9346_s21 + $0x80] sm:$0xff] }
  0x50   : > { %1798 = vrot.lane.b32.xlu0 %v8243_v36, %s9120_s26  ;;  %433 = vst.msk [vmem:[#allocation2 + $0xd9] sm:$0xff] %vm360_vm0, %v344_v33  ;;  %v2195_v33 = vld [vmem:[#allocation2 + $0xa9] sm:$0xff] }
  0x53   : > { %1547 = vrot.lane.b32.xlu1 %v8308_v60, %s9119_s25 }
  0x54   : > { %1802 = vrot.lane.b32.xlu0 %v8339_v63, %s9120_s26 }
  0x57   : > { %1800 = vrot.lane.b32.xlu1 %v8244_v44, %s9120_s26  ;;  %v1942_v36 = vld [vmem:[#allocation2 + $0xd8] sm:$0xff] }
  0x58   : > { %2056 = vrot.lane.b32.xlu0 %v9374_v34, %s11714_s10  ;;  %v9512_v34 = vpack.c.bf16 %v1677_v32, %v1677_v32  ;;  %v9525_v37 = vpack.c.bf16 %v1942_v36, %v1942_v36 }
  0x5a   : > { %628 = vst.msk [vmem:[#allocation5 + $0x48] sm:$0xf] %vm609_vm2, %v9525_v37 }
  0x5b   : > { %1804 = vrot.lane.b32.xlu1 %v8340_v2, %s9120_s26 }
  0x5c   : > { %2060 = vrot.lane.b32.xlu0 %v9381_v40, %s11714_s10 }
  0x5f   : > { %2058 = vrot.lane.b32.xlu1 %v9376_v35, %s11714_s10  ;;  %v345_v35 = vld [vmem:[%s9346_s21 + $0x88] sm:$0xff] }
  0x60   : > { %2313 = vrot.lane.b32.xlu0 %v8307_v59, %s9122_s12  ;;  %434 = vst.msk [vmem:[#allocation2 + $0xe1] sm:$0xff] %vm360_vm0, %v345_v35  ;;  %v2196_v35 = vld [vmem:[#allocation2 + $0xb1] sm:$0xff] }
  0x63   : > { %2062 = vrot.lane.b32.xlu1 %v9383_v41, %s11714_s10  ;;  %s9123_s10 = smov 32  }
  0x64   : > { %2317 = vrot.lane.b32.xlu0 %v8403_v10, %s9122_s12 }
  0x67   : > { %2315 = vrot.lane.b32.xlu1 %v8308_v60, %s9122_s12  ;;  %v1943_v38 = vld [vmem:[#allocation2 + $0xe0] sm:$0xff] }
  0x68   : > { %2570 = vrot.lane.b32.xlu0 %v8339_v63, %s9123_s10 }
  0x6b   : > { %2319 = vrot.lane.b32.xlu1 %v8404_v12, %s9122_s12 }
  0x6c   : > { %778 = vrot.lane.b32.xlu0 %v8307_v59, %s11722_s22 }
  0x6f   : > { %2572 = vrot.lane.b32.xlu1 %v8340_v2, %s9123_s10 }
  0x70   : > { %2574 = vrot.lane.b32.xlu0 %v8435_v18, %s9123_s10 }
  0x73   : > { %780 = vrot.lane.b32.xlu1 %v8308_v60, %s11722_s22 }
  0x74   : > { %782 = vrot.lane.b32.xlu0 %v8403_v10, %s11722_s22 }
  0x77   : > { %2576 = vrot.lane.b32.xlu1 %v8436_v19, %s9123_s10 }
  0x78   : > { %1035 = vrot.lane.b32.xlu0 %v8339_v63, %s11723_s23 }
  0x7b   : > { %784 = vrot.lane.b32.xlu1 %v8404_v12, %s11722_s22 }
  0x7c   : > { %1039 = vrot.lane.b32.xlu0 %v8435_v18, %s11723_s23 }
  0x7f   : > { %1037 = vrot.lane.b32.xlu1 %v8340_v2, %s11723_s23  ;;  %v346_v2 = vld [vmem:[%s9346_s21 + $0x90] sm:$0xff] }
  0x80   : > { %1292 = vrot.lane.b32.xlu0 %v9381_v40, %s9118_s24  ;;  %v9529_v40 = vpack.c.bf16 %v1943_v38, %v1943_v38  ;;  %435 = vst.msk [vmem:[#allocation2 + $0xf1] sm:$0xff] %vm360_vm0, %v346_v2  ;;  %v9660_v38 = vpack.c.bf16 %v2196_v35, %v2196_v35 }
  0x82   : > { %629 = vst.msk [vmem:[#allocation5 + $0x4c] sm:$0xf] %vm609_vm2, %v9529_v40 }
  0x83   : > { %1041 = vrot.lane.b32.xlu1 %v8436_v19, %s11723_s23 }
  0x84   : > { %1296 = vrot.lane.b32.xlu0 %v9390_v45, %s9118_s24 }
  0x87   : > { %1294 = vrot.lane.b32.xlu1 %v9383_v41, %s9118_s24  ;;  %v9538_v41 = vpack.c.bf16 %v2191_v39, %v2191_v39 }
  0x88   : > { %1549 = vrot.lane.b32.xlu0 %v8403_v10, %s9119_s25 }
  0x8b   : > { %1298 = vrot.lane.b32.xlu1 %v9392_v46, %s9118_s24 }
  0x8c   : > { %1553 = vrot.lane.b32.xlu0 %v8311_v27, %s9119_s25 }
  0x8f   : > { %1551 = vrot.lane.b32.xlu1 %v8404_v12, %s9119_s25 }
  0x90   : > { %1806 = vrot.lane.b32.xlu0 %v8435_v18, %s9120_s26 }
  0x92   : > { %v771_v43 = vpop.permute.xlu0 %770 }
  0x93   : > { %1555 = vrot.lane.b32.xlu1 %v8312_v29, %s9119_s25  ;;  %867 = vst.msk [vmem:[#allocation5] sm:$0xf] %vm11719_vm4, %v771_v43 }
  0x94   : > { %1810 = vrot.lane.b32.xlu0 %v9508_v31, %s9120_s26 }
  0x97   : > { %1808 = vrot.lane.b32.xlu1 %v8436_v19, %s9120_s26  ;;  %v9622_v19 = vpack.c.bf16 %v1680_v17, %v1680_v17 }
  0x98   : > { %2064 = vrot.lane.b32.xlu0 %v9390_v45, %s11730_s18  ;;  %v9542_v45 = vpack.c.bf16 %v2192_v42, %v2192_v42 }
  0x9b   : > { %1812 = vrot.lane.b32.xlu1 %v9512_v34, %s9120_s26 }
  0x9c   : > { %2068 = vrot.lane.b32.xlu0 %v9399_v49, %s11730_s18 }
  0x9f   : > { %2066 = vrot.lane.b32.xlu1 %v9392_v46, %s11730_s18 }
  0xa0   : > { %2321 = vrot.lane.b32.xlu0 %v8311_v27, %s9122_s12 }
  0xa3   : > { %2070 = vrot.lane.b32.xlu1 %v9401_v50, %s11730_s18 }
  0xa4   : > { %v1030_v44 = vpop.permute.xlu1 %1029  ;;  %2325 = vrot.lane.b32.xlu0 %v9538_v41, %s9122_s12 }
  0xa5   : > { %v773_v46 = vpop.permute.xlu0 %772 }
  0xa6   : > { %868 = vst.msk [vmem:[#allocation5 + $0x4] sm:$0xf] %vm11719_vm4, %v773_v46 }
  0xa7   : > { %2323 = vrot.lane.b32.xlu1 %v8312_v29, %s9122_s12  ;;  %1125 = vst.msk [vmem:[#allocation5 + $0x4] sm:$0xf] %vm1123_vm5, %v1030_v44  ;;  %v2452_v44 = vld [vmem:[#allocation2 + $0xaa] sm:$0xff] }
  0xa8   : > { %2578 = vrot.lane.b32.xlu0 %v9508_v31, %s9123_s10  ;;  %v9677_v46 = vpack.c.bf16 %v2452_v44, %v2452_v44 }
  0xa9   : > { %v1028_v51 = vpop.permute.xlu0 %1027 }
  0xaa   : > { %1124 = vst.msk [vmem:[#allocation5] sm:$0xf] %vm1123_vm5, %v1028_v51 }
  0xab   : > { %2327 = vrot.lane.b32.xlu1 %v9542_v45, %s9122_s12 }
  0xac   : > { %786 = vrot.lane.b32.xlu0 %v8311_v27, %s11722_s22  ;;  %v349_v27 = vld [vmem:[%s9346_s21 + $0xa8] sm:$0xff] }
  0xad   : > { %v775_v47 = vpop.permute.xlu1 %774  ;;  %438 = vst.msk [vmem:[#allocation2 + $0x111] sm:$0xff] %vm360_vm0, %v349_v27 }
  0xae   : > { %869 = vst.msk [vmem:[#allocation5 + $0x8] sm:$0xf] %vm11719_vm4, %v775_v47  ;;  %v1032_v55 = vpop.permute.xlu0 %1031  ;;  %v2453_v47 = vld [vmem:[#allocation2 + $0xb2] sm:$0xff] }
  0xaf   : > { %2580 = vrot.lane.b32.xlu1 %v9512_v34, %s9123_s10  ;;  %1126 = vst.msk [vmem:[#allocation5 + $0x8] sm:$0xf] %vm1123_vm5, %v1032_v55  ;;  %v9684_v53 = vpack.c.bf16 %v2453_v47, %v2453_v47 }
  0xb0   : > { %2582 = vrot.lane.b32.xlu0 %v9557_v52, %s9123_s10 }
  0xb1   : > { %v777_v54 = vpop.permute.xlu1 %776 }
  0xb2   : > { %870 = vst.msk [vmem:[#allocation5 + $0xc] sm:$0xf] %vm11719_vm4, %v777_v54  ;;  %v1285_v60 = vpop.permute.xlu0 %1284 }
  0xb3   : > { %788 = vrot.lane.b32.xlu1 %v8312_v29, %s11722_s22  ;;  %1381 = vst.msk [vmem:[#allocation5] sm:$0xf] %vm11716_vm6, %v1285_v60 }
  0xb4   : > { %790 = vrot.lane.b32.xlu0 %v9538_v41, %s11722_s22 }
  0xb5   : > { %v1034_v59 = vpop.permute.xlu1 %1033 }
  0xb6   : > { %1127 = vst.msk [vmem:[#allocation5 + $0xc] sm:$0xf] %vm1123_vm5, %v1034_v59  ;;  %v1289_v62 = vpop.permute.xlu0 %1288 }
  0xb7   : > { %2584 = vrot.lane.b32.xlu1 %v9562_v56, %s9123_s10  ;;  %1383 = vst.msk [vmem:[#allocation5 + $0x8] sm:$0xf] %vm11716_vm6, %v1289_v62  ;;  %v350_v62 = vld [vmem:[%s9346_s21 + $0xb0] sm:$0xff] }
  0xb8   : > { %1043 = vrot.lane.b32.xlu0 %v9508_v31, %s11723_s23  ;;  %439 = vst.msk [vmem:[#allocation2 + $0x121] sm:$0xff] %vm360_vm0, %v350_v62 }
  0xb9   : > { %v1287_v61 = vpop.permute.xlu1 %1286 }
  0xba   : > { %1382 = vst.msk [vmem:[#allocation5 + $0x4] sm:$0xf] %vm11716_vm6, %v1287_v61  ;;  %v1542_v1 = vpop.permute.xlu0 %1541 }
  0xbb   : > { %792 = vrot.lane.b32.xlu1 %v9542_v45, %s11722_s22  ;;  %1638 = vst.msk [vmem:[#allocation5] sm:$0xf] %vm1637_vm7, %v1542_v1 }
  0xbc   : > { %1047 = vrot.lane.b32.xlu0 %v9557_v52, %s11723_s23 }
  0xbd   : > { %v1291_v63 = vpop.permute.xlu1 %1290 }
  0xbe   : > { %1384 = vst.msk [vmem:[#allocation5 + $0xc] sm:$0xf] %vm11716_vm6, %v1291_v63  ;;  %v1546_v5 = vpop.permute.xlu0 %1545  ;;  %v351_v63 = vld [vmem:[%s9346_s21 + $0xb8] sm:$0xff] }
  0xbf   : > { %1045 = vrot.lane.b32.xlu1 %v9512_v34, %s11723_s23  ;;  %1640 = vst.msk [vmem:[#allocation5 + $0x8] sm:$0xf] %vm1637_vm7, %v1546_v5 }
  0xc0   : > { %1300 = vrot.lane.b32.xlu0 %v9399_v49, %s9118_s24  ;;  %v9606_v49 = vpack.c.bf16 %v1423_v11, %v1423_v11  ;;  %440 = vst.msk [vmem:[#allocation2 + $0x129] sm:$0xff] %vm360_vm0, %v351_v63 }
  0xc1   : > { %v1544_v4 = vpop.permute.xlu1 %1543 }
  0xc2   : > { %1639 = vst.msk [vmem:[#allocation5 + $0x4] sm:$0xf] %vm1637_vm7, %v1544_v4  ;;  %v1799_v9 = vpop.permute.xlu0 %1798 }
  0xc3   : > { %1049 = vrot.lane.b32.xlu1 %v9562_v56, %s11723_s23  ;;  %1895 = vst.msk [vmem:[#allocation5] sm:$0xf] %vm1894_vm8, %v1799_v9 }
  0xc4   : > { %1304 = vrot.lane.b32.xlu0 %v9422_v57, %s9118_s24 }
  0xc5   : > { %v1548_v7 = vpop.permute.xlu1 %1547 }
  0xc6   : > { %1641 = vst.msk [vmem:[#allocation5 + $0xc] sm:$0xf] %vm1637_vm7, %v1548_v7  ;;  %v1803_v12 = vpop.permute.xlu0 %1802  ;;  %v1427_v7 = vld [vmem:[#allocation2 + $0xc1] sm:$0xff] }
  0xc7   : > { %1302 = vrot.lane.b32.xlu1 %v9401_v50, %s9118_s24  ;;  %1897 = vst.msk [vmem:[#allocation5 + $0x8] sm:$0xf] %vm1894_vm8, %v1803_v12  ;;  %v1424_v50 = vld [vmem:[#allocation2 + $0x99] sm:$0xff] }
  0xc8   : > { %1557 = vrot.lane.b32.xlu0 %v9538_v41, %s9119_s25  ;;  %v9612_v15 = vpack.c.bf16 %v1424_v50, %v1424_v50  ;;  %v1684_v50 = vld [vmem:[#allocation2 + $0xc2] sm:$0xff] }
  0xc9   : > { %v1801_v10 = vpop.permute.xlu1 %1800 }
  0xca   : > { %1896 = vst.msk [vmem:[#allocation5 + $0x4] sm:$0xf] %vm1894_vm8, %v1801_v10  ;;  %v2057_v14 = vpop.permute.xlu0 %2056  ;;  %v1428_v10 = vld [vmem:[#allocation2 + $0xc9] sm:$0xff] }
  0xcb   : > { %1306 = vrot.lane.b32.xlu1 %v9424_v58, %s9118_s24  ;;  %2153 = vst.msk [vmem:[#allocation5] sm:$0xf] %vm11721_vm9, %v2057_v14  ;;  %v9734_v12 = vpack.c.bf16 %v1428_v10, %v1428_v10  ;;  %v9744_v14 = vpack.c.bf16 %v1684_v50, %v1684_v50  ;;  %v1688_v10 = vld [vmem:[#allocation2 + $0xf2] sm:$0xff] }
  0xcc   : > { %1561 = vrot.lane.b32.xlu0 %v9606_v49, %s9119_s25 }
  0xcd   : > { %v1805_v13 = vpop.permute.xlu1 %1804 }
  0xce   : > { %1898 = vst.msk [vmem:[#allocation5 + $0xc] sm:$0xf] %vm1894_vm8, %v1805_v13  ;;  %v2061_v18 = vpop.permute.xlu0 %2060 }
  0xcf   : > { %1559 = vrot.lane.b32.xlu1 %v9542_v45, %s9119_s25  ;;  %2155 = vst.msk [vmem:[#allocation5 + $0x8] sm:$0xf] %vm11721_vm9, %v2061_v18  ;;  %v352_v18 = vld [vmem:[%s9346_s21 + $0xc0] sm:$0xff] }
  0xd0   : > { %1814 = vrot.lane.b32.xlu0 %v9557_v52, %s9120_s26  ;;  %441 = vst.msk [vmem:[#allocation2 + $0x139] sm:$0xff] %vm360_vm0, %v352_v18  ;;  %v1947_v18 = vld [vmem:[#allocation2 + $0x110] sm:$0xff] }
  0xd1   : > { %v2059_v16 = vpop.permute.xlu1 %2058 }
  0xd2   : > { %2154 = vst.msk [vmem:[#allocation5 + $0x4] sm:$0xf] %vm11721_vm9, %v2059_v16  ;;  %v2314_v22 = vpop.permute.xlu0 %2313 }
  0xd3   : > { %1563 = vrot.lane.b32.xlu1 %v9612_v15, %s9119_s25  ;;  %2410 = vst.msk [vmem:[#allocation5] sm:$0xf] %vm11720_vm10, %v2314_v22 }
  0xd4   : > { %1818 = vrot.lane.b32.xlu0 %v9622_v19, %s9120_s26 }
  0xd5   : > { %v2063_v21 = vpop.permute.xlu1 %2062 }
  0xd6   : > { %2156 = vst.msk [vmem:[#allocation5 + $0xc] sm:$0xf] %vm11721_vm9, %v2063_v21  ;;  %v2318_v29 = vpop.permute.xlu0 %2317 }
  0xd7   : > { %1816 = vrot.lane.b32.xlu1 %v9562_v56, %s9120_s26  ;;  %2412 = vst.msk [vmem:[#allocation5 + $0x8] sm:$0xf] %vm11720_vm10, %v2318_v29 }
  0xd8   : > { %2072 = vrot.lane.b32.xlu0 %v9422_v57, %s11730_s18  ;;  %v9654_v57 = vpack.c.bf16 %v2195_v33, %v2195_v33 }
  0xd9   : > { %v2316_v28 = vpop.permute.xlu1 %2315 }
  0xda   : > { %2411 = vst.msk [vmem:[#allocation5 + $0x4] sm:$0xf] %vm11720_vm10, %v2316_v28  ;;  %v2571_v31 = vpop.permute.xlu0 %2570  ;;  %v2199_v28 = vld [vmem:[#allocation2 + $0xd9] sm:$0xff] }
  0xdb   : > { %1820 = vrot.lane.b32.xlu1 %v9629_v25, %s9120_s26  ;;  %2667 = vst.msk [vmem:[#allocation5] sm:$0xf] %vm2666_vm11, %v2571_v31 }
  0xdc   : > { %2076 = vrot.lane.b32.xlu0 %v9446_v6, %s11730_s18 }
  0xdd   : > { %v2320_v30 = vpop.permute.xlu1 %2319 }
  0xde   : > { %2413 = vst.msk [vmem:[#allocation5 + $0xc] sm:$0xf] %vm11720_vm10, %v2320_v30  ;;  %v779_v34 = vpop.permute.xlu0 %778  ;;  %v2200_v30 = vld [vmem:[#allocation2 + $0xe1] sm:$0xff] }
  0xdf   : > { %2074 = vrot.lane.b32.xlu1 %v9424_v58, %s11730_s18  ;;  %871 = vst.msk [vmem:[#allocation5 + $0x10] sm:$0xf] %vm11719_vm4, %v779_v34 }
  0xe0   : > { %2329 = vrot.lane.b32.xlu0 %v9606_v49, %s9122_s12 }
  0xe1   : > { %v2573_v32 = vpop.permute.xlu1 %2572 }
  0xe2   : > { %2668 = vst.msk [vmem:[#allocation5 + $0x4] sm:$0xf] %vm2666_vm11, %v2573_v32  ;;  %v2575_v36 = vpop.permute.xlu0 %2574  ;;  %v9782_v32 = vpack.c.bf16 %v2200_v30, %v2200_v30 }
  0xe3   : > { %2078 = vrot.lane.b32.xlu1 %v9450_v8, %s11730_s18  ;;  %2669 = vst.msk [vmem:[#allocation5 + $0x8] sm:$0xf] %vm2666_vm11, %v2575_v36 }
  0xe4   : > { %2333 = vrot.lane.b32.xlu0 %v9654_v57, %s9122_s12 }
  0xe5   : > { %v781_v58 = vpop.permute.xlu1 %780 }
  0xe6   : > { %872 = vst.msk [vmem:[#allocation5 + $0x14] sm:$0xf] %vm11719_vm4, %v781_v58  ;;  %v783_v42 = vpop.permute.xlu0 %782  ;;  %v2456_v58 = vld [vmem:[#allocation2 + $0xda] sm:$0xff] }
  0xe7   : > { %2331 = vrot.lane.b32.xlu1 %v9612_v15, %s9122_s12  ;;  %873 = vst.msk [vmem:[#allocation5 + $0x18] sm:$0xf] %vm11719_vm4, %v783_v42 }
  0xe8   : > { %2586 = vrot.lane.b32.xlu0 %v9622_v19, %s9123_s10 }
  0xe9   : > { %v2577_v39 = vpop.permute.xlu1 %2576  ;;  %v8884_v41 = vld [vmem:[#allocation5] sm:$0xff]  }
  0xea   : > { %2670 = vst.msk [vmem:[#allocation5 + $0xc] sm:$0xf] %vm2666_vm11, %v2577_v39  ;;  %8703 = vmatprep.mubr.msk.bf16.mxu0 %vm11718_vm12, %v8884_v41  ;;  %v1036_v45 = vpop.permute.xlu0 %1035  ;;  %v2457_v39 = vld [vmem:[#allocation2 + $0xe2] sm:$0xff] }
  0xeb   : > { %2335 = vrot.lane.b32.xlu1 %v9660_v38, %s9122_s12  ;;  %1128 = vst.msk [vmem:[#allocation5 + $0x10] sm:$0xf] %vm1123_vm5, %v1036_v45  ;;  %v9806_v44 = vpack.c.bf16 %v2457_v39, %v2457_v39 }
  0xec   : > { %794 = vrot.lane.b32.xlu0 %v9606_v49, %s11722_s22 }
  0xed   : > { %v785_v43 = vpop.permute.xlu1 %784 }
  0xee   : > { %874 = vst.msk [vmem:[#allocation5 + $0x1c] sm:$0xf] %vm11719_vm4, %v785_v43  ;;  %v1040_v52 = vpop.permute.xlu0 %1039 }
  0xef   : > { %2588 = vrot.lane.b32.xlu1 %v9629_v25, %s9123_s10  ;;  %1130 = vst.msk [vmem:[#allocation5 + $0x18] sm:$0xf] %vm1123_vm5, %v1040_v52 }
  0xf0   : > { %2590 = vrot.lane.b32.xlu0 %v9677_v46, %s9123_s10 }
  0xf1   : > { %v1038_v48 = vpop.permute.xlu1 %1037  ;;  %v8886_v51 = vld [vmem:[#allocation5 + $0x8] sm:$0xff]  }
  0xf2   : > { %1129 = vst.msk [vmem:[#allocation5 + $0x14] sm:$0xf] %vm1123_vm5, %v1038_v48  ;;  %8704 = vmatmul.mubr.msk.bf16.vlgmr.msra.gmra.mxu0 %vm11718_vm12, %v8886_v51  ;;  %v1293_v55 = vpop.permute.xlu0 %1292 }
  0xf3   : > { %796 = vrot.lane.b32.xlu1 %v9612_v15, %s11722_s22  ;;  %1385 = vst.msk [vmem:[#allocation5 + $0x10] sm:$0xf] %vm11716_vm6, %v1293_v55  ;;  %v1685_v15 = vld [vmem:[#allocation2 + $0xca] sm:$0xff] }
  0xf4   : > { %798 = vrot.lane.b32.xlu0 %v9654_v57, %s11722_s22 }
  0xf5   : > { %v1042_v54 = vpop.permute.xlu1 %1041 }
  0xf6   : > { %1131 = vst.msk [vmem:[#allocation5 + $0x1c] sm:$0xf] %vm1123_vm5, %v1042_v54  ;;  %v1297_v59 = vpop.permute.xlu0 %1296  ;;  %v1174_v54 = vld [vmem:[#allocation2 + $0xf0] sm:$0xff] }
  0xf7   : > { %2592 = vrot.lane.b32.xlu1 %v9684_v53, %s9123_s10  ;;  %1387 = vst.msk [vmem:[#allocation5 + $0x18] sm:$0xf] %vm11716_vm6, %v1297_v59  ;;  %v1175_v59 = vld [vmem:[#allocation2 + $0xf8] sm:$0xff] }
  0xf8   : > { %1051 = vrot.lane.b32.xlu0 %v9622_v19, %s11723_s23  ;;  %v9751_v19 = vpack.c.bf16 %v1685_v15, %v1685_v15  ;;  %v8292_v62 = vpack.c.bf16 %v1175_v59, %v1175_v59  ;;  %v1946_v15 = vld [vmem:[#allocation2 + $0x108] sm:$0xff] }
  0xf9   : > { %v1295_v56 = vpop.permute.xlu1 %1294 }
  0xfa   : > { %1386 = vst.msk [vmem:[#allocation5 + $0x14] sm:$0xf] %vm11716_vm6, %v1295_v56  ;;  %v1550_v61 = vpop.permute.xlu0 %1549  ;;  %v8291_v56 = vpack.c.bf16 %v1174_v54, %v1174_v54 }
  0xfb   : > { %800 = vrot.lane.b32.xlu1 %v9660_v38, %s11722_s22  ;;  %1642 = vst.msk [vmem:[#allocation5 + $0x10] sm:$0xf] %vm1637_vm7, %v1550_v61 }
  0xfc   : > { %1055 = vrot.lane.b32.xlu0 %v9677_v46, %s11723_s23 }
  0xfd   : > { %v1299_v60 = vpop.permute.xlu1 %1298 }
  0xfe   : > { %1388 = vst.msk [vmem:[#allocation5 + $0x1c] sm:$0xf] %vm11716_vm6, %v1299_v60  ;;  %v1554_v2 = vpop.permute.xlu0 %1553 }
  0xff   : > { %1053 = vrot.lane.b32.xlu1 %v9629_v25, %s11723_s23  ;;  %1644 = vst.msk [vmem:[#allocation5 + $0x18] sm:$0xf] %vm1637_vm7, %v1554_v2  ;;  %v354_v2 = vld [vmem:[%s9346_s21 + $0xd0] sm:$0xff] }
 0x100   : > { %1308 = vrot.lane.b32.xlu0 %v9446_v6, %s9118_s24  ;;  %v9728_v6 = vpack.c.bf16 %v1427_v7, %v1427_v7  ;;  %443 = vst.msk [vmem:[#allocation2 + $0x151] sm:$0xff] %vm360_vm0, %v354_v2  ;;  %v1179_v2 = vld [vmem:[#allocation2 + $0x128] sm:$0xff] }
 0x101   : > { %v1552_v1 = vpop.permute.xlu1 %1551 }
 0x102   : > { %1643 = vst.msk [vmem:[#allocation5 + $0x14] sm:$0xf] %vm1637_vm7, %v1552_v1  ;;  %v1807_v4 = vpop.permute.xlu0 %1806  ;;  %v1431_v1 = vld [vmem:[#allocation2 + $0xf1] sm:$0xff] }
 0x103   : > { %1057 = vrot.lane.b32.xlu1 %v9684_v53, %s11723_s23  ;;  %1899 = vst.msk [vmem:[#allocation5 + $0x10] sm:$0xf] %vm1894_vm8, %v1807_v4  ;;  %v1432_v4 = vld [vmem:[#allocation2 + $0xf9] sm:$0xff] }
 0x104   : > { %1312 = vrot.lane.b32.xlu0 %v9491_v23, %s9118_s24 }
 0x105   : > { %v1556_v3 = vpop.permute.xlu1 %1555 }
 0x106   : > { %1645 = vst.msk [vmem:[#allocation5 + $0x1c] sm:$0xf] %vm1637_vm7, %v1556_v3  ;;  %v1811_v9 = vpop.permute.xlu0 %1810  ;;  %v9845_v3 = vpack.c.bf16 %v1431_v1, %v1431_v1 }
 0x107   : > { %1310 = vrot.lane.b32.xlu1 %v9450_v8, %s9118_s24  ;;  %1901 = vst.msk [vmem:[#allocation5 + $0x18] sm:$0xf] %vm1894_vm8, %v1811_v9  ;;  %v9854_v9 = vpack.c.bf16 %v1432_v4, %v1432_v4 }
 0x108   : > { %1565 = vrot.lane.b32.xlu0 %v9654_v57, %s9119_s25 }
 0x109   : > { %v1809_v5 = vpop.permute.xlu1 %1808 }
 0x10a   : > { %1900 = vst.msk [vmem:[#allocation5 + $0x14] sm:$0xf] %vm1894_vm8, %v1809_v5  ;;  %v2065_v11 = vpop.permute.xlu0 %2064  ;;  %v355_v5 = vld [vmem:[%s9346_s21 + $0xd8] sm:$0xff] }
 0x10b   : > { %1314 = vrot.lane.b32.xlu1 %v9495_v26, %s9118_s24  ;;  %2157 = vst.msk [vmem:[#allocation5 + $0x10] sm:$0xf] %vm11721_vm9, %v2065_v11  ;;  %v9864_v11 = vpack.c.bf16 %v1688_v10, %v1688_v10 }
 0x10c   : > { %1569 = vrot.lane.b32.xlu0 %v9728_v6, %s9119_s25  ;;  %444 = vst.msk [vmem:[#allocation2 + $0x159] sm:$0xff] %vm360_vm0, %v355_v5 }
 0x10d   : > { %v1813_v8 = vpop.permute.xlu1 %1812 }
 0x10e   : > { %1902 = vst.msk [vmem:[#allocation5 + $0x1c] sm:$0xf] %vm1894_vm8, %v1813_v8  ;;  %v2069_v13 = vpop.permute.xlu0 %2068 }
 0x10f   : > { %1567 = vrot.lane.b32.xlu1 %v9660_v38, %s9119_s25  ;;  %2159 = vst.msk [vmem:[#allocation5 + $0x18] sm:$0xf] %vm11721_vm9, %v2069_v13  ;;  %v9799_v38 = vpack.c.bf16 %v2456_v58, %v2456_v58 }
 0x110   : > { %1822 = vrot.lane.b32.xlu0 %v9677_v46, %s9120_s26 }
 0x111   : > { %v2067_v49 = vpop.permute.xlu1 %2066 }
 0x112   : > { %2158 = vst.msk [vmem:[#allocation5 + $0x14] sm:$0xf] %vm11721_vm9, %v2067_v49  ;;  %v2322_v17 = vpop.permute.xlu0 %2321 }
 0x113   : > { %1571 = vrot.lane.b32.xlu1 %v9734_v12, %s9119_s25  ;;  %2414 = vst.msk [vmem:[#allocation5 + $0x10] sm:$0xf] %vm11720_vm10, %v2322_v17  ;;  %v9879_v17 = vpack.c.bf16 %v1946_v15, %v1946_v15 }
 0x114   : > { %1826 = vrot.lane.b32.xlu0 %v9744_v14, %s9120_s26 }
 0x115   : > { %v2071_v16 = vpop.permute.xlu1 %2070 }
 0x116   : > { %2160 = vst.msk [vmem:[#allocation5 + $0x1c] sm:$0xf] %vm11721_vm9, %v2071_v16  ;;  %v2326_v22 = vpop.permute.xlu0 %2325 }
 0x117   : > { %1824 = vrot.lane.b32.xlu1 %v9684_v53, %s9120_s26  ;;  %2416 = vst.msk [vmem:[#allocation5 + $0x18] sm:$0xf] %vm11720_vm10, %v2326_v22  ;;  %v356_v22 = vld [vmem:[%s9346_s21 + $0xe0] sm:$0xff] }
 0x118   : > { %2080 = vrot.lane.b32.xlu0 %v9491_v23, %s11730_s18  ;;  %v9776_v23 = vpack.c.bf16 %v2199_v28, %v2199_v28  ;;  %445 = vst.msk [vmem:[#allocation2 + $0x169] sm:$0xff] %vm360_vm0, %v356_v22  ;;  %v469_v28 = vld [vmem:[#allocation2 + $0xf0] sm:$0xff]  ;;  %v1950_v22 = vld [vmem:[#allocation2 + $0x138] sm:$0xff] }
 0x119   : > { %v2324_v21 = vpop.permute.xlu1 %2323 }
 0x11a   : > { %2415 = vst.msk [vmem:[#allocation5 + $0x14] sm:$0xf] %vm11720_vm10, %v2324_v21  ;;  %v2579_v25 = vpop.permute.xlu0 %2578  ;;  %v9884_v21 = vpack.c.bf16 %v1947_v18, %v1947_v18 }
 0x11b   : > { %1828 = vrot.lane.b32.xlu1 %v9751_v19, %s9120_s26  ;;  %2671 = vst.msk [vmem:[#allocation5 + $0x10] sm:$0xf] %vm2666_vm11, %v2579_v25  ;;  %v2203_v25 = vld [vmem:[#allocation2 + $0x109] sm:$0xff] }
 0x11c   : > { %2084 = vrot.lane.b32.xlu0 %v9525_v37, %s11730_s18  ;;  %v9897_v30 = vpack.c.bf16 %v2203_v25, %v2203_v25  ;;  %v10005_v25 = vpack.c.bf16 %v1950_v22, %v1950_v22 }
 0x11d   : > { %v2328_v24 = vpop.permute.xlu1 %2327 }
 0x11e   : > { %2417 = vst.msk [vmem:[#allocation5 + $0x1c] sm:$0xf] %vm11720_vm10, %v2328_v24  ;;  %v787_v29 = vpop.permute.xlu0 %786 }
 0x11f   : > { %2082 = vrot.lane.b32.xlu1 %v9495_v26, %s11730_s18  ;;  %875 = vst.msk [vmem:[#allocation5 + $0x20] sm:$0xf] %vm11719_vm4, %v787_v29  ;;  %v8197_v29 = vpack.c.bf16 %v469_v28, %v469_v28 }
 0x120   : > { %2337 = vrot.lane.b32.xlu0 %v9728_v6, %s9122_s12 }
 0x121   : > { %v2581_v27 = vpop.permute.xlu1 %2580  ;;  %630 = vst.msk [vmem:[#allocation5 + $0x50] sm:$0xf] %vm609_vm2, %v8197_v29 }
 0x122   : > { %2672 = vst.msk [vmem:[#allocation5 + $0x14] sm:$0xf] %vm2666_vm11, %v2581_v27  ;;  %v2583_v31 = vpop.permute.xlu0 %2582 }
 0x123   : > { %2086 = vrot.lane.b32.xlu1 %v9529_v40, %s11730_s18  ;;  %2673 = vst.msk [vmem:[#allocation5 + $0x18] sm:$0xf] %vm2666_vm11, %v2583_v31  ;;  %v470_v31 = vld [vmem:[#allocation2 + $0xf8] sm:$0xff] }
 0x124   : > { %2341 = vrot.lane.b32.xlu0 %v9776_v23, %s9122_s12 }
 0x125   : > { %v789_v26 = vpop.permute.xlu1 %788 }
 0x126   : > { %876 = vst.msk [vmem:[#allocation5 + $0x24] sm:$0xf] %vm11719_vm4, %v789_v26  ;;  %v791_v57 = vpop.permute.xlu0 %790  ;;  %v2204_v26 = vld [vmem:[#allocation2 + $0x111] sm:$0xff] }
 0x127   : > { %2339 = vrot.lane.b32.xlu1 %v9734_v12, %s9122_s12  ;;  %877 = vst.msk [vmem:[#allocation5 + $0x28] sm:$0xf] %vm11719_vm4, %v791_v57  ;;  %v9905_v57 = vpack.c.bf16 %v2204_v26, %v2204_v26  ;;  %v2207_v26 = vld [vmem:[#allocation2 + $0x139] sm:$0xff] }
 0x128   : > { %2594 = vrot.lane.b32.xlu0 %v9744_v14, %s9123_s10 }
 0x129   : > { %v2585_v33 = vpop.permute.xlu1 %2584  ;;  %v8887_v34 = vld [vmem:[#allocation5 + $0x10] sm:$0xff]  }
 0x12a   : > { %2674 = vst.msk [vmem:[#allocation5 + $0x1c] sm:$0xf] %vm2666_vm11, %v2585_v33  ;;  %8707 = vmatprep.mubr.msk.bf16.mxu0 %vm11718_vm12, %v8887_v34  ;;  %v1044_v36 = vpop.permute.xlu0 %1043  ;;  %v8198_v33 = vpack.c.bf16 %v470_v31, %v470_v31 }
 0x12b   : > { %2343 = vrot.lane.b32.xlu1 %v9782_v32, %s9122_s12  ;;  %1132 = vst.msk [vmem:[#allocation5 + $0x20] sm:$0xf] %vm1123_vm5, %v1044_v36 }
 0x12c   : > { %802 = vrot.lane.b32.xlu0 %v9728_v6, %s11722_s22  ;;  %631 = vst.msk [vmem:[#allocation5 + $0x54] sm:$0xf] %vm609_vm2, %v8198_v33 }
 0x12d   : > { %v793_v35 = vpop.permute.xlu1 %792 }
 0x12e   : > { %878 = vst.msk [vmem:[#allocation5 + $0x2c] sm:$0xf] %vm11719_vm4, %v793_v35  ;;  %v1048_v43 = vpop.permute.xlu0 %1047 }
 0x12f   : > { %2596 = vrot.lane.b32.xlu1 %v9751_v19, %s9123_s10  ;;  %1134 = vst.msk [vmem:[#allocation5 + $0x28] sm:$0xf] %vm1123_vm5, %v1048_v43  ;;  %v2460_v43 = vld [vmem:[#allocation2 + $0x10a] sm:$0xff] }
 0x130   : > { %2598 = vrot.lane.b32.xlu0 %v9799_v38, %s9123_s10 }
 0x131   : > { %v1046_v41 = vpop.permute.xlu1 %1045  ;;  %v8888_v42 = vld [vmem:[#allocation5 + $0x18] sm:$0xff]  }
 0x132   : > { %1133 = vst.msk [vmem:[#allocation5 + $0x24] sm:$0xf] %vm1123_vm5, %v1046_v41  ;;  %8708 = vmatmul.mubr.msk.bf16.gmra.mxu0 %vm11718_vm12, %v8888_v42  ;;  %v1301_v46 = vpop.permute.xlu0 %1300  ;;  %v472_v41 = vld [vmem:[#allocation2 + $0x110] sm:$0xff] }
 0x133   : > { %804 = vrot.lane.b32.xlu1 %v9734_v12, %s11722_s22  ;;  %1389 = vst.msk [vmem:[#allocation5 + $0x20] sm:$0xf] %vm11716_vm6, %v1301_v46  ;;  %v1689_v12 = vld [vmem:[#allocation2 + $0xfa] sm:$0xff]  ;;  %v9925_v46 = vpack.c.bf16 %v2460_v43, %v2460_v43  ;;  %v3098_v43 = vlaneseq }
 0x134   : > { %806 = vrot.lane.b32.xlu0 %v9776_v23, %s11722_s22  ;;  %v9870_v13 = vpack.c.bf16 %v1689_v12, %v1689_v12  ;;  %v359_v12 = vld [vmem:[%s9346_s21 + $0xf8] sm:$0xff] }
 0x135   : > { %v1050_v45 = vpop.permute.xlu1 %1049  ;;  %448 = vst.msk [vmem:[#allocation2 + $0x189] sm:$0xff] %vm360_vm0, %v359_v12 }
 0x136   : > { %1135 = vst.msk [vmem:[#allocation5 + $0x2c] sm:$0xf] %vm1123_vm5, %v1050_v45  ;;  %v1305_v48 = vpop.permute.xlu0 %1304 }
 0x137   : > { %2600 = vrot.lane.b32.xlu1 %v9806_v44, %s9123_s10  ;;  %1391 = vst.msk [vmem:[#allocation5 + $0x28] sm:$0xf] %vm11716_vm6, %v1305_v48 }
 0x138   : > { %1059 = vrot.lane.b32.xlu0 %v9744_v14, %s11723_s23 }
 0x139   : > { %v1303_v47 = vpop.permute.xlu1 %1302 }
 0x13a   : > { %1390 = vst.msk [vmem:[#allocation5 + $0x24] sm:$0xf] %vm11716_vm6, %v1303_v47  ;;  %v1558_v52 = vpop.permute.xlu0 %1557  ;;  %v2461_v47 = vld [vmem:[#allocation2 + $0x112] sm:$0xff] }
 0x13b   : > { %808 = vrot.lane.b32.xlu1 %v9782_v32, %s11722_s22  ;;  %1646 = vst.msk [vmem:[#allocation5 + $0x20] sm:$0xf] %vm1637_vm7, %v1558_v52 }
 0x13c   : > { %1063 = vrot.lane.b32.xlu0 %v9799_v38, %s11723_s23 }
 0x13d   : > { %v1307_v51 = vpop.permute.xlu1 %1306 }
 0x13e   : > { %1392 = vst.msk [vmem:[#allocation5 + $0x2c] sm:$0xf] %vm11716_vm6, %v1307_v51  ;;  %v1562_v55 = vpop.permute.xlu0 %1561 }
 0x13f   : > { %1061 = vrot.lane.b32.xlu1 %v9751_v19, %s11723_s23  ;;  %1648 = vst.msk [vmem:[#allocation5 + $0x28] sm:$0xf] %vm1637_vm7, %v1562_v55 }
 0x140   : > { %1316 = vrot.lane.b32.xlu0 %v9525_v37, %s9118_s24 }
 0x141   : > { %v1560_v53 = vpop.permute.xlu1 %1559 }
 0x142   : > { %1647 = vst.msk [vmem:[#allocation5 + $0x24] sm:$0xf] %vm1637_vm7, %v1560_v53  ;;  %v1815_v61 = vpop.permute.xlu0 %1814  ;;  %v9932_v53 = vpack.c.bf16 %v2461_v47, %v2461_v47  ;;  %v475_v47 = vld [vmem:[#allocation2 + $0x138] sm:$0xff] }
 0x143   : > { %1065 = vrot.lane.b32.xlu1 %v9806_v44, %s11723_s23  ;;  %1903 = vst.msk [vmem:[#allocation5 + $0x20] sm:$0xf] %vm1894_vm8, %v1815_v61 }
 0x144   : > { %1320 = vrot.lane.b32.xlu0 %v8291_v56, %s9118_s24 }
 0x145   : > { %v1564_v60 = vpop.permute.xlu1 %1563 }
 0x146   : > { %1649 = vst.msk [vmem:[#allocation5 + $0x2c] sm:$0xf] %vm1637_vm7, %v1564_v60  ;;  %v1819_v37 = vpop.permute.xlu0 %1818 }
 0x147   : > { %1318 = vrot.lane.b32.xlu1 %v9529_v40, %s9118_s24  ;;  %1905 = vst.msk [vmem:[#allocation5 + $0x28] sm:$0xf] %vm1894_vm8, %v1819_v37 }
 0x148   : > { %1573 = vrot.lane.b32.xlu0 %v9776_v23, %s9119_s25  ;;  %v357_v23 = vld [vmem:[%s9346_s21 + $0xe8] sm:$0xff] }
 0x149   : > { %v1817_v63 = vpop.permute.xlu1 %1816  ;;  %446 = vst.msk [vmem:[#allocation2 + $0x171] sm:$0xff] %vm360_vm0, %v357_v23 }
 0x14a   : > { %1904 = vst.msk [vmem:[#allocation5 + $0x24] sm:$0xf] %vm1894_vm8, %v1817_v63  ;;  %v2073_v7 = vpop.permute.xlu0 %2072  ;;  %v1178_v63 = vld [vmem:[#allocation2 + $0x120] sm:$0xff] }
 0x14b   : > { %1322 = vrot.lane.b32.xlu1 %v8292_v62, %s9118_s24  ;;  %2161 = vst.msk [vmem:[#allocation5 + $0x20] sm:$0xf] %vm11721_vm9, %v2073_v7  ;;  %v8295_v37 = vpack.c.bf16 %v1178_v63, %v1178_v63  ;;  %v1435_v7 = vld [vmem:[#allocation2 + $0x121] sm:$0xff] }
 0x14c   : > { %1577 = vrot.lane.b32.xlu0 %v9845_v3, %s9119_s25  ;;  %v9971_v10 = vpack.c.bf16 %v1435_v7, %v1435_v7  ;;  %v1183_v7 = vld [vmem:[#allocation2 + $0x158] sm:$0xff] }
 0x14d   : > { %v1821_v40 = vpop.permute.xlu1 %1820 }
 0x14e   : > { %1906 = vst.msk [vmem:[#allocation5 + $0x2c] sm:$0xf] %vm1894_vm8, %v1821_v40  ;;  %v2077_v8 = vpop.permute.xlu0 %2076  ;;  %v8296_v40 = vpack.c.bf16 %v1179_v2, %v1179_v2 }
 0x14f   : > { %1575 = vrot.lane.b32.xlu1 %v9782_v32, %s9119_s25  ;;  %2163 = vst.msk [vmem:[#allocation5 + $0x28] sm:$0xf] %vm11721_vm9, %v2077_v8  ;;  %v1436_v8 = vld [vmem:[#allocation2 + $0x129] sm:$0xff] }
 0x150   : > { %1830 = vrot.lane.b32.xlu0 %v9799_v38, %s9120_s26  ;;  %v471_v38 = vld [vmem:[#allocation2 + $0x108] sm:$0xff] }
 0x151   : > { %v2075_v6 = vpop.permute.xlu1 %2074  ;;  %v8199_v39 = vpack.c.bf16 %v471_v38, %v471_v38 }
 0x152   : > { %2162 = vst.msk [vmem:[#allocation5 + $0x24] sm:$0xf] %vm11721_vm9, %v2075_v6  ;;  %v2330_v50 = vpop.permute.xlu0 %2329  ;;  %v358_v6 = vld [vmem:[%s9346_s21 + $0xf0] sm:$0xff]  ;;  %s11731_s21 = sshll.u32 %s9338_s17, 8  ;;  %s9125_s17 = smov 112  }
 0x153   : > { %1579 = vrot.lane.b32.xlu1 %v9854_v9, %s9119_s25  ;;  %2418 = vst.msk [vmem:[#allocation5 + $0x20] sm:$0xf] %vm11720_vm10, %v2330_v50  ;;  %v9980_v50 = vpack.c.bf16 %v1436_v8, %v1436_v8  ;;  %s10056_s19 = scalar_lea.vmem %s11710_s6, %s11731_s21  ;;  %s11727_s21 = smov 64  }
 0x154   : > { %1834 = vrot.lane.b32.xlu0 %v9864_v11, %s9120_s26  ;;  %632 = vst.msk [vmem:[#allocation5 + $0x58] sm:$0xf] %vm609_vm2, %v8199_v39 }
 0x155   : > { %v2079_v49 = vpop.permute.xlu1 %2078  ;;  %447 = vst.msk [vmem:[#allocation2 + $0x181] sm:$0xff] %vm360_vm0, %v358_v6  ;;  %vm3634_vm0 = vcmask 1043459  }
 0x156   : > { %2164 = vst.msk [vmem:[#allocation5 + $0x2c] sm:$0xf] %vm11721_vm9, %v2079_v49  ;;  %v2334_v16 = vpop.permute.xlu0 %2333 }
 0x157   : > { %1832 = vrot.lane.b32.xlu1 %v9806_v44, %s9120_s26  ;;  %2420 = vst.msk [vmem:[#allocation5 + $0x28] sm:$0xf] %vm11720_vm10, %v2334_v16  ;;  %v8200_v44 = vpack.c.bf16 %v472_v41, %v472_v41  ;;  %v9124_v41 = vmov 1983009808  }
 0x158   : > { %2088 = vrot.lane.b32.xlu0 %v8291_v56, %s11730_s18 }
 0x159   : > { %v2332_v14 = vpop.permute.xlu1 %2331  ;;  %633 = vst.msk [vmem:[#allocation5 + $0x5c] sm:$0xf] %vm609_vm2, %v8200_v44 }
 0x15a   : > { %2419 = vst.msk [vmem:[#allocation5 + $0x24] sm:$0xf] %vm11720_vm10, %v2332_v14  ;;  %v2587_v20 = vpop.permute.xlu0 %2586  ;;  %v1692_v14 = vld [vmem:[#allocation2 + $0x122] sm:$0xff] }
 0x15b   : > { %1836 = vrot.lane.b32.xlu1 %v9870_v13, %s9120_s26  ;;  %2675 = vst.msk [vmem:[#allocation5 + $0x20] sm:$0xf] %vm2666_vm11, %v2587_v20  ;;  %v9990_v16 = vpack.c.bf16 %v1692_v14, %v1692_v14 }
 0x15c   : > { %2092 = vrot.lane.b32.xlu0 %v9879_v17, %s11730_s18 }
 0x15d   : > { %v2336_v19 = vpop.permute.xlu1 %2335 }
 0x15e   : > { %2421 = vst.msk [vmem:[#allocation5 + $0x2c] sm:$0xf] %vm11720_vm10, %v2336_v19  ;;  %v795_v27 = vpop.permute.xlu0 %794 }
 0x15f   : > { %2090 = vrot.lane.b32.xlu1 %v8292_v62, %s11730_s18  ;;  %879 = vst.msk [vmem:[#allocation5 + $0x30] sm:$0xf] %vm11719_vm4, %v795_v27  ;;  %v1951_v27 = vld [vmem:[#allocation2 + $0x140] sm:$0xff] }
 0x160   : > { %2345 = vrot.lane.b32.xlu0 %v9845_v3, %s9122_s12  ;;  %v10010_v23 = vpack.c.bf16 %v1951_v27, %v1951_v27 }
 0x161   : > { %v2589_v24 = vpop.permute.xlu1 %2588 }
 0x162   : > { %2676 = vst.msk [vmem:[#allocation5 + $0x24] sm:$0xf] %vm2666_vm11, %v2589_v24  ;;  %v2591_v34 = vpop.permute.xlu0 %2590 }
 0x163   : > { %2094 = vrot.lane.b32.xlu1 %v9884_v21, %s11730_s18  ;;  %2677 = vst.msk [vmem:[#allocation5 + $0x28] sm:$0xf] %vm2666_vm11, %v2591_v34  ;;  %v10020_v34 = vpack.c.bf16 %v2207_v26, %v2207_v26 }
 0x164   : > { %2349 = vrot.lane.b32.xlu0 %v9897_v30, %s9122_s12 }
 0x165   : > { %v797_v32 = vpop.permute.xlu1 %796 }
 0x166   : > { %880 = vst.msk [vmem:[#allocation5 + $0x34] sm:$0xf] %vm11719_vm4, %v797_v32  ;;  %v799_v36 = vpop.permute.xlu0 %798  ;;  %v473_v32 = vld [vmem:[#allocation2 + $0x120] sm:$0xff] }
 0x167   : > { %2347 = vrot.lane.b32.xlu1 %v9854_v9, %s9122_s12  ;;  %881 = vst.msk [vmem:[#allocation5 + $0x38] sm:$0xf] %vm11719_vm4, %v799_v36  ;;  %v8201_v33 = vpack.c.bf16 %v473_v32, %v473_v32 }
 0x168   : > { %2602 = vrot.lane.b32.xlu0 %v9864_v11, %s9123_s10 }
 0x169   : > { %v2593_v35 = vpop.permute.xlu1 %2592  ;;  %v8889_v58 = vld [vmem:[#allocation5 + $0x20] sm:$0xff]   ;;  %634 = vst.msk [vmem:[#allocation5 + $0x60] sm:$0xf] %vm609_vm2, %v8201_v33 }
 0x16a   : > { %2678 = vst.msk [vmem:[#allocation5 + $0x2c] sm:$0xf] %vm2666_vm11, %v2593_v35  ;;  %8711 = vmatprep.mubr.msk.bf16.mxu0 %vm11718_vm12, %v8889_v58  ;;  %v1052_v45 = vpop.permute.xlu0 %1051  ;;  %v474_v35 = vld [vmem:[#allocation2 + $0x128] sm:$0xff] }
 0x16b   : > { %2351 = vrot.lane.b32.xlu1 %v9905_v57, %s9122_s12  ;;  %1136 = vst.msk [vmem:[#allocation5 + $0x30] sm:$0xf] %vm1123_vm5, %v1052_v45  ;;  %v8202_v36 = vpack.c.bf16 %v474_v35, %v474_v35 }
 0x16c   : > { %810 = vrot.lane.b32.xlu0 %v9845_v3, %s11722_s22 }
 0x16d   : > { %v801_v42 = vpop.permute.xlu1 %800  ;;  %635 = vst.msk [vmem:[#allocation5 + $0x64] sm:$0xf] %vm609_vm2, %v8202_v36 }
 0x16e   : > { %882 = vst.msk [vmem:[#allocation5 + $0x3c] sm:$0xf] %vm11719_vm4, %v801_v42  ;;  %v1056_v52 = vpop.permute.xlu0 %1055  ;;  %v3096_v42 = vunpack.c.l.s4 %v9124_v41 }
 0x16f   : > { %2604 = vrot.lane.b32.xlu1 %v9870_v13, %s9123_s10  ;;  %1138 = vst.msk [vmem:[#allocation5 + $0x38] sm:$0xf] %vm1123_vm5, %v1056_v52  ;;  %v3099_v52 = vshrl.u32 %v3098_v43, 7 }
 0x170   : > { %2606 = vrot.lane.b32.xlu0 %v9925_v46, %s9123_s10 }
 0x171   : > { %v1054_v48 = vpop.permute.xlu1 %1053  ;;  %v8890_v51 = vld [vmem:[#allocation5 + $0x28] sm:$0xff]  }
 0x172   : > { %1137 = vst.msk [vmem:[#allocation5 + $0x34] sm:$0xf] %vm1123_vm5, %v1054_v48  ;;  %8712 = vmatmul.mubr.msk.bf16.gmra.mxu0 %vm11718_vm12, %v8890_v51  ;;  %v1309_v55 = vpop.permute.xlu0 %1308  ;;  %v8203_v48 = vpack.c.bf16 %v475_v47, %v475_v47  ;;  %v3097_v51 = vunpack.c.0.s8 %v3096_v42 }
 0x173   : > { %812 = vrot.lane.b32.xlu1 %v9854_v9, %s11722_s22  ;;  %1393 = vst.msk [vmem:[#allocation5 + $0x30] sm:$0xf] %vm11716_vm6, %v1309_v55  ;;  %v2464_v55 = vld [vmem:[#allocation2 + $0x13a] sm:$0xff] }
 0x174   : > { %814 = vrot.lane.b32.xlu0 %v9897_v30, %s11722_s22  ;;  %636 = vst.msk [vmem:[#allocation5 + $0x68] sm:$0xf] %vm609_vm2, %v8203_v48 }
 0x175   : > { %v1058_v54 = vpop.permute.xlu1 %1057 }
 0x176   : > { %1139 = vst.msk [vmem:[#allocation5 + $0x3c] sm:$0xf] %vm1123_vm5, %v1058_v54  ;;  %v1313_v59 = vpop.permute.xlu0 %1312 }
 0x177   : > { %2608 = vrot.lane.b32.xlu1 %v9932_v53, %s9123_s10  ;;  %1395 = vst.msk [vmem:[#allocation5 + $0x38] sm:$0xf] %vm11716_vm6, %v1313_v59 }
 0x178   : > { %1067 = vrot.lane.b32.xlu0 %v9864_v11, %s11723_s23 }
 0x179   : > { %v1311_v56 = vpop.permute.xlu1 %1310 }
 0x17a   : > { %1394 = vst.msk [vmem:[#allocation5 + $0x34] sm:$0xf] %vm11716_vm6, %v1311_v56  ;;  %v1566_v61 = vpop.permute.xlu0 %1565 }
 0x17b   : > { %816 = vrot.lane.b32.xlu1 %v9905_v57, %s11722_s22  ;;  %1650 = vst.msk [vmem:[#allocation5 + $0x30] sm:$0xf] %vm1637_vm7, %v1566_v61  ;;  %v10049_v61 = vpack.c.bf16 %v2464_v55, %v2464_v55 }
 0x17c   : > { %1071 = vrot.lane.b32.xlu0 %v9925_v46, %s11723_s23 }
 0x17d   : > { %v1315_v60 = vpop.permute.xlu1 %1314 }
 0x17e   : > { %1396 = vst.msk [vmem:[#allocation5 + $0x3c] sm:$0xf] %vm11716_vm6, %v1315_v60  ;;  %v1570_v1 = vpop.permute.xlu0 %1569  ;;  %v10047_v60 = vsub.s32 %v3097_v51, %v3099_v52 }
 0x17f   : > { %1069 = vrot.lane.b32.xlu1 %v9870_v13, %s11723_s23  ;;  %1652 = vst.msk [vmem:[#allocation5 + $0x38] sm:$0xf] %vm1637_vm7, %v1570_v1 }
 0x180   : > { %1324 = vrot.lane.b32.xlu0 %v9879_v17, %s9118_s24  ;;  %v1693_v17 = vld [vmem:[#allocation2 + $0x12a] sm:$0xff] }
 0x181   : > { %v1568_v62 = vpop.permute.xlu1 %1567  ;;  %v9996_v20 = vpack.c.bf16 %v1693_v17, %v1693_v17  ;;  %v10082_v17 = vpack.c.bf16 %v1183_v7, %v1183_v7 }
 0x182   : > { %1651 = vst.msk [vmem:[#allocation5 + $0x34] sm:$0xf] %vm1637_vm7, %v1568_v62  ;;  %v1823_v4 = vpop.permute.xlu0 %1822  ;;  %v2465_v62 = vld [vmem:[#allocation2 + $0x142] sm:$0xff] }
 0x183   : > { %1073 = vrot.lane.b32.xlu1 %v9932_v53, %s11723_s23  ;;  %1907 = vst.msk [vmem:[#allocation5 + $0x30] sm:$0xf] %vm1894_vm8, %v1823_v4 }
 0x184   : > { %1328 = vrot.lane.b32.xlu0 %v8295_v37, %s9118_s24 }
 0x185   : > { %v1572_v3 = vpop.permute.xlu1 %1571 }
 0x186   : > { %1653 = vst.msk [vmem:[#allocation5 + $0x3c] sm:$0xf] %vm1637_vm7, %v1572_v3  ;;  %v1827_v9 = vpop.permute.xlu0 %1826  ;;  %v10063_v3 = vpack.c.bf16 %v2465_v62, %v2465_v62 }
 0x187   : > { %1326 = vrot.lane.b32.xlu1 %v9884_v21, %s9118_s24  ;;  %1909 = vst.msk [vmem:[#allocation5 + $0x38] sm:$0xf] %vm1894_vm8, %v1827_v9  ;;  %v1439_v9 = vld [vmem:[#allocation2 + $0x151] sm:$0xff] }
 0x188   : > { %1581 = vrot.lane.b32.xlu0 %v9897_v30, %s9119_s25 }
 0x189   : > { %v1825_v5 = vpop.permute.xlu1 %1824 }
 0x18a   : > { %1908 = vst.msk [vmem:[#allocation5 + $0x34] sm:$0xf] %vm1894_vm8, %v1825_v5  ;;  %v2081_v49 = vpop.permute.xlu0 %2080  ;;  %v1182_v5 = vld [vmem:[#allocation2 + $0x150] sm:$0xff] }
 0x18b   : > { %1330 = vrot.lane.b32.xlu1 %v8296_v40, %s9118_s24  ;;  %2165 = vst.msk [vmem:[#allocation5 + $0x30] sm:$0xf] %vm11721_vm9, %v2081_v49 }
 0x18c   : > { %1585 = vrot.lane.b32.xlu0 %v9971_v10, %s9119_s25 }
 0x18d   : > { %v1829_v11 = vpop.permute.xlu1 %1828 }
 0x18e   : > { %1910 = vst.msk [vmem:[#allocation5 + $0x3c] sm:$0xf] %vm1894_vm8, %v1829_v11  ;;  %v2085_v15 = vpop.permute.xlu0 %2084 }
 0x18f   : > { %1583 = vrot.lane.b32.xlu1 %v9905_v57, %s9119_s25  ;;  %2167 = vst.msk [vmem:[#allocation5 + $0x38] sm:$0xf] %vm11721_vm9, %v2085_v15  ;;  %v2208_v57 = vld [vmem:[#allocation2 + $0x141] sm:$0xff]  ;;  %v10080_v15 = vpack.c.bf16 %v1182_v5, %v1182_v5 }
 0x190   : > { %1838 = vrot.lane.b32.xlu0 %v9925_v46, %s9120_s26  ;;  %v10027_v39 = vpack.c.bf16 %v2208_v57, %v2208_v57 }
 0x191   : > { %v2083_v13 = vpop.permute.xlu1 %2082 }
 0x192   : > { %2166 = vst.msk [vmem:[#allocation5 + $0x34] sm:$0xf] %vm11721_vm9, %v2083_v13  ;;  %v2338_v19 = vpop.permute.xlu0 %2337 }
 0x193   : > { %1587 = vrot.lane.b32.xlu1 %v9980_v50, %s9119_s25  ;;  %2422 = vst.msk [vmem:[#allocation5 + $0x30] sm:$0xf] %vm11720_vm10, %v2338_v19 }
 0x194   : > { %1842 = vrot.lane.b32.xlu0 %v9990_v16, %s9120_s26 }
 0x195   : > { %v2087_v18 = vpop.permute.xlu1 %2086 }
 0x196   : > { %2168 = vst.msk [vmem:[#allocation5 + $0x3c] sm:$0xf] %vm11721_vm9, %v2087_v18  ;;  %v2342_v24 = vpop.permute.xlu0 %2341  ;;  %v10084_v18 = vpack.c.bf16 %v1439_v9, %v1439_v9 }
 0x197   : > { %1840 = vrot.lane.b32.xlu1 %v9932_v53, %s9120_s26  ;;  %2424 = vst.msk [vmem:[#allocation5 + $0x38] sm:$0xf] %vm11720_vm10, %v2342_v24  ;;  %v476_v53 = vld [vmem:[#allocation2 + $0x140] sm:$0xff] }
 0x198   : > { %2096 = vrot.lane.b32.xlu0 %v8295_v37, %s11730_s18  ;;  %v8204_v56 = vpack.c.bf16 %v476_v53, %v476_v53 }
 0x199   : > { %v2340_v21 = vpop.permute.xlu1 %2339 }
 0x19a   : > { %2423 = vst.msk [vmem:[#allocation5 + $0x34] sm:$0xf] %vm11720_vm10, %v2340_v21  ;;  %v2595_v29 = vpop.permute.xlu0 %2594 }
 0x19b   : > { %1844 = vrot.lane.b32.xlu1 %v9996_v20, %s9120_s26  ;;  %2679 = vst.msk [vmem:[#allocation5 + $0x30] sm:$0xf] %vm2666_vm11, %v2595_v29 }
 0x19c   : > { %2100 = vrot.lane.b32.xlu0 %v10005_v25, %s11730_s18  ;;  %637 = vst.msk [vmem:[#allocation5 + $0x6c] sm:$0xf] %vm609_vm2, %v8204_v56 }
 0x19d   : > { %v2344_v28 = vpop.permute.xlu1 %2343 }
 0x19e   : > { %2425 = vst.msk [vmem:[#allocation5 + $0x3c] sm:$0xf] %vm11720_vm10, %v2344_v28  ;;  %v803_v31 = vpop.permute.xlu0 %802 }
 0x19f   : > { %2098 = vrot.lane.b32.xlu1 %v8296_v40, %s11730_s18  ;;  %883 = vst.msk [vmem:[#allocation5 + $0x40] sm:$0xf] %vm11719_vm4, %v803_v31 }
 0x1a0   : > { %2353 = vrot.lane.b32.xlu0 %v9971_v10, %s9122_s12 }
 0x1a1   : > { %v2597_v30 = vpop.permute.xlu1 %2596 }
 0x1a2   : > { %2680 = vst.msk [vmem:[#allocation5 + $0x34] sm:$0xf] %vm2666_vm11, %v2597_v30  ;;  %v2599_v38 = vpop.permute.xlu0 %2598 }
 0x1a3   : > { %2102 = vrot.lane.b32.xlu1 %v10010_v23, %s11730_s18  ;;  %2681 = vst.msk [vmem:[#allocation5 + $0x38] sm:$0xf] %vm2666_vm11, %v2599_v38 }
 0x1a4   : > { %2357 = vrot.lane.b32.xlu0 %v10020_v34, %s9122_s12 }
 0x1a5   : > { %v805_v58 = vpop.permute.xlu1 %804 }
 0x1a6   : > { %884 = vst.msk [vmem:[#allocation5 + $0x44] sm:$0xf] %vm11719_vm4, %v805_v58  ;;  %v807_v46 = vpop.permute.xlu0 %806 }
 0x1a7   : > { %2355 = vrot.lane.b32.xlu1 %v9980_v50, %s9122_s12  ;;  %885 = vst.msk [vmem:[#allocation5 + $0x48] sm:$0xf] %vm11719_vm4, %v807_v46 }
 0x1a8   : > { %2610 = vrot.lane.b32.xlu0 %v9990_v16, %s9123_s10 }
 0x1a9   : > { %v2601_v44 = vpop.permute.xlu1 %2600  ;;  %v8891_v45 = vld [vmem:[#allocation5 + $0x30] sm:$0xff]  }
 0x1aa   : > { %2682 = vst.msk [vmem:[#allocation5 + $0x3c] sm:$0xf] %vm2666_vm11, %v2601_v44  ;;  %8715 = vmatprep.mubr.msk.bf16.mxu0 %vm11718_vm12, %v8891_v45  ;;  %v1060_v59 = vpop.permute.xlu0 %1059 }
 0x1ab   : > { %2359 = vrot.lane.b32.xlu1 %v10027_v39, %s9122_s12  ;;  %1140 = vst.msk [vmem:[#allocation5 + $0x40] sm:$0xf] %vm1123_vm5, %v1060_v59 }
 0x1ac   : > { %818 = vrot.lane.b32.xlu0 %v9971_v10, %s11722_s22 }
 0x1ad   : > { %v809_v54 = vpop.permute.xlu1 %808 }
 0x1ae   : > { %886 = vst.msk [vmem:[#allocation5 + $0x4c] sm:$0xf] %vm11719_vm4, %v809_v54  ;;  %v1064_v37 = vpop.permute.xlu0 %1063 }
 0x1af   : > { %2612 = vrot.lane.b32.xlu1 %v9996_v20, %s9123_s10  ;;  %1142 = vst.msk [vmem:[#allocation5 + $0x48] sm:$0xf] %vm1123_vm5, %v1064_v37 }
 0x1b0   : > { %2614 = vrot.lane.b32.xlu0 %v10049_v61, %s9123_s10 }
 0x1b1   : > { %v1062_v63 = vpop.permute.xlu1 %1061  ;;  %v8892_v1 = vld [vmem:[#allocation5 + $0x38] sm:$0xff]  }
 0x1b2   : > { %1141 = vst.msk [vmem:[#allocation5 + $0x44] sm:$0xf] %vm1123_vm5, %v1062_v63  ;;  %v8705_v2 = vpop.f32.mrf.mxu0  ;;  %8716 = vmatmul.mubr.msk.bf16.gmra.mxu0 %vm11718_vm12, %v8892_v1 }
 0x1b3   : > { %820 = vrot.lane.b32.xlu1 %v9980_v50, %s11722_s22  ;;  %3048 = vst.msk [vmem:[%s10056_s19 + $0x10] sm:$0xff] %vm11717_vm13, %v8705_v2  ;;  %v4064_v4 = vcombine.high %v8705_v2, %v8705_v2  ;;  %v4071_v40 = vrot.slane %v8705_v2, %v10047_v60  ;;  %v1317_v50 = vpop.permute.xlu0 %1316 }
 0x1b4   : > { %v2918_v10 = vpop.f32.mrf.mxu0  ;;  %1397 = vst.msk [vmem:[#allocation5 + $0x40] sm:$0xf] %vm11716_vm6, %v1317_v50  ;;  %822 = vrot.lane.b32.xlu0 %v10020_v34, %s11722_s22 }
 0x1b5   : > { %v1066_v6 = vpop.permute.xlu1 %1065  ;;  %v4078_v8 = vrot.slane %v4064_v4, %v10047_v60  ;;  %v4079_v11 = vcombine.high %v4071_v40, %v4071_v40  ;;  %v4400_v12 = vpack.c.bf16 %v4071_v40, %v4071_v40  ;;  %3046 = vst.msk [vmem:[%s10056_s19] sm:$0xff] %vm11717_vm13, %v2918_v10  ;;  %v3094_v49 = vcombine.high %v2918_v10, %v2918_v10 }
 0x1b6   : > { %1143 = vst.msk [vmem:[#allocation5 + $0x4c] sm:$0xf] %vm1123_vm5, %v1066_v6  ;;  %v3101_v13 = vrot.slane %v2918_v10, %v10047_v60  ;;  %v10078_v14 = vpop.f32.mrf.mxu0 }
 0x1b7   : > { %2616 = vrot.lane.b32.xlu1 %v10063_v3, %s9123_s10  ;;  %v4080_v19 = vcombine.high %v4078_v8, %v4078_v8  ;;  %v4401_v21 = vpack.c.bf16 %v4079_v11, %v4079_v11  ;;  %v4402_v22 = vpack.c.bf16 %v4078_v8, %v4078_v8  ;;  %v4531_v24 = vunpack.c.l.b16 %v4400_v12  ;;  %3049 = vst.msk [vmem:[%s10056_s19 + $0x18] sm:$0xff] %vm11717_vm13, %v10078_v14  ;;  %v1321_v58 = vpop.permute.xlu0 %1320 }
 0x1b8   : > { %v3108_v27 = vrot.slane %v3094_v49, %v10047_v60  ;;  %v3109_v28 = vcombine.high %v3101_v13, %v3101_v13  ;;  %v3430_v29 = vpack.c.bf16 %v3101_v13, %v3101_v13  ;;  %v4081_v30 = vcombine.high %v10078_v14, %v10078_v14  ;;  %v10094_v31 = vpop.f32.mrf.mxu0  ;;  %1399 = vst.msk [vmem:[#allocation5 + $0x48] sm:$0xf] %vm11716_vm6, %v1321_v58 }
 0x1b9   : > { %v1319_v26 = vpop.permute.xlu1 %1318  ;;  %v4403_v32 = vpack.c.bf16 %v4080_v19, %v4080_v19  ;;  %v4532_v33 = vunpack.c.l.b16 %v4401_v21  ;;  %v4533_v57 = vunpack.c.l.b16 %v4402_v22  ;;  %v4813_v35 = vrot.slane %v4531_v24, 1  ;;  %3047 = vst.msk [vmem:[%s10056_s19 + $0x8] sm:$0xff] %vm11717_vm13, %v10094_v31  ;;  %1075 = vrot.lane.b32.xlu0 %v9990_v16, %s11723_s23 }
 0x1ba   : > { %1398 = vst.msk [vmem:[#allocation5 + $0x44] sm:$0xf] %vm11716_vm6, %v1319_v26  ;;  %v3110_v36 = vcombine.high %v3108_v27, %v3108_v27  ;;  %v3431_v38 = vpack.c.bf16 %v3109_v28, %v3109_v28  ;;  %v3432_v41 = vpack.c.bf16 %v3108_v27, %v3108_v27  ;;  %v3563_v42 = vunpack.c.l.b16 %v3430_v29 }
 0x1bb   : > { %824 = vrot.lane.b32.xlu1 %v10027_v39, %s11722_s22  ;;  %v4534_v43 = vunpack.c.l.b16 %v4403_v32  ;;  %v4595_v44 = vrot.slane %v4532_v33, 7  ;;  %v4597_v45 = vrot.slane %v4533_v57, 6  ;;  %v4814_v46 = vsel %vm3628_vm14, %v4532_v33, %v4813_v35  ;;  %v1574_v62 = vpop.permute.xlu0 %1573 }
 0x1bc   : > { %v4815_v47 = vrot.slane %v4533_v57, 7  ;;  %v3433_v48 = vpack.c.bf16 %v3110_v36, %v3110_v36  ;;  %v3564_v51 = vunpack.c.l.b16 %v3431_v38  ;;  %v3565_v52 = vunpack.c.l.b16 %v3432_v41  ;;  %1654 = vst.msk [vmem:[#allocation5 + $0x40] sm:$0xf] %vm1637_vm7, %v1574_v62 }
 0x1bd   : > { %v1323_v53 = vpop.permute.xlu1 %1322  ;;  %v4596_v54 = vsel %vm3628_vm14, %v4595_v44, %v4531_v24  ;;  %v4599_v55 = vrot.slane %v4534_v43, 5  ;;  %v4817_v56 = vrot.slane %v4534_v43, 6  ;;  %v3627_v59 = vrot.slane %v3563_v42, 1  ;;  %1079 = vrot.lane.b32.xlu0 %v10049_v61, %s11723_s23 }
 0x1be   : > { %1400 = vst.msk [vmem:[#allocation5 + $0x4c] sm:$0xf] %vm11716_vm6, %v1323_v53  ;;  %v4598_v63 = vsel %vm3631_vm15, %v4597_v45, %v4596_v54  ;;  %v4816_v1 = vsel %vm3631_vm15, %v4815_v47, %v4814_v46  ;;  %v3566_v37 = vunpack.c.l.b16 %v3433_v48  ;;  %v3630_v16 = vrot.slane %v3565_v52, 7 }
 0x1bf   : > { %1077 = vrot.lane.b32.xlu1 %v9996_v20, %s11723_s23  ;;  %v3629_v2 = vsel %vm3628_vm14, %v3564_v51, %v3627_v59  ;;  %v3841_v4 = vrot.slane %v3564_v51, 7  ;;  %v3843_v40 = vrot.slane %v3565_v52, 6  ;;  %v4088_v5 = vrot.slane %v10078_v14, %v10047_v60  ;;  %v1578_v50 = vpop.permute.xlu0 %1577 }
 0x1c0   : > { %vm3643_vm6 = vcmask 1046534   ;;  %v3632_v7 = vsel %vm3631_vm15, %v3630_v16, %v3629_v2  ;;  %v3633_v9 = vrot.slane %v3566_v37, 6  ;;  %v3845_v6 = vrot.slane %v3566_v37, 5  ;;  %1656 = vst.msk [vmem:[#allocation5 + $0x48] sm:$0xf] %vm1637_vm7, %v1578_v50 }
 0x1c1   : > { %v4095_v10 = vrot.slane %v4081_v30, %v10047_v60  ;;  %v1576_v8 = vpop.permute.xlu1 %1575  ;;  %vm11726_vm13 = vcmask 1047559   ;;  %v3842_v20 = vsel %vm3628_vm14, %v3841_v4, %v3563_v42  ;;  %v4096_v11 = vcombine.high %v4088_v5, %v4088_v5  ;;  %1332 = vrot.lane.b32.xlu0 %v10005_v25, %s9118_s24 }
 0x1c2   : > { %v4404_v12 = vpack.c.bf16 %v4088_v5, %v4088_v5  ;;  %v4600_v49 = vsel %vm3634_vm0, %v4599_v55, %v4598_v63  ;;  %1655 = vst.msk [vmem:[#allocation5 + $0x44] sm:$0xf] %vm1637_vm7, %v1576_v8  ;;  %v3844_v13 = vsel %vm3631_vm15, %v3843_v40, %v3842_v20  ;;  %v4818_v21 = vsel %vm3634_vm0, %v4817_v56, %v4816_v1 }
 0x1c3   : > { %v4097_v14 = vcombine.high %v4095_v10, %v4095_v10  ;;  %v4406_v19 = vpack.c.bf16 %v4095_v10, %v4095_v10  ;;  %1081 = vrot.lane.b32.xlu1 %v10063_v3, %s11723_s23  ;;  %v4405_v22 = vpack.c.bf16 %v4096_v11, %v4096_v11  ;;  %v3111_v27 = vcombine.high %v10094_v31, %v10094_v31  ;;  %v1831_v38 = vpop.permute.xlu0 %1830 }
 0x1c4   : > { %v4535_v24 = vunpack.c.l.b16 %v4404_v12  ;;  %v3118_v28 = vrot.slane %v10094_v31, %v10047_v60  ;;  %v3635_v26 = vsel %vm3634_vm0, %v3633_v9, %v3632_v7  ;;  %v3846_v32 = vsel %vm3634_vm0, %v3845_v6, %v3844_v13  ;;  %1911 = vst.msk [vmem:[#allocation5 + $0x40] sm:$0xf] %vm1894_vm8, %v1831_v38  ;;  %v1954_v38 = vld [vmem:[#allocation2 + $0x168] sm:$0xff] }
 0x1c5   : > { %v4407_v29 = vpack.c.bf16 %v4097_v14, %v4097_v14  ;;  %v4537_v30 = vunpack.c.l.b16 %v4406_v19  ;;  %v1580_v33 = vpop.permute.xlu1 %1579  ;;  %v4536_v57 = vunpack.c.l.b16 %v4405_v22  ;;  %v3125_v36 = vrot.slane %v3111_v27, %v10047_v60  ;;  %1336 = vrot.lane.b32.xlu0 %v10080_v15, %s9118_s24  ;;  %v1696_v27 = vld [vmem:[#allocation2 + $0x152] sm:$0xff] }
 0x1c6   : > { %v4601_v35 = vrot.slane %v4535_v24, 4  ;;  %v4819_v58 = vrot.slane %v4535_v24, 5  ;;  %1657 = vst.msk [vmem:[#allocation5 + $0x4c] sm:$0xf] %vm1637_vm7, %v1580_v33  ;;  %v3126_v43 = vcombine.high %v3118_v28, %v3118_v28  ;;  %v3434_v52 = vpack.c.bf16 %v3118_v28, %v3118_v28  ;;  %v1697_v33 = vld [vmem:[#allocation2 + $0x15a] sm:$0xff] }
 0x1c7   : > { %v4538_v41 = vunpack.c.l.b16 %v4407_v29  ;;  %v4605_v31 = vrot.slane %v4537_v30, 2  ;;  %v4823_v42 = vrot.slane %v4537_v30, 3  ;;  %1334 = vrot.lane.b32.xlu1 %v10010_v23, %s9118_s24  ;;  %v4603_v44 = vrot.slane %v4536_v57, 3  ;;  %v1835_v56 = vpop.permute.xlu0 %1834  ;;  %v1440_v23 = vld [vmem:[#allocation2 + $0x159] sm:$0xff] }
 0x1c8   : > { %v4602_v25 = vsel %vm3637_vm1, %v4601_v35, %v4600_v49  ;;  %v4820_v45 = vsel %vm3637_vm1, %v4819_v58, %v4818_v21  ;;  %v4821_v46 = vrot.slane %v4536_v57, 4  ;;  %v3127_v51 = vcombine.high %v3125_v36, %v3125_v36  ;;  %1913 = vst.msk [vmem:[#allocation5 + $0x48] sm:$0xf] %vm1894_vm8, %v1835_v56 }
 0x1c9   : > { %v4607_v47 = vrot.slane %v4538_v41, 1  ;;  %v4825_v48 = vrot.slane %v4538_v41, 2  ;;  %v1833_v53 = vpop.permute.xlu1 %1832  ;;  %v3435_v54 = vpack.c.bf16 %v3126_v43, %v3126_v43  ;;  %v3436_v55 = vpack.c.bf16 %v3125_v36, %v3125_v36  ;;  %1589 = vrot.lane.b32.xlu0 %v10020_v34, %s9119_s25 }
 0x1ca   : > { %1912 = vst.msk [vmem:[#allocation5 + $0x44] sm:$0xf] %vm1894_vm8, %v1833_v53  ;;  %v4604_v59 = vsel %vm3640_vm3, %v4603_v44, %v4602_v25  ;;  %v4822_v62 = vsel %vm3640_vm3, %v4821_v46, %v4820_v45  ;;  %v3437_v63 = vpack.c.bf16 %v3127_v51, %v3127_v51  ;;  %v3567_v1 = vunpack.c.l.b16 %v3434_v52  ;;  %v2211_v44 = vld [vmem:[#allocation2 + $0x169] sm:$0xff] }
 0x1cb   : > { %1338 = vrot.lane.b32.xlu1 %v10082_v17, %s9118_s24  ;;  %v4606_v37 = vsel %vm3643_vm6, %v4605_v31, %v4604_v59  ;;  %v4824_v16 = vsel %vm3643_vm6, %v4823_v42, %v4822_v62  ;;  %v3568_v2 = vunpack.c.l.b16 %v3435_v54  ;;  %v3569_v4 = vunpack.c.l.b16 %v3436_v55  ;;  %v2089_v50 = vpop.permute.xlu0 %2088  ;;  %v477_v45 = vld [vmem:[#allocation2 + $0x150] sm:$0xff]  ;;  %v479_v59 = vld [vmem:[#allocation2 + $0x168] sm:$0xff] }
 0x1cc   : > { %v10156_v40 = vsel %vm11726_vm13, %v4607_v47, %v4606_v37  ;;  %v10159_v5 = vsel %vm11726_vm13, %v4825_v48, %v4824_v16  ;;  %v3570_v7 = vunpack.c.l.b16 %v3437_v63  ;;  %v3636_v9 = vrot.slane %v3567_v1, 5  ;;  %2169 = vst.msk [vmem:[#allocation5 + $0x40] sm:$0xf] %vm11721_vm9, %v2089_v50  ;;  %v478_v47 = vld [vmem:[#allocation2 + $0x158] sm:$0xff]  ;;  %v480_v63 = vld [vmem:[#allocation2 + $0x170] sm:$0xff] }
 0x1cd   : > { %v3847_v6 = vrot.slane %v3567_v1, 4  ;;  %v1837_v10 = vpop.permute.xlu1 %1836  ;;  %v10161_v8 = vpack.c.bf16 %v1440_v23, %v1440_v23  ;;  %v3639_v20 = vrot.slane %v3568_v2, 4  ;;  %v3642_v11 = vrot.slane %v3569_v4, 3  ;;  %1593 = vrot.lane.b32.xlu0 %v10084_v18, %s9119_s25  ;;  %v2212_v48 = vld [vmem:[#allocation2 + $0x171] sm:$0xff] }
 0x1ce   : > { %v3849_v12 = vrot.slane %v3568_v2, 3  ;;  %v3851_v49 = vrot.slane %v3569_v4, 2  ;;  %1914 = vst.msk [vmem:[#allocation5 + $0x4c] sm:$0xf] %vm1894_vm8, %v1837_v10  ;;  %v3638_v34 = vsel %vm3637_vm1, %v3636_v9, %v3635_v26  ;;  %v3645_v13 = vrot.slane %v3570_v7, 2  ;;  %v2468_v16 = vld [vmem:[#allocation2 + $0x16a] sm:$0xff] }
 0x1cf   : > { %v3848_v14 = vsel %vm3637_vm1, %v3847_v6, %v3846_v32  ;;  %v3853_v19 = vrot.slane %v3570_v7, 1  ;;  %1591 = vrot.lane.b32.xlu1 %v10027_v39, %s9119_s25  ;;  %v3641_v21 = vsel %vm3640_vm3, %v3639_v20, %v3638_v34  ;;  %v2093_v30 = vpop.permute.xlu0 %2092  ;;  %v10187_v32 = vpack.c.bf16 %v1696_v27, %v1696_v27  ;;  %v2469_v7 = vld [vmem:[#allocation2 + $0x172] sm:$0xff] }
 0x1d0   : > { %v3850_v22 = vsel %vm3640_vm3, %v3849_v12, %v3848_v14  ;;  %v3644_v28 = vsel %vm3643_vm6, %v3642_v11, %v3641_v21  ;;  %2171 = vst.msk [vmem:[#allocation5 + $0x48] sm:$0xf] %vm11721_vm9, %v2093_v30  ;;  %v10193_v58 = vpack.c.bf16 %v1697_v33, %v1697_v33  ;;  %v10203_v41 = vpack.c.bf16 %v1954_v38, %v1954_v38 }
 0x1d1   : > { %v2091_v24 = vpop.permute.xlu1 %2090  ;;  %v3852_v29 = vsel %vm3643_vm6, %v3851_v49, %v3850_v22  ;;  %v10177_v26 = vsel %vm11726_vm13, %v3645_v13, %v3644_v28  ;;  %1846 = vrot.lane.b32.xlu0 %v10049_v61, %s9120_s26  ;;  %v8205_v46 = vpack.c.bf16 %v477_v45, %v477_v45  ;;  %v8206_v51 = vpack.c.bf16 %v478_v47, %v478_v47  ;;  %v1186_v45 = vld [vmem:[#allocation2 + $0x180] sm:$0xff] }
 0x1d2   : > { %2170 = vst.msk [vmem:[#allocation5 + $0x44] sm:$0xf] %vm11721_vm9, %v2091_v24  ;;  %v10180_v39 = vsel %vm11726_vm13, %v3853_v19, %v3852_v29  ;;  %v10227_v54 = vpack.c.bf16 %v2212_v48, %v2212_v48  ;;  %v8207_v62 = vpack.c.bf16 %v479_v59, %v479_v59  ;;  %v8208_v1 = vpack.c.bf16 %v480_v63, %v480_v63 }
 0x1d3   : > { %1595 = vrot.lane.b32.xlu1 %v10161_v8, %s9119_s25  ;;  %v2346_v35 = vpop.permute.xlu0 %2345  ;;  %638 = vst.msk [vmem:[#allocation5 + $0x70] sm:$0xf] %vm609_vm2, %v8205_v46  ;;  %639 = vst.msk [vmem:[#allocation5 + $0x74] sm:$0xf] %vm609_vm2, %v8206_v51  ;;  %v10246_v4 = vpack.c.bf16 %v2468_v16, %v2468_v16  ;;  %v10253_v11 = vpack.c.bf16 %v2469_v7, %v2469_v7  ;;  %v1443_v46 = vld [vmem:[#allocation2 + $0x181] sm:$0xff] }
 0x1d4   : > { %2426 = vst.msk [vmem:[#allocation5 + $0x40] sm:$0xf] %vm11720_vm10, %v2346_v35  ;;  %v10292_v16 = vpack.c.bf16 %v1443_v46, %v1443_v46 }
 0x1d5   : > { %v2095_v57 = vpop.permute.xlu1 %2094  ;;  %1850 = vrot.lane.b32.xlu0 %v10187_v32, %s9120_s26  ;;  %640 = vst.msk [vmem:[#allocation5 + $0x78] sm:$0xf] %vm609_vm2, %v8207_v62  ;;  %641 = vst.msk [vmem:[#allocation5 + $0x7c] sm:$0xf] %vm609_vm2, %v8208_v1  ;;  %vm11732_vm2 = vcmask 130048   ;;  %v10290_v1 = vpack.c.bf16 %v1186_v45, %v1186_v45 }
 0x1d6   : > { %2172 = vst.msk [vmem:[#allocation5 + $0x4c] sm:$0xf] %vm11721_vm9, %v2095_v57 }
 0x1d7   : > { %1848 = vrot.lane.b32.xlu1 %v10063_v3, %s9120_s26  ;;  %v2350_v61 = vpop.permute.xlu0 %2349  ;;  %v1955_v3 = vld [vmem:[#allocation2 + $0x170] sm:$0xff] }
 0x1d8   : > { %2428 = vst.msk [vmem:[#allocation5 + $0x48] sm:$0xf] %vm11720_vm10, %v2350_v61  ;;  %v10209_v43 = vpack.c.bf16 %v1955_v3, %v1955_v3 }
 0x1d9   : > { %v2348_v36 = vpop.permute.xlu1 %2347  ;;  %2104 = vrot.lane.b32.xlu0 %v10080_v15, %s11730_s18 }
 0x1da   : > { %2427 = vst.msk [vmem:[#allocation5 + $0x44] sm:$0xf] %vm11720_vm10, %v2348_v36 }
 0x1db   : > { %1852 = vrot.lane.b32.xlu1 %v10193_v58, %s9120_s26  ;;  %v2603_v42 = vpop.permute.xlu0 %2602 }
 0x1dc   : > { %2683 = vst.msk [vmem:[#allocation5 + $0x40] sm:$0xf] %vm2666_vm11, %v2603_v42 }
 0x1dd   : > { %v2352_v31 = vpop.permute.xlu1 %2351  ;;  %2108 = vrot.lane.b32.xlu0 %v10203_v41, %s11730_s18 }
 0x1de   : > { %2429 = vst.msk [vmem:[#allocation5 + $0x4c] sm:$0xf] %vm11720_vm10, %v2352_v31 }
 0x1df   : > { %2106 = vrot.lane.b32.xlu1 %v10082_v17, %s11730_s18  ;;  %v811_v15 = vpop.permute.xlu0 %810  ;;  %v10219_v17 = vpack.c.bf16 %v2211_v44, %v2211_v44 }
 0x1e0   : > { %887 = vst.msk [vmem:[#allocation5 + $0x50] sm:$0xf] %vm11719_vm4, %v811_v15 }
 0x1e1   : > { %v2605_v25 = vpop.permute.xlu1 %2604  ;;  %2361 = vrot.lane.b32.xlu0 %v10084_v18, %s9122_s12 }
 0x1e2   : > { %2684 = vst.msk [vmem:[#allocation5 + $0x44] sm:$0xf] %vm2666_vm11, %v2605_v25 }
 0x1e3   : > { %2110 = vrot.lane.b32.xlu1 %v10209_v43, %s11730_s18  ;;  %v2607_v53 = vpop.permute.xlu0 %2606 }
 0x1e4   : > { %2685 = vst.msk [vmem:[#allocation5 + $0x48] sm:$0xf] %vm2666_vm11, %v2607_v53 }
 0x1e5   : > { %v813_v52 = vpop.permute.xlu1 %812  ;;  %2365 = vrot.lane.b32.xlu0 %v10219_v17, %s9122_s12 }
 0x1e6   : > { %888 = vst.msk [vmem:[#allocation5 + $0x54] sm:$0xf] %vm11719_vm4, %v813_v52 }
 0x1e7   : > { %2363 = vrot.lane.b32.xlu1 %v10161_v8, %s9122_s12  ;;  %v815_v23 = vpop.permute.xlu0 %814 }
 0x1e8   : > { %889 = vst.msk [vmem:[#allocation5 + $0x58] sm:$0xf] %vm11719_vm4, %v815_v23 }
 0x1e9   : > { %v2609_v55 = vpop.permute.xlu1 %2608  ;;  %v8893_v56 = vld [vmem:[#allocation5 + $0x40] sm:$0xff]   ;;  %2618 = vrot.lane.b32.xlu0 %v10187_v32, %s9123_s10 }
 0x1ea   : > { %2686 = vst.msk [vmem:[#allocation5 + $0x4c] sm:$0xf] %vm2666_vm11, %v2609_v55  ;;  %8719 = vmatprep.mubr.msk.bf16.mxu0 %vm11718_vm12, %v8893_v56 }
 0x1eb   : > { %2367 = vrot.lane.b32.xlu1 %v10227_v54, %s9122_s12  ;;  %v1068_v2 = vpop.permute.xlu0 %1067 }
 0x1ec   : > { %1144 = vst.msk [vmem:[#allocation5 + $0x50] sm:$0xf] %vm1123_vm5, %v1068_v2 }
 0x1ed   : > { %v817_v37 = vpop.permute.xlu1 %816  ;;  %826 = vrot.lane.b32.xlu0 %v10084_v18, %s11722_s22 }
 0x1ee   : > { %890 = vst.msk [vmem:[#allocation5 + $0x5c] sm:$0xf] %vm11719_vm4, %v817_v37  ;;  %v1187_v37 = vld [vmem:[#allocation2 + $0x188] sm:$0xff] }
 0x1ef   : > { %2620 = vrot.lane.b32.xlu1 %v10193_v58, %s9123_s10  ;;  %v1072_v10 = vpop.permute.xlu0 %1071 }
 0x1f0   : > { %1146 = vst.msk [vmem:[#allocation5 + $0x58] sm:$0xf] %vm1123_vm5, %v1072_v10 }
 0x1f1   : > { %v1070_v9 = vpop.permute.xlu1 %1069  ;;  %v8894_v6 = vld [vmem:[#allocation5 + $0x48] sm:$0xff]   ;;  %2622 = vrot.lane.b32.xlu0 %v10246_v4, %s9123_s10 }
 0x1f2   : > { %1145 = vst.msk [vmem:[#allocation5 + $0x54] sm:$0xf] %vm1123_vm5, %v1070_v9  ;;  %v8709_v20 = vpop.f32.mrf.mxu0  ;;  %8720 = vmatmul.mubr.msk.bf16.gmra.mxu0 %vm11718_vm12, %v8894_v6  ;;  %vm11733_vm12 = vmmov %vm11732_vm2 }
 0x1f3   : > { %828 = vrot.lane.b32.xlu1 %v10161_v8, %s11722_s22  ;;  %3052 = vst.msk [vmem:[%s10056_s19 + $0x30] sm:$0xff] %vm11732_vm2, %v8709_v20  ;;  %v4098_v18 = vcombine.high %v8709_v20, %v8709_v20  ;;  %v4105_v12 = vrot.slane %v8709_v20, %v10047_v60  ;;  %v1325_v19 = vpop.permute.xlu0 %1324  ;;  %vm11734_vm2 = vcmask 126048   ;;  %vm11735_vm4 = vmmov %vm11733_vm12 }
 0x1f4   : > { %v2934_v50 = vpop.f32.mrf.mxu0  ;;  %1401 = vst.msk [vmem:[#allocation5 + $0x50] sm:$0xf] %vm11734_vm2, %v1325_v19 }
 0x1f5   : > { %v1074_v49 = vpop.permute.xlu1 %1073  ;;  %v4112_v34 = vrot.slane %v4098_v18, %v10047_v60  ;;  %v4113_v13 = vcombine.high %v4105_v12, %v4105_v12  ;;  %v4408_v8 = vpack.c.bf16 %v4105_v12, %v4105_v12  ;;  %3050 = vst.msk [vmem:[%s10056_s19 + $0x20] sm:$0xff] %vm11733_vm12, %v2934_v50  ;;  %v3128_v14 = vcombine.high %v2934_v50, %v2934_v50  ;;  %vm11736_vm12 = vmmov %vm11734_vm2 }
 0x1f6   : > { %1147 = vst.msk [vmem:[#allocation5 + $0x5c] sm:$0xf] %vm1123_vm5, %v1074_v49  ;;  %v3135_v21 = vrot.slane %v2934_v50, %v10047_v60  ;;  %v8710_v22 = vpop.f32.mrf.mxu0  ;;  %830 = vrot.lane.b32.xlu0 %v10219_v17, %s11722_s22  ;;  %vm11737_vm2 = vmmov %vm11735_vm4 }
 0x1f7   : > { %2624 = vrot.lane.b32.xlu1 %v10253_v11, %s9123_s10  ;;  %v4114_v24 = vcombine.high %v4112_v34, %v4112_v34  ;;  %v4409_v27 = vpack.c.bf16 %v4113_v13, %v4113_v13  ;;  %v4410_v28 = vpack.c.bf16 %v4112_v34, %v4112_v34  ;;  %v4539_v29 = vunpack.c.l.b16 %v4408_v8  ;;  %3053 = vst.msk [vmem:[%s10056_s19 + $0x38] sm:$0xff] %vm11735_vm4, %v8710_v22  ;;  %v1329_v31 = vpop.permute.xlu0 %1328  ;;  %vm11738_vm4 = vmmov %vm11736_vm12 }
 0x1f8   : > { %v3142_v30 = vrot.slane %v3128_v14, %v10047_v60  ;;  %v3143_v33 = vcombine.high %v3135_v21, %v3135_v21  ;;  %v10273_v35 = vpop.f32.mrf.mxu0  ;;  %v3438_v3 = vpack.c.bf16 %v3135_v21, %v3135_v21  ;;  %1403 = vst.msk [vmem:[#allocation5 + $0x58] sm:$0xf] %vm11738_vm4, %v1329_v31  ;;  %v4115_v56 = vcombine.high %v8710_v22, %v8710_v22 }
 0x1f9   : > { %v1327_v57 = vpop.permute.xlu1 %1326  ;;  %v4411_v36 = vpack.c.bf16 %v4114_v24, %v4114_v24  ;;  %v4540_v38 = vunpack.c.l.b16 %v4409_v27  ;;  %v4541_v61 = vunpack.c.l.b16 %v4410_v28  ;;  %3051 = vst.msk [vmem:[%s10056_s19 + $0x28] sm:$0xff] %vm11737_vm2, %v10273_v35  ;;  %v4827_v42 = vrot.slane %v4539_v29, 1 }
 0x1fa   : > { %1402 = vst.msk [vmem:[#allocation5 + $0x54] sm:$0xf] %vm11736_vm12, %v1327_v57  ;;  %v3144_v25 = vcombine.high %v3142_v30, %v3142_v30  ;;  %v3439_v44 = vpack.c.bf16 %v3143_v33, %v3143_v33  ;;  %v3440_v15 = vpack.c.bf16 %v3142_v30, %v3142_v30  ;;  %1083 = vrot.lane.b32.xlu0 %v10187_v32, %s11723_s23  ;;  %vm11739_vm12 = vmmov %vm11738_vm4  ;;  %v10295_v7 = vunpack.c.l.b16 %v3438_v3 }
 0x1fb   : > { %832 = vrot.lane.b32.xlu1 %v10227_v54, %s11722_s22  ;;  %v4542_v47 = vunpack.c.l.b16 %v4411_v36  ;;  %v4609_v48 = vrot.slane %v4540_v38, 7  ;;  %v4611_v51 = vrot.slane %v4541_v61, 6  ;;  %v4829_v62 = vrot.slane %v4541_v61, 7  ;;  %v1582_v63 = vpop.permute.xlu0 %1581 }
 0x1fc   : > { %v3441_v52 = vpack.c.bf16 %v3144_v25, %v3144_v25  ;;  %v10284_v53 = vunpack.c.l.b16 %v3439_v44  ;;  %v10286_v55 = vunpack.c.l.b16 %v3440_v15  ;;  %v4828_v32 = vsel %vm3628_vm14, %v4540_v38, %v4827_v42  ;;  %1658 = vst.msk [vmem:[#allocation5 + $0x50] sm:$0xf] %vm1637_vm7, %v1582_v63 }
 0x1fd   : > { %v1331_v23 = vpop.permute.xlu1 %1330  ;;  %v4610_v59 = vsel %vm3628_vm14, %v4609_v48, %v4539_v29  ;;  %v4613_v2 = vrot.slane %v4542_v47, 5  ;;  %v4122_v18 = vrot.slane %v8710_v22, %v10047_v60  ;;  %v4831_v12 = vrot.slane %v4542_v47, 6 }
 0x1fe   : > { %1404 = vst.msk [vmem:[#allocation5 + $0x5c] sm:$0xf] %vm11739_vm12, %v1331_v23  ;;  %v10297_v9 = vunpack.c.l.b16 %v3441_v52  ;;  %v4612_v6 = vsel %vm3631_vm15, %v4611_v51, %v4610_v59  ;;  %v3855_v10 = vrot.slane %v10284_v53, 7  ;;  %v3857_v20 = vrot.slane %v10286_v55, 6  ;;  %1087 = vrot.lane.b32.xlu0 %v10246_v4, %s11723_s23 }
 0x1ff   : > { %1085 = vrot.lane.b32.xlu1 %v10193_v58, %s11723_s23  ;;  %v4129_v50 = vrot.slane %v4115_v56, %v10047_v60  ;;  %v10310_v13 = vpack.c.bf16 %v1187_v37, %v1187_v37  ;;  %v4830_v58 = vsel %vm3631_vm15, %v4829_v62, %v4828_v32  ;;  %v4130_v14 = vcombine.high %v4122_v18, %v4122_v18  ;;  %v1586_v21 = vpop.permute.xlu0 %1585 }
 0x200   : > { %v3859_v49 = vrot.slane %v10297_v9, 5  ;;  %v3856_v8 = vsel %vm3628_vm14, %v3855_v10, %v10295_v7  ;;  %v4412_v19 = vpack.c.bf16 %v4122_v18, %v4122_v18  ;;  %v4614_v28 = vsel %vm3634_vm0, %v4613_v2, %v4612_v6  ;;  %1660 = vst.msk [vmem:[#allocation5 + $0x58] sm:$0xf] %vm1637_vm7, %v1586_v21 }
 0x201   : > { %v1584_v34 = vpop.permute.xlu1 %1583  ;;  %v3858_v22 = vsel %vm3631_vm15, %v3857_v20, %v3856_v8  ;;  %v4131_v24 = vcombine.high %v4129_v50, %v4129_v50  ;;  %v4414_v27 = vpack.c.bf16 %v4129_v50, %v4129_v50  ;;  %v4413_v29 = vpack.c.bf16 %v4130_v14, %v4130_v14 }
 0x202   : > { %1659 = vst.msk [vmem:[#allocation5 + $0x54] sm:$0xf] %vm1637_vm7, %v1584_v34  ;;  %v4543_v30 = vunpack.c.l.b16 %v4412_v19  ;;  %v3145_v33 = vcombine.high %v10273_v35, %v10273_v35  ;;  %v3152_v57 = vrot.slane %v10273_v35, %v10047_v60  ;;  %1340 = vrot.lane.b32.xlu0 %v10203_v41, %s9118_s24  ;;  %v4832_v61 = vsel %vm3634_vm0, %v4831_v12, %v4830_v58  ;;  %v1444_v58 = vld [vmem:[#allocation2 + $0x189] sm:$0xff] }
 0x203   : > { %1089 = vrot.lane.b32.xlu1 %v10253_v11, %s11723_s23  ;;  %v4415_v36 = vpack.c.bf16 %v4131_v24, %v4131_v24  ;;  %v4545_v38 = vunpack.c.l.b16 %v4414_v27  ;;  %v3860_v3 = vsel %vm3634_vm0, %v3859_v49, %v3858_v22  ;;  %v4544_v42 = vunpack.c.l.b16 %v4413_v29  ;;  %v1839_v45 = vpop.permute.xlu0 %1838  ;;  %s11724_s23 = smov 80  }
 0x204   : > { %v4615_v25 = vrot.slane %v4543_v30, 4  ;;  %v4833_v44 = vrot.slane %v4543_v30, 5  ;;  %v3159_v15 = vrot.slane %v3145_v33, %v10047_v60  ;;  %v3160_v48 = vcombine.high %v3152_v57, %v3152_v57  ;;  %1915 = vst.msk [vmem:[#allocation5 + $0x50] sm:$0xf] %vm1894_vm8, %v1839_v45 }
 0x205   : > { %v1588_v31 = vpop.permute.xlu1 %1587  ;;  %v4546_v46 = vunpack.c.l.b16 %v4415_v36  ;;  %v4619_v35 = vrot.slane %v4545_v38, 2  ;;  %v4837_v47 = vrot.slane %v4545_v38, 3  ;;  %v4617_v51 = vrot.slane %v4544_v42, 3 }
 0x206   : > { %1661 = vst.msk [vmem:[#allocation5 + $0x5c] sm:$0xf] %vm1637_vm7, %v1588_v31  ;;  %v4616_v41 = vsel %vm3637_vm1, %v4615_v25, %v4614_v28  ;;  %v4834_v52 = vsel %vm3637_vm1, %v4833_v44, %v4832_v61  ;;  %v4835_v56 = vrot.slane %v4544_v42, 4  ;;  %1344 = vrot.lane.b32.xlu0 %v10290_v1, %s9118_s24  ;;  %v3161_v62 = vcombine.high %v3159_v15, %v3159_v15  ;;  %v1700_v61 = vld [vmem:[#allocation2 + $0x182] sm:$0xff]  ;;  %v1701_v44 = vld [vmem:[#allocation2 + $0x18a] sm:$0xff] }
 0x207   : > { %1342 = vrot.lane.b32.xlu1 %v10209_v43, %s9118_s24  ;;  %v4621_v23 = vrot.slane %v4546_v46, 1  ;;  %v4839_v59 = vrot.slane %v4546_v46, 2  ;;  %v3442_v63 = vpack.c.bf16 %v3152_v57, %v3152_v57  ;;  %v3443_v2 = vpack.c.bf16 %v3160_v48, %v3160_v48  ;;  %v1843_v6 = vpop.permute.xlu0 %1842  ;;  %v1958_v48 = vld [vmem:[#allocation2 + $0x198] sm:$0xff] }
 0x208   : > { %v3444_v32 = vpack.c.bf16 %v3159_v15, %v3159_v15  ;;  %v4618_v43 = vsel %vm3640_vm3, %v4617_v51, %v4616_v41  ;;  %v4836_v10 = vsel %vm3640_vm3, %v4835_v56, %v4834_v52  ;;  %v3445_v20 = vpack.c.bf16 %v3161_v62, %v3161_v62  ;;  %1917 = vst.msk [vmem:[#allocation5 + $0x58] sm:$0xf] %vm1894_vm8, %v1843_v6  ;;  %v1959_v51 = vld [vmem:[#allocation2 + $0x1a0] sm:$0xff] }
 0x209   : > { %v1841_v37 = vpop.permute.xlu1 %1840  ;;  %v10341_v18 = vunpack.c.l.b16 %v3442_v63  ;;  %v4620_v12 = vsel %vm3643_vm6, %v4619_v35, %v4618_v43  ;;  %v4838_v49 = vsel %vm3643_vm6, %v4837_v47, %v4836_v10  ;;  %v10348_v50 = vunpack.c.l.b16 %v3443_v2  ;;  %v2215_v62 = vld [vmem:[#allocation2 + $0x199] sm:$0xff] }
 0x20a   : > { %1916 = vst.msk [vmem:[#allocation5 + $0x54] sm:$0xf] %vm1894_vm8, %v1841_v37  ;;  %v10350_v34 = vunpack.c.l.b16 %v3444_v32  ;;  %1597 = vrot.lane.b32.xlu0 %v10219_v17, %s9119_s25  ;;  %v10355_v8 = vsel %vm11726_vm13, %v4621_v23, %v4620_v12  ;;  %v10358_v14 = vsel %vm11726_vm13, %v4839_v59, %v4838_v49  ;;  %v10360_v19 = vunpack.c.l.b16 %v3445_v20  ;;  %v2472_v12 = vld [vmem:[#allocation2 + $0x19a] sm:$0xff] }
 0x20b   : > { %1346 = vrot.lane.b32.xlu1 %v10310_v13, %s9118_s24  ;;  %v3861_v21 = vrot.slane %v10341_v18, 4  ;;  %v4707_v24 = vpack.c.b16 %v10355_v8, %v10156_v40  ;;  %v3863_v27 = vrot.slane %v10348_v50, 3  ;;  %v2097_v17 = vpop.permute.xlu0 %2096  ;;  %v8336_v33 = vpack.c.bf16 %v1444_v58, %v1444_v58  ;;  %s9126_s24 = smov 96  }
 0x20c   : > { %v3865_v28 = vrot.slane %v10350_v34, 2  ;;  %v3867_v30 = vrot.slane %v10360_v19, 1  ;;  %2173 = vst.msk [vmem:[#allocation5 + $0x50] sm:$0xf] %vm11721_vm9, %v2097_v17  ;;  %v4925_v36 = vpack.c.b16 %v10358_v14, %v10159_v5  ;;  %v8367_v25 = vpack.c.bf16 %v1700_v61, %v1700_v61 }
 0x20d   : > { %v1845_v22 = vpop.permute.xlu1 %1844  ;;  %v3862_v29 = vsel %vm3637_vm1, %v3861_v21, %v3860_v3  ;;  %v8368_v46 = vpack.c.bf16 %v1701_v44, %v1701_v44  ;;  %v3648_v35 = vrot.slane %v10295_v7, 1  ;;  %v3650_v41 = vrot.slane %v10286_v55, 7  ;;  %v2473_v21 = vld [vmem:[#allocation2 + $0x1a2] sm:$0xff] }
 0x20e   : > { %1918 = vst.msk [vmem:[#allocation5 + $0x5c] sm:$0xf] %vm1894_vm8, %v1845_v22  ;;  %1601 = vrot.lane.b32.xlu0 %v10292_v16, %s9119_s25  ;;  %v3864_v57 = vsel %vm3640_vm3, %v3863_v27, %v3862_v29  ;;  %v3652_v23 = vrot.slane %v10297_v9, 6  ;;  %v8400_v55 = vpack.c.bf16 %v1959_v51, %v1959_v51  ;;  %vm11740_vm2 = vcmask 60448  }
 0x20f   : > { %1599 = vrot.lane.b32.xlu1 %v10227_v54, %s9119_s25  ;;  %v3866_v3 = vsel %vm3643_vm6, %v3865_v28, %v3864_v57  ;;  %v2101_v31 = vpop.permute.xlu0 %2100  ;;  %v3649_v52 = vsel %vm3628_vm14, %v10284_v53, %v3648_v35  ;;  %v3654_v53 = vrot.slane %v10341_v18, 5  ;;  %v8431_v9 = vpack.c.bf16 %v2215_v62, %v2215_v62  ;;  %vm11741_vm4 = vmmov %vm11740_vm2 }
 0x210   : > { %v10381_v42 = vsel %vm11726_vm13, %v3867_v30, %v3866_v3  ;;  %2175 = vst.msk [vmem:[#allocation5 + $0x58] sm:$0xf] %vm11721_vm9, %v2101_v31  ;;  %v3651_v59 = vsel %vm3631_vm15, %v3650_v41, %v3649_v52  ;;  %v3656_v2 = vrot.slane %v10348_v50, 4  ;;  %v3658_v20 = vrot.slane %v10350_v34, 3  ;;  %vm11742_vm12 = vmmov %vm11740_vm2 }
 0x211   : > { %v2099_v38 = vpop.permute.xlu1 %2098  ;;  %v3953_v54 = vpack.c.b16 %v10381_v42, %v10180_v39  ;;  %v3653_v37 = vsel %vm3634_vm0, %v3652_v23, %v3651_v59  ;;  %v3660_v58 = vrot.slane %v10360_v19, 2  ;;  %v8463_v34 = vpack.c.bf16 %v2472_v12, %v2472_v12 }
 0x212   : > { %2174 = vst.msk [vmem:[#allocation5 + $0x54] sm:$0xf] %vm11721_vm9, %v2099_v38  ;;  %1854 = vrot.lane.b32.xlu0 %v10246_v4, %s9120_s26  ;;  %v3655_v6 = vsel %vm3637_vm1, %v3654_v53, %v3653_v37  ;;  %v8464_v19 = vpack.c.bf16 %v2473_v21, %v2473_v21 }
 0x213   : > { %1603 = vrot.lane.b32.xlu1 %v8336_v33, %s9119_s25  ;;  %v2354_v45 = vpop.permute.xlu0 %2353  ;;  %v3657_v49 = vsel %vm3640_vm3, %v3656_v2, %v3655_v6 }
 0x214   : > { %2430 = vst.msk [vmem:[#allocation5 + $0x50] sm:$0xf] %vm11720_vm10, %v2354_v45  ;;  %v3659_v22 = vsel %vm3643_vm6, %v3658_v20, %v3657_v49 }
 0x215   : > { %v2103_v15 = vpop.permute.xlu1 %2102  ;;  %v3661_v17 = vsel %vm11726_vm13, %v3660_v58, %v3659_v22 }
 0x216   : > { %2176 = vst.msk [vmem:[#allocation5 + $0x5c] sm:$0xf] %vm11721_vm9, %v2103_v15  ;;  %1858 = vrot.lane.b32.xlu0 %v8367_v25, %s9120_s26  ;;  %v3746_v57 = vpack.c.b16 %v3661_v17, %v10177_v26 }
 0x217   : > { %1856 = vrot.lane.b32.xlu1 %v10253_v11, %s9120_s26  ;;  %v2358_v4 = vpop.permute.xlu0 %2357  ;;  %v8399_v11 = vpack.c.bf16 %v1958_v48, %v1958_v48 }
 0x218   : > { %2432 = vst.msk [vmem:[#allocation5 + $0x58] sm:$0xf] %vm11720_vm10, %v2358_v4 }
 0x219   : > { %v2356_v47 = vpop.permute.xlu1 %2355 }
 0x21a   : > { %2431 = vst.msk [vmem:[#allocation5 + $0x54] sm:$0xf] %vm11720_vm10, %v2356_v47  ;;  %2112 = vrot.lane.b32.xlu0 %v10290_v1, %s11730_s18 }
 0x21b   : > { %1860 = vrot.lane.b32.xlu1 %v8368_v46, %s9120_s26  ;;  %v2611_v56 = vpop.permute.xlu0 %2610  ;;  %s9127_s26 = smov 48  }
 0x21c   : > { %2687 = vst.msk [vmem:[#allocation5 + $0x50] sm:$0xf] %vm2666_vm11, %v2611_v56 }
 0x21d   : > { %v2360_v7 = vpop.permute.xlu1 %2359 }
 0x21e   : > { %2433 = vst.msk [vmem:[#allocation5 + $0x5c] sm:$0xf] %vm11720_vm10, %v2360_v7  ;;  %2116 = vrot.lane.b32.xlu0 %v8399_v11, %s11730_s18 }
 0x21f   : > { %2114 = vrot.lane.b32.xlu1 %v10310_v13, %s11730_s18  ;;  %v819_v63 = vpop.permute.xlu0 %818  ;;  %v2216_v13 = vld [vmem:[#allocation2 + $0x1a1] sm:$0xff] }
 0x220   : > { %891 = vst.msk [vmem:[#allocation5 + $0x60] sm:$0xf] %vm11740_vm2, %v819_v63  ;;  %v8432_v10 = vpack.c.bf16 %v2216_v13, %v2216_v13  ;;  %vm11743_vm2 = vcmask 293888  }
 0x221   : > { %v2613_v1 = vpop.permute.xlu1 %2612 }
 0x222   : > { %2688 = vst.msk [vmem:[#allocation5 + $0x54] sm:$0xf] %vm2666_vm11, %v2613_v1  ;;  %2369 = vrot.lane.b32.xlu0 %v10292_v16, %s9122_s12 }
 0x223   : > { %2118 = vrot.lane.b32.xlu1 %v8400_v55, %s11730_s18  ;;  %v2615_v43 = vpop.permute.xlu0 %2614 }
 0x224   : > { %2689 = vst.msk [vmem:[#allocation5 + $0x58] sm:$0xf] %vm2666_vm11, %v2615_v43 }
 0x225   : > { %v821_v32 = vpop.permute.xlu1 %820 }
 0x226   : > { %892 = vst.msk [vmem:[#allocation5 + $0x64] sm:$0xf] %vm11741_vm4, %v821_v32  ;;  %2373 = vrot.lane.b32.xlu0 %v8431_v9, %s9122_s12 }
 0x227   : > { %2371 = vrot.lane.b32.xlu1 %v8336_v33, %s9122_s12  ;;  %v823_v50 = vpop.permute.xlu0 %822 }
 0x228   : > { %893 = vst.msk [vmem:[#allocation5 + $0x68] sm:$0xf] %vm11742_vm12, %v823_v50  ;;  %vm11744_vm12 = vmmov %vm11743_vm2 }
 0x229   : > { %v2617_v16 = vpop.permute.xlu1 %2616  ;;  %v8895_v18 = vld [vmem:[#allocation5 + $0x50] sm:$0xff]  }
 0x22a   : > { %2690 = vst.msk [vmem:[#allocation5 + $0x5c] sm:$0xf] %vm2666_vm11, %v2617_v16  ;;  %8723 = vmatprep.mubr.msk.bf16.mxu0 %vm11743_vm2, %v8895_v18  ;;  %2626 = vrot.lane.b32.xlu0 %v8367_v25, %s9123_s10  ;;  %vm11745_vm2 = vcmask 130048  }
 0x22b   : > { %2375 = vrot.lane.b32.xlu1 %v8432_v10, %s9122_s12  ;;  %v1076_v28 = vpop.permute.xlu0 %1075  ;;  %s11320_s12 = sand.u32 1, %s9105_s28  }
 0x22c   : > { %1148 = vst.msk [vmem:[#allocation5 + $0x60] sm:$0xf] %vm1123_vm5, %v1076_v28  ;;  %s7609_s18 = sshll.u32 %s11320_s12, 6  ;;  %s7449_s20 = scalar_lea.sflag [#allocation9], %s11320_s12 }
 0x22d   : > { %v825_v27 = vpop.permute.xlu1 %824  ;;  %s11323_s22 = scalar_lea.vmem [#allocation8], %s7609_s18 }
 0x22e   : > { %894 = vst.msk [vmem:[#allocation5 + $0x6c] sm:$0xf] %vm11741_vm4, %v825_v27  ;;  %2630 = vrot.lane.b32.xlu0 %v8463_v34, %s9123_s10  ;;  %vm11746_vm4 = vmmov %vm11745_vm2 }
 0x22f   : > { %2628 = vrot.lane.b32.xlu1 %v8368_v46, %s9123_s10  ;;  %v1080_v33 = vpop.permute.xlu0 %1079 }
 0x230   : > { %1150 = vst.msk [vmem:[#allocation5 + $0x68] sm:$0xf] %vm1123_vm5, %v1080_v33 }
 0x231   : > { %v1078_v29 = vpop.permute.xlu1 %1077  ;;  %v8896_v30 = vld [vmem:[#allocation5 + $0x58] sm:$0xff]  }
 0x232   : > { %1149 = vst.msk [vmem:[#allocation5 + $0x64] sm:$0xf] %vm1123_vm5, %v1078_v29  ;;  %v8713_v38 = vpop.f32.mrf.mxu0  ;;  %8724 = vmatmul.mubr.msk.bf16.gmra.mxu0 %vm11744_vm12, %v8896_v30  ;;  %3750 = vrot.lane.b32.xlu0 %v3746_v57, %s9125_s17  ;;  %vm11747_vm12 = vcmask 126048  }
 0x233   : > { %2632 = vrot.lane.b32.xlu1 %v8464_v19, %s9123_s10  ;;  %3056 = vst.msk [vmem:[%s10056_s19 + $0x50] sm:$0xff] %vm11745_vm2, %v8713_v38  ;;  %v4132_v61 = vcombine.high %v8713_v38, %v8713_v38  ;;  %v4139_v3 = vrot.slane %v8713_v38, %v10047_v60  ;;  %v1333_v46 = vpop.permute.xlu0 %1332 }
 0x234   : > { %v2950_v25 = vpop.f32.mrf.mxu0  ;;  %1405 = vst.msk [vmem:[#allocation5 + $0x60] sm:$0xf] %vm11747_vm12, %v1333_v46 }
 0x235   : > { %v1082_v31 = vpop.permute.xlu1 %1081  ;;  %v4146_v26 = vrot.slane %v4132_v61, %v10047_v60  ;;  %v4147_v44 = vcombine.high %v4139_v3, %v4139_v3  ;;  %v4416_v15 = vpack.c.bf16 %v4139_v3, %v4139_v3  ;;  %3054 = vst.msk [vmem:[%s10056_s19 + $0x40] sm:$0xff] %vm11746_vm4, %v2950_v25  ;;  %v3162_v45 = vcombine.high %v2950_v25, %v2950_v25  ;;  %vm11748_vm4 = vmmov %vm11747_vm12 }
 0x236   : > { %1151 = vst.msk [vmem:[#allocation5 + $0x6c] sm:$0xf] %vm1123_vm5, %v1082_v31  ;;  %v3169_v35 = vrot.slane %v2950_v25, %v10047_v60  ;;  %v8714_v47 = vpop.f32.mrf.mxu0  ;;  %vm11749_vm12 = vmmov %vm11745_vm2 }
 0x237   : > { %v4148_v48 = vcombine.high %v4146_v26, %v4146_v26  ;;  %v4417_v4 = vpack.c.bf16 %v4147_v44, %v4147_v44  ;;  %v4418_v41 = vpack.c.bf16 %v4146_v26, %v4146_v26  ;;  %v4547_v11 = vunpack.c.l.b16 %v4416_v15  ;;  %3057 = vst.msk [vmem:[%s10056_s19 + $0x58] sm:$0xff] %vm11745_vm2, %v8714_v47  ;;  %v1337_v63 = vpop.permute.xlu0 %1336  ;;  %vm11750_vm2 = vmmov %vm11748_vm4 }
 0x238   : > { %v3176_v51 = vrot.slane %v3162_v45, %v10047_v60  ;;  %v3177_v52 = vcombine.high %v3169_v35, %v3169_v35  ;;  %v3446_v7 = vpack.c.bf16 %v3169_v35, %v3169_v35  ;;  %v4149_v56 = vcombine.high %v8714_v47, %v8714_v47  ;;  %v10455_v55 = vpop.f32.mrf.mxu0  ;;  %1407 = vst.msk [vmem:[#allocation5 + $0x68] sm:$0xf] %vm11750_vm2, %v1337_v63 }
 0x239   : > { %v1335_v23 = vpop.permute.xlu1 %1334  ;;  %v4419_v59 = vpack.c.bf16 %v4148_v48, %v4148_v48  ;;  %v4548_v1 = vunpack.c.l.b16 %v4417_v4  ;;  %v4549_v62 = vunpack.c.l.b16 %v4418_v41  ;;  %v4841_v53 = vrot.slane %v4547_v11, 1  ;;  %3055 = vst.msk [vmem:[%s10056_s19 + $0x48] sm:$0xff] %vm11749_vm12, %v10455_v55 }
 0x23a   : > { %1406 = vst.msk [vmem:[#allocation5 + $0x64] sm:$0xf] %vm11748_vm4, %v1335_v23  ;;  %v3178_v37 = vcombine.high %v3176_v51, %v3176_v51  ;;  %v3447_v9 = vpack.c.bf16 %v3177_v52, %v3177_v52  ;;  %v3448_v13 = vpack.c.bf16 %v3176_v51, %v3176_v51  ;;  %v3579_v2 = vunpack.c.l.b16 %v3446_v7  ;;  %vm11751_vm4 = vmmov %vm11750_vm2 }
 0x23b   : > { %v4550_v32 = vunpack.c.l.b16 %v4419_v59  ;;  %v4623_v6 = vrot.slane %v4548_v1, 7  ;;  %v4625_v43 = vrot.slane %v4549_v62, 6  ;;  %v4842_v10 = vsel %vm3628_vm14, %v4548_v1, %v4841_v53  ;;  %v1590_v22 = vpop.permute.xlu0 %1589 }
 0x23c   : > { %v4843_v20 = vrot.slane %v4549_v62, 7  ;;  %v3449_v16 = vpack.c.bf16 %v3178_v37, %v3178_v37  ;;  %v3580_v18 = vunpack.c.l.b16 %v3447_v9  ;;  %v3581_v12 = vunpack.c.l.b16 %v3448_v13  ;;  %1662 = vst.msk [vmem:[#allocation5 + $0x60] sm:$0xf] %vm1637_vm7, %v1590_v22 }
 0x23d   : > { %v1339_v49 = vpop.permute.xlu1 %1338  ;;  %v4624_v50 = vsel %vm3628_vm14, %v4623_v6, %v4547_v11  ;;  %v4627_v58 = vrot.slane %v4550_v32, 5  ;;  %v4845_v34 = vrot.slane %v4550_v32, 6  ;;  %v3662_v21 = vrot.slane %v3579_v2, 1 }
 0x23e   : > { %1408 = vst.msk [vmem:[#allocation5 + $0x6c] sm:$0xf] %vm11751_vm4, %v1339_v49  ;;  %v4626_v27 = vsel %vm3631_vm15, %v4625_v43, %v4624_v50  ;;  %v4844_v28 = vsel %vm3631_vm15, %v4843_v20, %v4842_v10  ;;  %v3582_v19 = vunpack.c.l.b16 %v3449_v16  ;;  %v3664_v17 = vrot.slane %v3581_v12, 7 }
 0x23f   : > { %v3663_v29 = vsel %vm3628_vm14, %v3580_v18, %v3662_v21  ;;  %v3869_v30 = vrot.slane %v3580_v18, 7  ;;  %v3871_v33 = vrot.slane %v3581_v12, 6  ;;  %v4156_v57 = vrot.slane %v8714_v47, %v10047_v60  ;;  %v1594_v46 = vpop.permute.xlu0 %1593 }
 0x240   : > { %v3665_v38 = vsel %vm3631_vm15, %v3664_v17, %v3663_v29  ;;  %v3666_v61 = vrot.slane %v3582_v19, 6  ;;  %v3873_v3 = vrot.slane %v3582_v19, 5  ;;  %v4163_v31 = vrot.slane %v4149_v56, %v10047_v60  ;;  %1664 = vst.msk [vmem:[#allocation5 + $0x68] sm:$0xf] %vm1637_vm7, %v1594_v46 }
 0x241   : > { %v1592_v25 = vpop.permute.xlu1 %1591  ;;  %v3870_v26 = vsel %vm3628_vm14, %v3869_v30, %v3579_v2  ;;  %v4164_v44 = vcombine.high %v4156_v57, %v4156_v57  ;;  %v4420_v15 = vpack.c.bf16 %v4156_v57, %v4156_v57  ;;  %v4628_v45 = vsel %vm3634_vm0, %v4627_v58, %v4626_v27 }
 0x242   : > { %1663 = vst.msk [vmem:[#allocation5 + $0x64] sm:$0xf] %vm1637_vm7, %v1592_v25  ;;  %v3872_v35 = vsel %vm3631_vm15, %v3871_v33, %v3870_v26  ;;  %v4165_v48 = vcombine.high %v4163_v31, %v4163_v31  ;;  %v4422_v47 = vpack.c.bf16 %v4163_v31, %v4163_v31  ;;  %v4846_v4 = vsel %vm3634_vm0, %v4845_v34, %v4844_v28 }
 0x243   : > { %v4421_v41 = vpack.c.bf16 %v4164_v44, %v4164_v44  ;;  %v4551_v11 = vunpack.c.l.b16 %v4420_v15  ;;  %v3179_v51 = vcombine.high %v10455_v55, %v10455_v55  ;;  %v3186_v52 = vrot.slane %v10455_v55, %v10047_v60  ;;  %v1847_v9 = vpop.permute.xlu0 %1846 }
 0x244   : > { %v4423_v7 = vpack.c.bf16 %v4165_v48, %v4165_v48  ;;  %v4553_v56 = vunpack.c.l.b16 %v4422_v47  ;;  %v3667_v23 = vsel %vm3634_vm0, %v3666_v61, %v3665_v38  ;;  %v3874_v59 = vsel %vm3634_vm0, %v3873_v3, %v3872_v35  ;;  %1919 = vst.msk [vmem:[#allocation5 + $0x60] sm:$0xf] %vm1894_vm8, %v1847_v9 }
 0x245   : > { %v1596_v1 = vpop.permute.xlu1 %1595  ;;  %v4552_v62 = vunpack.c.l.b16 %v4421_v41  ;;  %v4629_v53 = vrot.slane %v4551_v11, 4  ;;  %v4847_v63 = vrot.slane %v4551_v11, 5  ;;  %v3193_v37 = vrot.slane %v3179_v51, %v10047_v60 }
 0x246   : > { %1665 = vst.msk [vmem:[#allocation5 + $0x6c] sm:$0xf] %vm1637_vm7, %v1596_v1  ;;  %v4554_v13 = vunpack.c.l.b16 %v4423_v7  ;;  %v4633_v2 = vrot.slane %v4553_v56, 2  ;;  %v4851_v32 = vrot.slane %v4553_v56, 3  ;;  %v3194_v6 = vcombine.high %v3186_v52, %v3186_v52 }
 0x247   : > { %v4630_v55 = vsel %vm3637_vm1, %v4629_v53, %v4628_v45  ;;  %v4631_v43 = vrot.slane %v4552_v62, 3  ;;  %v4848_v10 = vsel %vm3637_vm1, %v4847_v63, %v4846_v4  ;;  %v4849_v20 = vrot.slane %v4552_v62, 4  ;;  %v1851_v21 = vpop.permute.xlu0 %1850 }
 0x248   : > { %v4635_v16 = vrot.slane %v4554_v13, 1  ;;  %v4853_v18 = vrot.slane %v4554_v13, 2  ;;  %v3195_v12 = vcombine.high %v3193_v37, %v3193_v37  ;;  %v3450_v49 = vpack.c.bf16 %v3186_v52, %v3186_v52  ;;  %1921 = vst.msk [vmem:[#allocation5 + $0x68] sm:$0xf] %vm1894_vm8, %v1851_v21 }
 0x249   : > { %v1849_v50 = vpop.permute.xlu1 %1848  ;;  %v3451_v58 = vpack.c.bf16 %v3194_v6, %v3194_v6  ;;  %v3452_v34 = vpack.c.bf16 %v3193_v37, %v3193_v37  ;;  %v4632_v22 = vsel %vm3640_vm3, %v4631_v43, %v4630_v55  ;;  %v4850_v27 = vsel %vm3640_vm3, %v4849_v20, %v4848_v10 }
 0x24a   : > { %1920 = vst.msk [vmem:[#allocation5 + $0x64] sm:$0xf] %vm1894_vm8, %v1849_v50  ;;  %v3453_v28 = vpack.c.bf16 %v3195_v12, %v3195_v12  ;;  %v3583_v19 = vunpack.c.l.b16 %v3450_v49  ;;  %v4634_v17 = vsel %vm3643_vm6, %v4633_v2, %v4632_v22  ;;  %v4852_v29 = vsel %vm3643_vm6, %v4851_v32, %v4850_v27 }
 0x24b   : > { %v3584_v30 = vunpack.c.l.b16 %v3451_v58  ;;  %v3585_v33 = vunpack.c.l.b16 %v3452_v34  ;;  %v10496_v57 = vsel %vm11726_vm13, %v4635_v16, %v4634_v17  ;;  %v10499_v38 = vsel %vm11726_vm13, %v4853_v18, %v4852_v29  ;;  %v2105_v46 = vpop.permute.xlu0 %2104 }
 0x24c   : > { %v3586_v61 = vunpack.c.l.b16 %v3453_v28  ;;  %v3668_v3 = vrot.slane %v3583_v19, 5  ;;  %v3875_v31 = vrot.slane %v3583_v19, 4  ;;  %2177 = vst.msk [vmem:[#allocation5 + $0x60] sm:$0xf] %vm11721_vm9, %v2105_v46  ;;  %vm11752_vm12 = vcmask 60448  }
 0x24d   : > { %v1853_v25 = vpop.permute.xlu1 %1852  ;;  %v3670_v26 = vrot.slane %v3584_v30, 4  ;;  %v3672_v44 = vrot.slane %v3585_v33, 3  ;;  %v3877_v15 = vrot.slane %v3584_v30, 3  ;;  %v3879_v45 = vrot.slane %v3585_v33, 2  ;;  %vm11753_vm2 = vmmov %vm11752_vm12 }
 0x24e   : > { %1922 = vst.msk [vmem:[#allocation5 + $0x6c] sm:$0xf] %vm1894_vm8, %v1853_v25  ;;  %v3669_v35 = vsel %vm3637_vm1, %v3668_v3, %v3667_v23  ;;  %v3674_v48 = vrot.slane %v3586_v61, 2  ;;  %v3876_v47 = vsel %vm3637_vm1, %v3875_v31, %v3874_v59  ;;  %v3881_v4 = vrot.slane %v3586_v61, 1  ;;  %vm11754_vm4 = vmmov %vm11753_vm2 }
 0x24f   : > { %v3671_v41 = vsel %vm3640_vm3, %v3670_v26, %v3669_v35  ;;  %v3878_v11 = vsel %vm3640_vm3, %v3877_v15, %v3876_v47  ;;  %v2109_v56 = vpop.permute.xlu0 %2108 }
 0x250   : > { %v3673_v52 = vsel %vm3643_vm6, %v3672_v44, %v3671_v41  ;;  %v3880_v7 = vsel %vm3643_vm6, %v3879_v45, %v3878_v11  ;;  %2179 = vst.msk [vmem:[#allocation5 + $0x68] sm:$0xf] %vm11721_vm9, %v2109_v56 }
 0x251   : > { %v2107_v51 = vpop.permute.xlu1 %2106  ;;  %v10511_v23 = vsel %vm11726_vm13, %v3674_v48, %v3673_v52  ;;  %v10514_v59 = vsel %vm11726_vm13, %v3881_v4, %v3880_v7 }
 0x252   : > { %2178 = vst.msk [vmem:[#allocation5 + $0x64] sm:$0xf] %vm11721_vm9, %v2107_v51 }
 0x253   : > { %v2362_v62 = vpop.permute.xlu0 %2361 }
 0x254   : > { %2434 = vst.msk [vmem:[#allocation5 + $0x60] sm:$0xf] %vm11720_vm10, %v2362_v62 }
 0x255   : > { %v2111_v1 = vpop.permute.xlu1 %2110 }
 0x256   : > { %2180 = vst.msk [vmem:[#allocation5 + $0x6c] sm:$0xf] %vm11721_vm9, %v2111_v1  ;;  %vm11756_vm9 = vmmov %vm11753_vm2 }
 0x257   : > { %v2366_v63 = vpop.permute.xlu0 %2365 }
 0x258   : > { %2436 = vst.msk [vmem:[#allocation5 + $0x68] sm:$0xf] %vm11720_vm10, %v2366_v63 }
 0x259   : > { %v2364_v53 = vpop.permute.xlu1 %2363 }
 0x25a   : > { %2435 = vst.msk [vmem:[#allocation5 + $0x64] sm:$0xf] %vm11720_vm10, %v2364_v53 }
 0x25b   : > { %v2619_v9 = vpop.permute.xlu0 %2618 }
 0x25c   : > { %2691 = vst.msk [vmem:[#allocation5 + $0x60] sm:$0xf] %vm2666_vm11, %v2619_v9 }
 0x25d   : > { %v2368_v37 = vpop.permute.xlu1 %2367 }
 0x25e   : > { %2437 = vst.msk [vmem:[#allocation5 + $0x6c] sm:$0xf] %vm11720_vm10, %v2368_v37  ;;  %vm11755_vm10 = vcmask 293888  }
 0x25f   : > { %v827_v2 = vpop.permute.xlu0 %826 }
 0x260   : > { %895 = vst.msk [vmem:[#allocation5 + $0x70] sm:$0xf] %vm11752_vm12, %v827_v2  ;;  %vm11757_vm12 = vmmov %vm11755_vm10 }
 0x261   : > { %v2621_v13 = vpop.permute.xlu1 %2620 }
 0x262   : > { %2692 = vst.msk [vmem:[#allocation5 + $0x64] sm:$0xf] %vm2666_vm11, %v2621_v13 }
 0x263   : > { %v2623_v6 = vpop.permute.xlu0 %2622 }
 0x264   : > { %2693 = vst.msk [vmem:[#allocation5 + $0x68] sm:$0xf] %vm2666_vm11, %v2623_v6 }
 0x265   : > { %v829_v32 = vpop.permute.xlu1 %828 }
 0x266   : > { %896 = vst.msk [vmem:[#allocation5 + $0x74] sm:$0xf] %vm11753_vm2, %v829_v32  ;;  %vm11758_vm2 = vcmask 130048  }
 0x268   : > { %v831_v10 = vpop.permute.xlu0 %830 }
 0x269   : > { %v2625_v55 = vpop.permute.xlu1 %2624  ;;  %v8897_v43 = vld [vmem:[#allocation5 + $0x60] sm:$0xff]   ;;  %897 = vst.msk [vmem:[#allocation5 + $0x78] sm:$0xf] %vm11754_vm4, %v831_v10  ;;  %vm11761_vm4 = vmmov %vm11758_vm2 }
 0x26a   : > { %2694 = vst.msk [vmem:[#allocation5 + $0x6c] sm:$0xf] %vm2666_vm11, %v2625_v55  ;;  %8727 = vmatprep.mubr.msk.bf16.mxu0 %vm11755_vm10, %v8897_v43  ;;  %vm11760_vm10 = vcmask 126048  }
 0x26c   : > { %v1084_v16 = vpop.permute.xlu0 %1083 }
 0x26d   : > { %v833_v20 = vpop.permute.xlu1 %832  ;;  %1152 = vst.msk [vmem:[#allocation5 + $0x70] sm:$0xf] %vm1123_vm5, %v1084_v16 }
 0x26e   : > { %898 = vst.msk [vmem:[#allocation5 + $0x7c] sm:$0xf] %vm11756_vm9, %v833_v20  ;;  %vm11759_vm9 = vmmov %vm11758_vm2 }
 0x270   : > { %v1088_v49 = vpop.permute.xlu0 %1087 }
 0x271   : > { %v1086_v18 = vpop.permute.xlu1 %1085  ;;  %v8898_v12 = vld [vmem:[#allocation5 + $0x68] sm:$0xff]   ;;  %1154 = vst.msk [vmem:[#allocation5 + $0x78] sm:$0xf] %vm1123_vm5, %v1088_v49 }
 0x272   : > { %1153 = vst.msk [vmem:[#allocation5 + $0x74] sm:$0xf] %vm1123_vm5, %v1086_v18  ;;  %v8717_v50 = vpop.f32.mrf.mxu0  ;;  %8728 = vmatmul.mubr.msk.bf16.gmra.mxu0 %vm11757_vm12, %v8898_v12  ;;  %vm11763_vm12 = vmmov %vm11758_vm2 }
 0x273   : > { %3060 = vst.msk [vmem:[%s10056_s19 + $0x70] sm:$0xff] %vm11758_vm2, %v8717_v50  ;;  %v4166_v58 = vcombine.high %v8717_v50, %v8717_v50  ;;  %v4173_v34 = vrot.slane %v8717_v50, %v10047_v60 }
 0x274   : > { %v2966_v22 = vpop.f32.mrf.mxu0  ;;  %v1341_v29 = vpop.permute.xlu0 %1340 }
 0x275   : > { %v1090_v21 = vpop.permute.xlu1 %1089  ;;  %v4180_v27 = vrot.slane %v4166_v58, %v10047_v60  ;;  %v4181_v28 = vcombine.high %v4173_v34, %v4173_v34  ;;  %v4424_v19 = vpack.c.bf16 %v4173_v34, %v4173_v34  ;;  %3058 = vst.msk [vmem:[%s10056_s19 + $0x60] sm:$0xff] %vm11759_vm9, %v2966_v22  ;;  %v3196_v17 = vcombine.high %v2966_v22, %v2966_v22 }
 0x276   : > { %1155 = vst.msk [vmem:[#allocation5 + $0x7c] sm:$0xf] %vm1123_vm5, %v1090_v21  ;;  %v3203_v30 = vrot.slane %v2966_v22, %v10047_v60  ;;  %v8718_v33 = vpop.f32.mrf.mxu0  ;;  %vm11762_vm5 = vmmov %vm11760_vm10 }
 0x277   : > { %1409 = vst.msk [vmem:[#allocation5 + $0x70] sm:$0xf] %vm11760_vm10, %v1341_v29  ;;  %v4182_v61 = vcombine.high %v4180_v27, %v4180_v27  ;;  %v4425_v3 = vpack.c.bf16 %v4181_v28, %v4181_v28  ;;  %v4426_v31 = vpack.c.bf16 %v4180_v27, %v4180_v27  ;;  %v4555_v25 = vunpack.c.l.b16 %v4424_v19  ;;  %vm11764_vm2 = vmmov %vm11762_vm5 }
 0x278   : > { %3061 = vst.msk [vmem:[%s10056_s19 + $0x78] sm:$0xff] %vm11761_vm4, %v8718_v33  ;;  %v3210_v26 = vrot.slane %v3196_v17, %v10047_v60  ;;  %v3211_v44 = vcombine.high %v3203_v30, %v3203_v30  ;;  %v3454_v15 = vpack.c.bf16 %v3203_v30, %v3203_v30  ;;  %v4183_v45 = vcombine.high %v8718_v33, %v8718_v33  ;;  %v10547_v35 = vpop.f32.mrf.mxu0  ;;  %v1345_v11 = vpop.permute.xlu0 %1344  ;;  %vm11765_vm9 = vmmov %vm11764_vm2 }
 0x279   : > { %v1343_v46 = vpop.permute.xlu1 %1342  ;;  %v4427_v48 = vpack.c.bf16 %v4182_v61, %v4182_v61  ;;  %v4556_v47 = vunpack.c.l.b16 %v4425_v3  ;;  %v4557_v4 = vunpack.c.l.b16 %v4426_v31  ;;  %v4855_v41 = vrot.slane %v4555_v25, 1  ;;  %3059 = vst.msk [vmem:[%s10056_s19 + $0x68] sm:$0xff] %vm11763_vm12, %v10547_v35 }
 0x27a   : > { %1410 = vst.msk [vmem:[#allocation5 + $0x74] sm:$0xf] %vm11762_vm5, %v1343_v46  ;;  %v3212_v51 = vcombine.high %v3210_v26, %v3210_v26  ;;  %v3455_v52 = vpack.c.bf16 %v3211_v44, %v3211_v44  ;;  %v3456_v7 = vpack.c.bf16 %v3210_v26, %v3210_v26  ;;  %v3587_v56 = vunpack.c.l.b16 %v3454_v15  ;;  %v8901_v15 = vld [vmem:[%s11706_s2 + $0x8] sm:$0xff]  }
 0x27b   : > { %1411 = vst.msk [vmem:[#allocation5 + $0x78] sm:$0xf] %vm11764_vm2, %v1345_v11  ;;  %v4558_v1 = vunpack.c.l.b16 %v4427_v48  ;;  %v4637_v62 = vrot.slane %v4556_v47, 7  ;;  %v4639_v53 = vrot.slane %v4557_v4, 6  ;;  %v4856_v63 = vsel %vm3628_vm14, %v4556_v47, %v4855_v41  ;;  %8735 = vmatprep.subr.bf16.mxu1 %v8901_v15 }
 0x27c   : > { %v4857_v37 = vrot.slane %v4557_v4, 7  ;;  %v3457_v9 = vpack.c.bf16 %v3212_v51, %v3212_v51  ;;  %v3588_v13 = vunpack.c.l.b16 %v3455_v52  ;;  %v3589_v2 = vunpack.c.l.b16 %v3456_v7  ;;  %v1598_v20 = vpop.permute.xlu0 %1597  ;;  %8736 = vmatpush3.bf16.msra.mxu1 %v8901_v15 }
 0x27d   : > { %v1347_v32 = vpop.permute.xlu1 %1346  ;;  %v4638_v6 = vsel %vm3628_vm14, %v4637_v62, %v4555_v25  ;;  %v4641_v55 = vrot.slane %v4558_v1, 5  ;;  %v4859_v43 = vrot.slane %v4558_v1, 6  ;;  %v3676_v10 = vrot.slane %v3587_v56, 1  ;;  %1666 = vst.msk [vmem:[#allocation5 + $0x70] sm:$0xf] %vm1637_vm7, %v1598_v20 }
 0x27e   : > { %1412 = vst.msk [vmem:[#allocation5 + $0x7c] sm:$0xf] %vm11765_vm9, %v1347_v32  ;;  %v4640_v16 = vsel %vm3631_vm15, %v4639_v53, %v4638_v6  ;;  %v4858_v18 = vsel %vm3631_vm15, %v4857_v37, %v4856_v63  ;;  %v3590_v12 = vunpack.c.l.b16 %v3457_v9  ;;  %v3678_v49 = vrot.slane %v3589_v2, 7 }
 0x27f   : > { %v3677_v50 = vsel %vm3628_vm14, %v3588_v13, %v3676_v10  ;;  %v3883_v58 = vrot.slane %v3588_v13, 7  ;;  %v3885_v34 = vrot.slane %v3589_v2, 6  ;;  %v4190_v21 = vrot.slane %v8718_v33, %v10047_v60 }
 0x280   : > { %v3679_v22 = vsel %vm3631_vm15, %v3678_v49, %v3677_v50  ;;  %v3680_v27 = vrot.slane %v3590_v12, 6  ;;  %v3887_v28 = vrot.slane %v3590_v12, 5  ;;  %v4197_v19 = vrot.slane %v4183_v45, %v10047_v60  ;;  %v1602_v31 = vpop.permute.xlu0 %1601 }
 0x281   : > { %v1600_v17 = vpop.permute.xlu1 %1599  ;;  %v3884_v29 = vsel %vm3628_vm14, %v3883_v58, %v3587_v56  ;;  %v4198_v30 = vcombine.high %v4190_v21, %v4190_v21  ;;  %v4428_v61 = vpack.c.bf16 %v4190_v21, %v4190_v21  ;;  %v4642_v3 = vsel %vm3634_vm0, %v4641_v55, %v4640_v16  ;;  %1668 = vst.msk [vmem:[#allocation5 + $0x78] sm:$0xf] %vm1637_vm7, %v1602_v31 }
 0x282   : > { %1667 = vst.msk [vmem:[#allocation5 + $0x74] sm:$0xf] %vm1637_vm7, %v1600_v17  ;;  %v3886_v25 = vsel %vm3631_vm15, %v3885_v34, %v3884_v29  ;;  %v4199_v26 = vcombine.high %v4197_v19, %v4197_v19  ;;  %v4430_v33 = vpack.c.bf16 %v4197_v19, %v4197_v19  ;;  %v4860_v44 = vsel %vm3634_vm0, %v4859_v43, %v4858_v18 }
 0x283   : > { %v4429_v45 = vpack.c.bf16 %v4198_v30, %v4198_v30  ;;  %v4559_v46 = vunpack.c.l.b16 %v4428_v61  ;;  %v3213_v48 = vcombine.high %v10547_v35, %v10547_v35  ;;  %v3220_v47 = vrot.slane %v10547_v35, %v10047_v60 }
 0x284   : > { %v4431_v4 = vpack.c.bf16 %v4199_v26, %v4199_v26  ;;  %v4561_v41 = vunpack.c.l.b16 %v4430_v33  ;;  %v3681_v11 = vsel %vm3634_vm0, %v3680_v27, %v3679_v22  ;;  %v3888_v51 = vsel %vm3634_vm0, %v3887_v28, %v3886_v25  ;;  %v1855_v53 = vpop.permute.xlu0 %1854 }
 0x285   : > { %v1604_v52 = vpop.permute.xlu1 %1603  ;;  %v4560_v7 = vunpack.c.l.b16 %v4429_v45  ;;  %v4643_v56 = vrot.slane %v4559_v46, 4  ;;  %v4861_v1 = vrot.slane %v4559_v46, 5  ;;  %v3227_v62 = vrot.slane %v3213_v48, %v10047_v60  ;;  %1923 = vst.msk [vmem:[#allocation5 + $0x70] sm:$0xf] %vm1894_vm8, %v1855_v53 }
 0x286   : > { %1669 = vst.msk [vmem:[#allocation5 + $0x7c] sm:$0xf] %vm1637_vm7, %v1604_v52  ;;  %v4562_v63 = vunpack.c.l.b16 %v4431_v4  ;;  %v4647_v37 = vrot.slane %v4561_v41, 2  ;;  %v4865_v35 = vrot.slane %v4561_v41, 3  ;;  %v3228_v9 = vcombine.high %v3220_v47, %v3220_v47 }
 0x287   : > { %v4644_v13 = vsel %vm3637_vm1, %v4643_v56, %v4642_v3  ;;  %v4645_v2 = vrot.slane %v4560_v7, 3  ;;  %v4862_v32 = vsel %vm3637_vm1, %v4861_v1, %v4860_v44  ;;  %v4863_v6 = vrot.slane %v4560_v7, 4 }
 0x288   : > { %v4649_v55 = vrot.slane %v4562_v63, 1  ;;  %v4867_v43 = vrot.slane %v4562_v63, 2  ;;  %v3229_v10 = vcombine.high %v3227_v62, %v3227_v62  ;;  %v3458_v20 = vpack.c.bf16 %v3220_v47, %v3220_v47  ;;  %v1859_v49 = vpop.permute.xlu0 %1858 }
 0x289   : > { %v1857_v16 = vpop.permute.xlu1 %1856  ;;  %v3459_v18 = vpack.c.bf16 %v3228_v9, %v3228_v9  ;;  %v3460_v12 = vpack.c.bf16 %v3227_v62, %v3227_v62  ;;  %v4646_v50 = vsel %vm3640_vm3, %v4645_v2, %v4644_v13  ;;  %v4864_v58 = vsel %vm3640_vm3, %v4863_v6, %v4862_v32  ;;  %1925 = vst.msk [vmem:[#allocation5 + $0x78] sm:$0xf] %vm1894_vm8, %v1859_v49 }
 0x28a   : > { %1924 = vst.msk [vmem:[#allocation5 + $0x74] sm:$0xf] %vm1894_vm8, %v1857_v16  ;;  %v3461_v34 = vpack.c.bf16 %v3229_v10, %v3229_v10  ;;  %v3591_v21 = vunpack.c.l.b16 %v3458_v20  ;;  %v4648_v22 = vsel %vm3643_vm6, %v4647_v37, %v4646_v50  ;;  %v4866_v27 = vsel %vm3643_vm6, %v4865_v35, %v4864_v58 }
 0x28b   : > { %v3592_v28 = vunpack.c.l.b16 %v3459_v18  ;;  %v3593_v19 = vunpack.c.l.b16 %v3460_v12  ;;  %v10591_v17 = vsel %vm11726_vm13, %v4649_v55, %v4648_v22  ;;  %v10594_v29 = vsel %vm11726_vm13, %v4867_v43, %v4866_v27 }
 0x28c   : > { %v3594_v30 = vunpack.c.l.b16 %v3461_v34  ;;  %v3682_v61 = vrot.slane %v3591_v21, 5  ;;  %v3889_v3 = vrot.slane %v3591_v21, 4  ;;  %v4708_v25 = vpack.c.b16 %v10591_v17, %v10496_v57  ;;  %v2113_v45 = vpop.permute.xlu0 %2112 }
 0x28d   : > { %v1861_v31 = vpop.permute.xlu1 %1860  ;;  %v3684_v26 = vrot.slane %v3592_v28, 4  ;;  %v3686_v33 = vrot.slane %v3593_v19, 3  ;;  %v3891_v44 = vrot.slane %v3592_v28, 3  ;;  %v3893_v15 = vrot.slane %v3593_v19, 2 }
 0x28e   : > { %1926 = vst.msk [vmem:[#allocation5 + $0x7c] sm:$0xf] %vm1894_vm8, %v1861_v31  ;;  %v3683_v46 = vsel %vm3637_vm1, %v3682_v61, %v3681_v11  ;;  %v3688_v48 = vrot.slane %v3594_v30, 2  ;;  %v3890_v47 = vsel %vm3637_vm1, %v3889_v3, %v3888_v51  ;;  %v3895_v4 = vrot.slane %v3594_v30, 1 }
 0x28f   : > { %vm11766_vm7 = vcmask 224448   ;;  %v3685_v41 = vsel %vm3640_vm3, %v3684_v26, %v3683_v46  ;;  %v3892_v52 = vsel %vm3640_vm3, %v3891_v44, %v3890_v47  ;;  %v4926_v7 = vpack.c.b16 %v10594_v29, %v10499_v38 }
 0x290   : > { %2181 = vst.msk [vmem:[#allocation5 + $0x70] sm:$0xf] %vm11766_vm7, %v2113_v45  ;;  %v3687_v56 = vsel %vm3643_vm6, %v3686_v33, %v3685_v41  ;;  %v3894_v62 = vsel %vm3643_vm6, %v3893_v15, %v3892_v52  ;;  %vm11767_vm8 = vmmov %vm11766_vm7  ;;  %v2117_v51 = vpop.permute.xlu0 %2116  ;;  %vm11770_vm5 = vcmask 257248  }
 0x291   : > { %v2115_v1 = vpop.permute.xlu1 %2114  ;;  %v3689_v11 = vsel %vm11726_vm13, %v3688_v48, %v3687_v56  ;;  %v10611_v53 = vsel %vm11726_vm13, %v3895_v4, %v3894_v62  ;;  %vm11768_vm10 = vmmov %vm11766_vm7 }
 0x292   : > { %2182 = vst.msk [vmem:[#allocation5 + $0x74] sm:$0xf] %vm11767_vm8, %v2115_v1  ;;  %v3747_v63 = vpack.c.b16 %v3689_v11, %v10511_v23  ;;  %v3954_v37 = vpack.c.b16 %v10611_v53, %v10514_v59  ;;  %vm11769_vm4 = vmmov %vm11766_vm7  ;;  %vm11774_vm7 = vcmask 130048   ;;  %vm11775_vm8 = vcmask 293888  }
 0x293   : > { %2183 = vst.msk [vmem:[#allocation5 + $0x78] sm:$0xf] %vm11768_vm10, %v2117_v51  ;;  %vm11771_vm12 = vmmov %vm11770_vm5 }
 0x294   : > { %3752 = vrot.lane.b32.xlu1 %v3747_v63, %s9125_s17  ;;  %v2370_v9 = vpop.permute.xlu0 %2369  ;;  %vm11772_vm2 = vmmov %vm11770_vm5 }
 0x295   : > { %v2119_v35 = vpop.permute.xlu1 %2118  ;;  %2438 = vst.msk [vmem:[#allocation5 + $0x70] sm:$0xf] %vm11770_vm5, %v2370_v9  ;;  %vm11773_vm9 = vmmov %vm11772_vm2 }
 0x296   : > { %2184 = vst.msk [vmem:[#allocation5 + $0x7c] sm:$0xf] %vm11769_vm4, %v2119_v35  ;;  %vm11776_vm10 = vmmov %vm11775_vm8 }
 0x297   : > { %vm11777_vm4 = vmmov %vm11774_vm7 }
 0x298   : > { %v2374_v2 = vpop.permute.xlu0 %2373  ;;  %vm11779_vm5 = vmmov %vm11777_vm4 }
 0x299   : > { %v2372_v13 = vpop.permute.xlu1 %2371  ;;  %2440 = vst.msk [vmem:[#allocation5 + $0x78] sm:$0xf] %vm11772_vm2, %v2374_v2  ;;  %vm11781_vm2 = vmmov %vm11777_vm4 }
 0x29a   : > { %2439 = vst.msk [vmem:[#allocation5 + $0x74] sm:$0xf] %vm11771_vm12, %v2372_v13  ;;  %vm11780_vm12 = vmmov %vm11777_vm4 }
 0x29c   : > { %v2627_v32 = vpop.permute.xlu0 %2626 }
 0x29d   : > { %v2376_v23 = vpop.permute.xlu1 %2375  ;;  %2695 = vst.msk [vmem:[#allocation5 + $0x70] sm:$0xf] %vm2666_vm11, %v2627_v32 }
 0x29e   : > { %2441 = vst.msk [vmem:[#allocation5 + $0x7c] sm:$0xf] %vm11773_vm9, %v2376_v23  ;;  %vm11782_vm9 = vmmov %vm11781_vm2 }
 0x2a0   : > { %v2631_v55 = vpop.permute.xlu0 %2630 }
 0x2a1   : > { %v2629_v6 = vpop.permute.xlu1 %2628  ;;  %2697 = vst.msk [vmem:[#allocation5 + $0x78] sm:$0xf] %vm2666_vm11, %v2631_v55 }
 0x2a2   : > { %2696 = vst.msk [vmem:[#allocation5 + $0x74] sm:$0xf] %vm2666_vm11, %v2629_v6 }
 0x2a4   : > { %v3751_v10 = vpop.permute.xlu0 %3750 }
 0x2a5   : > { %v2633_v43 = vpop.permute.xlu1 %2632  ;;  %8737 = vmatprep.mubr.msk.bf16.mxu1 %vm11774_vm7, %v3751_v10  ;;  %vm11783_vm7 = vmmov %vm11781_vm2 }
 0x2a6   : > { %2698 = vst.msk [vmem:[#allocation5 + $0x7c] sm:$0xf] %vm2666_vm11, %v2633_v43  ;;  %vm11778_vm11 = vmmov %vm11777_vm4 }
 0x2a9   : > { %v8899_v20 = vld [vmem:[#allocation5 + $0x70] sm:$0xff]  }
 0x2aa   : > { %8731 = vmatprep.mubr.msk.bf16.mxu0 %vm11775_vm8, %v8899_v20  ;;  %vm11784_vm8 = vmmov %vm11781_vm2 }
 0x2ad   : > { %v8900_v16 = vld [vmem:[#allocation5 + $0x78] sm:$0xff]  }
 0x2ae   : > { %8732 = vmatmul.mubr.msk.bf16.gmra.mxu0 %vm11776_vm10, %v8900_v16  ;;  %vm11785_vm10 = vmmov %vm11781_vm2 }
 0x2b2   : > { %v8721_v18 = vpop.f32.mrf.mxu0 }
 0x2b3   : > { %3064 = vst.msk [vmem:[%s10056_s19 + $0x90] sm:$0xff] %vm11777_vm4, %v8721_v18  ;;  %v4200_v12 = vcombine.high %v8721_v18, %v8721_v18  ;;  %v4207_v49 = vrot.slane %v8721_v18, %v10047_v60  ;;  %vm11786_vm4 = vmmov %vm11781_vm2 }
 0x2b4   : > { %v2982_v50 = vpop.f32.mrf.mxu0 }
 0x2b5   : > { %v4214_v58 = vrot.slane %v4200_v12, %v10047_v60  ;;  %v4215_v34 = vcombine.high %v4207_v49, %v4207_v49  ;;  %v4432_v21 = vpack.c.bf16 %v4207_v49, %v4207_v49  ;;  %3062 = vst.msk [vmem:[%s10056_s19 + $0x80] sm:$0xff] %vm11778_vm11, %v2982_v50  ;;  %v3230_v22 = vcombine.high %v2982_v50, %v2982_v50  ;;  %vm11787_vm11 = vmmov %vm11781_vm2 }
 0x2b6   : > { %v3237_v27 = vrot.slane %v2982_v50, %v10047_v60  ;;  %v8722_v28 = vpop.f32.mrf.mxu0 }
 0x2b7   : > { %v4216_v19 = vcombine.high %v4214_v58, %v4214_v58  ;;  %v4433_v30 = vpack.c.bf16 %v4215_v34, %v4215_v34  ;;  %v4434_v61 = vpack.c.bf16 %v4214_v58, %v4214_v58  ;;  %v4563_v3 = vunpack.c.l.b16 %v4432_v21  ;;  %3065 = vst.msk [vmem:[%s10056_s19 + $0x98] sm:$0xff] %vm11779_vm5, %v8722_v28  ;;  %vm11788_vm5 = vmmov %vm11781_vm2 }
 0x2b8   : > { %v3244_v31 = vrot.slane %v3230_v22, %v10047_v60  ;;  %v3245_v26 = vcombine.high %v3237_v27, %v3237_v27  ;;  %v3462_v33 = vpack.c.bf16 %v3237_v27, %v3237_v27  ;;  %v4217_v44 = vcombine.high %v8722_v28, %v8722_v28  ;;  %v2985_v15 = vpop.f32.mrf.mxu0 }
 0x2b9   : > { %v4435_v45 = vpack.c.bf16 %v4216_v19, %v4216_v19  ;;  %v4564_v46 = vunpack.c.l.b16 %v4433_v30  ;;  %v4565_v48 = vunpack.c.l.b16 %v4434_v61  ;;  %v4869_v47 = vrot.slane %v4563_v3, 1  ;;  %3063 = vst.msk [vmem:[%s10056_s19 + $0x88] sm:$0xff] %vm11780_vm12, %v2985_v15  ;;  %vm11789_vm12 = vmmov %vm11781_vm2 }
 0x2ba   : > { %v3246_v4 = vcombine.high %v3244_v31, %v3244_v31  ;;  %v3463_v41 = vpack.c.bf16 %v3245_v26, %v3245_v26  ;;  %v3464_v52 = vpack.c.bf16 %v3244_v31, %v3244_v31  ;;  %v3595_v56 = vunpack.c.l.b16 %v3462_v33 }
 0x2bb   : > { %v4566_v1 = vunpack.c.l.b16 %v4435_v45  ;;  %v4651_v62 = vrot.slane %v4564_v46, 7  ;;  %v4653_v11 = vrot.slane %v4565_v48, 6  ;;  %v4870_v51 = vsel %vm3628_vm14, %v4564_v46, %v4869_v47 }
 0x2bc   : > { %v4871_v63 = vrot.slane %v4565_v48, 7  ;;  %v3465_v35 = vpack.c.bf16 %v3246_v4, %v3246_v4  ;;  %v3596_v9 = vunpack.c.l.b16 %v3463_v41  ;;  %v3597_v13 = vunpack.c.l.b16 %v3464_v52 }
 0x2bd   : > { %v4652_v2 = vsel %vm3628_vm14, %v4651_v62, %v4563_v3  ;;  %v4655_v23 = vrot.slane %v4566_v1, 5  ;;  %v4873_v32 = vrot.slane %v4566_v1, 6  ;;  %v3690_v6 = vrot.slane %v3595_v56, 1 }
 0x2be   : > { %v4654_v55 = vsel %vm3631_vm15, %v4653_v11, %v4652_v2  ;;  %v4872_v43 = vsel %vm3631_vm15, %v4871_v63, %v4870_v51  ;;  %v3598_v10 = vunpack.c.l.b16 %v3465_v35  ;;  %v3692_v20 = vrot.slane %v3597_v13, 7 }
 0x2bf   : > { %v3691_v16 = vsel %vm3628_vm14, %v3596_v9, %v3690_v6  ;;  %v3897_v18 = vrot.slane %v3596_v9, 7  ;;  %v3899_v12 = vrot.slane %v3597_v13, 6  ;;  %v4224_v49 = vrot.slane %v8722_v28, %v10047_v60 }
 0x2c0   : > { %v3693_v50 = vsel %vm3631_vm15, %v3692_v20, %v3691_v16  ;;  %v3694_v58 = vrot.slane %v3598_v10, 6  ;;  %v3901_v34 = vrot.slane %v3598_v10, 5  ;;  %v4231_v21 = vrot.slane %v4217_v44, %v10047_v60 }
 0x2c1   : > { %v3898_v22 = vsel %vm3628_vm14, %v3897_v18, %v3595_v56  ;;  %v4232_v27 = vcombine.high %v4224_v49, %v4224_v49  ;;  %v4436_v19 = vpack.c.bf16 %v4224_v49, %v4224_v49  ;;  %v4656_v30 = vsel %vm3634_vm0, %v4655_v23, %v4654_v55 }
 0x2c2   : > { %v3900_v61 = vsel %vm3631_vm15, %v3899_v12, %v3898_v22  ;;  %v4233_v3 = vcombine.high %v4231_v21, %v4231_v21  ;;  %v4438_v31 = vpack.c.bf16 %v4231_v21, %v4231_v21  ;;  %v4874_v26 = vsel %vm3634_vm0, %v4873_v32, %v4872_v43 }
 0x2c3   : > { %v4437_v33 = vpack.c.bf16 %v4232_v27, %v4232_v27  ;;  %v4567_v28 = vunpack.c.l.b16 %v4436_v19  ;;  %v3247_v45 = vcombine.high %v2985_v15, %v2985_v15  ;;  %v3254_v46 = vrot.slane %v2985_v15, %v10047_v60 }
 0x2c4   : > { %v4439_v48 = vpack.c.bf16 %v4233_v3, %v4233_v3  ;;  %v4569_v47 = vunpack.c.l.b16 %v4438_v31  ;;  %v3695_v44 = vsel %vm3634_vm0, %v3694_v58, %v3693_v50  ;;  %v3902_v4 = vsel %vm3634_vm0, %v3901_v34, %v3900_v61 }
 0x2c5   : > { %v4568_v41 = vunpack.c.l.b16 %v4437_v33  ;;  %v4657_v52 = vrot.slane %v4567_v28, 4  ;;  %v4875_v56 = vrot.slane %v4567_v28, 5  ;;  %v3261_v1 = vrot.slane %v3247_v45, %v10047_v60 }
 0x2c6   : > { %v4570_v62 = vunpack.c.l.b16 %v4439_v48  ;;  %v4661_v11 = vrot.slane %v4569_v47, 2  ;;  %v4879_v51 = vrot.slane %v4569_v47, 3  ;;  %v3262_v63 = vcombine.high %v3254_v46, %v3254_v46 }
 0x2c7   : > { %v4658_v35 = vsel %vm3637_vm1, %v4657_v52, %v4656_v30  ;;  %v4659_v9 = vrot.slane %v4568_v41, 3  ;;  %v4876_v15 = vsel %vm3637_vm1, %v4875_v56, %v4874_v26  ;;  %v4877_v13 = vrot.slane %v4568_v41, 4 }
 0x2c8   : > { %v4663_v2 = vrot.slane %v4570_v62, 1  ;;  %v4881_v23 = vrot.slane %v4570_v62, 2  ;;  %v3263_v32 = vcombine.high %v3261_v1, %v3261_v1  ;;  %v3466_v6 = vpack.c.bf16 %v3254_v46, %v3254_v46 }
 0x2c9   : > { %v3467_v55 = vpack.c.bf16 %v3262_v63, %v3262_v63  ;;  %v3468_v43 = vpack.c.bf16 %v3261_v1, %v3261_v1  ;;  %v4660_v10 = vsel %vm3640_vm3, %v4659_v9, %v4658_v35  ;;  %v4878_v20 = vsel %vm3640_vm3, %v4877_v13, %v4876_v15 }
 0x2ca   : > { %v3469_v16 = vpack.c.bf16 %v3263_v32, %v3263_v32  ;;  %v3599_v18 = vunpack.c.l.b16 %v3466_v6  ;;  %v4662_v12 = vsel %vm3643_vm6, %v4661_v11, %v4660_v10  ;;  %v4880_v49 = vsel %vm3643_vm6, %v4879_v51, %v4878_v20 }
 0x2cb   : > { %v3600_v50 = vunpack.c.l.b16 %v3467_v55  ;;  %v3601_v58 = vunpack.c.l.b16 %v3468_v43  ;;  %v10665_v34 = vsel %vm11726_vm13, %v4663_v2, %v4662_v12  ;;  %v10668_v21 = vsel %vm11726_vm13, %v4881_v23, %v4880_v49 }
 0x2cc   : > { %v3602_v22 = vunpack.c.l.b16 %v3469_v16  ;;  %v3696_v27 = vrot.slane %v3599_v18, 5  ;;  %v3903_v19 = vrot.slane %v3599_v18, 4 }
 0x2cd   : > { %v3698_v30 = vrot.slane %v3600_v50, 4  ;;  %v3700_v61 = vrot.slane %v3601_v58, 3  ;;  %v3905_v3 = vrot.slane %v3600_v50, 3  ;;  %v3907_v31 = vrot.slane %v3601_v58, 2 }
 0x2ce   : > { %v3697_v26 = vsel %vm3637_vm1, %v3696_v27, %v3695_v44  ;;  %v3702_v33 = vrot.slane %v3602_v22, 2  ;;  %v3904_v28 = vsel %vm3637_vm1, %v3903_v19, %v3902_v4  ;;  %v3909_v45 = vrot.slane %v3602_v22, 1 }
 0x2cf   : > { %v3699_v46 = vsel %vm3640_vm3, %v3698_v30, %v3697_v26  ;;  %v3906_v48 = vsel %vm3640_vm3, %v3905_v3, %v3904_v28 }
 0x2d0   : > { %v3701_v47 = vsel %vm3643_vm6, %v3700_v61, %v3699_v46  ;;  %v3908_v41 = vsel %vm3643_vm6, %v3907_v31, %v3906_v48 }
 0x2d1   : > { %v10677_v52 = vsel %vm11726_vm13, %v3702_v33, %v3701_v47  ;;  %v10680_v56 = vsel %vm11726_vm13, %v3909_v45, %v3908_v41 }
 0x2f2   : > { %v8725_v44 = vpop.f32.mrf.mxu0 }
 0x2f3   : > { %3068 = vst.msk [vmem:[%s10056_s19 + $0xb0] sm:$0xff] %vm11781_vm2, %v8725_v44  ;;  %v4234_v62 = vcombine.high %v8725_v44, %v8725_v44  ;;  %v4241_v63 = vrot.slane %v8725_v44, %v10047_v60 }
 0x2f4   : > { %v2998_v4 = vpop.f32.mrf.mxu0 }
 0x2f5   : > { %3066 = vst.msk [vmem:[%s10056_s19 + $0xa0] sm:$0xff] %vm11782_vm9, %v2998_v4  ;;  %v3264_v1 = vcombine.high %v2998_v4, %v2998_v4  ;;  %v3271_v11 = vrot.slane %v2998_v4, %v10047_v60  ;;  %v4248_v2 = vrot.slane %v4234_v62, %v10047_v60  ;;  %v4249_v32 = vcombine.high %v4241_v63, %v4241_v63  ;;  %vm11790_vm9 = vmmov %vm11781_vm2 }
 0x2f6   : > { %v8726_v51 = vpop.f32.mrf.mxu0  ;;  %v4440_v22 = vpack.c.bf16 %v4241_v63, %v4241_v63 }
 0x2f7   : > { %3069 = vst.msk [vmem:[%s10056_s19 + $0xb8] sm:$0xff] %vm11783_vm7, %v8726_v51  ;;  %v3278_v35 = vrot.slane %v3264_v1, %v10047_v60  ;;  %v3279_v9 = vcombine.high %v3271_v11, %v3271_v11  ;;  %v3470_v13 = vpack.c.bf16 %v3271_v11, %v3271_v11  ;;  %v4250_v20 = vcombine.high %v4248_v2, %v4248_v2  ;;  %vm11791_vm7 = vmmov %vm11781_vm2 }
 0x2f8   : > { %v3001_v15 = vpop.f32.mrf.mxu0  ;;  %v4441_v16 = vpack.c.bf16 %v4249_v32, %v4249_v32  ;;  %v4442_v12 = vpack.c.bf16 %v4248_v2, %v4248_v2  ;;  %v4258_v46 = vrot.slane %v8726_v51, %v10047_v60  ;;  %v4571_v47 = vunpack.c.l.b16 %v4440_v22 }
 0x2f9   : > { %3067 = vst.msk [vmem:[%s10056_s19 + $0xa8] sm:$0xff] %vm11784_vm8, %v3001_v15  ;;  %v3471_v23 = vpack.c.bf16 %v3279_v9, %v3279_v9  ;;  %v3280_v6 = vcombine.high %v3278_v35, %v3278_v35  ;;  %v3472_v55 = vpack.c.bf16 %v3278_v35, %v3278_v35  ;;  %v3603_v43 = vunpack.c.l.b16 %v3470_v13  ;;  %vm11792_vm8 = vmmov %vm11781_vm2 }
 0x2fa   : > { %v4443_v27 = vpack.c.bf16 %v4250_v20, %v4250_v20  ;;  %v10694_v19 = vunpack.c.l.b16 %v4441_v16  ;;  %v3281_v61 = vcombine.high %v3001_v15, %v3001_v15  ;;  %v3288_v3 = vrot.slane %v3001_v15, %v10047_v60 }
 0x2fb   : > { %v3604_v10 = vunpack.c.l.b16 %v3471_v23  ;;  %v3473_v18 = vpack.c.bf16 %v3280_v6, %v3280_v6  ;;  %v3605_v49 = vunpack.c.l.b16 %v3472_v55  ;;  %v3704_v50 = vrot.slane %v3603_v43, 1 }
 0x2fc   : > { %v10697_v31 = vunpack.c.l.b16 %v4442_v12  ;;  %v3295_v48 = vrot.slane %v3281_v61, %v10047_v60  ;;  %v4251_v41 = vcombine.high %v8726_v51, %v8726_v51  ;;  %v3296_v44 = vcombine.high %v3288_v3, %v3288_v3 }
 0x2fd   : > { %v3911_v58 = vrot.slane %v3604_v10, 7  ;;  %v3606_v30 = vunpack.c.l.b16 %v3473_v18  ;;  %v3706_v26 = vrot.slane %v3605_v49, 7  ;;  %v3913_v33 = vrot.slane %v3605_v49, 6 }
 0x2fe   : > { %v3705_v28 = vsel %vm3628_vm14, %v3604_v10, %v3704_v50  ;;  %v10703_v1 = vunpack.c.l.b16 %v4443_v27  ;;  %v4665_v62 = vrot.slane %v10694_v19, 7  ;;  %v3297_v15 = vcombine.high %v3295_v48, %v3295_v48 }
 0x2ff   : > { %v3912_v45 = vsel %vm3628_vm14, %v3911_v58, %v3603_v43  ;;  %v3708_v11 = vrot.slane %v3606_v30, 6  ;;  %v3915_v63 = vrot.slane %v3606_v30, 5  ;;  %v3707_v35 = vsel %vm3631_vm15, %v3706_v26, %v3705_v28 }
 0x300   : > { %v3914_v9 = vsel %vm3631_vm15, %v3913_v33, %v3912_v45  ;;  %v3474_v13 = vpack.c.bf16 %v3288_v3, %v3288_v3  ;;  %v4667_v2 = vrot.slane %v10697_v31, 6  ;;  %v4266_v23 = vcombine.high %v4258_v46, %v4258_v46 }
 0x301   : > { %v3475_v51 = vpack.c.bf16 %v3296_v44, %v3296_v44  ;;  %v3476_v32 = vpack.c.bf16 %v3295_v48, %v3295_v48  ;;  %v4265_v6 = vrot.slane %v4251_v41, %v10047_v60  ;;  %v4444_v55 = vpack.c.bf16 %v4258_v46, %v4258_v46 }
 0x302   : > { %v3477_v43 = vpack.c.bf16 %v3297_v15, %v3297_v15  ;;  %v3607_v10 = vunpack.c.l.b16 %v3474_v13  ;;  %v3709_v18 = vsel %vm3634_vm0, %v3708_v11, %v3707_v35  ;;  %v3916_v12 = vsel %vm3634_vm0, %v3915_v63, %v3914_v9 }
 0x303   : > { %v3608_v20 = vunpack.c.l.b16 %v3475_v51  ;;  %v3609_v16 = vunpack.c.l.b16 %v3476_v32  ;;  %v4666_v49 = vsel %vm3628_vm14, %v4665_v62, %v4571_v47  ;;  %v4445_v27 = vpack.c.bf16 %v4266_v23, %v4266_v23 }
 0x304   : > { %v3610_v50 = vunpack.c.l.b16 %v3477_v43  ;;  %v3710_v58 = vrot.slane %v3607_v10, 5  ;;  %v3917_v22 = vrot.slane %v3607_v10, 4  ;;  %v4575_v26 = vunpack.c.l.b16 %v4444_v55 }
 0x305   : > { %v3712_v30 = vrot.slane %v3608_v20, 4  ;;  %v3714_v61 = vrot.slane %v3609_v16, 3  ;;  %v3919_v3 = vrot.slane %v3608_v20, 3  ;;  %v4669_v46 = vrot.slane %v10703_v1, 5 }
 0x306   : > { %v3753_v4 = vpop.permute.xlu1 %3752  ;;  %v3711_v33 = vsel %vm3637_vm1, %v3710_v58, %v3709_v18  ;;  %v3716_v28 = vrot.slane %v3610_v50, 2  ;;  %v3918_v45 = vsel %vm3637_vm1, %v3917_v22, %v3916_v12  ;;  %v4267_v48 = vcombine.high %v4265_v6, %v4265_v6 }
 0x307   : > { %8738 = vmatmul.mubr.msk.bf16.vlgmr.msra.gmra.mxu1 %vm11785_vm10, %v3753_v4  ;;  %v3713_v41 = vsel %vm3640_vm3, %v3712_v30, %v3711_v33  ;;  %v4668_v44 = vsel %vm3631_vm15, %v4667_v2, %v4666_v49  ;;  %v4446_v4 = vpack.c.bf16 %v4265_v6, %v4265_v6  ;;  %v3921_v62 = vrot.slane %v3609_v16, 2  ;;  %vm11793_vm10 = vmmov %vm11781_vm2 }
 0x308   : > { %v3715_v11 = vsel %vm3643_vm6, %v3714_v61, %v3713_v41  ;;  %v4883_v63 = vrot.slane %v4571_v47, 1  ;;  %v4576_v35 = vunpack.c.l.b16 %v4445_v27  ;;  %v3920_v15 = vsel %vm3640_vm3, %v3919_v3, %v3918_v45 }
 0x309   : > { %v3717_v9 = vsel %vm11726_vm13, %v3716_v28, %v3715_v11  ;;  %v4671_v13 = vrot.slane %v4575_v26, 4  ;;  %v4447_v51 = vpack.c.bf16 %v4267_v48, %v4267_v48  ;;  %v4670_v32 = vsel %vm3634_vm0, %v4669_v46, %v4668_v44 }
 0x30a   : > { %v3748_v23 = vpack.c.b16 %v3717_v9, %v10677_v52  ;;  %v3923_v55 = vrot.slane %v3610_v50, 1  ;;  %v4885_v43 = vrot.slane %v10697_v31, 7  ;;  %v4577_v2 = vunpack.c.l.b16 %v4446_v4 }
 0x30b   : > { %v3922_v6 = vsel %vm3643_vm6, %v3921_v62, %v3920_v15  ;;  %v4884_v47 = vsel %vm3628_vm14, %v10694_v19, %v4883_v63  ;;  %v4673_v10 = vrot.slane %v4576_v35, 3  ;;  %v4672_v20 = vsel %vm3637_vm1, %v4671_v13, %v4670_v32 }
 0x30c   : > { %3754 = vrot.lane.b32.xlu0 %v3748_v23, %s9125_s17  ;;  %v4887_v16 = vrot.slane %v10703_v1, 6  ;;  %v4578_v52 = vunpack.c.l.b16 %v4447_v51  ;;  %v3924_v18 = vsel %vm11726_vm13, %v3923_v55, %v3922_v6  ;;  %v4886_v12 = vsel %vm3631_vm15, %v4885_v43, %v4884_v47 }
 0x30d   : > { %v4675_v49 = vrot.slane %v4577_v2, 2  ;;  %v4674_v31 = vsel %vm3640_vm3, %v4673_v10, %v4672_v20  ;;  %v4889_v50 = vrot.slane %v4575_v26, 5  ;;  %v3955_v19 = vpack.c.b16 %v3924_v18, %v10680_v56 }
 0x30e   : > { %v4677_v58 = vrot.slane %v4578_v52, 1  ;;  %v4888_v22 = vsel %vm3634_vm0, %v4887_v16, %v4886_v12  ;;  %v4891_v27 = vrot.slane %v4576_v35, 4  ;;  %v4893_v39 = vrot.slane %v4577_v2, 3 }
 0x30f   : > { %v4676_v1 = vsel %vm3643_vm6, %v4675_v49, %v4674_v31  ;;  %v4890_v30 = vsel %vm3637_vm1, %v4889_v50, %v4888_v22  ;;  %v4895_v56 = vrot.slane %v4578_v52, 2 }
 0x310   : > { %3957 = vrot.lane.b32.xlu0 %v3953_v54, %s9125_s17  ;;  %v4678_v61 = vsel %vm11726_vm13, %v4677_v58, %v4676_v1  ;;  %v4892_v42 = vsel %vm3640_vm3, %v4891_v27, %v4890_v30 }
 0x311   : > { %v4709_v54 = vpack.c.b16 %v4678_v61, %v10665_v34  ;;  %v4894_v3 = vsel %vm3643_vm6, %v4893_v39, %v4892_v42 }
 0x312   : > { %v4896_v26 = vsel %vm11726_vm13, %v4895_v56, %v4894_v3 }
 0x313   : > { %v4927_v40 = vpack.c.b16 %v4896_v26, %v10668_v21 }
 0x314   : > { %3961 = vrot.lane.b32.xlu0 %v3955_v19, %s9125_s17 }
 0x318   : > { %4711 = vrot.lane.b32.xlu0 %v4707_v24, %s9125_s17 }
 0x31c   : > { %4715 = vrot.lane.b32.xlu0 %v4709_v54, %s9125_s17 }
 0x320   : > { %4929 = vrot.lane.b32.xlu0 %v4925_v36, %s9125_s17 }
 0x324   : > { %4933 = vrot.lane.b32.xlu0 %v4927_v40, %s9125_s17 }
 0x332   : > { %v8729_v8 = vpop.f32.mrf.mxu0 }
 0x333   : > { %3072 = vst.msk [vmem:[%s10056_s19 + $0xd0] sm:$0xff] %vm11786_vm4, %v8729_v8  ;;  %v4268_v24 = vcombine.high %v8729_v8, %v8729_v8  ;;  %v4275_v34 = vrot.slane %v8729_v8, %v10047_v60  ;;  %vm11794_vm4 = vmmov %vm11781_vm2 }
 0x334   : > { %v3014_v33 = vpop.f32.mrf.mxu0 }
 0x335   : > { %v4282_v28 = vrot.slane %v4268_v24, %v10047_v60  ;;  %v4283_v45 = vcombine.high %v4275_v34, %v4275_v34  ;;  %v4448_v46 = vpack.c.bf16 %v4275_v34, %v4275_v34  ;;  %3070 = vst.msk [vmem:[%s10056_s19 + $0xc0] sm:$0xff] %vm11787_vm11, %v3014_v33  ;;  %v3298_v5 = vcombine.high %v3014_v33, %v3014_v33  ;;  %vm11795_vm11 = vmmov %vm11781_vm2 }
 0x336   : > { %v3305_v14 = vrot.slane %v3014_v33, %v10047_v60  ;;  %v8730_v36 = vpop.f32.mrf.mxu0 }
 0x337   : > { %v4284_v21 = vcombine.high %v4282_v28, %v4282_v28  ;;  %v4449_v48 = vpack.c.bf16 %v4283_v45, %v4283_v45  ;;  %v4450_v41 = vpack.c.bf16 %v4282_v28, %v4282_v28  ;;  %v4579_v44 = vunpack.c.l.b16 %v4448_v46  ;;  %3073 = vst.msk [vmem:[%s10056_s19 + $0xd8] sm:$0xff] %vm11788_vm5, %v8730_v36  ;;  %vm11796_vm5 = vmmov %vm11781_vm2 }
 0x338   : > { %v3312_v4 = vrot.slane %v3298_v5, %v10047_v60  ;;  %v3313_v62 = vcombine.high %v3305_v14, %v3305_v14  ;;  %v3478_v11 = vpack.c.bf16 %v3305_v14, %v3305_v14  ;;  %v4285_v63 = vcombine.high %v8730_v36, %v8730_v36  ;;  %v3017_v35 = vpop.f32.mrf.mxu0 }
 0x339   : > { %v4451_v9 = vpack.c.bf16 %v4284_v21, %v4284_v21  ;;  %v4580_v15 = vunpack.c.l.b16 %v4449_v48  ;;  %v4581_v13 = vunpack.c.l.b16 %v4450_v41  ;;  %v4897_v23 = vrot.slane %v4579_v44, 1  ;;  %3071 = vst.msk [vmem:[%s10056_s19 + $0xc8] sm:$0xff] %vm11789_vm12, %v3017_v35  ;;  %vm11797_vm12 = vmmov %vm11781_vm2 }
 0x33a   : > { %v3314_v51 = vcombine.high %v3312_v4, %v3312_v4  ;;  %v3479_v32 = vpack.c.bf16 %v3313_v62, %v3313_v62  ;;  %v3480_v55 = vpack.c.bf16 %v3312_v4, %v3312_v4  ;;  %v3611_v43 = vunpack.c.l.b16 %v3478_v11 }
 0x33b   : > { %v4582_v2 = vunpack.c.l.b16 %v4451_v9  ;;  %v4679_v6 = vrot.slane %v4580_v15, 7  ;;  %v4681_v47 = vrot.slane %v4581_v13, 6  ;;  %v4898_v10 = vsel %vm3628_vm14, %v4580_v15, %v4897_v23 }
 0x33c   : > { %v4899_v20 = vrot.slane %v4581_v13, 7  ;;  %v3481_v16 = vpack.c.bf16 %v3314_v51, %v3314_v51  ;;  %v3612_v52 = vunpack.c.l.b16 %v3479_v32  ;;  %v3613_v18 = vunpack.c.l.b16 %v3480_v55 }
 0x33d   : > { %v4680_v12 = vsel %vm3628_vm14, %v4679_v6, %v4579_v44  ;;  %v4683_v49 = vrot.slane %v4582_v2, 5  ;;  %v4901_v31 = vrot.slane %v4582_v2, 6  ;;  %v3718_v50 = vrot.slane %v3611_v43, 1 }
 0x33e   : > { %v4682_v19 = vsel %vm3631_vm15, %v4681_v47, %v4680_v12  ;;  %v4900_v58 = vsel %vm3631_vm15, %v4899_v20, %v4898_v10  ;;  %v3614_v22 = vunpack.c.l.b16 %v3481_v16  ;;  %v3720_v1 = vrot.slane %v3613_v18, 7 }
 0x33f   : > { %v3719_v27 = vsel %vm3628_vm14, %v3612_v52, %v3718_v50  ;;  %v3925_v30 = vrot.slane %v3612_v52, 7  ;;  %v3927_v61 = vrot.slane %v3613_v18, 6  ;;  %v4292_v39 = vrot.slane %v8730_v36, %v10047_v60 }
 0x340   : > { %v3721_v42 = vsel %vm3631_vm15, %v3720_v1, %v3719_v27  ;;  %v3722_v54 = vrot.slane %v3614_v22, 6  ;;  %v3929_v56 = vrot.slane %v3614_v22, 5  ;;  %v4299_v3 = vrot.slane %v4285_v63, %v10047_v60 }
 0x341   : > { %v3926_v26 = vsel %vm3628_vm14, %v3925_v30, %v3611_v43  ;;  %v4300_v40 = vcombine.high %v4292_v39, %v4292_v39  ;;  %v4452_v8 = vpack.c.bf16 %v4292_v39, %v4292_v39  ;;  %v4684_v24 = vsel %vm3634_vm0, %v4683_v49, %v4682_v19 }
 0x342   : > { %v3928_v34 = vsel %vm3631_vm15, %v3927_v61, %v3926_v26  ;;  %v4301_v33 = vcombine.high %v4299_v3, %v4299_v3  ;;  %v4454_v28 = vpack.c.bf16 %v4299_v3, %v4299_v3  ;;  %v4902_v45 = vsel %vm3634_vm0, %v4901_v31, %v4900_v58 }
 0x343   : > { %v4453_v46 = vpack.c.bf16 %v4300_v40, %v4300_v40  ;;  %v4583_v5 = vunpack.c.l.b16 %v4452_v8  ;;  %v3315_v14 = vcombine.high %v3017_v35, %v3017_v35  ;;  %v3322_v36 = vrot.slane %v3017_v35, %v10047_v60 }
 0x344   : > { %v4455_v21 = vpack.c.bf16 %v4301_v33, %v4301_v33  ;;  %v4585_v48 = vunpack.c.l.b16 %v4454_v28  ;;  %v3723_v41 = vsel %vm3634_vm0, %v3722_v54, %v3721_v42  ;;  %v3930_v44 = vsel %vm3634_vm0, %v3929_v56, %v3928_v34  ;;  %v8902_v56 = vld [vmem:[%s11706_s2] sm:$0xff]  }
 0x345   : > { %v4584_v4 = vunpack.c.l.b16 %v4453_v46  ;;  %v4685_v62 = vrot.slane %v4583_v5, 4  ;;  %v4903_v11 = vrot.slane %v4583_v5, 5  ;;  %v3329_v63 = vrot.slane %v3315_v14, %v10047_v60  ;;  %8745 = vmatprep.subr.bf16.mxu1 %v8902_v56 }
 0x346   : > { %v4586_v9 = vunpack.c.l.b16 %v4455_v21  ;;  %v4689_v15 = vrot.slane %v4585_v48, 2  ;;  %v4907_v13 = vrot.slane %v4585_v48, 3  ;;  %v3330_v23 = vcombine.high %v3322_v36, %v3322_v36  ;;  %8746 = vmatpush3.bf16.msra.mxu1 %v8902_v56 }
 0x347   : > { %v4686_v51 = vsel %vm3637_vm1, %v4685_v62, %v4684_v24  ;;  %v4687_v32 = vrot.slane %v4584_v4, 3  ;;  %v4904_v35 = vsel %vm3637_vm1, %v4903_v11, %v4902_v45  ;;  %v4905_v55 = vrot.slane %v4584_v4, 4 }
 0x348   : > { %v4691_v43 = vrot.slane %v4586_v9, 1  ;;  %v4909_v2 = vrot.slane %v4586_v9, 2  ;;  %v3331_v6 = vcombine.high %v3329_v63, %v3329_v63  ;;  %v3482_v47 = vpack.c.bf16 %v3322_v36, %v3322_v36 }
 0x349   : > { %v3483_v10 = vpack.c.bf16 %v3330_v23, %v3330_v23  ;;  %v3484_v20 = vpack.c.bf16 %v3329_v63, %v3329_v63  ;;  %v4688_v16 = vsel %vm3640_vm3, %v4687_v32, %v4686_v51  ;;  %v4906_v52 = vsel %vm3640_vm3, %v4905_v55, %v4904_v35 }
 0x34a   : > { %v3485_v18 = vpack.c.bf16 %v3331_v6, %v3331_v6  ;;  %v3615_v12 = vunpack.c.l.b16 %v3482_v47  ;;  %v4690_v49 = vsel %vm3643_vm6, %v4689_v15, %v4688_v16  ;;  %v4908_v31 = vsel %vm3643_vm6, %v4907_v13, %v4906_v52 }
 0x34b   : > { %v3616_v50 = vunpack.c.l.b16 %v3483_v10  ;;  %v3617_v19 = vunpack.c.l.b16 %v3484_v20  ;;  %v10794_v58 = vsel %vm11726_vm13, %v4691_v43, %v4690_v49  ;;  %v10797_v22 = vsel %vm11726_vm13, %v4909_v2, %v4908_v31 }
 0x34c   : > { %v3618_v1 = vunpack.c.l.b16 %v3485_v18  ;;  %v3724_v27 = vrot.slane %v3615_v12, 5  ;;  %v3931_v30 = vrot.slane %v3615_v12, 4 }
 0x34d   : > { %v3726_v61 = vrot.slane %v3616_v50, 4  ;;  %v3728_v39 = vrot.slane %v3617_v19, 3  ;;  %v3933_v42 = vrot.slane %v3616_v50, 3  ;;  %v3935_v54 = vrot.slane %v3617_v19, 2 }
 0x34e   : > { %v3725_v3 = vsel %vm3637_vm1, %v3724_v27, %v3723_v41  ;;  %v3730_v26 = vrot.slane %v3618_v1, 2  ;;  %v3932_v40 = vsel %vm3637_vm1, %v3931_v30, %v3930_v44  ;;  %v3937_v8 = vrot.slane %v3618_v1, 1 }
 0x34f   : > { %v3727_v24 = vsel %vm3640_vm3, %v3726_v61, %v3725_v3  ;;  %v3934_v34 = vsel %vm3640_vm3, %v3933_v42, %v3932_v40 }
 0x350   : > { %v3729_v33 = vsel %vm3643_vm6, %v3728_v39, %v3727_v24  ;;  %v3936_v28 = vsel %vm3643_vm6, %v3935_v54, %v3934_v34 }
 0x351   : > { %v10809_v45 = vsel %vm11726_vm13, %v3730_v26, %v3729_v33  ;;  %v10812_v46 = vsel %vm11726_vm13, %v3937_v8, %v3936_v28 }
 0x36e   : > { %v8733_v5 = vpop.f32.mrf.mxu0 }
 0x36f   : > { %3076 = vst.msk [vmem:[%s10056_s19 + $0xf0] sm:$0xff] %vm11781_vm2, %v8733_v5  ;;  %v4302_v21 = vcombine.high %v8733_v5, %v8733_v5  ;;  %v4309_v44 = vrot.slane %v8733_v5, %v10047_v60 }
 0x370   : > { %v3030_v14 = vpop.f32.mrf.mxu0 }
 0x371   : > { %3074 = vst.msk [vmem:[%s10056_s19 + $0xe0] sm:$0xff] %vm11790_vm9, %v3030_v14  ;;  %v3332_v36 = vcombine.high %v3030_v14, %v3030_v14  ;;  %v3339_v48 = vrot.slane %v3030_v14, %v10047_v60  ;;  %v4316_v9 = vrot.slane %v4302_v21, %v10047_v60  ;;  %v4317_v13 = vcombine.high %v4309_v44, %v4309_v44  ;;  %vm11798_vm9 = vmmov %vm11781_vm2 }
 0x372   : > { %v8734_v41 = vpop.f32.mrf.mxu0  ;;  %v4456_v16 = vpack.c.bf16 %v4309_v44, %v4309_v44 }
 0x373   : > { %3077 = vst.msk [vmem:[%s10056_s19 + $0xf8] sm:$0xff] %vm11791_vm7, %v8734_v41  ;;  %v3346_v4 = vrot.slane %v3332_v36, %v10047_v60  ;;  %v3347_v62 = vcombine.high %v3339_v48, %v3339_v48  ;;  %v3486_v63 = vpack.c.bf16 %v3339_v48, %v3339_v48  ;;  %v4318_v55 = vcombine.high %v4316_v9, %v4316_v9  ;;  %vm11799_vm7 = vmmov %vm11781_vm2 }
 0x374   : > { %v3033_v11 = vpop.f32.mrf.mxu0  ;;  %v4457_v43 = vpack.c.bf16 %v4317_v13, %v4317_v13  ;;  %v4458_v6 = vpack.c.bf16 %v4316_v9, %v4316_v9  ;;  %v4326_v61 = vrot.slane %v8734_v41, %v10047_v60  ;;  %v4587_v42 = vunpack.c.l.b16 %v4456_v16 }
 0x375   : > { %3075 = vst.msk [vmem:[%s10056_s19 + $0xe8] sm:$0xff] %vm11792_vm8, %v3033_v11  ;;  %v3487_v15 = vpack.c.bf16 %v3347_v62, %v3347_v62  ;;  %v3348_v23 = vcombine.high %v3346_v4, %v3346_v4  ;;  %v3488_v51 = vpack.c.bf16 %v3346_v4, %v3346_v4  ;;  %v3619_v32 = vunpack.c.l.b16 %v3486_v63  ;;  %vm11800_vm8 = vmmov %vm11781_vm2  ;;  %s9027_s19 = sshll.u32 %s9132_s13, 4  ;;  %s9028_s19 = int_to_ptr.vmem [resolvable:$false] %s9027_s19 }
 0x376   : > { %v4459_v52 = vpack.c.bf16 %v4318_v55, %v4318_v55  ;;  %v10826_v18 = vunpack.c.l.b16 %v4457_v43  ;;  %v3349_v49 = vcombine.high %v3033_v11, %v3033_v11  ;;  %v3356_v31 = vrot.slane %v3033_v11, %v10047_v60  ;;  %v10845_v11 = vld [vmem:[%s11706_s2 + $0x10] sm:$0xff]  }
 0x377   : > { %v3620_v35 = vunpack.c.l.b16 %v3487_v15  ;;  %v3489_v2 = vpack.c.bf16 %v3348_v23, %v3348_v23  ;;  %v3621_v47 = vunpack.c.l.b16 %v3488_v51  ;;  %v3732_v10 = vrot.slane %v3619_v32, 1  ;;  %8755 = vmatprep.subr.bf16.mxu1 %v10845_v11 }
 0x378   : > { %v10829_v50 = vunpack.c.l.b16 %v4458_v6  ;;  %v3363_v39 = vrot.slane %v3349_v49, %v10047_v60  ;;  %v4319_v54 = vcombine.high %v8734_v41, %v8734_v41  ;;  %v3364_v56 = vcombine.high %v3356_v31, %v3356_v31 }
 0x379   : > { %v3939_v20 = vrot.slane %v3620_v35, 7  ;;  %v3622_v12 = vunpack.c.l.b16 %v3489_v2  ;;  %v3734_v19 = vrot.slane %v3621_v47, 7  ;;  %v3941_v1 = vrot.slane %v3621_v47, 6 }
 0x37a   : > { %v3733_v27 = vsel %vm3628_vm14, %v3620_v35, %v3732_v10  ;;  %v10835_v3 = vunpack.c.l.b16 %v4459_v52  ;;  %v4693_v26 = vrot.slane %v10826_v18, 7  ;;  %v3365_v33 = vcombine.high %v3363_v39, %v3363_v39 }
 0x37b   : > { %v3940_v30 = vsel %vm3628_vm14, %v3939_v20, %v3619_v32  ;;  %v3736_v40 = vrot.slane %v3622_v12, 6  ;;  %v3943_v8 = vrot.slane %v3622_v12, 5  ;;  %v3735_v24 = vsel %vm3631_vm15, %v3734_v19, %v3733_v27 }
 0x37c   : > { %v3942_v34 = vsel %vm3631_vm15, %v3941_v1, %v3940_v30  ;;  %v3490_v28 = vpack.c.bf16 %v3356_v31, %v3356_v31  ;;  %v4695_v5 = vrot.slane %v10829_v50, 6  ;;  %v4334_v14 = vcombine.high %v4326_v61, %v4326_v61 }
 0x37d   : > { %v3491_v36 = vpack.c.bf16 %v3364_v56, %v3364_v56  ;;  %v3492_v21 = vpack.c.bf16 %v3363_v39, %v3363_v39  ;;  %v4333_v48 = vrot.slane %v4319_v54, %v10047_v60  ;;  %v4460_v41 = vpack.c.bf16 %v4326_v61, %v4326_v61 }
 0x37e   : > { %v3493_v44 = vpack.c.bf16 %v3365_v33, %v3365_v33  ;;  %v3623_v4 = vunpack.c.l.b16 %v3490_v28  ;;  %v3755_v62 = vpop.permute.xlu0 %3754  ;;  %v3737_v15 = vsel %vm3634_vm0, %v3736_v40, %v3735_v24  ;;  %v3944_v13 = vsel %vm3634_vm0, %v3943_v8, %v3942_v34 }
 0x37f   : > { %v3624_v63 = vunpack.c.l.b16 %v3491_v36  ;;  %v3625_v9 = vunpack.c.l.b16 %v3492_v21  ;;  %8741 = vmatprep.mubr.msk.bf16.mxu1 %vm11793_vm10, %v3755_v62  ;;  %v4694_v23 = vsel %vm3628_vm14, %v4693_v26, %v4587_v42  ;;  %v4461_v55 = vpack.c.bf16 %v4334_v14, %v4334_v14  ;;  %vm11801_vm10 = vmmov %vm11781_vm2 }
 0x380   : > { %v3626_v51 = vunpack.c.l.b16 %v3493_v44  ;;  %v3738_v32 = vrot.slane %v3623_v4, 5  ;;  %v3945_v35 = vrot.slane %v3623_v4, 4  ;;  %v4591_v47 = vunpack.c.l.b16 %v4460_v41 }
 0x381   : > { %v3740_v43 = vrot.slane %v3624_v63, 4  ;;  %v3742_v2 = vrot.slane %v3625_v9, 3  ;;  %v3947_v6 = vrot.slane %v3624_v63, 3  ;;  %v4697_v52 = vrot.slane %v10835_v3, 5 }
 0x382   : > { %v3739_v10 = vsel %vm3637_vm1, %v3738_v32, %v3737_v15  ;;  %v3744_v20 = vrot.slane %v3626_v51, 2  ;;  %v3946_v16 = vsel %vm3637_vm1, %v3945_v35, %v3944_v13  ;;  %v4335_v12 = vcombine.high %v4333_v48, %v4333_v48  ;;  %v3958_v17 = vpop.permute.xlu0 %3957 }
 0x383   : > { %v3741_v49 = vsel %vm3640_vm3, %v3740_v43, %v3739_v10  ;;  %v4696_v31 = vsel %vm3631_vm15, %v4695_v5, %v4694_v23  ;;  %v4462_v19 = vpack.c.bf16 %v4333_v48, %v4333_v48  ;;  %v3949_v1 = vrot.slane %v3625_v9, 2 }
 0x384   : > { %v3743_v27 = vsel %vm3643_vm6, %v3742_v2, %v3741_v49  ;;  %v4911_v30 = vrot.slane %v4587_v42, 1  ;;  %v4592_v61 = vunpack.c.l.b16 %v4461_v55  ;;  %v3948_v54 = vsel %vm3640_vm3, %v3947_v6, %v3946_v16 }
 0x385   : > { %v3745_v39 = vsel %vm11726_vm13, %v3744_v20, %v3743_v27  ;;  %v4699_v56 = vrot.slane %v4591_v47, 4  ;;  %v4463_v40 = vpack.c.bf16 %v4335_v12, %v4335_v12  ;;  %v4698_v8 = vsel %vm3634_vm0, %v4697_v52, %v4696_v31 }
 0x386   : > { %v3749_v26 = vpack.c.b16 %v3745_v39, %v10809_v45  ;;  %v3951_v24 = vrot.slane %v3626_v51, 1  ;;  %v4913_v34 = vrot.slane %v10829_v50, 7  ;;  %v4593_v33 = vunpack.c.l.b16 %v4462_v19  ;;  %v3962_v32 = vpop.permute.xlu0 %3961 }
 0x387   : > { %v3950_v28 = vsel %vm3643_vm6, %v3949_v1, %v3948_v54  ;;  %v4912_v42 = vsel %vm3628_vm14, %v10826_v18, %v4911_v30  ;;  %v4701_v5 = vrot.slane %v4592_v61, 3  ;;  %v4700_v14 = vsel %vm3637_vm1, %v4699_v56, %v4698_v8 }
 0x388   : > { %3756 = vrot.lane.b32.xlu1 %v3749_v26, %s9125_s17  ;;  %v4915_v36 = vrot.slane %v10835_v3, 6  ;;  %v4594_v45 = vunpack.c.l.b16 %v4463_v40  ;;  %v3952_v21 = vsel %vm11726_vm13, %v3951_v24, %v3950_v28  ;;  %v4914_v48 = vsel %vm3631_vm15, %v4913_v34, %v4912_v42 }
 0x389   : > { %v4703_v41 = vrot.slane %v4593_v33, 2  ;;  %v4702_v50 = vsel %vm3640_vm3, %v4701_v5, %v4700_v14  ;;  %v4917_v44 = vrot.slane %v4591_v47, 5  ;;  %v3956_v18 = vpack.c.b16 %v3952_v21, %v10812_v46 }
 0x38a   : > { %v4705_v4 = vrot.slane %v4594_v45, 1  ;;  %v4916_v62 = vsel %vm3634_vm0, %v4915_v36, %v4914_v48  ;;  %v4919_v63 = vrot.slane %v4592_v61, 4  ;;  %v4921_v13 = vrot.slane %v4593_v33, 3  ;;  %v4712_v29 = vpop.permute.xlu0 %4711 }
 0x38b   : > { %v4704_v3 = vsel %vm3643_vm6, %v4703_v41, %v4702_v50  ;;  %v4918_v9 = vsel %vm3637_vm1, %v4917_v44, %v4916_v62 }
 0x38c   : > { %3959 = vrot.lane.b32.xlu1 %v3954_v37, %s9125_s17  ;;  %v4706_v15 = vsel %vm11726_vm13, %v4705_v4, %v4704_v3  ;;  %v4920_v59 = vsel %vm3640_vm3, %v4919_v63, %v4918_v9  ;;  %v4923_v37 = vrot.slane %v4594_v45, 2 }
 0x38d   : > { %v4710_v53 = vpack.c.b16 %v4706_v15, %v10794_v58  ;;  %v4922_v46 = vsel %vm3643_vm6, %v4921_v13, %v4920_v59 }
 0x38e   : > { %v4924_v23 = vsel %vm11726_vm13, %v4923_v37, %v4922_v46  ;;  %vm5443_vm13 = vcmask 916480  }
 0x38f   : > { %v4928_v51 = vpack.c.b16 %v4924_v23, %v10797_v22  ;;  %v4716_v22 = vpop.permute.xlu0 %4715 }
 0x390   : > { %3963 = vrot.lane.b32.xlu1 %v3956_v18, %s9125_s17 }
 0x393   : > { %v4930_v55 = vpop.permute.xlu0 %4929 }
 0x394   : > { %4713 = vrot.lane.b32.xlu1 %v4708_v25, %s9125_s17  ;;  %v8904_v25 = vld [vmem:[%s11706_s2 + $0x18] sm:$0xff]  }
 0x397   : > { %v4934_v43 = vpop.permute.xlu0 %4933 }
 0x398   : > { %4717 = vrot.lane.b32.xlu1 %v4710_v53, %s9125_s17 }
 0x39c   : > { %4931 = vrot.lane.b32.xlu1 %v4926_v7, %s9125_s17 }
 0x3a0   : > { %4935 = vrot.lane.b32.xlu1 %v4928_v51, %s9125_s17 }
 0x3c7   : > { %v8739_v16 = vpop.f32.mrf.mxu1 }
 0x3c9   : > { %v3810_v52 = vpop.f32.mrf.mxu1 }
 0x3cb   : > { %v8740_v12 = vpop.f32.mrf.mxu1 }
 0x3cd   : > { %v3813_v49 = vpop.f32.mrf.mxu1 }
 0x3fa   : > { %v3757_v57 = vpop.permute.xlu1 %3756 }
 0x3fb   : > { %8742 = vmatmul.mubr.msk.bf16.gmra.mxu1 %vm11794_vm4, %v3757_v57  ;;  %vm11802_vm4 = vmmov %vm11781_vm2 }
 0x3fc   : > { %8747 = vmatprep.mubr.msk.bf16.mxu1 %vm11795_vm11, %v3958_v17  ;;  %vm11803_vm11 = vmmov %vm11781_vm2 }
 0x3fe   : > { %v3960_v58 = vpop.permute.xlu1 %3959 }
 0x402   : > { %v3964_v38 = vpop.permute.xlu1 %3963 }
 0x403   : > { %8748 = vmatmul.mubr.msk.bf16.vlgmr.msra.gmra.mxu1 %vm11796_vm5, %v3960_v58  ;;  %vm11804_vm5 = vmmov %vm11781_vm2 }
 0x404   : > { %8756 = vmatpush3.bf16.msra.mxu1 %v10845_v11  ;;  %8751 = vmatprep.mubr.msk.bf16.mxu1 %vm11797_vm12, %v3962_v32  ;;  %vm11805_vm12 = vmmov %vm11781_vm2 }
 0x405   : > { %8765 = vmatprep.subr.bf16.mxu1 %v8904_v25 }
 0x406   : > { %v4714_v7 = vpop.permute.xlu1 %4713 }
 0x40a   : > { %v4718_v35 = vpop.permute.xlu1 %4717 }
 0x40b   : > { %8752 = vmatmul.mubr.msk.bf16.gmra.mxu1 %vm11781_vm2, %v3964_v38  ;;  %vm5028_vm2 = vcmask 392192  }
 0x40c   : > { %8757 = vmatprep.mubr.msk.bf16.mxu1 %vm11798_vm9, %v4712_v29  ;;  %vm5030_vm9 = vcmask 386048   ;;  %5036 = vst.msk [vmem:[#allocation3 + $0x30] sm:$0xff] %vm5028_vm2, %v9115_v0  ;;  %5029 = vst.msk [vmem:[#allocation3] sm:$0xff] %vm5028_vm2, %v9115_v0 }
 0x40d   : > { %5037 = vst.msk [vmem:[#allocation3 + $0x38] sm:$0x3] %vm5030_vm9, %v9115_v0  ;;  %5031 = vst.msk [vmem:[#allocation3 + $0x8] sm:$0x3] %vm5030_vm9, %v9115_v0 }
 0x40e   : > { %v4932_v11 = vpop.permute.xlu1 %4931  ;;  %5032 = vst.msk [vmem:[#allocation3 + $0x10] sm:$0xff] %vm5028_vm2, %v9115_v0  ;;  %5034 = vst.msk [vmem:[#allocation3 + $0x20] sm:$0xff] %vm5028_vm2, %v9115_v0 }
 0x40f   : > { %5033 = vst.msk [vmem:[#allocation3 + $0x18] sm:$0x3] %vm5030_vm9, %v9115_v0  ;;  %5035 = vst.msk [vmem:[#allocation3 + $0x28] sm:$0x3] %vm5030_vm9, %v9115_v0 }
 0x410   : > { %5038 = vst.msk [vmem:[#allocation3 + $0x40] sm:$0xff] %vm5028_vm2, %v9115_v0  ;;  %5040 = vst.msk [vmem:[#allocation3 + $0x50] sm:$0xff] %vm5028_vm2, %v9115_v0 }
 0x411   : > { %5039 = vst.msk [vmem:[#allocation3 + $0x48] sm:$0x3] %vm5030_vm9, %v9115_v0  ;;  %5041 = vst.msk [vmem:[#allocation3 + $0x58] sm:$0x3] %vm5030_vm9, %v9115_v0 }
 0x412   : > { %v4936_v2 = vpop.permute.xlu1 %4935  ;;  %5042 = vst.msk [vmem:[#allocation3 + $0x60] sm:$0xff] %vm5028_vm2, %v9115_v0  ;;  %5044 = vst.msk [vmem:[#allocation3 + $0x70] sm:$0xff] %vm5028_vm2, %v9115_v0 }
 0x413   : > { %8758 = vmatmul.mubr.msk.bf16.vlgmr.msra.gmra.mxu1 %vm11799_vm7, %v4714_v7  ;;  %5043 = vst.msk [vmem:[#allocation3 + $0x68] sm:$0x3] %vm5030_vm9, %v9115_v0  ;;  %5045 = vst.msk [vmem:[#allocation3 + $0x78] sm:$0x3] %vm5030_vm9, %v9115_v0  ;;  %v5059_v14 = vld [vmem:[#allocation3] sm:$0xff]  ;;  %vm5164_vm7 = vcmask 781696  }
 0x414   : > { %8766 = vmatpush3.bf16.msra.mxu1 %v8904_v25  ;;  %8761 = vmatprep.mubr.msk.bf16.mxu1 %vm11800_vm8, %v4716_v22  ;;  %5046 = vst.msk [vmem:[#allocation3 + $0x80] sm:$0xff] %vm5028_vm2, %v9115_v0  ;;  %5048 = vst.msk [vmem:[#allocation3 + $0x90] sm:$0xff] %vm5028_vm2, %v9115_v0  ;;  %v5173_v6 = vld [vmem:[#allocation3 + $0x2] sm:$0xff]  ;;  %v8465_v45 = vpack.c.bf16 %v5059_v14, %v5059_v14  ;;  %vm5099_vm8 = vcmask 388096  }
 0x415   : > { %5047 = vst.msk [vmem:[#allocation3 + $0x88] sm:$0x3] %vm5030_vm9, %v9115_v0  ;;  %5049 = vst.msk [vmem:[#allocation3 + $0x98] sm:$0x3] %vm5030_vm9, %v9115_v0  ;;  %v8481_v47 = vpack.c.bf16 %v5173_v6, %v5173_v6  ;;  %v5108_v10 = vld [vmem:[#allocation3 + $0x1] sm:$0xff]  ;;  %vm5460_vm9 = vcmask 1044352  }
 0x416   : > { %v8473_v20 = vpack.c.bf16 %v5108_v10, %v5108_v10  ;;  %5100 = vst.msk [vmem:[#allocation6] sm:$0xf] %vm5099_vm8, %v8465_v45  ;;  %v8905_v14 = vld [vmem:[%s11707_s3 + $0xb8] sm:$0xff]  }
 0x417   : > { %5205 = vrot.lane.b32.xlu0 %v8481_v47, %s9126_s24 }
 0x41b   : > { %8762 = vmatmul.mubr.msk.bf16.gmra.mxu1 %vm11801_vm10, %v4718_v35  ;;  %5140 = vrot.lane.b32.xlu0 %v8473_v20, %s9127_s26  ;;  %vm5229_vm10 = vcmask 785408  }
 0x41c   : > { %8767 = vmatprep.mubr.msk.bf16.mxu1 %vm11802_vm4, %v4930_v55  ;;  %vm5246_vm4 = vcmask 1044224  }
 0x423   : > { %8768 = vmatmul.mubr.msk.bf16.vlgmr.msra.gmra.mxu1 %vm11803_vm11, %v4932_v11  ;;  %vm5247_vm11 = vcmask 130052  }
 0x424   : > { %8771 = vmatprep.mubr.msk.bf16.mxu1 %vm11804_vm5, %v4934_v43  ;;  %vm10959_vm5 = vmor %vm5247_vm11, %vm5246_vm4  ;;  %vm5378_vm4 = vcmask 912896  }
 0x42b   : > { %8772 = vmatmul.mubr.msk.bf16.gmra.mxu1 %vm11805_vm12, %v4936_v2  ;;  %vm5313_vm12 = vcmask 519296  }
 0x489   : > { %v5206_v5 = vpop.permute.xlu0 %5205 }
 0x48a   : > { %v5221_v21 = vrot.slane %v5206_v5, 4 }
 0x48c   : > { %v5230_v62 = vsel %vm5229_vm10, %v5221_v21, %v5206_v5  ;;  %v9128_v5 = vmov 0  }
 0x48d   : > { %v5141_v41 = vpop.permute.xlu0 %5140  ;;  %6035 = vmatprep.subr.bf16.mxu1 %v9128_v5 }
 0x48e   : > { %5165 = vst.msk [vmem:[#allocation6] sm:$0xf] %vm5164_vm7, %v5141_v41  ;;  %6036 = vmatpush1.bf16.msra.mxu1 %v8905_v14 }
 0x48f   : > { %5249 = vst.msk [vmem:[#allocation6] sm:$0xff] %vm10959_vm5, %v5230_v62  ;;  %6037 = vmatprep.subr.bf16.mxu1 %v9128_v5  ;;  %v8907_v62 = vld [vmem:[%s11707_s3 + $0xb0] sm:$0xff]  }
 0x492   : > { %6038 = vmatpush1.bf16.msra.mxu1 %v8907_v62 }
 0x493   : > { %6039 = vmatprep.subr.bf16.mxu1 %v9128_v5 }
 0x4bb   : > { %v8743_v31 = vpop.f32.mrf.mxu1 }
 0x4bd   : > { %v3826_v19 = vpop.f32.mrf.mxu1 }
 0x4bf   : > { %v8744_v1 = vpop.f32.mrf.mxu1 }
 0x4c1   : > { %v3829_v27 = vpop.f32.mrf.mxu1 }
 0x4c3   : > { %v8749_v30 = vpop.f32.mrf.mxu1 }
 0x4c4   : > { %v4026_v50 = vadd.f32 %v8749_v30, %v8739_v16 }
 0x4c5   : > { %v4017_v61 = vpop.f32.mrf.mxu1 }
 0x4c6   : > { %v4018_v18 = vadd.f32 %v4017_v61, %v3810_v52 }
 0x4c7   : > { %v8750_v39 = vpop.f32.mrf.mxu1 }
 0x4c8   : > { %v4029_v63 = vadd.f32 %v8750_v39, %v8740_v12 }
 0x4c9   : > { %v4020_v54 = vpop.f32.mrf.mxu1 }
 0x4ca   : > { %v4021_v53 = vadd.f32 %v4020_v54, %v3813_v49 }
 0x4cb   : > { %v8753_v56 = vpop.f32.mrf.mxu1 }
 0x4cc   : > { %v4042_v51 = vadd.f32 %v8753_v56, %v8743_v31 }
 0x4cd   : > { %v4033_v26 = vpop.f32.mrf.mxu1 }
 0x4ce   : > { %v4034_v58 = vadd.f32 %v4033_v26, %v3826_v19 }
 0x4cf   : > { %v8754_v40 = vpop.f32.mrf.mxu1 }
 0x4d0   : > { %v4045_v7 = vadd.f32 %v8754_v40, %v8744_v1 }
 0x4d1   : > { %v4036_v8 = vpop.f32.mrf.mxu1 }
 0x4d2   : > { %v4037_v55 = vadd.f32 %v4036_v8, %v3829_v27 }
 0x4d3   : > { %v8759_v24 = vpop.f32.mrf.mxu1 }
 0x4d4   : > { %v4804_v4 = vadd.f32 %v8759_v24, %v4026_v50 }
 0x4d5   : > { %v4771_v34 = vpop.f32.mrf.mxu1 }
 0x4d6   : > { %v4802_v9 = vadd.f32 %v4771_v34, %v4018_v18 }
 0x4d7   : > { %v8760_v33 = vpop.f32.mrf.mxu1 }
 0x4d8   : > { %v4805_v37 = vadd.f32 %v8760_v33, %v4029_v63 }
 0x4d9   : > { %v4774_v28 = vpop.f32.mrf.mxu1 }
 0x4da   : > { %v4803_v57 = vadd.f32 %v4774_v28, %v4021_v53  ;;  %v8909_v53 = vld [vmem:[%s11707_s3 + $0x70] sm:$0xff]  }
 0x4db   : > { %v8763_v42 = vpop.f32.mrf.mxu1 }
 0x4dc   : > { %v4808_v32 = vadd.f32 %v8763_v42, %v4042_v51  ;;  %v8912_v51 = vld [vmem:[%s11707_s3 + $0x68] sm:$0xff]  }
 0x4dd   : > { %v4787_v36 = vpop.f32.mrf.mxu1 }
 0x4de   : > { %v4806_v22 = vadd.f32 %v4787_v36, %v4034_v58  ;;  %v8915_v58 = vld [vmem:[%s11707_s3 + $0x60] sm:$0xff]  }
 0x4df   : > { %v8764_v48 = vpop.f32.mrf.mxu1 }
 0x4e0   : > { %v4809_v6 = vadd.f32 %v8764_v48, %v4045_v7  ;;  %v8919_v7 = vld [vmem:[%s11707_s3 + $0x90] sm:$0xff]  }
 0x4e1   : > { %v4790_v44 = vpop.f32.mrf.mxu1 }
 0x4e2   : > { %v4807_v12 = vadd.f32 %v4790_v44, %v4037_v55  ;;  %v8921_v55 = vld [vmem:[%s11707_s3 + $0x50] sm:$0xff]  }
 0x4e3   : > { %v8769_v3 = vpop.f32.mrf.mxu1 }
 0x4e4   : > { %v5022_v15 = vadd.f32 %v8769_v3, %v4804_v4  ;;  %v8906_v4 = vld [vmem:[%s11707_s3 + $0x78] sm:$0xff]  }
 0x4e5   : > { %v4989_v59 = vpop.f32.mrf.mxu1  ;;  %v8908_v3 = vld [vmem:[%s11707_s3 + $0x38] sm:$0xff]   ;;  %8596 = vmatprep.subr.bf16.mxu0 %v8906_v4 }
 0x4e6   : > { %5053 = vst.msk [vmem:[#allocation3 + $0x31] sm:$0xff] %vm5028_vm2, %v5022_v15  ;;  %v5020_v46 = vadd.f32 %v4989_v59, %v4802_v9  ;;  %8597 = vmatpush3.bf16.msra.mxu0 %v8908_v3 }
 0x4e7   : > { %v8770_v23 = vpop.f32.mrf.mxu1  ;;  %8598 = vmatprep.subr.bf16.mxu0 %v8909_v53 }
 0x4e8   : > { %5051 = vst.msk [vmem:[#allocation3 + $0x11] sm:$0xff] %vm5028_vm2, %v5020_v46  ;;  %v5023_v17 = vadd.f32 %v8770_v23, %v4805_v37  ;;  %v8910_v37 = vld [vmem:[%s11707_s3 + $0xa8] sm:$0xff]   ;;  %v8911_v46 = vld [vmem:[%s11707_s3 + $0x30] sm:$0xff]  }
 0x4e9   : > { %v4992_v25 = vpop.f32.mrf.mxu1  ;;  %6040 = vmatpush1.bf16.msra.mxu1 %v8910_v37 }
 0x4ea   : > { %5054 = vst.msk [vmem:[#allocation3 + $0x41] sm:$0xff] %vm5028_vm2, %v5023_v17  ;;  %v5021_v38 = vadd.f32 %v4992_v25, %v4803_v57  ;;  %v8913_v57 = vld [vmem:[%s11707_s3 + $0xa0] sm:$0xff]   ;;  %8599 = vmatpush3.bf16.msra.mxu0 %v8911_v46  ;;  %6041 = vmatprep.subr.bf16.mxu1 %v9128_v5  ;;  %v8914_v25 = vld [vmem:[%s11707_s3 + $0x28] sm:$0xff]  }
 0x4eb   : > { %v8773_v29 = vpop.f32.mrf.mxu1  ;;  %8600 = vmatprep.subr.bf16.mxu0 %v8912_v51 }
 0x4ec   : > { %5052 = vst.msk [vmem:[#allocation3 + $0x21] sm:$0xff] %vm5028_vm2, %v5021_v38  ;;  %v5026_v35 = vadd.f32 %v8773_v29, %v4808_v32  ;;  %v8916_v32 = vld [vmem:[%s11707_s3 + $0x98] sm:$0xff]   ;;  %v8917_v38 = vld [vmem:[%s11707_s3 + $0x20] sm:$0xff]  }
 0x4ed   : > { %v5603_v11 = vld [vmem:[#allocation3 + $0x32] sm:$0xff]  ;;  %v5005_v43 = vpop.f32.mrf.mxu1  ;;  %6042 = vmatpush1.bf16.msra.mxu1 %v8913_v57  ;;  %v8918_v29 = vld [vmem:[%s11707_s3 + $0x58] sm:$0xff]  }
 0x4ee   : > { %v5259_v2 = vld [vmem:[#allocation3 + $0x30] sm:$0xff]  ;;  %v8530_v47 = vpack.c.bf16 %v5603_v11, %v5603_v11  ;;  %5057 = vst.msk [vmem:[#allocation3 + $0x71] sm:$0xff] %vm5028_vm2, %v5026_v35  ;;  %v5024_v10 = vadd.f32 %v5005_v43, %v4806_v22  ;;  %8601 = vmatpush3.bf16.msra.mxu0 %v8914_v25  ;;  %6043 = vmatprep.subr.bf16.mxu1 %v9128_v5  ;;  %v8920_v22 = vld [vmem:[%s11707_s3 + $0x18] sm:$0xff]   ;;  %v8922_v11 = vld [vmem:[%s11707_s3 + $0x88] sm:$0xff]  }
 0x4ef   : > { %v8491_v20 = vpack.c.bf16 %v5259_v2, %v5259_v2  ;;  %v8774_v16 = vpop.f32.mrf.mxu1  ;;  %v5257_v52 = vld [vmem:[#allocation3 + $0x10] sm:$0xff]  ;;  %8602 = vmatprep.subr.bf16.mxu0 %v8915_v58  ;;  %v8923_v2 = vld [vmem:[%s11707_s3 + $0x10] sm:$0xff]  }
 0x4f0   : > { %5055 = vst.msk [vmem:[#allocation3 + $0x51] sm:$0xff] %vm5028_vm2, %v5024_v10  ;;  %v5027_v49 = vadd.f32 %v8774_v16, %v4809_v6  ;;  %5423 = vrot.lane.b32.xlu0 %v8530_v47, %s9125_s17  ;;  %5211 = vrot.lane.b32.xlu1 %v8530_v47, %s9126_s24  ;;  %v10973_v31 = vpack.c.bf16 %v5257_v52, %v5257_v52  ;;  %v5324_v56 = vld [vmem:[#allocation3 + $0x31] sm:$0xff]  ;;  %v8928_v16 = vld [vmem:[%s11707_s3 + $0xd0] sm:$0xff]  }
 0x4f1   : > { %5643 = vst.msk [vmem:[#allocation6 + $0x1c] sm:$0xf] %vm5099_vm8, %v8530_v47  ;;  %5103 = vst.msk [vmem:[#allocation6 + $0x30] sm:$0xf] %vm5099_vm8, %v8491_v20  ;;  %v5604_v19 = vld [vmem:[#allocation3 + $0x42] sm:$0xff]  ;;  %v5008_v1 = vpop.f32.mrf.mxu1  ;;  %v8499_v28 = vpack.c.bf16 %v5324_v56, %v5324_v56  ;;  %v5387_v45 = vld [vmem:[#allocation3 + $0x12] sm:$0xff]  ;;  %6044 = vmatpush1.bf16.msra.mxu1 %v8916_v32 }
 0x4f2   : > { %v5260_v27 = vld [vmem:[#allocation3 + $0x40] sm:$0xff]  ;;  %v10977_v30 = vpack.c.bf16 %v5604_v19, %v5604_v19  ;;  %5058 = vst.msk [vmem:[#allocation3 + $0x81] sm:$0xff] %vm5028_vm2, %v5027_v49  ;;  %v5025_v61 = vadd.f32 %v5008_v1, %v4807_v12  ;;  %v8505_v18 = vpack.c.bf16 %v5387_v45, %v5387_v45  ;;  %v5322_v23 = vld [vmem:[#allocation3 + $0x11] sm:$0xff]  ;;  %8603 = vmatpush3.bf16.msra.mxu0 %v8917_v38 }
 0x4f3   : > { %v10980_v39 = vpack.c.bf16 %v5260_v27, %v5260_v27  ;;  %5101 = vst.msk [vmem:[#allocation6 + $0x10] sm:$0xf] %vm5099_vm8, %v10973_v31  ;;  %v5602_v54 = vld [vmem:[#allocation3 + $0x22] sm:$0xff]  ;;  %v8497_v17 = vpack.c.bf16 %v5322_v23, %v5322_v23  ;;  %6045 = vmatprep.subr.bf16.mxu1 %v9128_v5  ;;  %8604 = vmatprep.subr.bf16.mxu0 %v8918_v29  ;;  %v8924_v6 = vld [vmem:[%s11707_s3 + $0x48] sm:$0xff]   ;;  %v8925_v47 = vld [vmem:[%s11707_s3 + $0x80] sm:$0xff]  }
 0x4f4   : > { %v5258_v26 = vld [vmem:[#allocation3 + $0x20] sm:$0xff]  ;;  %v10984_v40 = vpack.c.bf16 %v5602_v54, %v5602_v54  ;;  %5056 = vst.msk [vmem:[#allocation3 + $0x61] sm:$0xff] %vm5028_vm2, %v5025_v61  ;;  %5293 = vrot.lane.b32.xlu0 %v8491_v20, %s9119_s25  ;;  %5506 = vrot.lane.b32.xlu1 %v8491_v20, %s9123_s10  ;;  %v8926_v10 = vld [vmem:[%s11707_s3 + $0x8] sm:$0xff]   ;;  %v8927_v20 = vld [vmem:[%s11707_s3 + $0x40] sm:$0xff]  }
 0x4f5   : > { %v10989_v8 = vpack.c.bf16 %v5258_v26, %v5258_v26  ;;  %5644 = vst.msk [vmem:[#allocation6 + $0x2c] sm:$0xf] %vm5099_vm8, %v10977_v30  ;;  %5104 = vst.msk [vmem:[#allocation6 + $0x40] sm:$0xf] %vm5099_vm8, %v10980_v39  ;;  %v5607_v24 = vld [vmem:[#allocation3 + $0x72] sm:$0xff]  ;;  %v5325_v35 = vld [vmem:[#allocation3 + $0x41] sm:$0xff]  ;;  %6046 = vmatpush1.bf16.msra.mxu1 %v8919_v7 }
 0x4f6   : > { %v5477_v34 = vld [vmem:[#allocation3 + $0x70] sm:$0xff]  ;;  %v10995_v33 = vpack.c.bf16 %v5607_v24, %v5607_v24  ;;  %5642 = vst.msk [vmem:[#allocation6 + $0xc] sm:$0xf] %vm5099_vm8, %v10984_v40  ;;  %v8500_v43 = vpack.c.bf16 %v5325_v35, %v5325_v35  ;;  %8605 = vmatpush3.bf16.msra.mxu0 %v8920_v22  ;;  %6047 = vmatprep.subr.bf16.mxu1 %v9128_v5  ;;  %v5323_v12 = vld [vmem:[#allocation3 + $0x21] sm:$0xff]  ;;  %v8933_v49 = vld [vmem:[%s11707_s3 + $0xc8] sm:$0xff]  }
 0x4f7   : > { %v10997_v42 = vpack.c.bf16 %v5477_v34, %v5477_v34  ;;  %5102 = vst.msk [vmem:[#allocation6 + $0x20] sm:$0xf] %vm5099_vm8, %v10989_v8  ;;  %v5605_v36 = vld [vmem:[#allocation3 + $0x52] sm:$0xff]  ;;  %8606 = vmatprep.subr.bf16.mxu0 %v8921_v55 }
 0x4f8   : > { %v5261_v21 = vld [vmem:[#allocation3 + $0x50] sm:$0xff]  ;;  %v11007_v48 = vpack.c.bf16 %v5605_v36, %v5605_v36  ;;  %5358 = vrot.lane.b32.xlu0 %v8499_v28, %s11727_s21  ;;  %5146 = vrot.lane.b32.xlu1 %v8499_v28, %s9127_s26  ;;  %5647 = vst.msk [vmem:[#allocation6 + $0x5c] sm:$0xf] %vm5099_vm8, %v10995_v33 }
 0x4f9   : > { %v11011_v41 = vpack.c.bf16 %v5261_v21, %v5261_v21  ;;  %5107 = vst.msk [vmem:[#allocation6 + $0x70] sm:$0xf] %vm5099_vm8, %v10997_v42  ;;  %v5608_v50 = vld [vmem:[#allocation3 + $0x82] sm:$0xff]  ;;  %6048 = vmatpush1.bf16.msra.mxu1 %v8922_v11  ;;  %v8929_v52 = vld [vmem:[%s11707_s3] sm:$0xff]  }
 0x4fa   : > { %v11017_v44 = vpack.c.bf16 %v5608_v50, %v5608_v50  ;;  %5645 = vst.msk [vmem:[#allocation6 + $0x3c] sm:$0xf] %vm5099_vm8, %v11007_v48  ;;  %8607 = vmatpush3.bf16.msra.mxu0 %v8923_v2  ;;  %6049 = vmatprep.subr.bf16.mxu1 %v9128_v5  ;;  %v8934_v19 = vld [vmem:[%s11707_s3 + $0xc0] sm:$0xff]   ;;  %v5264_v56 = vld [vmem:[#allocation3 + $0x80] sm:$0xff] }
 0x4fb   : > { %5105 = vst.msk [vmem:[#allocation6 + $0x50] sm:$0xf] %vm5099_vm8, %v11011_v41  ;;  %v5606_v63 = vld [vmem:[#allocation3 + $0x62] sm:$0xff]  ;;  %8608 = vmatprep.subr.bf16.mxu0 %v8924_v6  ;;  %v5115_v1 = vld [vmem:[#allocation3 + $0x71] sm:$0xff] }
 0x4fc   : > { %v5476_v9 = vld [vmem:[#allocation3 + $0x60] sm:$0xff]  ;;  %v11033_v15 = vpack.c.bf16 %v5606_v63, %v5606_v63  ;;  %5571 = vrot.lane.b32.xlu1 %v8499_v28, %s11724_s23  ;;  %5419 = vrot.lane.b32.xlu0 %v8505_v18, %s9125_s17  ;;  %5648 = vst.msk [vmem:[#allocation6 + $0x6c] sm:$0xf] %vm5099_vm8, %v11017_v44  ;;  %s11808_s23 = smov 80   ;;  %v8480_v27 = vpack.c.bf16 %v5115_v1, %v5115_v1  ;;  %v5609_v26 = vld [vmem:[#allocation3 + $0x92] sm:$0xff] }
 0x4fd   : > { %v11037_v59 = vpack.c.bf16 %v5476_v9, %v5476_v9  ;;  %6050 = vmatpush1.bf16.msra.mxu1 %v8925_v47  ;;  %v5329_v24 = vld [vmem:[#allocation3 + $0x81] sm:$0xff]  ;;  %v5479_v34 = vld [vmem:[#allocation3 + $0x90] sm:$0xff] }
 0x4fe   : > { %5646 = vst.msk [vmem:[#allocation6 + $0x4c] sm:$0xf] %vm5099_vm8, %v11033_v15  ;;  %8609 = vmatpush3.bf16.msra.mxu0 %v8926_v10  ;;  %6061 = vmatprep.subr.bf16.mxu1 %v9128_v5  ;;  %v8520_v28 = vpack.c.bf16 %v5479_v34, %v5479_v34 }
 0x4ff   : > { %5106 = vst.msk [vmem:[#allocation6 + $0x60] sm:$0xf] %vm5099_vm8, %v11037_v59  ;;  %8610 = vmatprep.subr.bf16.mxu0 %v8927_v20 }
 0x500   : > { %5289 = vrot.lane.b32.xlu0 %v10973_v31, %s9119_s25  ;;  %5207 = vrot.lane.b32.xlu1 %v8505_v18, %s9126_s24  ;;  %v8498_v31 = vpack.c.bf16 %v5323_v12, %v5323_v12 }
 0x501   : > { %6062 = vmatpush2.bf16.msra.mxu1 %v8928_v16 }
 0x502   : > { %8611 = vmatpush3.bf16.msra.mxu0 %v8929_v52  ;;  %6063 = vmatprep.subr.bf16.mxu1 %v9128_v5 }
 0x503   : > { %8783 = vmatprep.subr.bf16.mxu0 %v9115_v0 }
 0x504   : > { %5354 = vrot.lane.b32.xlu0 %v8497_v17, %s11727_s21  ;;  %5142 = vrot.lane.b32.xlu1 %v8497_v17, %s9127_s26 }
 0x505   : > { %6064 = vmatpush2.bf16.msra.mxu1 %v8933_v49 }
 0x506   : > { %6065 = vmatprep.subr.bf16.mxu1 %v9128_v5 }
 0x508   : > { %5425 = vrot.lane.b32.xlu1 %v10977_v30, %s9125_s17  ;;  %5213 = vrot.lane.b32.xlu0 %v10977_v30, %s9126_s24  ;;  %v5326_v30 = vld [vmem:[#allocation3 + $0x51] sm:$0xff] }
 0x509   : > { %6066 = vmatpush2.bf16.msra.mxu1 %v8934_v19  ;;  %v8501_v61 = vpack.c.bf16 %v5326_v30, %v5326_v30 }
 0x50a   : > { %8775 = vmatprep.subr.bf16.mxu1 %v9115_v0 }
 0x50c   : > { %5295 = vrot.lane.b32.xlu1 %v10980_v39, %s9119_s25  ;;  %5508 = vrot.lane.b32.xlu0 %v10980_v39, %s9123_s10  ;;  %v5114_v39 = vld [vmem:[#allocation3 + $0x61] sm:$0xff] }
 0x50d   : > { %v8479_v54 = vpack.c.bf16 %v5114_v39, %v5114_v39 }
 0x510   : > { %5360 = vrot.lane.b32.xlu1 %v8500_v43, %s11727_s21  ;;  %5148 = vrot.lane.b32.xlu0 %v8500_v43, %s9127_s26 }
 0x514   : > { %5573 = vrot.lane.b32.xlu0 %v8500_v43, %s11808_s23  ;;  %5421 = vrot.lane.b32.xlu1 %v10984_v40, %s9125_s17 }
 0x518   : > { %5291 = vrot.lane.b32.xlu1 %v10989_v8, %s9119_s25  ;;  %5209 = vrot.lane.b32.xlu0 %v10984_v40, %s9126_s24  ;;  %v8496_v40 = vpack.c.bf16 %v5264_v56, %v5264_v56 }
 0x51c   : > { %5356 = vrot.lane.b32.xlu1 %v8498_v31, %s11727_s21  ;;  %5504 = vrot.lane.b32.xlu0 %v10989_v8, %s9123_s10  ;;  %v8536_v8 = vpack.c.bf16 %v5609_v26, %v5609_v26 }
 0x51e   : > { %5649 = vst.msk [vmem:[#allocation6 + $0x7c] sm:$0xf] %vm5099_vm8, %v8536_v8  ;;  %vm5461_vm8 = vcmask 261124  }
 0x51f   : > { %vm11205_vm11 = vmor %vm5461_vm8, %vm5460_vm9  ;;  %vm5528_vm9 = vcmask 650496   ;;  %vm5593_vm8 = vcmask 1044096  }
 0x520   : > { %5144 = vrot.lane.b32.xlu0 %v8498_v31, %s9127_s26  ;;  %5219 = vrot.lane.b32.xlu1 %v10995_v33, %s9126_s24 }
 0x524   : > { %5569 = vrot.lane.b32.xlu0 %v8498_v31, %s11808_s23  ;;  %5514 = vrot.lane.b32.xlu1 %v10997_v42, %s9123_s10 }
 0x528   : > { %5431 = vrot.lane.b32.xlu0 %v10995_v33, %s9125_s17  ;;  %5154 = vrot.lane.b32.xlu1 %v8480_v27, %s9127_s26  ;;  %v8504_v33 = vpack.c.bf16 %v5329_v24, %v5329_v24  ;;  %v8939_v24 = vld [vmem:[#allocation6 + $0xc] ss:$16 sps:$4 sm:$0xff]  }
 0x529   : > { %8079 = vmatprep.mubr.msk.bf16.mxu1 %vm5028_vm2, %v8939_v24 }
 0x52c   : > { %5301 = vrot.lane.b32.xlu0 %v10997_v42, %s9119_s25  ;;  %5579 = vrot.lane.b32.xlu1 %v8480_v27, %s11808_s23  ;;  %v5544_v42 = vld [vmem:[#allocation3 + $0x91] sm:$0xff] }
 0x52d   : > { %v8528_v5 = vpack.c.bf16 %v5544_v42, %v5544_v42 }
 0x530   : > { %5427 = vrot.lane.b32.xlu0 %v11007_v48, %s9125_s17  ;;  %5215 = vrot.lane.b32.xlu1 %v11007_v48, %s9126_s24 }
 0x534   : > { %5297 = vrot.lane.b32.xlu0 %v11011_v41, %s9119_s25  ;;  %5510 = vrot.lane.b32.xlu1 %v11011_v41, %s9123_s10 }
 0x538   : > { %5362 = vrot.lane.b32.xlu0 %v8501_v61, %s11727_s21  ;;  %5150 = vrot.lane.b32.xlu1 %v8501_v61, %s9127_s26 }
 0x53c   : > { %5366 = vrot.lane.b32.xlu0 %v8480_v27, %s11727_s21  ;;  %5575 = vrot.lane.b32.xlu1 %v8501_v61, %s11808_s23 }
 0x540   : > { %5433 = vrot.lane.b32.xlu1 %v11017_v44, %s9125_s17  ;;  %5217 = vrot.lane.b32.xlu0 %v11033_v15, %s9126_s24 }
 0x544   : > { %5429 = vrot.lane.b32.xlu1 %v11033_v15, %s9125_s17  ;;  %5512 = vrot.lane.b32.xlu0 %v11037_v59, %s9123_s10  ;;  %v8951_v15 = vld [vmem:[#allocation6 + $0x6c] ss:$16 sps:$4 sm:$0xff]  }
 0x548   : > { %5299 = vrot.lane.b32.xlu1 %v11037_v59, %s9119_s25  ;;  %5152 = vrot.lane.b32.xlu0 %v8479_v54, %s9127_s26 }
 0x54c   : > { %5364 = vrot.lane.b32.xlu1 %v8479_v54, %s11727_s21  ;;  %5577 = vrot.lane.b32.xlu0 %v8479_v54, %s11808_s23 }
 0x550   : > { %5303 = vrot.lane.b32.xlu1 %v8496_v40, %s9119_s25  ;;  %5516 = vrot.lane.b32.xlu0 %v8496_v40, %s9123_s10  ;;  %s8555_s25 = sshll.u32 %s9201_s9, 10 }
 0x554   : > { %5368 = vrot.lane.b32.xlu1 %v8504_v33, %s11727_s21  ;;  %5581 = vrot.lane.b32.xlu0 %v8504_v33, %s11808_s23 }
 0x558   : > { %5518 = vrot.lane.b32.xlu1 %v8520_v28, %s9123_s10  ;;  %s7470_s10 = sshll.u32 %s11323_s22, 4  ;;  %s11624_s10 = int_to_ptr.vmem [resolvable:$true] %s7470_s10 }
 0x559   : > { %p9030_p0 = scmp.lt.s32.totalorder %s11624_s10, %s9028_s19 }
 0x55c   : > { %5583 = vrot.lane.b32.xlu1 %v8528_v5, %s11808_s23  ;;  %s11622_s23 = scalar_lea.hbm %s11711_s7, %s8555_s25 }
 0x562   : > { %v11194_v14 = vpop.permute.xlu0 %5423  ;;  %v5212_v36 = vpop.permute.xlu1 %5211 }
 0x563   : > { %v5224_v48 = vrot.slane %v5212_v36, 4  ;;  %v5437_v20 = vrot.slane %v11194_v14, 4 }
 0x565   : > { %v5233_v44 = vsel %vm5229_vm10, %v5224_v48, %v5212_v36  ;;  %v5446_v49 = vsel %vm5443_vm13, %v5437_v20, %v11194_v14 }
 0x566   : > { %v11196_v45 = vpop.permute.xlu0 %5293  ;;  %v5507_v21 = vpop.permute.xlu1 %5506 }
 0x56a   : > { %v11198_v41 = vpop.permute.xlu0 %5358  ;;  %v5147_v50 = vpop.permute.xlu1 %5146 }
 0x56b   : > { %5168 = vst.msk [vmem:[#allocation6 + $0x30] sm:$0xf] %vm5164_vm7, %v5147_v50 }
 0x56c   : > { %5252 = vst.msk [vmem:[#allocation6 + $0x30] sm:$0xff] %vm10959_vm5, %v5233_v44 }
 0x56e   : > { %v5420_v18 = vpop.permute.xlu0 %5419  ;;  %v5572_v4 = vpop.permute.xlu1 %5571 }
 0x56f   : > { %v5435_v63 = vrot.slane %v5420_v18, 4 }
 0x571   : > { %v5444_v37 = vsel %vm5443_vm13, %v5435_v63, %v5420_v18 }
 0x572   : > { %v5290_v62 = vpop.permute.xlu0 %5289  ;;  %v5208_v3 = vpop.permute.xlu1 %5207 }
 0x573   : > { %5314 = vst.msk [vmem:[#allocation6 + $0x4] sm:$0xf] %vm5313_vm12, %v5290_v62  ;;  %v5222_v9 = vrot.slane %v5208_v3, 4 }
 0x575   : > { %v5231_v46 = vsel %vm5229_vm10, %v5222_v9, %v5208_v3 }
 0x576   : > { %v5355_v59 = vpop.permute.xlu0 %5354  ;;  %v5143_v53 = vpop.permute.xlu1 %5142 }
 0x577   : > { %5379 = vst.msk [vmem:[#allocation6 + $0x4] sm:$0xf] %vm5378_vm4, %v5355_v59  ;;  %v8941_v59 = vld [vmem:[#allocation6 + $0x2c] ss:$16 sps:$4 sm:$0xff]  }
 0x578   : > { %5166 = vst.msk [vmem:[#allocation6 + $0x10] sm:$0xf] %vm5164_vm7, %v5143_v53 }
 0x579   : > { %5250 = vst.msk [vmem:[#allocation6 + $0x10] sm:$0xff] %vm10959_vm5, %v5231_v46 }
 0x57a   : > { %5463 = vst.msk [vmem:[#allocation6 + $0x4] sm:$0xff] %vm11205_vm11, %v5444_v37  ;;  %v5214_v23 = vpop.permute.xlu0 %5213  ;;  %v5426_v51 = vpop.permute.xlu1 %5425 }
 0x57b   : > { %v5225_v25 = vrot.slane %v5214_v23, 4  ;;  %v5438_v58 = vrot.slane %v5426_v51, 4 }
 0x57d   : > { %v5234_v29 = vsel %vm5229_vm10, %v5225_v25, %v5214_v23  ;;  %v5447_v7 = vsel %vm5443_vm13, %v5438_v58, %v5426_v51 }
 0x57e   : > { %v5509_v57 = vpop.permute.xlu0 %5508  ;;  %v5296_v17 = vpop.permute.xlu1 %5295 }
 0x57f   : > { %5317 = vst.msk [vmem:[#allocation6 + $0x34] sm:$0xf] %vm5313_vm12, %v5296_v17 }
 0x580   : > { %v8930_v27 = vld [vmem:[#allocation6] ss:$16 sps:$4 sm:$0xff]  }
 0x582   : > { %v5149_v32 = vpop.permute.xlu0 %5148  ;;  %v5361_v38 = vpop.permute.xlu1 %5360 }
 0x583   : > { %5169 = vst.msk [vmem:[#allocation6 + $0x40] sm:$0xf] %vm5164_vm7, %v5149_v32 }
 0x584   : > { %5382 = vst.msk [vmem:[#allocation6 + $0x34] sm:$0xf] %vm5378_vm4, %v5361_v38 }
 0x585   : > { %5253 = vst.msk [vmem:[#allocation6 + $0x40] sm:$0xff] %vm10959_vm5, %v5234_v29 }
 0x586   : > { %5466 = vst.msk [vmem:[#allocation6 + $0x34] sm:$0xff] %vm11205_vm11, %v5447_v7  ;;  %v5574_v22 = vpop.permute.xlu0 %5573  ;;  %v5422_v35 = vpop.permute.xlu1 %5421 }
 0x587   : > { %v5436_v43 = vrot.slane %v5422_v35, 4 }
 0x589   : > { %v5445_v47 = vsel %vm5443_vm13, %v5436_v43, %v5422_v35 }
 0x58a   : > { %v5210_v55 = vpop.permute.xlu0 %5209  ;;  %v5292_v11 = vpop.permute.xlu1 %5291 }
 0x58b   : > { %5315 = vst.msk [vmem:[#allocation6 + $0x14] sm:$0xf] %vm5313_vm12, %v5292_v11  ;;  %v5223_v10 = vrot.slane %v5210_v55, 4 }
 0x58d   : > { %v5232_v12 = vsel %vm5229_vm10, %v5223_v10, %v5210_v55 }
 0x58e   : > { %v5505_v2 = vpop.permute.xlu0 %5504  ;;  %v5357_v6 = vpop.permute.xlu1 %5356 }
 0x58f   : > { %5529 = vst.msk [vmem:[#allocation6 + $0x8] sm:$0xf] %vm5528_vm9, %v5505_v2 }
 0x590   : > { %5380 = vst.msk [vmem:[#allocation6 + $0x14] sm:$0xf] %vm5378_vm4, %v5357_v6 }
 0x591   : > { %5464 = vst.msk [vmem:[#allocation6 + $0x14] sm:$0xff] %vm11205_vm11, %v5445_v47  ;;  %v8945_v47 = vld [vmem:[#allocation6 + $0x4c] ss:$16 sps:$4 sm:$0xff]  }
 0x592   : > { %5530 = vst.msk [vmem:[#allocation6 + $0x18] sm:$0xf] %vm5528_vm9, %v5507_v21  ;;  %v5145_v16 = vpop.permute.xlu0 %5144  ;;  %v5220_v52 = vpop.permute.xlu1 %5219 }
 0x593   : > { %5595 = vst.msk [vmem:[#allocation6 + $0x18] sm:$0xf] %vm5593_vm8, %v5572_v4  ;;  %v5228_v1 = vrot.slane %v5220_v52, 4 }
 0x594   : > { %5167 = vst.msk [vmem:[#allocation6 + $0x20] sm:$0xf] %vm5164_vm7, %v5145_v16 }
 0x595   : > { %5251 = vst.msk [vmem:[#allocation6 + $0x20] sm:$0xff] %vm10959_vm5, %v5232_v12  ;;  %v5237_v54 = vsel %vm5229_vm10, %v5228_v1, %v5220_v52  ;;  %v8956_v1 = vld [vmem:[%s11708_s4] sm:$0xff]  }
 0x596   : > { %5316 = vst.msk [vmem:[#allocation6 + $0x24] sm:$0xf] %vm5313_vm12, %v11196_v45  ;;  %v5570_v31 = vpop.permute.xlu0 %5569  ;;  %v11245_v19 = vpop.permute.xlu1 %5514 }
 0x597   : > { %5381 = vst.msk [vmem:[#allocation6 + $0x24] sm:$0xf] %vm5378_vm4, %v11198_v41 }
 0x598   : > { %5465 = vst.msk [vmem:[#allocation6 + $0x24] sm:$0xff] %vm11205_vm11, %v5446_v49  ;;  %v8932_v30 = vld [vmem:[#allocation6 + $0x4] ss:$16 sps:$4 sm:$0xff]  }
 0x599   : > { %5594 = vst.msk [vmem:[#allocation6 + $0x8] sm:$0xf] %vm5593_vm8, %v5570_v31  ;;  %6002 = vmatprep.mubr.bf16.mxu0 %v8932_v30  ;;  %v8954_v31 = vld [vmem:[%s11708_s4 + $0x8] sm:$0xff]  }
 0x59a   : > { %5531 = vst.msk [vmem:[#allocation6 + $0x28] sm:$0xf] %vm5528_vm9, %v5509_v57  ;;  %v5432_v61 = vpop.permute.xlu0 %5431  ;;  %v5155_v39 = vpop.permute.xlu1 %5154  ;;  %6003 = vmatmul.mubr.bf16.vlgmr.msra.gmra.mxu0 %v8930_v27  ;;  %v8957_v27 = vld [vmem:[%s11708_s4 + $0x10] sm:$0xff]  }
 0x59b   : > { %5596 = vst.msk [vmem:[#allocation6 + $0x28] sm:$0xf] %vm5593_vm8, %v5574_v22  ;;  %v5441_v46 = vrot.slane %v5432_v61, 4  ;;  %8784 = vmatpush3.bf16.msra.mxu0 %v8954_v31 }
 0x59c   : > { %5172 = vst.msk [vmem:[#allocation6 + $0x70] sm:$0xf] %vm5164_vm7, %v5155_v39  ;;  %v8940_v34 = vld [vmem:[#allocation6 + $0x20] ss:$16 sps:$4 sm:$0xff]   ;;  %8785 = vmatprep.subr.bf16.mxu0 %v9115_v0 }
 0x59d   : > { %5256 = vst.msk [vmem:[#allocation6 + $0x70] sm:$0xff] %vm10959_vm5, %v5237_v54  ;;  %v5450_v25 = vsel %vm5443_vm13, %v5441_v46, %v5432_v61 }
 0x59e   : > { %v5302_v56 = vpop.permute.xlu0 %5301  ;;  %v5580_v26 = vpop.permute.xlu1 %5579 }
 0x59f   : > { %v8935_v40 = vld [vmem:[#allocation6 + $0x24] ss:$16 sps:$4 sm:$0xff]   ;;  %8786 = vmatpush3.bf16.msra.mxu0 %v8956_v1 }
 0x5a0   : > { %v8937_v8 = vld [vmem:[#allocation6 + $0x8] ss:$16 sps:$4 sm:$0xff]   ;;  %6010 = vmatprep.mubr.bf16.mxu0 %v8935_v40  ;;  %8791 = vmatprep.subr.bf16.mxu0 %v9115_v0 }
 0x5a1   : > { %6068 = vmatmul.mubr.bf16.vlgmr.msra.gmra.mxu1 %v8937_v8 }
 0x5a2   : > { %v5428_v33 = vpop.permute.xlu0 %5427  ;;  %v5216_v28 = vpop.permute.xlu1 %5215  ;;  %6011 = vmatmul.mubr.bf16.gmra.mxu0 %v8940_v34  ;;  %v5655_v63 = vld [vmem:[#allocation6 + $0x28] sm:$0xff]  ;;  %8080 = vmatprep.mubr.msk.bf16.mxu1 %vm5028_vm2, %v8941_v59 }
 0x5a3   : > { %v5439_v14 = vrot.slane %v5428_v33, 4  ;;  %v5226_v36 = vrot.slane %v5216_v28, 4 }
 0x5a5   : > { %v5448_v48 = vsel %vm5443_vm13, %v5439_v14, %v5428_v33  ;;  %v5235_v41 = vsel %vm5229_vm10, %v5226_v36, %v5216_v28 }
 0x5a6   : > { %v5298_v42 = vpop.permute.xlu0 %5297  ;;  %v5511_v5 = vpop.permute.xlu1 %5510 }
 0x5a7   : > { %5318 = vst.msk [vmem:[#allocation6 + $0x44] sm:$0xf] %vm5313_vm12, %v5298_v42 }
 0x5a8   : > { %5532 = vst.msk [vmem:[#allocation6 + $0x38] sm:$0xf] %vm5528_vm9, %v5511_v5 }
 0x5aa   : > { %v5363_v45 = vpop.permute.xlu0 %5362  ;;  %v5151_v21 = vpop.permute.xlu1 %5150 }
 0x5ab   : > { %5383 = vst.msk [vmem:[#allocation6 + $0x44] sm:$0xf] %vm5378_vm4, %v5363_v45 }
 0x5ac   : > { %5170 = vst.msk [vmem:[#allocation6 + $0x50] sm:$0xf] %vm5164_vm7, %v5151_v21 }
 0x5ad   : > { %5467 = vst.msk [vmem:[#allocation6 + $0x44] sm:$0xff] %vm11205_vm11, %v5448_v48 }
 0x5ae   : > { %5254 = vst.msk [vmem:[#allocation6 + $0x50] sm:$0xff] %vm10959_vm5, %v5235_v41  ;;  %v5367_v50 = vpop.permute.xlu0 %5366  ;;  %v5576_v44 = vpop.permute.xlu1 %5575 }
 0x5af   : > { %5597 = vst.msk [vmem:[#allocation6 + $0x38] sm:$0xf] %vm5593_vm8, %v5576_v44 }
 0x5b2   : > { %v5218_v18 = vpop.permute.xlu0 %5217  ;;  %v5434_v4 = vpop.permute.xlu1 %5433 }
 0x5b3   : > { %v5227_v53 = vrot.slane %v5218_v18, 4  ;;  %v5442_v7 = vrot.slane %v5434_v4, 4 }
 0x5b4   : > { %v5658_v11 = vld [vmem:[#allocation6 + $0x40] sm:$0xff] }
 0x5b5   : > { %v5236_v57 = vsel %vm5229_vm10, %v5227_v53, %v5218_v18  ;;  %v5451_v55 = vsel %vm5443_vm13, %v5442_v7, %v5434_v4 }
 0x5b6   : > { %v5513_v62 = vpop.permute.xlu0 %5512  ;;  %v5430_v3 = vpop.permute.xlu1 %5429  ;;  %v5657_v9 = vld [vmem:[#allocation6 + $0x38] sm:$0xff] }
 0x5b7   : > { %5533 = vst.msk [vmem:[#allocation6 + $0x48] sm:$0xf] %vm5528_vm9, %v5513_v62  ;;  %v8042_v37 = vcombine.low %v5655_v63, %v5657_v9  ;;  %v5440_v17 = vrot.slane %v5430_v3, 4 }
 0x5b9   : > { %6076 = vmatmul.mubr.bf16.gmra.mxu1 %v8042_v37  ;;  %v5449_v38 = vsel %vm5443_vm13, %v5440_v17, %v5430_v3  ;;  %vm9131_vm13 = vmmov 0  }
 0x5ba   : > { %v5153_v23 = vpop.permute.xlu0 %5152  ;;  %v5300_v51 = vpop.permute.xlu1 %5299  ;;  %8081 = vmatprep.mubr.msk.bf16.mxu1 %vm5028_vm2, %v8945_v47 }
 0x5bb   : > { %5171 = vst.msk [vmem:[#allocation6 + $0x60] sm:$0xf] %vm5164_vm7, %v5153_v23  ;;  %vm11811_vm7 = vcmask 1047559  }
 0x5bc   : > { %5319 = vst.msk [vmem:[#allocation6 + $0x54] sm:$0xf] %vm5313_vm12, %v5300_v51  ;;  %vm11812_vm10 = vmmov %vm11811_vm7 }
 0x5bd   : > { %5255 = vst.msk [vmem:[#allocation6 + $0x60] sm:$0xff] %vm10959_vm5, %v5236_v57 }
 0x5be   : > { %5320 = vst.msk [vmem:[#allocation6 + $0x64] sm:$0xf] %vm5313_vm12, %v5302_v56  ;;  %v5578_v58 = vpop.permute.xlu0 %5577  ;;  %v5365_v32 = vpop.permute.xlu1 %5364 }
 0x5bf   : > { %5385 = vst.msk [vmem:[#allocation6 + $0x64] sm:$0xf] %vm5378_vm4, %v5367_v50  ;;  %5384 = vst.msk [vmem:[#allocation6 + $0x54] sm:$0xf] %vm5378_vm4, %v5365_v32 }
 0x5c0   : > { %5469 = vst.msk [vmem:[#allocation6 + $0x64] sm:$0xff] %vm11205_vm11, %v5450_v25  ;;  %5468 = vst.msk [vmem:[#allocation6 + $0x54] sm:$0xff] %vm11205_vm11, %v5449_v38 }
 0x5c1   : > { %5598 = vst.msk [vmem:[#allocation6 + $0x48] sm:$0xf] %vm5593_vm8, %v5578_v58 }
 0x5c2   : > { %5534 = vst.msk [vmem:[#allocation6 + $0x58] sm:$0xf] %vm5528_vm9, %v11245_v19  ;;  %v5517_v13 = vpop.permute.xlu0 %5516  ;;  %v5304_v29 = vpop.permute.xlu1 %5303  ;;  %v8955_v19 = vld [vmem:[%s11708_s4 + $0x18] sm:$0xff]  }
 0x5c3   : > { %5599 = vst.msk [vmem:[#allocation6 + $0x58] sm:$0xf] %vm5593_vm8, %v5580_v26  ;;  %8776 = vmatpush3.bf16.msra.mxu1 %v8955_v19 }
 0x5c4   : > { %5535 = vst.msk [vmem:[#allocation6 + $0x68] sm:$0xf] %vm5528_vm9, %v5517_v13  ;;  %v8950_v12 = vld [vmem:[#allocation6 + $0x60] ss:$16 sps:$4 sm:$0xff]   ;;  %8777 = vmatprep.subr.bf16.mxu1 %v9115_v0 }
 0x5c5   : > { %5321 = vst.msk [vmem:[#allocation6 + $0x74] sm:$0xf] %vm5313_vm12, %v5304_v29  ;;  %vm6766_vm12 = vcmask 519168  }
 0x5c6   : > { %v5582_v22 = vpop.permute.xlu0 %5581  ;;  %v5369_v35 = vpop.permute.xlu1 %5368 }
 0x5c7   : > { %5600 = vst.msk [vmem:[#allocation6 + $0x68] sm:$0xf] %vm5593_vm8, %v5582_v22  ;;  %v5660_v43 = vld [vmem:[#allocation6 + $0x50] sm:$0xff]  ;;  %8778 = vmatpush3.bf16.msra.mxu1 %v8957_v27 }
 0x5c8   : > { %5386 = vst.msk [vmem:[#allocation6 + $0x74] sm:$0xf] %vm5378_vm4, %v5369_v35  ;;  %v8943_v2 = vld [vmem:[#allocation6 + $0x44] ss:$16 sps:$4 sm:$0xff]   ;;  %v8044_v6 = vcombine.low %v5658_v11, %v5660_v43  ;;  %8799 = vmatprep.subr.bf16.mxu1 %v9115_v0  ;;  %vm6817_vm4 = vcmask 1043968  }
 0x5c9   : > { %5470 = vst.msk [vmem:[#allocation6 + $0x74] sm:$0xff] %vm11205_vm11, %v5451_v55  ;;  %6018 = vmatprep.mubr.bf16.mxu0 %v8943_v2  ;;  %vm7306_vm11 = vcmask 523264  }
 0x5ca   : > { %v8947_v10 = vld [vmem:[#allocation6 + $0x48] ss:$16 sps:$4 sm:$0xff]   ;;  %v5519_v20 = vpop.permute.xlu1 %5518  ;;  %6019 = vmatmul.mubr.bf16.gmra.mxu0 %v8044_v6 }
 0x5cb   : > { %5536 = vst.msk [vmem:[#allocation6 + $0x78] sm:$0xf] %vm5528_vm9, %v5519_v20  ;;  %6084 = vmatmul.mubr.bf16.gmra.mxu1 %v8947_v10 }
 0x5cc   : > { %8082 = vmatprep.mubr.msk.bf16.mxu1 %vm5028_vm2, %v8951_v15  ;;  %vm6100_vm2 = vcmask 261120  }
 0x5ce   : > { %v5584_v16 = vpop.permute.xlu1 %5583 }
 0x5cf   : > { %5601 = vst.msk [vmem:[#allocation6 + $0x78] sm:$0xf] %vm5593_vm8, %v5584_v16 }
 0x5d0   : > { %v8948_v52 = vld [vmem:[#allocation6 + $0x64] ss:$16 sps:$4 sm:$0xff]  }
 0x5d1   : > { %6026 = vmatprep.mubr.bf16.mxu0 %v8948_v52 }
 0x5d2   : > { %6027 = vmatmul.mubr.bf16.gmra.mxu0 %v8950_v12 }
 0x5d3   : > { %8787 = vmatprep.mubr.msk.bf16.mxu0 %vm9131_vm13, %v9115_v0 }
 0x5d6   : > { %v8953_v49 = vld [vmem:[#allocation6 + $0x68] ss:$16 sps:$4 sm:$0xff]  }
 0x5d7   : > { %6092 = vmatmul.mubr.bf16.gmra.mxu1 %v8953_v49 }
 0x5d8   : > { %8779 = vmatprep.mubr.msk.bf16.mxu1 %vm9131_vm13, %v9115_v0 }
 0x65a   : > { %v8612_v30 = vpop.f32.mrf.mxu0 }
 0x65c   : > { %v8613_v61 = vpop.f32.mrf.mxu0 }
 0x65d   : > { %v8614_v54 = vadd.f32 %v8613_v61, %v8612_v30 }
 0x65e   : > { %v8615_v39 = vpop.f32.mrf.mxu0 }
 0x660   : > { %v8616_v56 = vpop.f32.mrf.mxu0 }
 0x661   : > { %v6069_v26 = vpop.f32.mrf.mxu1  ;;  %v8617_v24 = vadd.f32 %v8616_v56, %v8615_v39 }
 0x662   : > { %v6070_v40 = vadd.f32 %v8614_v54, %v6069_v26  ;;  %v8618_v14 = vpop.f32.mrf.mxu0 }
 0x663   : > { %v6071_v8 = vpop.f32.mrf.mxu1 }
 0x664   : > { %6101 = vst.msk [vmem:[%s11323_s22] sm:$0xff] %vm6100_vm2, %v6070_v40  ;;  %v6113_v42 = vcombine.high %v6070_v40, %v6070_v40  ;;  %v6120_v5 = vrot.slane %v6070_v40, %v10047_v60  ;;  %v8619_v21 = vpop.f32.mrf.mxu0 }
 0x665   : > { %v6072_v34 = vpop.f32.mrf.mxu1  ;;  %v8620_v63 = vadd.f32 %v8619_v21, %v8618_v14 }
 0x666   : > { %v6073_v33 = vadd.f32 %v8617_v24, %v6072_v34  ;;  %v6127_v36 = vrot.slane %v6113_v42, %v10047_v60  ;;  %v6128_v45 = vcombine.high %v6120_v5, %v6120_v5  ;;  %v6197_v48 = vpack.c.bf16 %v6120_v5, %v6120_v5  ;;  %v8621_v4 = vpop.f32.mrf.mxu0 }
 0x667   : > { %v6074_v28 = vpop.f32.mrf.mxu1 }
 0x668   : > { %6102 = vst.msk [vmem:[%s11323_s22 + $0x8] sm:$0xff] %vm6100_vm2, %v6073_v33  ;;  %v6439_v41 = vrot.slane %v6073_v33, %v10047_v60  ;;  %v6129_v50 = vcombine.high %v6127_v36, %v6127_v36  ;;  %v6198_v44 = vpack.c.bf16 %v6128_v45, %v6128_v45  ;;  %v6199_v18 = vpack.c.bf16 %v6127_v36, %v6127_v36  ;;  %v8622_v46 = vpop.f32.mrf.mxu0 }
 0x669   : > { %v6238_v62 = vunpack.c.l.b16 %v6197_v48  ;;  %v6432_v3 = vcombine.high %v6073_v33, %v6073_v33  ;;  %v8623_v32 = vadd.f32 %v8622_v46, %v8621_v4 }
 0x66a   : > { %v6447_v9 = vcombine.high %v6439_v41, %v6439_v41  ;;  %v6200_v59 = vpack.c.bf16 %v6129_v50, %v6129_v50  ;;  %v6239_v53 = vunpack.c.l.b16 %v6198_v44  ;;  %v6240_v37 = vunpack.c.l.b16 %v6199_v18 }
 0x66b   : > { %v6254_v57 = vrot.slane %v6238_v62, 1  ;;  %v6446_v17 = vrot.slane %v6432_v3, %v10047_v60  ;;  %v6516_v35 = vpack.c.bf16 %v6439_v41, %v6439_v41 }
 0x66c   : > { %v6517_v58 = vpack.c.bf16 %v6447_v9, %v6447_v9  ;;  %v6241_v29 = vunpack.c.l.b16 %v6200_v59  ;;  %v6256_v7 = vrot.slane %v6240_v37, 7  ;;  %v6341_v22 = vrot.slane %v6239_v53, 7 }
 0x66d   : > { %v6255_v47 = vsel %vm3628_vm14, %v6239_v53, %v6254_v57  ;;  %v6448_v10 = vcombine.high %v6446_v17, %v6446_v17  ;;  %v6518_v20 = vpack.c.bf16 %v6446_v17, %v6446_v17  ;;  %v6343_v52 = vrot.slane %v6240_v37, 6 }
 0x66e   : > { %v6554_v12 = vunpack.c.l.b16 %v6517_v58  ;;  %v6342_v31 = vsel %vm3628_vm14, %v6341_v22, %v6238_v62  ;;  %v6553_v19 = vunpack.c.l.b16 %v6516_v35  ;;  %v6257_v30 = vsel %vm3631_vm15, %v6256_v7, %v6255_v47 }
 0x66f   : > { %v6258_v61 = vrot.slane %v6241_v29, 6  ;;  %v6345_v56 = vrot.slane %v6241_v29, 5  ;;  %v6519_v26 = vpack.c.bf16 %v6448_v10, %v6448_v10  ;;  %v6555_v40 = vunpack.c.l.b16 %v6518_v20 }
 0x670   : > { %v6344_v24 = vsel %vm3631_vm15, %v6343_v52, %v6342_v31  ;;  %v6569_v34 = vrot.slane %v6554_v12, 7  ;;  %v6663_v42 = vrot.slane %v6553_v19, 1 }
 0x671   : > { %v6259_v45 = vsel %vm3634_vm0, %v6258_v61, %v6257_v30  ;;  %v6556_v41 = vunpack.c.l.b16 %v6519_v26  ;;  %v6571_v50 = vrot.slane %v6555_v40, 6  ;;  %v6346_v44 = vsel %vm3634_vm0, %v6345_v56, %v6344_v24 }
 0x672   : > { %v6570_v4 = vsel %vm3628_vm14, %v6569_v34, %v6553_v19  ;;  %v6665_v62 = vrot.slane %v6555_v40, 7  ;;  %v6664_v9 = vsel %vm3628_vm14, %v6554_v12, %v6663_v42 }
 0x673   : > { %v6667_v58 = vrot.slane %v6556_v41, 6 }
 0x679   : > { %v6077_v23 = vpop.f32.mrf.mxu1 }
 0x67a   : > { %v6078_v51 = vadd.f32 %v8620_v63, %v6077_v23 }
 0x67b   : > { %v6079_v25 = vpop.f32.mrf.mxu1 }
 0x67c   : > { %6103 = vst.msk [vmem:[%s11323_s22 + $0x10] sm:$0xff] %vm6100_vm2, %v6078_v51  ;;  %v6130_v38 = vcombine.high %v6078_v51, %v6078_v51  ;;  %v6137_v13 = vrot.slane %v6078_v51, %v10047_v60  ;;  %v6573_v25 = vrot.slane %v6556_v41, 5 }
 0x67d   : > { %v6080_v55 = vpop.f32.mrf.mxu1 }
 0x67e   : > { %v6144_v11 = vrot.slane %v6130_v38, %v10047_v60  ;;  %v6145_v43 = vcombine.high %v6137_v13, %v6137_v13  ;;  %v6201_v2 = vpack.c.bf16 %v6137_v13, %v6137_v13  ;;  %v6081_v6 = vadd.f32 %v8623_v32, %v6080_v55 }
 0x67f   : > { %v6082_v16 = vpop.f32.mrf.mxu1  ;;  %v6572_v38 = vsel %vm3631_vm15, %v6571_v50, %v6570_v4  ;;  %v6666_v13 = vsel %vm3631_vm15, %v6665_v62, %v6664_v9 }
 0x680   : > { %v6202_v15 = vpack.c.bf16 %v6145_v43, %v6145_v43  ;;  %v6242_v49 = vunpack.c.l.b16 %v6201_v2  ;;  %6104 = vst.msk [vmem:[%s11323_s22 + $0x18] sm:$0xff] %vm6100_vm2, %v6081_v6  ;;  %v6146_v1 = vcombine.high %v6144_v11, %v6144_v11  ;;  %v6449_v27 = vcombine.high %v6081_v6, %v6081_v6 }
 0x681   : > { %v6203_v39 = vpack.c.bf16 %v6144_v11, %v6144_v11  ;;  %v6456_v54 = vrot.slane %v6081_v6, %v10047_v60  ;;  %v6574_v52 = vsel %vm3634_vm0, %v6573_v25, %v6572_v38  ;;  %v6668_v12 = vsel %vm3634_vm0, %v6667_v58, %v6666_v13 }
 0x682   : > { %v6243_v8 = vunpack.c.l.b16 %v6202_v15  ;;  %v6347_v33 = vrot.slane %v6242_v49, 4  ;;  %v6463_v28 = vrot.slane %v6449_v27, %v10047_v60  ;;  %v6204_v5 = vpack.c.bf16 %v6146_v1, %v6146_v1 }
 0x683   : > { %v6260_v14 = vrot.slane %v6242_v49, 5  ;;  %v6244_v36 = vunpack.c.l.b16 %v6203_v39  ;;  %v6464_v21 = vcombine.high %v6456_v54, %v6456_v54  ;;  %v6520_v48 = vpack.c.bf16 %v6456_v54, %v6456_v54 }
 0x684   : > { %v6349_v18 = vrot.slane %v6243_v8, 3  ;;  %v6348_v3 = vsel %vm3637_vm1, %v6347_v33, %v6346_v44  ;;  %v6465_v63 = vcombine.high %v6463_v28, %v6463_v28  ;;  %v11350_v59 = vunpack.c.l.b16 %v6204_v5 }
 0x685   : > { %v6261_v53 = vsel %vm3637_vm1, %v6260_v14, %v6259_v45  ;;  %v6262_v37 = vrot.slane %v6243_v8, 4  ;;  %v6351_v46 = vrot.slane %v6244_v36, 2  ;;  %v6521_v23 = vpack.c.bf16 %v6464_v21, %v6464_v21 }
 0x686   : > { %v6522_v51 = vpack.c.bf16 %v6463_v28, %v6463_v28  ;;  %v6557_v57 = vunpack.c.l.b16 %v6520_v48  ;;  %v6350_v32 = vsel %vm3640_vm3, %v6349_v18, %v6348_v3  ;;  %v6264_v29 = vrot.slane %v6244_v36, 3 }
 0x687   : > { %v6523_v7 = vpack.c.bf16 %v6465_v63, %v6465_v63  ;;  %v6353_v55 = vrot.slane %v11350_v59, 1  ;;  %v6263_v43 = vsel %vm3640_vm3, %v6262_v37, %v6261_v53  ;;  %v6558_v2 = vunpack.c.l.b16 %v6521_v23 }
 0x688   : > { %v11358_v6 = vunpack.c.l.b16 %v6522_v51  ;;  %v6575_v47 = vrot.slane %v6557_v57, 4  ;;  %v6352_v16 = vsel %vm3643_vm6, %v6351_v46, %v6350_v32  ;;  %v6266_v49 = vrot.slane %v11350_v59, 2 }
 0x689   : > { %v11364_v31 = vunpack.c.l.b16 %v6523_v7  ;;  %v6669_v19 = vrot.slane %v6557_v57, 5  ;;  %v6265_v30 = vsel %vm3643_vm6, %v6264_v29, %v6263_v43  ;;  %v11371_v56 = vsel %vm11811_vm7, %v6353_v55, %v6352_v16 }
 0x68a   : > { %v8624_v17 = vpop.f32.mrf.mxu0  ;;  %v6576_v26 = vsel %vm3637_vm1, %v6575_v47, %v6574_v52  ;;  %v6577_v40 = vrot.slane %v6558_v2, 3  ;;  %v6579_v8 = vrot.slane %v11358_v6, 2  ;;  %v6671_v24 = vrot.slane %v6558_v2, 4 }
 0x68b   : > { %v6085_v35 = vpop.f32.mrf.mxu1  ;;  %v6581_v36 = vrot.slane %v11364_v31, 1  ;;  %v6670_v45 = vsel %vm3637_vm1, %v6669_v19, %v6668_v12  ;;  %v6673_v21 = vrot.slane %v11358_v6, 3  ;;  %v6675_v48 = vrot.slane %v11364_v31, 2 }
 0x68c   : > { %v8625_v22 = vpop.f32.mrf.mxu0  ;;  %v11384_v63 = vsel %vm11812_vm10, %v6266_v49, %v6265_v30  ;;  %v6578_v9 = vsel %vm3640_vm3, %v6577_v40, %v6576_v26 }
 0x68d   : > { %v8626_v11 = vadd.f32 %v8625_v22, %v8624_v17  ;;  %v6087_v20 = vpop.f32.mrf.mxu1  ;;  %v6672_v17 = vsel %vm3640_vm3, %v6671_v24, %v6670_v45  ;;  %v11392_v6 = vsel %vm3643_vm6, %v6579_v8, %v6578_v9 }
 0x68e   : > { %v8627_v10 = vpop.f32.mrf.mxu0  ;;  %v11395_v47 = vsel %vm3643_vm6, %v6673_v21, %v6672_v17 }
 0x68f   : > { %v6086_v15 = vadd.f32 %v8626_v11, %v6085_v35  ;;  %v6088_v27 = vpop.f32.mrf.mxu1 }
 0x690   : > { %v8628_v1 = vpop.f32.mrf.mxu0 }
 0x691   : > { %6105 = vst.msk [vmem:[%s11323_s22 + $0x20] sm:$0xff] %vm6100_vm2, %v6086_v15  ;;  %v6147_v61 = vcombine.high %v6086_v15, %v6086_v15  ;;  %v6154_v39 = vrot.slane %v6086_v15, %v10047_v60  ;;  %v8629_v54 = vadd.f32 %v8628_v1, %v8627_v10  ;;  %v6090_v33 = vpop.f32.mrf.mxu1 }
 0x692   : > { %v8630_v34 = vpop.f32.mrf.mxu0 }
 0x693   : > { %v6161_v28 = vrot.slane %v6147_v61, %v10047_v60  ;;  %v6162_v42 = vcombine.high %v6154_v39, %v6154_v39  ;;  %v6205_v5 = vpack.c.bf16 %v6154_v39, %v6154_v39  ;;  %v6089_v14 = vadd.f32 %v8629_v54, %v6088_v27 }
 0x694   : > { %v8631_v4 = vpop.f32.mrf.mxu0 }
 0x695   : > { %v6163_v41 = vcombine.high %v6161_v28, %v6161_v28  ;;  %v6206_v50 = vpack.c.bf16 %v6162_v42, %v6162_v42  ;;  %v6207_v44 = vpack.c.bf16 %v6161_v28, %v6161_v28  ;;  %v6246_v18 = vunpack.c.l.b16 %v6205_v5  ;;  %6106 = vst.msk [vmem:[%s11323_s22 + $0x28] sm:$0xff] %vm6100_vm2, %v6089_v14 }
 0x696   : > { %v6466_v62 = vcombine.high %v6089_v14, %v6089_v14  ;;  %v6473_v3 = vrot.slane %v6089_v14, %v10047_v60  ;;  %v8633_v13 = vpop.f32.mrf.mxu0  ;;  %v8632_v43 = vadd.f32 %v8631_v4, %v8630_v34 }
 0x697   : > { %v6208_v59 = vpack.c.bf16 %v6163_v41, %v6163_v41  ;;  %v6247_v53 = vunpack.c.l.b16 %v6206_v50  ;;  %v6248_v37 = vunpack.c.l.b16 %v6207_v44  ;;  %v6268_v46 = vrot.slane %v6246_v18, 1  ;;  %v6093_v29 = vpop.f32.mrf.mxu1 }
 0x698   : > { %v6480_v23 = vrot.slane %v6466_v62, %v10047_v60  ;;  %v6481_v51 = vcombine.high %v6473_v3, %v6473_v3  ;;  %v6524_v57 = vpack.c.bf16 %v6473_v3, %v6473_v3  ;;  %v8634_v19 = vpop.f32.mrf.mxu0  ;;  %v6094_v1 = vadd.f32 %v8632_v43, %v6093_v29 }
 0x699   : > { %v6249_v25 = vunpack.c.l.b16 %v6208_v59  ;;  %v6269_v58 = vsel %vm3628_vm14, %v6247_v53, %v6268_v46  ;;  %v6270_v32 = vrot.slane %v6248_v37, 7  ;;  %v6355_v38 = vrot.slane %v6247_v53, 7  ;;  %v6095_v2 = vpop.f32.mrf.mxu1 }
 0x69a   : > { %v6357_v7 = vrot.slane %v6248_v37, 6  ;;  %v6482_v22 = vcombine.high %v6480_v23, %v6480_v23  ;;  %v6525_v35 = vpack.c.bf16 %v6481_v51, %v6481_v51  ;;  %v6526_v55 = vpack.c.bf16 %v6480_v23, %v6480_v23  ;;  %6107 = vst.msk [vmem:[%s11323_s22 + $0x30] sm:$0xff] %vm6100_vm2, %v6094_v1 }
 0x69b   : > { %v6356_v11 = vsel %vm3628_vm14, %v6355_v38, %v6246_v18  ;;  %v6271_v10 = vsel %vm3631_vm15, %v6270_v32, %v6269_v58  ;;  %v6561_v16 = vunpack.c.l.b16 %v6524_v57  ;;  %v6272_v12 = vrot.slane %v6249_v25, 6  ;;  %v6096_v27 = vpop.f32.mrf.mxu1 }
 0x69c   : > { %v6527_v20 = vpack.c.bf16 %v6482_v22, %v6482_v22  ;;  %v6562_v52 = vunpack.c.l.b16 %v6525_v35  ;;  %v6359_v15 = vrot.slane %v6249_v25, 5  ;;  %v6563_v49 = vunpack.c.l.b16 %v6526_v55 }
 0x69d   : > { %v6358_v30 = vsel %vm3631_vm15, %v6357_v7, %v6356_v11  ;;  %v6677_v54 = vrot.slane %v6561_v16, 1  ;;  %v6164_v8 = vcombine.high %v6094_v1, %v6094_v1  ;;  %v6171_v24 = vrot.slane %v6094_v1, %v10047_v60  ;;  %v6098_v34 = vpop.f32.mrf.mxu1 }
 0x69e   : > { %v6564_v61 = vunpack.c.l.b16 %v6527_v20  ;;  %v6583_v39 = vrot.slane %v6562_v52, 7  ;;  %v6585_v26 = vrot.slane %v6563_v49, 6  ;;  %v6679_v40 = vrot.slane %v6563_v49, 7 }
 0x69f   : > { %v6678_v42 = vsel %vm3628_vm14, %v6562_v52, %v6677_v54  ;;  %v8635_v5 = vadd.f32 %v8634_v19, %v8633_v13  ;;  %v6178_v21 = vrot.slane %v6164_v8, %v10047_v60  ;;  %v6179_v41 = vcombine.high %v6171_v24, %v6171_v24 }
 0x6a0   : > { %v6584_v33 = vsel %vm3628_vm14, %v6583_v39, %v6561_v16  ;;  %v6587_v28 = vrot.slane %v6564_v61, 5  ;;  %v6681_v45 = vrot.slane %v6564_v61, 6  ;;  %v6680_v50 = vsel %vm3631_vm15, %v6679_v40, %v6678_v42  ;;  %vm11813_vm14 = vmmov %vm11811_vm7 }
 0x6a1   : > { %v6586_v14 = vsel %vm3631_vm15, %v6585_v26, %v6584_v33  ;;  %v6209_v44 = vpack.c.bf16 %v6171_v24, %v6171_v24  ;;  %v6273_v18 = vsel %vm3634_vm0, %v6272_v12, %v6271_v10  ;;  %v6097_v4 = vadd.f32 %v8635_v5, %v6096_v27  ;;  %vm11814_vm15 = vmmov %vm11811_vm7 }
 0x6a2   : > { %v6180_v62 = vcombine.high %v6178_v21, %v6178_v21  ;;  %v6210_v3 = vpack.c.bf16 %v6179_v41, %v6179_v41  ;;  %v6211_v9 = vpack.c.bf16 %v6178_v21, %v6178_v21  ;;  %v6360_v59 = vsel %vm3634_vm0, %v6359_v15, %v6358_v30 }
 0x6a3   : > { %v6250_v53 = vunpack.c.l.b16 %v6209_v44  ;;  %6108 = vst.msk [vmem:[%s11323_s22 + $0x38] sm:$0xff] %vm6100_vm2, %v6097_v4  ;;  %v6483_v37 = vcombine.high %v6097_v4, %v6097_v4  ;;  %v6490_v46 = vrot.slane %v6097_v4, %v10047_v60  ;;  %v6588_v23 = vsel %vm3634_vm0, %v6587_v28, %v6586_v14  ;;  %s9029_s22 = scalar_lea.vmem %s9028_s19, 2048 }
 0x6a4   : > { %v6212_v51 = vpack.c.bf16 %v6180_v62, %v6180_v62  ;;  %v6251_v57 = vunpack.c.l.b16 %v6210_v3  ;;  %v6252_v17 = vunpack.c.l.b16 %v6211_v9  ;;  %v6682_v25 = vsel %vm3634_vm0, %v6681_v45, %v6680_v50  ;;  %vm11815_vm0 = vmmov %vm11811_vm7 }
 0x6a5   : > { %v6274_v58 = vrot.slane %v6250_v53, 5  ;;  %v6361_v32 = vrot.slane %v6250_v53, 4  ;;  %v6497_v38 = vrot.slane %v6483_v37, %v10047_v60  ;;  %v6498_v13 = vcombine.high %v6490_v46, %v6490_v46  ;;  %vm11817_vm5 = vmmov %vm11815_vm0  ;;  %v8958_v53 = vld [vmem:[%s11708_s4 + $0x28] sm:$0xff]  }
 0x6a6   : > { %v6253_v29 = vunpack.c.l.b16 %v6212_v51  ;;  %v6276_v7 = vrot.slane %v6251_v57, 4  ;;  %v6278_v22 = vrot.slane %v6252_v17, 3  ;;  %v6363_v35 = vrot.slane %v6251_v57, 3  ;;  %v8973_v51 = vld [vmem:[%s11709_s5 + $0x38] sm:$0xff]   ;;  %v8974_v57 = vld [vmem:[%s11709_s5 + $0x70] sm:$0xff]  }
 0x6a7   : > { %v6275_v55 = vsel %vm3637_vm1, %v6274_v58, %v6273_v18  ;;  %v6362_v11 = vsel %vm3637_vm1, %v6361_v32, %v6360_v59  ;;  %v6365_v43 = vrot.slane %v6252_v17, 2  ;;  %v6499_v2 = vcombine.high %v6497_v38, %v6497_v38  ;;  %v8978_v17 = vld [vmem:[%s11709_s5 + $0xf8] sm:$0xff]   ;;  %v8975_v58 = vld [vmem:[%s11709_s5 + $0x30] sm:$0xff]  }
 0x6a8   : > { %v6280_v10 = vrot.slane %v6253_v29, 2  ;;  %v6367_v20 = vrot.slane %v6253_v29, 1  ;;  %v6528_v16 = vpack.c.bf16 %v6490_v46, %v6490_v46  ;;  %v6529_v52 = vpack.c.bf16 %v6498_v13, %v6498_v13  ;;  %v8982_v32 = vld [vmem:[%s11709_s5 + $0xf0] sm:$0xff]   ;;  %v8977_v13 = vld [vmem:[%s11709_s5 + $0x28] sm:$0xff]   ;;  %v8980_v29 = vld [vmem:[%s11709_s5 + $0x60] sm:$0xff]  }
 0x6a9   : > { %v6530_v12 = vpack.c.bf16 %v6497_v38, %v6497_v38  ;;  %v6531_v15 = vpack.c.bf16 %v6499_v2, %v6499_v2  ;;  %v6364_v49 = vsel %vm3640_vm3, %v6363_v35, %v6362_v11  ;;  %v6277_v60 = vsel %vm3640_vm3, %v6276_v7, %v6275_v55  ;;  %v8976_v38 = vld [vmem:[%s11709_s5 + $0x68] sm:$0xff]   ;;  %v8981_v7 = vld [vmem:[%s11709_s5 + $0x20] sm:$0xff]  }
 0x6aa   : > { %v6565_v19 = vunpack.c.l.b16 %v6528_v16  ;;  %v6566_v1 = vunpack.c.l.b16 %v6529_v52  ;;  %v6366_v27 = vsel %vm3643_vm6, %v6365_v43, %v6364_v49  ;;  %v6279_v30 = vsel %vm3643_vm6, %v6278_v22, %v6277_v60 }
 0x6ab   : > { %v6567_v61 = vunpack.c.l.b16 %v6530_v12  ;;  %v6568_v39 = vunpack.c.l.b16 %v6531_v15  ;;  %v6368_v54 = vsel %vm11813_vm14, %v6367_v20, %v6366_v27  ;;  %v6281_v26 = vsel %vm11814_vm15, %v6280_v10, %v6279_v30  ;;  %v8984_v27 = vld [vmem:[%s11709_s5 + $0xb0] sm:$0xff]   ;;  %v8985_v30 = vld [vmem:[%s11709_s5 + $0x58] sm:$0xff]  }
 0x6ac   : > { %v6589_v40 = vrot.slane %v6565_v19, 4  ;;  %v6591_v8 = vrot.slane %v6566_v1, 3  ;;  %v6683_v24 = vrot.slane %v6565_v19, 5  ;;  %v6685_v34 = vrot.slane %v6566_v1, 4 }
 0x6ad   : > { %v6593_v33 = vrot.slane %v6567_v61, 2  ;;  %v6595_v28 = vrot.slane %v6568_v39, 1  ;;  %v6687_v42 = vrot.slane %v6567_v61, 3  ;;  %v6689_v5 = vrot.slane %v6568_v39, 2  ;;  %v8986_v61 = vld [vmem:[%s11709_s5 + $0x18] sm:$0xff]  }
 0x6ae   : > { %v6590_v14 = vsel %vm3637_vm1, %v6589_v40, %v6588_v23  ;;  %v6684_v45 = vsel %vm3637_vm1, %v6683_v24, %v6682_v25  ;;  %v6369_v21 = vpack.c.b16 %v6368_v54, %v11371_v56  ;;  %v6282_v41 = vpack.c.b16 %v6281_v26, %v11384_v63  ;;  %vm11816_vm1 = vmmov %vm11815_vm0  ;;  %v8972_v23 = vld [vmem:[%s11709_s5 + $0x78] sm:$0xff]   ;;  %v8987_v26 = vld [vmem:[%s11709_s5 + $0xe8] sm:$0xff]  }
 0x6af   : > { %v6592_v50 = vsel %vm3640_vm3, %v6591_v8, %v6590_v14  ;;  %v6686_v44 = vsel %vm3640_vm3, %v6685_v34, %v6684_v45  ;;  %v6582_v62 = vsel %vm11815_vm0, %v6581_v36, %v11392_v6  ;;  %v6676_v63 = vsel %vm11817_vm5, %v6675_v48, %v11395_v47  ;;  %vm11818_vm3 = vmmov %vm11815_vm0  ;;  %v8959_v36 = vld [vmem:[%s11708_s4 + $0x38] sm:$0xff]   ;;  %v8960_v48 = vld [vmem:[%s11708_s4 + $0x20] sm:$0xff]  }
 0x6b0   : > { %6370 = vrot.lane.b32.xlu0 %v6369_v21, %s9126_s24  ;;  %6283 = vrot.lane.b32.xlu1 %v6282_v41, %s9126_s24  ;;  %v6594_v18 = vsel %vm3643_vm6, %v6593_v33, %v6592_v50  ;;  %v6688_v4 = vsel %vm3643_vm6, %v6687_v42, %v6686_v44  ;;  %v8961_v47 = vld [vmem:[%s11708_s4 + $0x30] sm:$0xff]   ;;  %vm6752_vm6 = vcmask 521216   ;;  %v8979_v25 = vld [vmem:[%s11709_s5 + $0xb8] sm:$0xff]  }
 0x6b1   : > { %v6596_v56 = vsel %vm11816_vm1, %v6595_v28, %v6594_v18  ;;  %v6690_v3 = vsel %vm11818_vm3, %v6689_v5, %v6688_v4  ;;  %6753 = vst.msk [vmem:[#allocation4] sm:$0x3f] %vm6752_vm6, %v9115_v0  ;;  %6754 = vst.msk [vmem:[#allocation4 + $0x8] sm:$0x3f] %vm6752_vm6, %v9115_v0  ;;  %v8990_v28 = vld [vmem:[%s11709_s5 + $0xa8] sm:$0xff]   ;;  %v8991_v42 = vld [vmem:[%s11709_s5 + $0x50] sm:$0xff]  }
 0x6b2   : > { %v6597_v9 = vpack.c.b16 %v6596_v56, %v6582_v62  ;;  %v6691_v59 = vpack.c.b16 %v6690_v3, %v6676_v63  ;;  %6755 = vst.msk [vmem:[#allocation4 + $0x10] sm:$0x3f] %vm6752_vm6, %v9115_v0  ;;  %6758 = vst.msk [vmem:[#allocation4 + $0x28] sm:$0x3f] %vm6752_vm6, %v9115_v0  ;;  %v8992_v5 = vld [vmem:[%s11709_s5 + $0x10] sm:$0xff]   ;;  %v8993_v45 = vld [vmem:[%s11709_s5 + $0xe0] sm:$0xff]  }
 0x6b3   : > { %6756 = vst.msk [vmem:[#allocation4 + $0x18] sm:$0x3f] %vm6752_vm6, %v9115_v0  ;;  %6757 = vst.msk [vmem:[#allocation4 + $0x20] sm:$0x3f] %vm6752_vm6, %v9115_v0 }
 0x6b4   : > { %6598 = vrot.lane.b32.xlu0 %v6597_v9, %s9126_s24  ;;  %6692 = vrot.lane.b32.xlu1 %v6691_v59, %s9126_s24  ;;  %s9023_s24 = scalar_lea.vmem %s11624_s10, 1024 }
 0x6b5   : > { %p9024_p11 = scmp.ne.s32.totalorder %s11624_s10, %s9023_s24  ;;  %p9031_p1 = scmp.lt.s32.totalorder %s9029_s22, %s9023_s24 }
 0x6b7   : > { %p9025_p12 = pnand %p9024_p11, %p9218_p5  ;;  %p9032_p2 = por %p9031_p1, %p9030_p0 }
 0x6b9   : > { %p9026_p13 = pneg %p9025_p12 }
 0x6bb   : > { %p9033_p3 = pnand %p9032_p2, %p9026_p13 }
 0x722   : > { %v6371_v6 = vpop.permute.xlu0 %6370  ;;  %v6284_v31 = vpop.permute.xlu1 %6283 }
 0x723   : > { %8780 = vmatmul.mubr.msk.bf16.vlgmr.msra.gmra.mxu1 %vm6100_vm2, %v6284_v31  ;;  %8788 = vmatmul.mubr.msk.bf16.vlgmr.msra.gmra.mxu0 %vm6100_vm2, %v6371_v6 }
 0x724   : > { %8792 = vmatpush3.bf16.msra.mxu0 %v8958_v53  ;;  %8800 = vmatpush3.bf16.msra.mxu1 %v8959_v36 }
 0x725   : > { %8793 = vmatprep.subr.bf16.mxu0 %v9115_v0  ;;  %8801 = vmatprep.subr.bf16.mxu1 %v9115_v0 }
 0x726   : > { %8795 = vmatprep.mubr.msk.bf16.mxu0 %vm9131_vm13, %v9115_v0  ;;  %8803 = vmatprep.mubr.msk.bf16.mxu1 %vm9131_vm13, %v9115_v0  ;;  %v6599_v37 = vpop.permute.xlu0 %6598  ;;  %v6693_v46 = vpop.permute.xlu1 %6692 }
 0x728   : > { %8794 = vmatpush3.bf16.msra.mxu0 %v8960_v48  ;;  %8802 = vmatpush3.bf16.msra.mxu1 %v8961_v47 }
 0x729   : > { %8648 = vmatprep.subr.bf16.mxu0 %v8972_v23  ;;  %8670 = vmatprep.subr.bf16.mxu1 %v8978_v17 }
 0x72b   : > { %8796 = vmatmul.mubr.msk.bf16.vlgmr.msra.gmra.mxu0 %vm6100_vm2, %v6599_v37  ;;  %8804 = vmatmul.mubr.msk.bf16.vlgmr.msra.gmra.mxu1 %vm6100_vm2, %v6693_v46 }
 0x72c   : > { %8649 = vmatpush3.bf16.msra.mxu0 %v8973_v51  ;;  %8671 = vmatpush3.bf16.msra.mxu1 %v8979_v25 }
 0x72d   : > { %8650 = vmatprep.subr.bf16.mxu0 %v8974_v57  ;;  %8672 = vmatprep.subr.bf16.mxu1 %v8982_v32  ;;  %v8997_v32 = vld [vmem:[%s11709_s5 + $0x48] sm:$0xff]  }
 0x730   : > { %8651 = vmatpush3.bf16.msra.mxu0 %v8975_v58  ;;  %8673 = vmatpush3.bf16.msra.mxu1 %v8984_v27  ;;  %v8996_v58 = vld [vmem:[%s11709_s5 + $0xa0] sm:$0xff]  }
 0x731   : > { %8652 = vmatprep.subr.bf16.mxu0 %v8976_v38  ;;  %8674 = vmatprep.subr.bf16.mxu1 %v8987_v26  ;;  %v9014_v27 = vld [vmem:[%s11709_s5 + $0xc0] sm:$0xff]  }
 0x734   : > { %8653 = vmatpush3.bf16.msra.mxu0 %v8977_v13  ;;  %8675 = vmatpush3.bf16.msra.mxu1 %v8990_v28 }
 0x735   : > { %8654 = vmatprep.subr.bf16.mxu0 %v8980_v29  ;;  %8676 = vmatprep.subr.bf16.mxu1 %v8993_v45  ;;  %v8998_v29 = vld [vmem:[%s11709_s5 + $0x8] sm:$0xff]  }
 0x738   : > { %8655 = vmatpush3.bf16.msra.mxu0 %v8981_v7  ;;  %v8999_v7 = vld [vmem:[%s11709_s5 + $0xd8] sm:$0xff]   ;;  %8677 = vmatpush3.bf16.msra.mxu1 %v8996_v58 }
 0x739   : > { %8656 = vmatprep.subr.bf16.mxu0 %v8985_v30  ;;  %8678 = vmatprep.subr.bf16.mxu1 %v8999_v7  ;;  %v9016_v30 = vld [vmem:[%s11709_s5 + $0x80] sm:$0xff]  }
 0x73c   : > { %8657 = vmatpush3.bf16.msra.mxu0 %v8986_v61 }
 0x73d   : > { %8658 = vmatprep.subr.bf16.mxu0 %v8991_v42 }
 0x740   : > { %8659 = vmatpush3.bf16.msra.mxu0 %v8992_v5  ;;  %v9015_v5 = vld [vmem:[%s11709_s5 + $0x110] sm:$0xff]  }
 0x741   : > { %8660 = vmatprep.subr.bf16.mxu0 %v8997_v32 }
 0x744   : > { %8661 = vmatpush3.bf16.msra.mxu0 %v8998_v29 }
 0x7e3   : > { %v6334_v22 = vpop.f32.mrf.mxu1  ;;  %v6421_v35 = vpop.f32.mrf.mxu0 }
 0x7e4   : > { %v6422_v16 = vadd.f32 %v6421_v35, %v6334_v22 }
 0x7e5   : > { %v8781_v55 = vpop.f32.mrf.mxu1  ;;  %v8789_v11 = vpop.f32.mrf.mxu0 }
 0x7e7   : > { %v6337_v43 = vpop.f32.mrf.mxu1  ;;  %v6424_v2 = vpop.f32.mrf.mxu0 }
 0x7e8   : > { %v6425_v19 = vadd.f32 %v6424_v2, %v6337_v43  ;;  %v9002_v43 = vld [vmem:[%s11709_s5 + $0x98] sm:$0xff]  }
 0x7e9   : > { %v8782_v10 = vpop.f32.mrf.mxu1  ;;  %v8790_v20 = vpop.f32.mrf.mxu0  ;;  %8679 = vmatpush3.bf16.msra.mxu1 %v9002_v43 }
 0x7ea   : > { %v9003_v10 = vld [vmem:[%s11709_s5 + $0x40] sm:$0xff]  }
 0x7eb   : > { %v6649_v52 = vpop.f32.mrf.mxu0  ;;  %v6743_v12 = vpop.f32.mrf.mxu1  ;;  %v9004_v20 = vld [vmem:[%s11709_s5] sm:$0xff]   ;;  %8662 = vmatprep.subr.bf16.mxu0 %v9003_v10 }
 0x7ec   : > { %v6656_v15 = vadd.f32 %v6649_v52, %v6422_v16  ;;  %v9005_v16 = vld [vmem:[%s11709_s5 + $0xd0] sm:$0xff]   ;;  %8663 = vmatpush3.bf16.msra.mxu0 %v9004_v20 }
 0x7ed   : > { %v8797_v49 = vpop.f32.mrf.mxu0  ;;  %v8805_v60 = vpop.f32.mrf.mxu1  ;;  %8680 = vmatprep.subr.bf16.mxu1 %v9005_v16  ;;  %8807 = vmatprep.subr.bf16.mxu0 %v9115_v0 }
 0x7ee   : > { %v6750_v1 = vadd.f32 %v6743_v12, %v6656_v15  ;;  %v9007_v49 = vld [vmem:[%s11709_s5 + $0x90] sm:$0xff]  }
 0x7ef   : > { %v6652_v39 = vpop.f32.mrf.mxu0  ;;  %v6746_v54 = vpop.f32.mrf.mxu1  ;;  %8681 = vmatpush3.bf16.msra.mxu1 %v9007_v49 }
 0x7f0   : > { %v6761_v40 = vcombine.high %v6750_v1, %v6750_v1  ;;  %6767 = vst.msk [vmem:[#allocation4 + $0x9] sm:$0xf] %vm6766_vm12, %v6750_v1  ;;  %v6657_v8 = vadd.f32 %v6652_v39, %v6425_v19  ;;  %v9011_v19 = vld [vmem:[%s11709_s5 + $0xc8] sm:$0xff]  }
 0x7f1   : > { %v8798_v24 = vpop.f32.mrf.mxu0  ;;  %v8806_v34 = vpop.f32.mrf.mxu1  ;;  %v9013_v1 = vld [vmem:[%s11709_s5 + $0x88] sm:$0xff]   ;;  %8682 = vmatprep.subr.bf16.mxu1 %v9011_v19 }
 0x7f2   : > { %6768 = vst.msk [vmem:[#allocation4 + $0x11] sm:$0xf] %vm6766_vm12, %v6761_v40  ;;  %v6751_v33 = vadd.f32 %v6746_v54, %v6657_v8  ;;  %v9012_v34 = vld [vmem:[%s11709_s5 + $0x118] sm:$0xff]  }
 0x7f3   : > { %8683 = vmatpush3.bf16.msra.mxu1 %v9013_v1 }
 0x7f4   : > { %v6762_v14 = vcombine.high %v6751_v33, %v6751_v33  ;;  %6769 = vst.msk [vmem:[#allocation4 + $0x19] sm:$0xf] %vm6766_vm12, %v6751_v33  ;;  %8684 = vmatprep.subr.bf16.mxu1 %v9014_v27 }
 0x7f6   : > { %6770 = vst.msk [vmem:[#allocation4 + $0x21] sm:$0xf] %vm6766_vm12, %v6762_v14  ;;  %v9020_v14 = vld [vmem:[%s11709_s5 + $0x108] sm:$0xff]  }
 0x7f7   : > { %v8964_v21 = vld [vmem:[#allocation4 + $0x1] ss:$8 sps:$4 sm:$0xff]   ;;  %8685 = vmatpush3.bf16.msra.mxu1 %v9016_v30 }
 0x7f8   : > { %v8983_v41 = vld [vmem:[#allocation4] ss:$8 sps:$4 sm:$0xff]   ;;  %v8539_v50 = vpack.c.bf16 %v8964_v21, %v8964_v21 }
 0x7f9   : > { %v8965_v44 = vld [vmem:[#allocation4 + $0x8] ss:$8 sps:$4 sm:$0xff]   ;;  %v8537_v18 = vpack.c.bf16 %v8983_v41, %v8983_v41 }
 0x7fa   : > { %6811 = vrot.lane.b32.xlu0 %v8539_v50, %s11727_s21  ;;  %v8967_v62 = vld [vmem:[#allocation4 + $0xa] ss:$8 sps:$4 sm:$0xff]   ;;  %v8543_v9 = vpack.c.bf16 %v8965_v44, %v8965_v44 }
 0x7fb   : > { %v8962_v4 = vld [vmem:[#allocation4 + $0x12] ss:$8 sps:$4 sm:$0xff]   ;;  %6791 = vst.msk [vmem:[#allocation7] sm:$0xf] %vm6766_vm12, %v8537_v18  ;;  %v8547_v48 = vpack.c.bf16 %v8967_v62, %v8967_v62  ;;  %v8988_v47 = vld [vmem:[#allocation4 + $0x2] ss:$8 sps:$4 sm:$0xff]  }
 0x7fc   : > { %v8966_v56 = vld [vmem:[#allocation4 + $0x11] ss:$8 sps:$4 sm:$0xff]   ;;  %v8553_v3 = vpack.c.bf16 %v8962_v4, %v8962_v4  ;;  %v8541_v23 = vpack.c.bf16 %v8988_v47, %v8988_v47 }
 0x7fd   : > { %v8963_v63 = vld [vmem:[#allocation4 + $0x22] ss:$8 sps:$4 sm:$0xff]   ;;  %v8540_v59 = vpack.c.bf16 %v8966_v56, %v8966_v56  ;;  %v8969_v6 = vld [vmem:[#allocation4 + $0x11] ss:$8 sps:$4 sm:$0xff]  }
 0x7fe   : > { %v8968_v53 = vld [vmem:[#allocation4 + $0x18] ss:$8 sps:$4 sm:$0xff]   ;;  %v8554_v36 = vpack.c.bf16 %v8963_v63, %v8963_v63  ;;  %6985 = vst.msk [vmem:[#allocation7 + $0x10] sm:$0xf] %vm6766_vm12, %v8553_v3  ;;  %6860 = vrot.lane.b32.xlu0 %v8543_v9, %s11727_s21  ;;  %v8994_v51 = vld [vmem:[#allocation4 + $0x9] ss:$8 sps:$4 sm:$0xff]   ;;  %v8551_v38 = vpack.c.bf16 %v8969_v6, %v8969_v6 }
 0x7ff   : > { %6813 = vrot.lane.b32.xlu1 %v8540_v59, %s11727_s21  ;;  %v8970_v31 = vld [vmem:[#allocation4 + $0x1a] ss:$8 sps:$4 sm:$0xff]   ;;  %v8544_v37 = vpack.c.bf16 %v8968_v53, %v8968_v53  ;;  %6840 = vst.msk [vmem:[#allocation7 + $0x4] sm:$0xf] %vm6766_vm12, %v8541_v23  ;;  %v8545_v13 = vpack.c.bf16 %v8994_v51, %v8994_v51  ;;  %v9021_v41 = vld [vmem:[%s11709_s5 + $0x100] sm:$0xff]  }
 0x800   : > { %6986 = vst.msk [vmem:[#allocation7 + $0x24] sm:$0xf] %vm6766_vm12, %v8554_v36  ;;  %v8989_v46 = vld [vmem:[#allocation4 + $0x10] ss:$8 sps:$4 sm:$0xff]   ;;  %v8971_v57 = vld [vmem:[#allocation4 + $0x21] ss:$8 sps:$4 sm:$0xff]   ;;  %v8548_v22 = vpack.c.bf16 %v8970_v31, %v8970_v31 }
 0x801   : > { %v8538_v17 = vpack.c.bf16 %v8989_v46, %v8989_v46  ;;  %v8995_v25 = vld [vmem:[#allocation4 + $0x12] ss:$8 sps:$4 sm:$0xff]   ;;  %6888 = vst.msk [vmem:[#allocation7 + $0x8] sm:$0xf] %vm6766_vm12, %v8545_v13  ;;  %v9006_v12 = vld [vmem:[#allocation4 + $0x20] ss:$8 sps:$4 sm:$0xff]   ;;  %v8552_v15 = vpack.c.bf16 %v8971_v57, %v8971_v57 }
 0x802   : > { %6908 = vrot.lane.b32.xlu0 %v8547_v48, %s11727_s21  ;;  %v8542_v35 = vpack.c.bf16 %v8995_v25, %v8995_v25  ;;  %v9000_v55 = vld [vmem:[#allocation4 + $0x10] ss:$8 sps:$4 sm:$0xff]   ;;  %v8550_v60 = vpack.c.bf16 %v9006_v12, %v9006_v12 }
 0x803   : > { %6862 = vrot.lane.b32.xlu1 %v8544_v37, %s11727_s21  ;;  %6792 = vst.msk [vmem:[#allocation7 + $0x14] sm:$0xf] %vm6766_vm12, %v8538_v17  ;;  %v9001_v11 = vld [vmem:[#allocation4 + $0x19] ss:$8 sps:$4 sm:$0xff]   ;;  %v8549_v2 = vpack.c.bf16 %v9000_v55, %v9000_v55 }
 0x804   : > { %6841 = vst.msk [vmem:[#allocation7 + $0x18] sm:$0xf] %vm6766_vm12, %v8542_v35  ;;  %v8546_v52 = vpack.c.bf16 %v9001_v11, %v9001_v11  ;;  %6938 = vst.msk [vmem:[#allocation7 + $0x20] sm:$0xf] %vm6766_vm12, %v8550_v60 }
 0x805   : > { %6937 = vst.msk [vmem:[#allocation7 + $0xc] sm:$0xf] %vm6766_vm12, %v8549_v2 }
 0x806   : > { %6957 = vrot.lane.b32.xlu0 %v8551_v38, %s11727_s21  ;;  %6889 = vst.msk [vmem:[#allocation7 + $0x1c] sm:$0xf] %vm6766_vm12, %v8546_v52 }
 0x807   : > { %6910 = vrot.lane.b32.xlu1 %v8548_v22, %s11727_s21  ;;  %v9022_v50 = vld [vmem:[#allocation7 + $0x10] ss:$20 sps:$4 sm:$0xff]  }
 0x80b   : > { %6959 = vrot.lane.b32.xlu1 %v8552_v15, %s11727_s21 }
 0x86c   : > { %v6812_v61 = vpop.permute.xlu0 %6811 }
 0x86d   : > { %6818 = vst.msk [vmem:[#allocation7] sm:$0xf] %vm6817_vm4, %v6812_v61 }
 0x870   : > { %v6861_v39 = vpop.permute.xlu0 %6860 }
 0x871   : > { %6866 = vst.msk [vmem:[#allocation7 + $0x4] sm:$0xf] %vm6817_vm4, %v6861_v39  ;;  %v6814_v54 = vpop.permute.xlu1 %6813 }
 0x872   : > { %6819 = vst.msk [vmem:[#allocation7 + $0x14] sm:$0xf] %vm6817_vm4, %v6814_v54 }
 0x874   : > { %v6909_v26 = vpop.permute.xlu0 %6908 }
 0x875   : > { %6914 = vst.msk [vmem:[#allocation7 + $0x8] sm:$0xf] %vm6817_vm4, %v6909_v26  ;;  %v6863_v40 = vpop.permute.xlu1 %6862 }
 0x876   : > { %6867 = vst.msk [vmem:[#allocation7 + $0x18] sm:$0xf] %vm6817_vm4, %v6863_v40 }
 0x878   : > { %v6958_v8 = vpop.permute.xlu0 %6957 }
 0x879   : > { %6963 = vst.msk [vmem:[#allocation7 + $0xc] sm:$0xf] %vm6817_vm4, %v6958_v8  ;;  %v6911_v24 = vpop.permute.xlu1 %6910  ;;  %v9008_v28 = vld [vmem:[#allocation7] ss:$20 sps:$4 sm:$0xff]  }
 0x87a   : > { %6915 = vst.msk [vmem:[#allocation7 + $0x1c] sm:$0xf] %vm6817_vm4, %v6911_v24 }
 0x87d   : > { %v6960_v33 = vpop.permute.xlu1 %6959  ;;  %v9010_v42 = vld [vmem:[#allocation7 + $0x4] ss:$20 sps:$4 sm:$0xff]  }
 0x87e   : > { %6964 = vst.msk [vmem:[#allocation7 + $0x20] sm:$0xf] %vm6817_vm4, %v6960_v33  ;;  %7342 = vmatprep.mubr.bf16.mxu0 %v9010_v42 }
 0x87f   : > { %7343 = vmatmul.mubr.bf16.vlgmr.msra.gmra.mxu0 %v9008_v28 }
 0x880   : > { %8808 = vmatpush3.bf16.msra.mxu0 %v9012_v34  ;;  %8815 = vmatprep.mubr.msk.bf16.mxu0 %vm9131_vm13, %v9115_v0 }
 0x881   : > { %8809 = vmatprep.subr.bf16.mxu0 %v9115_v0  ;;  %v9017_v45 = vld [vmem:[#allocation7 + $0x8] ss:$20 sps:$4 sm:$0xff]  }
 0x884   : > { %8810 = vmatpush3.bf16.msra.mxu0 %v9015_v5 }
 0x885   : > { %v9019_v21 = vld [vmem:[#allocation7 + $0xc] ss:$20 sps:$4 sm:$0xff]   ;;  %8811 = vmatprep.subr.bf16.mxu0 %v9115_v0 }
 0x886   : > { %7383 = vmatprep.mubr.bf16.mxu1 %v9019_v21 }
 0x887   : > { %7384 = vmatmul.mubr.bf16.vlgmr.msra.gmra.mxu1 %v9017_v45 }
 0x888   : > { %8812 = vmatpush3.bf16.msra.mxu0 %v9020_v14 }
 0x889   : > { %8813 = vmatprep.subr.bf16.mxu0 %v9115_v0 }
 0x88c   : > { %8814 = vmatpush3.bf16.msra.mxu0 %v9021_v41 }
 0x88f   : > { %8816 = vmatmul.mubr.msk.bf16.vlgmr.msra.gmra.mxu0 %vm7306_vm11, %v9022_v50 }
 0x890   : > { %9036 = shalt.err (!%p9033_p3)
}
 0x891   : > { %s9037_s18 = scalar_lea.hbm %s11622_s23, 1024  ;;  %s9041_s26 = scalar_lea.hbm %s11711_s7, 2048 }
 0x892   : > { %p9038_p4 = scmp.ne.s32.totalorder %s11622_s23, %s9037_s18  ;;  %p9042_p9 = scmp.lt.s32.totalorder %s11622_s23, %s11711_s7 }
 0x893   : > { %p9043_p10 = scmp.lt.s32.totalorder %s9041_s26, %s9037_s18 }
 0x894   : > { %p9039_p7 = pnand %p9038_p4, %p9218_p5 }
 0x895   : > { %p9044_p11 = por %p9043_p10, %p9042_p9 }
 0x896   : > { %p9040_p8 = pneg %p9039_p7 }
 0x898   : > { %p9045_p12 = pnand %p9044_p11, %p9040_p8 }
 0x89a   : > { %9048 = shalt.err (!%p9045_p12)
}
 0x89b   : > { %s9133_s24 = smov 128   ;;  %s11819_s19 = smov 8  }
 0x89c   : > { %8820 = dma.vmem_to_hbm [thread:$0]  (%p9218_p5), %s11624_s10, 1024, %s11622_s23, %s7449_s20, %s9133_s24, %s9133_s24, %s11819_s19  }
 0x89d   : > { %s7610_s21 = sshll.u32 %s11320_s12, 4  ;;  %s8556_s20 = sshll.u32 %s9201_s9, 8 }
 0x89e   : > { %s316_s10 = scalar_lea.vmem [#allocation10], %s7610_s21  ;;  %s11660_s25 = scalar_lea.hbm %s11712_s8, %s8556_s20 }
 0x89f   : > { %s7486_s23 = sshll.u32 %s316_s10, 4  ;;  %s7454_s9 = scalar_lea.sflag [#allocation11], %s11320_s12  ;;  %s11654_s23 = int_to_ptr.vmem [resolvable:$true] %s7486_s23 }
 0x8a0   : > { %s9049_s17 = scalar_lea.vmem %s11654_s23, 256  ;;  %s9134_s26 = smov [#allocation10]  }
 0x8a1   : > { %p9050_p13 = scmp.ne.s32.totalorder %s11654_s23, %s9049_s17  ;;  %s9053_s13 = sshll.u32 %s9134_s26, 4  ;;  %s9054_s13 = int_to_ptr.vmem [resolvable:$false] %s9053_s13 }
 0x8a2   : > { %s9055_s24 = scalar_lea.vmem %s9054_s13, 512  ;;  %p9056_p2 = scmp.lt.s32.totalorder %s11654_s23, %s9054_s13 }
 0x8a3   : > { %p9051_p0 = pnand %p9050_p13, %p9218_p5  ;;  %p9057_p3 = scmp.lt.s32.totalorder %s9055_s24, %s9049_s17 }
 0x8a5   : > { %p9052_p1 = pneg %p9051_p0  ;;  %p9058_p4 = por %p9057_p3, %p9056_p2 }
 0x8a7   : > { %p9059_p7 = pnand %p9058_p4, %p9052_p1 }
 0x93f   : > { %v8664_v0 = vpop.f32.mrf.mxu0 }
 0x941   : > { %v8665_v44 = vpop.f32.mrf.mxu0 }
 0x942   : > { %v8666_v56 = vadd.f32 %v8665_v44, %v8664_v0 }
 0x943   : > { %v8667_v18 = vpop.f32.mrf.mxu0 }
 0x945   : > { %v8668_v3 = vpop.f32.mrf.mxu0 }
 0x946   : > { %v8669_v36 = vadd.f32 %v8668_v3, %v8667_v18 }
 0x947   : > { %v8686_v4 = vpop.f32.mrf.mxu1 }
 0x949   : > { %v8687_v62 = vpop.f32.mrf.mxu1 }
 0x94a   : > { %v8688_v63 = vadd.f32 %v8687_v62, %v8686_v4 }
 0x94b   : > { %v8689_v9 = vpop.f32.mrf.mxu1 }
 0x94c   : > { %v7386_v59 = vadd.f32 %v8688_v63, %v8666_v56 }
 0x94d   : > { %v8690_v53 = vpop.f32.mrf.mxu1 }
 0x94e   : > { %v8691_v6 = vadd.f32 %v8690_v53, %v8689_v9 }
 0x94f   : > { %v7426_v31 = vpop.f32.mrf.mxu0 }
 0x950   : > { %v7427_v48 = vadd.f32 %v7426_v31, %v7386_v59  ;;  %v7389_v47 = vadd.f32 %v8691_v6, %v8669_v36 }
 0x951   : > { %v8817_v37 = vpop.f32.mrf.mxu0 }
 0x952   : > { %v7435_v46 = vcombine.high %v7427_v48, %v7427_v48  ;;  %7439 = vst.msk [vmem:[%s316_s10] sm:$0xf] %vm6766_vm12, %v7427_v48 }
 0x953   : > { %v7429_v23 = vpop.f32.mrf.mxu0 }
 0x954   : > { %7440 = vst.msk [vmem:[%s316_s10 + $0x4] sm:$0xf] %vm6766_vm12, %v7435_v46  ;;  %v7430_v51 = vadd.f32 %v7429_v23, %v7389_v47 }
 0x955   : > { %v8818_v57 = vpop.f32.mrf.mxu0 }
 0x956   : > { %v7436_v17 = vcombine.high %v7430_v51, %v7430_v51  ;;  %7441 = vst.msk [vmem:[%s316_s10 + $0x8] sm:$0xf] %vm6766_vm12, %v7430_v51 }
 0x958   : > { %7442 = vst.msk [vmem:[%s316_s10 + $0xc] sm:$0xf] %vm6766_vm12, %v7436_v17 }
 0x959   : > { %9062 = shalt.err (!%p9059_p7)
}
 0x95a   : > { %s9063_s19 = scalar_lea.hbm %s11660_s25, 256  ;;  %s9067_s10 = scalar_lea.hbm %s11712_s8, 512 }
 0x95b   : > { %p9064_p8 = scmp.ne.s32.totalorder %s11660_s25, %s9063_s19  ;;  %p9068_p11 = scmp.lt.s32.totalorder %s11660_s25, %s11712_s8 }
 0x95c   : > { %p9069_p12 = scmp.lt.s32.totalorder %s9067_s10, %s9063_s19 }
 0x95d   : > { %p9065_p9 = pnand %p9064_p8, %p9218_p5 }
 0x95e   : > { %p9070_p13 = por %p9069_p12, %p9068_p11 }
 0x95f   : > { %p9066_p10 = pneg %p9065_p9 }
 0x961   : > { %p9071_p0 = pnand %p9070_p13, %p9066_p10 }
 0x963   : > { %9074 = shalt.err (!%p9071_p0)
}
 0x964   : > { %s11820_s18 = smov 4   ;;  %s11821_s17 = smov 64  }
 0x965   : > { %8821 = dma.vmem_to_hbm [thread:$0]  (%p9218_p5), %s11654_s23, 256, %s11660_s25, %s7454_s9, %s11821_s17, %s11821_s17, %s11820_s18  }
 0x966 PF: > { %p8831_p1 = scmp.ge.s32.totalorder %s9113_s30, 2  ;;  %s7509_s26 = sand.u32 1, %s9101_s27  }
 0x967   : > { %s7510_s13 = scalar_lea.sflag [#allocation9], %s7509_s26 }
 0x968   : > { %p8825_p2 = pnand %p8831_p1, %p9222_p6 }
 0x96a   : > { %p8826_p3 = pneg %p8825_p2 }
 0x96c   : > { %9092 = dma.done.wait (%p8826_p3), %s7510_s13, 1024  }
 0x96d   : > { %9094 = vsyncadd (%p8826_p3), %s7510_s13, 4294966272  ;;  %s7519_s24 = scalar_lea.sflag [#allocation11], %s7509_s26 }
 0x96e   : > { %9096 = dma.done.wait (%p8826_p3), %s7519_s24, 256  }
 0x96f   : > { %9098 = vsyncadd (%p8826_p3), %s7519_s24, 4294967040  ;;  %p22_p5 = scmp.ge.s32.totalorder %s9205_s11, 4   ;;  %s11822_s27 = smov %s9105_s28 }
 0x970   : > { %s11823_s28 = smov %s9109_s29  ;;  %s11824_s29 = smov %s9216_s14 }
 0x971   : > { %s11825_s30 = smov %s9205_s11  ;;  %24 = sbr.rel (!%p22_p5) target bundleno = 5 (0x5), region = 120 }
 0x976   :  { %7524 = vsyncpa [#allocation9], 1 }
 0x977   :  { %7526 = vsyncpa [#allocation9 + $0x1], 1 }
 0x978   :  { %7527 = vsyncpa [#allocation11], 1 }
 0x979   :  { %7529 = vsyncpa [#allocation11 + $0x1], 1 }

</bundles_post_ra>
